<compile_context>
chip_gen: v7x
topology: tpu7x:2x2x1
jax: 0.10.0
libtpu: 0.0.40
codegen_flags: <defaults>
</compile_context>

<pallas_src>
import jax
import jax.numpy as jnp
from jax.experimental import pallas as pl
from jax.experimental.pallas import tpu as pltpu

GROUPS = 18
EPS = 1e-5
CP = 128  # lane-aligned channel-chunk width (group boundaries never straddle it)


def _chunk_layout(C, cpg):
    """Split the groups (cpg channels each) into <=128-channel chunks."""
    gpc = CP // cpg                        # groups per full chunk (8)
    G = C // cpg
    n_chunks = -(-G // gpc)                # ceil -> 3 chunks: 128, 128, 32
    widths = tuple(min(CP, C - i * gpc * cpg) for i in range(n_chunks))
    return widths, gpc


def _make_kernel(N, H, W, C, chunk_widths):
    Hp, Wp = H + 2, W + 2
    Mfull = N * Hp * Wp                    # conv evaluated on the padded grid
    halo = Wp + 1                          # zero rows pre/appended to flat input
    L = Mfull + 2 * Wp                     # length of each dw-shifted copy
    inv_cnt = 1.0 / float(N * H * W)       # valid pixels for BN statistics

    def kernel(xflat_ref, w3_ref, gamma_ref, beta_ref, w1_ref, out_ref, xr_ref):
        # xflat_ref : (Mfull + 2*halo, C) bf16  zero-extended flat padded input
        # w3_ref    : (3, n_chunks, 3*CP, CP) bf16  [dh, chunk, dw*CP+cin, cout]
        # gamma/beta: (1, C) f32
        # w1_ref    : (C, C) bf16              1x1 conv weight, [cin, cout]
        # out_ref   : (Mfull, C) f32           BN+ReLU+1x1 output on padded grid
        # xr_ref    : (n_chunks, L, 3*CP) bf16 scratch: ReLU'd, dw-shifted,
        #             lane-aligned per-chunk activation blocks (MXU K dim).

        # Pass 1a: ReLU once while scattering each chunk's three dw-shifted
        # copies into 128-lane-aligned blocks (K-concatenation over dw taps).
        c0 = 0
        for c, wc in enumerate(chunk_widths):
            if wc < CP:  # zero the padding lanes of the narrow chunk once
                xr_ref[c, :, :] = jnp.zeros((L, 3 * CP), jnp.bfloat16)
            for dw in range(3):
                xr_ref[c, :, dw * CP:dw * CP + wc] = jnp.maximum(
                    xflat_ref[dw:dw + L, c0:c0 + wc], 0)
            c0 += wc

        # Pass 1b: grouped 3x3 conv. Per chunk: 3 MXU matmuls (one per dh),
        # each contracting K = 3*CP over the dw taps (accumulation inside the
        # MXU); only 2 f32 adds per chunk instead of 8 full-slab adds.
        parts = []
        for c, wc in enumerate(chunk_widths):
            acc_c = None
            for dh in range(3):
                lhs = xr_ref[c, dh * Wp:dh * Wp + Mfull, :]   # aligned free view
                p = jnp.dot(lhs, w3_ref[dh, c],
                            preferred_element_type=jnp.float32)
                acc_c = p if acc_c is None else acc_c + p
            parts.append(acc_c if wc == CP else acc_c[:, :wc])
        acc = jnp.concatenate(parts, axis=-1)                 # (Mfull, C) f32

        # Pass 1c: BatchNorm2d training-mode batch statistics (biased variance)
        # in a single pass over the valid interior pixels (static slice; no
        # mask input, no lane broadcast).
        interior = acc.reshape(N, Hp, Wp, C)[:, 1:H + 1, 1:W + 1, :]
        s1 = jnp.sum(interior, axis=(0, 1, 2), keepdims=True).reshape(1, C)
        s2 = jnp.sum(interior * interior, axis=(0, 1, 2),
                     keepdims=True).reshape(1, C)
        mean = s1 * inv_cnt
        var = jnp.maximum(s2 * inv_cnt - mean * mean, 0.0)    # biased, f32
        scale = gamma_ref[...] * jax.lax.rsqrt(var + EPS)
        shift = beta_ref[...] - mean * scale

        # Pass 2: normalize + ReLU + 1x1 conv as one big matmul, slab store.
        y = jnp.maximum(acc * scale + shift, 0.0).astype(jnp.bfloat16)
        out_ref[...] = jnp.dot(y, w1_ref[...],
                               preferred_element_type=jnp.float32)

    return kernel, Mfull, halo, L


def _chunked_grouped_weight(w3_pt, chunk_widths, gpc):
    """(Cout, Cin/g, 3, 3) grouped weight -> (3, n_chunks, 3*CP, CP) bf16.

    Entry [dh, c, dw*CP + j, o] maps in-channel j to out-channel o within
    chunk c for tap (dh, dw); block-diagonal over the chunk's groups, zero in
    the padding rows/cols."""
    C = w3_pt.shape[0]
    cpg = w3_pt.shape[1]
    G = C // cpg
    # blocks[kh, kw, g, i_in, i_out] = w3_pt[g*cpg + i_out, i_in, kh, kw]
    blocks = jnp.transpose(w3_pt.reshape(G, cpg, cpg, 3, 3), (3, 4, 0, 2, 1))
    chunks = []
    for c, wc in enumerate(chunk_widths):
        g0 = c * gpc
        ng = wc // cpg
        blk = blocks[:, :, g0:g0 + ng]                        # (3,3,ng,cpg,cpg)
        eye = jnp.eye(ng, dtype=w3_pt.dtype)
        dense = jnp.einsum('xygio,gh->xygiho', blk,
                           eye).reshape(3, 3, wc, wc)         # block-diag in chunk
        padded = jnp.zeros((3, 3, CP, CP),
                           w3_pt.dtype).at[:, :, :wc, :wc].set(dense)
        chunks.append(padded.reshape(3, 3 * CP, CP))          # (3 dh, 3*CP, CP)
    return jnp.stack(chunks, axis=1).astype(jnp.bfloat16)     # (3, nc, 3*CP, CP)


def relu_conv_bn_relu_conv(x_nchw, w3_pt, gamma, beta, w1_pt):
    """Forward pass of module M. x_nchw: (N, 288, H, W) float32 -> same shape."""
    N, C, H, W = x_nchw.shape
    Hp, Wp = H + 2, W + 2
    cpg = w3_pt.shape[1]
    chunk_widths, gpc = _chunk_layout(C, cpg)

    kernel, Mfull, halo, L = _make_kernel(N, H, W, C, chunk_widths)

    # NCHW -> NHWC, zero pad, flatten spatial, add halo rows so every 3x3 tap
    # is one contiguous Mfull-row slice; cast to bf16 so the largest DMA and
    # the ReLU/shift prologue move half the bytes.
    # NOTE: these layout ops live outside the kernel only because the module's
    # interface is NCHW; keep the surrounding model NHWC to drop them.
    x_nhwc = jnp.transpose(x_nchw, (0, 2, 3, 1))
    xpad = jnp.pad(x_nhwc, ((0, 0), (1, 1), (1, 1), (0, 0)))
    xflat = jnp.pad(xpad.reshape(Mfull, C).astype(jnp.bfloat16),
                    ((halo, halo), (0, 0)))

    # Chunked block-diagonal grouped 3x3 weight (tap K-concatenated) and 1x1.
    w3_k = _chunked_grouped_weight(w3_pt, chunk_widths, gpc)
    w1_mat = jnp.transpose(w1_pt[:, :, 0, 0], (1, 0)).astype(jnp.bfloat16)

    # TODO(synk): for much larger N*H*W, add a leading "parallel" grid over row
    # blocks with a two-phase BN so both v7x TensorCores are used.
    out_flat = pl.pallas_call(
        kernel,
        out_shape=jax.ShapeDtypeStruct((Mfull, C), jnp.float32),
        in_specs=[pl.BlockSpec(memory_space=pltpu.MemorySpace.VMEM)] * 5,
        out_specs=pl.BlockSpec(memory_space=pltpu.MemorySpace.VMEM),
        scratch_shapes=[pltpu.VMEM((len(chunk_widths), L, 3 * CP),
                                   jnp.bfloat16)],
    )(xflat, w3_k,
      gamma.reshape(1, C).astype(jnp.float32),
      beta.reshape(1, C).astype(jnp.float32), w1_mat)

    # Crop the padded-grid border (garbage rows) and go back to NCHW.
    out_nhwc = out_flat.reshape(N, Hp, Wp, C)[:, 1:H + 1, 1:W + 1, :]
    return jnp.transpose(out_nhwc, (0, 3, 1, 2))


def reference(x, w3_pt, gamma, beta, w1_pt):
    """Pure-JAX reference mirroring the PyTorch forward (training-mode BN)."""
    xr = jnp.maximum(x, 0.0)
    y = jax.lax.conv_general_dilated(
        xr, w3_pt, window_strides=(1, 1), padding=((1, 1), (1, 1)),
        dimension_numbers=('NCHW', 'OIHW', 'NCHW'),
        feature_group_count=GROUPS, precision=jax.lax.Precision.HIGHEST)
    mean = jnp.mean(y, axis=(0, 2, 3), keepdims=True)
    var = jnp.var(y, axis=(0, 2, 3), keepdims=True)                    # biased
    y = (y - mean) * jax.lax.rsqrt(var + EPS) * gamma.reshape(1, -1, 1, 1) \
        + beta.reshape(1, -1, 1, 1)
    y = jnp.maximum(y, 0.0)
    return jax.lax.conv_general_dilated(
        y, w1_pt, window_strides=(1, 1), padding='VALID',
        dimension_numbers=('NCHW', 'OIHW', 'NCHW'),
        precision=jax.lax.Precision.HIGHEST)


if __name__ == "__main__":
    # Shapes implied by the module: Conv2d(288, 288, groups=18) fixes C=288;
    # spatial matches the original x111 = randn(1, 288, 14, 14).
    N, C, H, W = 1, 288, 14, 14

    key = jax.random.PRNGKey(0)
    k1, k2, k3, k4, k5 = jax.random.split(key, 5)
    x = jax.random.normal(k1, (N, C, H, W), jnp.float32)
    w3 = jax.random.normal(k2, (C, C // GROUPS, 3, 3), jnp.float32) * 0.05
    w1 = jax.random.normal(k3, (C, C, 1, 1), jnp.float32) * 0.05
    gamma = 1.0 + 0.1 * jax.random.normal(k4, (C,), jnp.float32)
    beta = 0.1 * jax.random.normal(k5, (C,), jnp.float32)

    out = jax.jit(relu_conv_bn_relu_conv)(x, w3, gamma, beta, w1)
    out = jax.block_until_ready(out)

    ref = reference(x, w3, gamma, beta, w1)
    assert out.shape == (N, C, H, W), out.shape
    assert jnp.allclose(out, ref, atol=2e-2, rtol=2e-2), \
        f"max abs diff {jnp.max(jnp.abs(out - ref))}"

    print("KERNEL_OK")
</pallas_src>

<mosaic_0001>
module attributes {stable_mosaic.version = 11 : i64} {
  func.func @kernel(%arg0: memref<290x288xbf16, #tpu.memory_space<vmem>>, %arg1: memref<3x3x384x128xbf16, #tpu.memory_space<vmem>>, %arg2: memref<1x288xf32, #tpu.memory_space<vmem>>, %arg3: memref<1x288xf32, #tpu.memory_space<vmem>>, %arg4: memref<288x288xbf16, #tpu.memory_space<vmem>>, %arg5: memref<256x288xf32, #tpu.memory_space<vmem>>, %arg6: memref<3x288x384xbf16, #tpu.memory_space<vmem>>) attributes {dimension_semantics = [], scalar_prefetch = 0 : i64, scratch_operands = 1 : i64, tpu.core_type = #tpu.core_type<tc>} {
    %c0 = arith.constant 0 : index
    %c0_0 = arith.constant 0 : index
    %0 = vector.load %arg0[%c0, %c0_0] : memref<290x288xbf16, #tpu.memory_space<vmem>>, vector<288x128xbf16>
    %cst = arith.constant 0.000000e+00 : bf16
    %1 = vector.broadcast %cst : bf16 to vector<288x128xbf16>
    %2 = arith.maximumf %0, %1 : vector<288x128xbf16>
    %c0_1 = arith.constant 0 : index
    %c0_2 = arith.constant 0 : index
    %c0_3 = arith.constant 0 : index
    %3 = vector.load %arg6[%c0_1, %c0_2, %c0_3] : memref<3x288x384xbf16, #tpu.memory_space<vmem>>, vector<1x288x128xbf16>
    %4 = vector.shape_cast %3 : vector<1x288x128xbf16> to vector<288x128xbf16>
    %5 = vector.shape_cast %2 : vector<288x128xbf16> to vector<1x288x128xbf16>
    tpu.vector_store %arg6[%c0_1, %c0_2, %c0_3], %5 {strides = array<i32>} : memref<3x288x384xbf16, #tpu.memory_space<vmem>>, vector<1x288x128xbf16>,
    %c1 = arith.constant 1 : index
    %c0_4 = arith.constant 0 : index
    %6 = vector.load %arg0[%c1, %c0_4] : memref<290x288xbf16, #tpu.memory_space<vmem>>, vector<288x128xbf16>
    %cst_5 = arith.constant 0.000000e+00 : bf16
    %7 = vector.broadcast %cst_5 : bf16 to vector<288x128xbf16>
    %8 = arith.maximumf %6, %7 : vector<288x128xbf16>
    %c0_6 = arith.constant 0 : index
    %c0_7 = arith.constant 0 : index
    %c128 = arith.constant 128 : index
    %9 = vector.load %arg6[%c0_6, %c0_7, %c128] : memref<3x288x384xbf16, #tpu.memory_space<vmem>>, vector<1x288x128xbf16>
    %10 = vector.shape_cast %9 : vector<1x288x128xbf16> to vector<288x128xbf16>
    %11 = vector.shape_cast %8 : vector<288x128xbf16> to vector<1x288x128xbf16>
    tpu.vector_store %arg6[%c0_6, %c0_7, %c128], %11 {strides = array<i32>} : memref<3x288x384xbf16, #tpu.memory_space<vmem>>, vector<1x288x128xbf16>,
    %c2 = arith.constant 2 : index
    %c0_8 = arith.constant 0 : index
    %12 = vector.load %arg0[%c2, %c0_8] : memref<290x288xbf16, #tpu.memory_space<vmem>>, vector<288x128xbf16>
    %cst_9 = arith.constant 0.000000e+00 : bf16
    %13 = vector.broadcast %cst_9 : bf16 to vector<288x128xbf16>
    %14 = arith.maximumf %12, %13 : vector<288x128xbf16>
    %c0_10 = arith.constant 0 : index
    %c0_11 = arith.constant 0 : index
    %c256 = arith.constant 256 : index
    %15 = vector.load %arg6[%c0_10, %c0_11, %c256] : memref<3x288x384xbf16, #tpu.memory_space<vmem>>, vector<1x288x128xbf16>
    %16 = vector.shape_cast %15 : vector<1x288x128xbf16> to vector<288x128xbf16>
    %17 = vector.shape_cast %14 : vector<288x128xbf16> to vector<1x288x128xbf16>
    tpu.vector_store %arg6[%c0_10, %c0_11, %c256], %17 {strides = array<i32>} : memref<3x288x384xbf16, #tpu.memory_space<vmem>>, vector<1x288x128xbf16>,
    %c0_12 = arith.constant 0 : index
    %c128_13 = arith.constant 128 : index
    %18 = vector.load %arg0[%c0_12, %c128_13] : memref<290x288xbf16, #tpu.memory_space<vmem>>, vector<288x128xbf16>
    %cst_14 = arith.constant 0.000000e+00 : bf16
    %19 = vector.broadcast %cst_14 : bf16 to vector<288x128xbf16>
    %20 = arith.maximumf %18, %19 : vector<288x128xbf16>
    %c1_15 = arith.constant 1 : index
    %c0_16 = arith.constant 0 : index
    %c0_17 = arith.constant 0 : index
    %21 = vector.load %arg6[%c1_15, %c0_16, %c0_17] : memref<3x288x384xbf16, #tpu.memory_space<vmem>>, vector<1x288x128xbf16>
    %22 = vector.shape_cast %21 : vector<1x288x128xbf16> to vector<288x128xbf16>
    %23 = vector.shape_cast %20 : vector<288x128xbf16> to vector<1x288x128xbf16>
    tpu.vector_store %arg6[%c1_15, %c0_16, %c0_17], %23 {strides = array<i32>} : memref<3x288x384xbf16, #tpu.memory_space<vmem>>, vector<1x288x128xbf16>,
    %c1_18 = arith.constant 1 : index
    %c128_19 = arith.constant 128 : index
    %24 = vector.load %arg0[%c1_18, %c128_19] : memref<290x288xbf16, #tpu.memory_space<vmem>>, vector<288x128xbf16>
    %cst_20 = arith.constant 0.000000e+00 : bf16
    %25 = vector.broadcast %cst_20 : bf16 to vector<288x128xbf16>
    %26 = arith.maximumf %24, %25 : vector<288x128xbf16>
    %c1_21 = arith.constant 1 : index
    %c0_22 = arith.constant 0 : index
    %c128_23 = arith.constant 128 : index
    %27 = vector.load %arg6[%c1_21, %c0_22, %c128_23] : memref<3x288x384xbf16, #tpu.memory_space<vmem>>, vector<1x288x128xbf16>
    %28 = vector.shape_cast %27 : vector<1x288x128xbf16> to vector<288x128xbf16>
    %29 = vector.shape_cast %26 : vector<288x128xbf16> to vector<1x288x128xbf16>
    tpu.vector_store %arg6[%c1_21, %c0_22, %c128_23], %29 {strides = array<i32>} : memref<3x288x384xbf16, #tpu.memory_space<vmem>>, vector<1x288x128xbf16>,
    %c2_24 = arith.constant 2 : index
    %c128_25 = arith.constant 128 : index
    %30 = vector.load %arg0[%c2_24, %c128_25] : memref<290x288xbf16, #tpu.memory_space<vmem>>, vector<288x128xbf16>
    %cst_26 = arith.constant 0.000000e+00 : bf16
    %31 = vector.broadcast %cst_26 : bf16 to vector<288x128xbf16>
    %32 = arith.maximumf %30, %31 : vector<288x128xbf16>
    %c1_27 = arith.constant 1 : index
    %c0_28 = arith.constant 0 : index
    %c256_29 = arith.constant 256 : index
    %33 = vector.load %arg6[%c1_27, %c0_28, %c256_29] : memref<3x288x384xbf16, #tpu.memory_space<vmem>>, vector<1x288x128xbf16>
    %34 = vector.shape_cast %33 : vector<1x288x128xbf16> to vector<288x128xbf16>
    %35 = vector.shape_cast %32 : vector<288x128xbf16> to vector<1x288x128xbf16>
    tpu.vector_store %arg6[%c1_27, %c0_28, %c256_29], %35 {strides = array<i32>} : memref<3x288x384xbf16, #tpu.memory_space<vmem>>, vector<1x288x128xbf16>,
    %cst_30 = arith.constant 0.000000e+00 : bf16
    %36 = vector.broadcast %cst_30 : bf16 to vector<288x384xbf16>
    %c2_31 = arith.constant 2 : index
    %c0_32 = arith.constant 0 : index
    %c0_33 = arith.constant 0 : index
    %37 = vector.load %arg6[%c2_31, %c0_32, %c0_33] : memref<3x288x384xbf16, #tpu.memory_space<vmem>>, vector<1x288x384xbf16>
    %38 = vector.shape_cast %37 : vector<1x288x384xbf16> to vector<288x384xbf16>
    %39 = vector.shape_cast %36 : vector<288x384xbf16> to vector<1x288x384xbf16>
    tpu.vector_store %arg6[%c2_31, %c0_32, %c0_33], %39 {strides = array<i32>} : memref<3x288x384xbf16, #tpu.memory_space<vmem>>, vector<1x288x384xbf16>,
    %c0_34 = arith.constant 0 : index
    %c256_35 = arith.constant 256 : index
    %40 = vector.load %arg0[%c0_34, %c256_35] : memref<290x288xbf16, #tpu.memory_space<vmem>>, vector<288x32xbf16>
    %cst_36 = arith.constant 0.000000e+00 : bf16
    %41 = vector.broadcast %cst_36 : bf16 to vector<288x32xbf16>
    %42 = arith.maximumf %40, %41 : vector<288x32xbf16>
    %c2_37 = arith.constant 2 : index
    %c0_38 = arith.constant 0 : index
    %c0_39 = arith.constant 0 : index
    %43 = vector.load %arg6[%c2_37, %c0_38, %c0_39] : memref<3x288x384xbf16, #tpu.memory_space<vmem>>, vector<1x288x32xbf16>
    %44 = vector.shape_cast %43 : vector<1x288x32xbf16> to vector<288x32xbf16>
    %45 = vector.shape_cast %42 : vector<288x32xbf16> to vector<1x288x32xbf16>
    tpu.vector_store %arg6[%c2_37, %c0_38, %c0_39], %45 {strides = array<i32>} : memref<3x288x384xbf16, #tpu.memory_space<vmem>>, vector<1x288x32xbf16>,
    %c1_40 = arith.constant 1 : index
    %c256_41 = arith.constant 256 : index
    %46 = vector.load %arg0[%c1_40, %c256_41] : memref<290x288xbf16, #tpu.memory_space<vmem>>, vector<288x32xbf16>
    %cst_42 = arith.constant 0.000000e+00 : bf16
    %47 = vector.broadcast %cst_42 : bf16 to vector<288x32xbf16>
    %48 = arith.maximumf %46, %47 : vector<288x32xbf16>
    %c2_43 = arith.constant 2 : index
    %c0_44 = arith.constant 0 : index
    %c128_45 = arith.constant 128 : index
    %49 = vector.load %arg6[%c2_43, %c0_44, %c128_45] : memref<3x288x384xbf16, #tpu.memory_space<vmem>>, vector<1x288x32xbf16>
    %50 = vector.shape_cast %49 : vector<1x288x32xbf16> to vector<288x32xbf16>
    %51 = vector.shape_cast %48 : vector<288x32xbf16> to vector<1x288x32xbf16>
    tpu.vector_store %arg6[%c2_43, %c0_44, %c128_45], %51 {strides = array<i32>} : memref<3x288x384xbf16, #tpu.memory_space<vmem>>, vector<1x288x32xbf16>,
    %c2_46 = arith.constant 2 : index
    %c256_47 = arith.constant 256 : index
    %52 = vector.load %arg0[%c2_46, %c256_47] : memref<290x288xbf16, #tpu.memory_space<vmem>>, vector<288x32xbf16>
    %cst_48 = arith.constant 0.000000e+00 : bf16
    %53 = vector.broadcast %cst_48 : bf16 to vector<288x32xbf16>
    %54 = arith.maximumf %52, %53 : vector<288x32xbf16>
    %c2_49 = arith.constant 2 : index
    %c0_50 = arith.constant 0 : index
    %c256_51 = arith.constant 256 : index
    %55 = vector.load %arg6[%c2_49, %c0_50, %c256_51] : memref<3x288x384xbf16, #tpu.memory_space<vmem>>, vector<1x288x32xbf16>
    %56 = vector.shape_cast %55 : vector<1x288x32xbf16> to vector<288x32xbf16>
    %57 = vector.shape_cast %54 : vector<288x32xbf16> to vector<1x288x32xbf16>
    tpu.vector_store %arg6[%c2_49, %c0_50, %c256_51], %57 {strides = array<i32>} : memref<3x288x384xbf16, #tpu.memory_space<vmem>>, vector<1x288x32xbf16>,
    %c0_52 = arith.constant 0 : index
    %c0_53 = arith.constant 0 : index
    %c0_54 = arith.constant 0 : index
    %58 = vector.load %arg6[%c0_52, %c0_53, %c0_54] : memref<3x288x384xbf16, #tpu.memory_space<vmem>>, vector<1x256x384xbf16>
    %59 = vector.shape_cast %58 : vector<1x256x384xbf16> to vector<256x384xbf16>
    %c0_55 = arith.constant 0 : index
    %c0_56 = arith.constant 0 : index
    %c0_57 = arith.constant 0 : index
    %c0_58 = arith.constant 0 : index
    %60 = vector.load %arg1[%c0_55, %c0_56, %c0_57, %c0_58] : memref<3x3x384x128xbf16, #tpu.memory_space<vmem>>, vector<1x1x384x128xbf16>
    %61 = vector.shape_cast %60 : vector<1x1x384x128xbf16> to vector<384x128xbf16>
    %cst_59 = arith.constant dense<0.000000e+00> : vector<256x128xf32>
    %62 = tpu.matmul %59, %61, %cst_59 {dimension_numbers = #tpu.dot_dimension_numbers<[1], [0], [0], [1], [0, 0, 1, 1], [], []>} : vector<256x384xbf16>, vector<384x128xbf16>, vector<256x128xf32> -> vector<256x128xf32>
    %c0_60 = arith.constant 0 : index
    %c16 = arith.constant 16 : index
    %c0_61 = arith.constant 0 : index
    %63 = vector.load %arg6[%c0_60, %c16, %c0_61] : memref<3x288x384xbf16, #tpu.memory_space<vmem>>, vector<1x256x384xbf16>
    %64 = vector.shape_cast %63 : vector<1x256x384xbf16> to vector<256x384xbf16>
    %c1_62 = arith.constant 1 : index
    %c0_63 = arith.constant 0 : index
    %c0_64 = arith.constant 0 : index
    %c0_65 = arith.constant 0 : index
    %65 = vector.load %arg1[%c1_62, %c0_63, %c0_64, %c0_65] : memref<3x3x384x128xbf16, #tpu.memory_space<vmem>>, vector<1x1x384x128xbf16>
    %66 = vector.shape_cast %65 : vector<1x1x384x128xbf16> to vector<384x128xbf16>
    %cst_66 = arith.constant dense<0.000000e+00> : vector<256x128xf32>
    %67 = tpu.matmul %64, %66, %cst_66 {dimension_numbers = #tpu.dot_dimension_numbers<[1], [0], [0], [1], [0, 0, 1, 1], [], []>} : vector<256x384xbf16>, vector<384x128xbf16>, vector<256x128xf32> -> vector<256x128xf32>
    %68 = arith.addf %62, %67 : vector<256x128xf32>
    %c0_67 = arith.constant 0 : index
    %c32 = arith.constant 32 : index
    %c0_68 = arith.constant 0 : index
    %69 = vector.load %arg6[%c0_67, %c32, %c0_68] : memref<3x288x384xbf16, #tpu.memory_space<vmem>>, vector<1x256x384xbf16>
    %70 = vector.shape_cast %69 : vector<1x256x384xbf16> to vector<256x384xbf16>
    %c2_69 = arith.constant 2 : index
    %c0_70 = arith.constant 0 : index
    %c0_71 = arith.constant 0 : index
    %c0_72 = arith.constant 0 : index
    %71 = vector.load %arg1[%c2_69, %c0_70, %c0_71, %c0_72] : memref<3x3x384x128xbf16, #tpu.memory_space<vmem>>, vector<1x1x384x128xbf16>
    %72 = vector.shape_cast %71 : vector<1x1x384x128xbf16> to vector<384x128xbf16>
    %cst_73 = arith.constant dense<0.000000e+00> : vector<256x128xf32>
    %73 = tpu.matmul %70, %72, %cst_73 {dimension_numbers = #tpu.dot_dimension_numbers<[1], [0], [0], [1], [0, 0, 1, 1], [], []>} : vector<256x384xbf16>, vector<384x128xbf16>, vector<256x128xf32> -> vector<256x128xf32>
    %74 = arith.addf %68, %73 : vector<256x128xf32>
    %c1_74 = arith.constant 1 : index
    %c0_75 = arith.constant 0 : index
    %c0_76 = arith.constant 0 : index
    %75 = vector.load %arg6[%c1_74, %c0_75, %c0_76] : memref<3x288x384xbf16, #tpu.memory_space<vmem>>, vector<1x256x384xbf16>
    %76 = vector.shape_cast %75 : vector<1x256x384xbf16> to vector<256x384xbf16>
    %c0_77 = arith.constant 0 : index
    %c1_78 = arith.constant 1 : index
    %c0_79 = arith.constant 0 : index
    %c0_80 = arith.constant 0 : index
    %77 = vector.load %arg1[%c0_77, %c1_78, %c0_79, %c0_80] : memref<3x3x384x128xbf16, #tpu.memory_space<vmem>>, vector<1x1x384x128xbf16>
    %78 = vector.shape_cast %77 : vector<1x1x384x128xbf16> to vector<384x128xbf16>
    %cst_81 = arith.constant dense<0.000000e+00> : vector<256x128xf32>
    %79 = tpu.matmul %76, %78, %cst_81 {dimension_numbers = #tpu.dot_dimension_numbers<[1], [0], [0], [1], [0, 0, 1, 1], [], []>} : vector<256x384xbf16>, vector<384x128xbf16>, vector<256x128xf32> -> vector<256x128xf32>
    %c1_82 = arith.constant 1 : index
    %c16_83 = arith.constant 16 : index
    %c0_84 = arith.constant 0 : index
    %80 = vector.load %arg6[%c1_82, %c16_83, %c0_84] : memref<3x288x384xbf16, #tpu.memory_space<vmem>>, vector<1x256x384xbf16>
    %81 = vector.shape_cast %80 : vector<1x256x384xbf16> to vector<256x384xbf16>
    %c1_85 = arith.constant 1 : index
    %c1_86 = arith.constant 1 : index
    %c0_87 = arith.constant 0 : index
    %c0_88 = arith.constant 0 : index
    %82 = vector.load %arg1[%c1_85, %c1_86, %c0_87, %c0_88] : memref<3x3x384x128xbf16, #tpu.memory_space<vmem>>, vector<1x1x384x128xbf16>
    %83 = vector.shape_cast %82 : vector<1x1x384x128xbf16> to vector<384x128xbf16>
    %cst_89 = arith.constant dense<0.000000e+00> : vector<256x128xf32>
    %84 = tpu.matmul %81, %83, %cst_89 {dimension_numbers = #tpu.dot_dimension_numbers<[1], [0], [0], [1], [0, 0, 1, 1], [], []>} : vector<256x384xbf16>, vector<384x128xbf16>, vector<256x128xf32> -> vector<256x128xf32>
    %85 = arith.addf %79, %84 : vector<256x128xf32>
    %c1_90 = arith.constant 1 : index
    %c32_91 = arith.constant 32 : index
    %c0_92 = arith.constant 0 : index
    %86 = vector.load %arg6[%c1_90, %c32_91, %c0_92] : memref<3x288x384xbf16, #tpu.memory_space<vmem>>, vector<1x256x384xbf16>
    %87 = vector.shape_cast %86 : vector<1x256x384xbf16> to vector<256x384xbf16>
    %c2_93 = arith.constant 2 : index
    %c1_94 = arith.constant 1 : index
    %c0_95 = arith.constant 0 : index
    %c0_96 = arith.constant 0 : index
    %88 = vector.load %arg1[%c2_93, %c1_94, %c0_95, %c0_96] : memref<3x3x384x128xbf16, #tpu.memory_space<vmem>>, vector<1x1x384x128xbf16>
    %89 = vector.shape_cast %88 : vector<1x1x384x128xbf16> to vector<384x128xbf16>
    %cst_97 = arith.constant dense<0.000000e+00> : vector<256x128xf32>
    %90 = tpu.matmul %87, %89, %cst_97 {dimension_numbers = #tpu.dot_dimension_numbers<[1], [0], [0], [1], [0, 0, 1, 1], [], []>} : vector<256x384xbf16>, vector<384x128xbf16>, vector<256x128xf32> -> vector<256x128xf32>
    %91 = arith.addf %85, %90 : vector<256x128xf32>
    %c2_98 = arith.constant 2 : index
    %c0_99 = arith.constant 0 : index
    %c0_100 = arith.constant 0 : index
    %92 = vector.load %arg6[%c2_98, %c0_99, %c0_100] : memref<3x288x384xbf16, #tpu.memory_space<vmem>>, vector<1x256x384xbf16>
    %93 = vector.shape_cast %92 : vector<1x256x384xbf16> to vector<256x384xbf16>
    %c0_101 = arith.constant 0 : index
    %c2_102 = arith.constant 2 : index
    %c0_103 = arith.constant 0 : index
    %c0_104 = arith.constant 0 : index
    %94 = vector.load %arg1[%c0_101, %c2_102, %c0_103, %c0_104] : memref<3x3x384x128xbf16, #tpu.memory_space<vmem>>, vector<1x1x384x128xbf16>
    %95 = vector.shape_cast %94 : vector<1x1x384x128xbf16> to vector<384x128xbf16>
    %cst_105 = arith.constant dense<0.000000e+00> : vector<256x128xf32>
    %96 = tpu.matmul %93, %95, %cst_105 {dimension_numbers = #tpu.dot_dimension_numbers<[1], [0], [0], [1], [0, 0, 1, 1], [], []>} : vector<256x384xbf16>, vector<384x128xbf16>, vector<256x128xf32> -> vector<256x128xf32>
    %c2_106 = arith.constant 2 : index
    %c16_107 = arith.constant 16 : index
    %c0_108 = arith.constant 0 : index
    %97 = vector.load %arg6[%c2_106, %c16_107, %c0_108] : memref<3x288x384xbf16, #tpu.memory_space<vmem>>, vector<1x256x384xbf16>
    %98 = vector.shape_cast %97 : vector<1x256x384xbf16> to vector<256x384xbf16>
    %c1_109 = arith.constant 1 : index
    %c2_110 = arith.constant 2 : index
    %c0_111 = arith.constant 0 : index
    %c0_112 = arith.constant 0 : index
    %99 = vector.load %arg1[%c1_109, %c2_110, %c0_111, %c0_112] : memref<3x3x384x128xbf16, #tpu.memory_space<vmem>>, vector<1x1x384x128xbf16>
    %100 = vector.shape_cast %99 : vector<1x1x384x128xbf16> to vector<384x128xbf16>
    %cst_113 = arith.constant dense<0.000000e+00> : vector<256x128xf32>
    %101 = tpu.matmul %98, %100, %cst_113 {dimension_numbers = #tpu.dot_dimension_numbers<[1], [0], [0], [1], [0, 0, 1, 1], [], []>} : vector<256x384xbf16>, vector<384x128xbf16>, vector<256x128xf32> -> vector<256x128xf32>
    %102 = arith.addf %96, %101 : vector<256x128xf32>
    %c2_114 = arith.constant 2 : index
    %c32_115 = arith.constant 32 : index
    %c0_116 = arith.constant 0 : index
    %103 = vector.load %arg6[%c2_114, %c32_115, %c0_116] : memref<3x288x384xbf16, #tpu.memory_space<vmem>>, vector<1x256x384xbf16>
    %104 = vector.shape_cast %103 : vector<1x256x384xbf16> to vector<256x384xbf16>
    %c2_117 = arith.constant 2 : index
    %c2_118 = arith.constant 2 : index
    %c0_119 = arith.constant 0 : index
    %c0_120 = arith.constant 0 : index
    %105 = vector.load %arg1[%c2_117, %c2_118, %c0_119, %c0_120] : memref<3x3x384x128xbf16, #tpu.memory_space<vmem>>, vector<1x1x384x128xbf16>
    %106 = vector.shape_cast %105 : vector<1x1x384x128xbf16> to vector<384x128xbf16>
    %cst_121 = arith.constant dense<0.000000e+00> : vector<256x128xf32>
    %107 = tpu.matmul %104, %106, %cst_121 {dimension_numbers = #tpu.dot_dimension_numbers<[1], [0], [0], [1], [0, 0, 1, 1], [], []>} : vector<256x384xbf16>, vector<384x128xbf16>, vector<256x128xf32> -> vector<256x128xf32>
    %108 = arith.addf %102, %107 : vector<256x128xf32>
    %109 = vector.extract_strided_slice %108 {offsets = [0, 0], sizes = [256, 32], strides = [1, 1]} : vector<256x128xf32> to vector<256x32xf32>
    %110 = tpu.concatenate %74, %91, %109 in 1 : vector<256x128xf32>, vector<256x128xf32>, vector<256x32xf32> -> vector<256x288xf32>
    %111 = vector.shape_cast %110 : vector<256x288xf32> to vector<1x16x16x288xf32>
    %112 = vector.extract_strided_slice %111 {offsets = [0, 1, 1, 0], sizes = [1, 14, 14, 288], strides = [1, 1, 1, 1]} : vector<1x16x16x288xf32> to vector<1x14x14x288xf32>
    %cst_122 = arith.constant dense<0.000000e+00> : vector<288xf32>
    %113 = vector.multi_reduction <add>, %112, %cst_122 [0, 1, 2] : vector<1x14x14x288xf32> to vector<288xf32>
    %114 = vector.shape_cast %113 : vector<288xf32> to vector<1x1x1x288xf32>
    %115 = vector.shape_cast %114 : vector<1x1x1x288xf32> to vector<1x288xf32>
    %116 = arith.mulf %112, %112 : vector<1x14x14x288xf32>
    %cst_123 = arith.constant dense<0.000000e+00> : vector<288xf32>
    %117 = vector.multi_reduction <add>, %116, %cst_123 [0, 1, 2] : vector<1x14x14x288xf32> to vector<288xf32>
    %118 = vector.shape_cast %117 : vector<288xf32> to vector<1x1x1x288xf32>
    %119 = vector.shape_cast %118 : vector<1x1x1x288xf32> to vector<1x288xf32>
    %cst_124 = arith.constant 0.00510204071 : f32
    %120 = vector.broadcast %cst_124 : f32 to vector<1x288xf32>
    %121 = arith.mulf %115, %120 : vector<1x288xf32>
    %cst_125 = arith.constant 0.00510204071 : f32
    %122 = vector.broadcast %cst_125 : f32 to vector<1x288xf32>
    %123 = arith.mulf %119, %122 : vector<1x288xf32>
    %124 = arith.mulf %121, %121 : vector<1x288xf32>
    %125 = arith.subf %123, %124 : vector<1x288xf32>
    %cst_126 = arith.constant 0.000000e+00 : f32
    %126 = vector.broadcast %cst_126 : f32 to vector<1x288xf32>
    %127 = arith.maximumf %125, %126 : vector<1x288xf32>
    %c0_127 = arith.constant 0 : index
    %c0_128 = arith.constant 0 : index
    %128 = vector.load %arg2[%c0_127, %c0_128] : memref<1x288xf32, #tpu.memory_space<vmem>>, vector<1x288xf32>
    %cst_129 = arith.constant 9.99999974E-6 : f32
    %129 = vector.broadcast %cst_129 : f32 to vector<1x288xf32>
    %130 = arith.addf %127, %129 : vector<1x288xf32>
    %131 = math.rsqrt %130 : vector<1x288xf32>
    %132 = arith.mulf %128, %131 : vector<1x288xf32>
    %c0_130 = arith.constant 0 : index
    %c0_131 = arith.constant 0 : index
    %133 = vector.load %arg3[%c0_130, %c0_131] : memref<1x288xf32, #tpu.memory_space<vmem>>, vector<1x288xf32>
    %134 = arith.mulf %121, %132 : vector<1x288xf32>
    %135 = arith.subf %133, %134 : vector<1x288xf32>
    %136 = vector.broadcast %132 : vector<1x288xf32> to vector<256x288xf32>
    %137 = arith.mulf %110, %136 : vector<256x288xf32>
    %138 = vector.broadcast %135 : vector<1x288xf32> to vector<256x288xf32>
    %139 = arith.addf %137, %138 : vector<256x288xf32>
    %cst_132 = arith.constant 0.000000e+00 : f32
    %140 = vector.broadcast %cst_132 : f32 to vector<256x288xf32>
    %141 = arith.maximumf %139, %140 : vector<256x288xf32>
    %142 = arith.truncf %141 : vector<256x288xf32> to vector<256x288xbf16>
    %c0_133 = arith.constant 0 : index
    %c0_134 = arith.constant 0 : index
    %143 = vector.load %arg4[%c0_133, %c0_134] : memref<288x288xbf16, #tpu.memory_space<vmem>>, vector<288x288xbf16>
    %cst_135 = arith.constant dense<0.000000e+00> : vector<256x288xf32>
    %144 = tpu.matmul %142, %143, %cst_135 {dimension_numbers = #tpu.dot_dimension_numbers<[1], [0], [0], [1], [0, 0, 1, 1], [], []>} : vector<256x288xbf16>, vector<288x288xbf16>, vector<256x288xf32> -> vector<256x288xf32>
    %c0_136 = arith.constant 0 : index
    %c0_137 = arith.constant 0 : index
    %145 = vector.load %arg5[%c0_136, %c0_137] : memref<256x288xf32, #tpu.memory_space<vmem>>, vector<256x288xf32>
    tpu.vector_store %arg5[%c0_136, %c0_137], %144 {strides = array<i32>} : memref<256x288xf32, #tpu.memory_space<vmem>>, vector<256x288xf32>,
    return
  }
}

</mosaic_0001>

<bundles_post_ra>
// kernel: relu_conv_bn_relu_conv.1
= control target key start
LH: loop header
LB: loop body
LE: loop exit
PB: predicated region body
PF: predicated region fallthrough
CT: control target
= control target key end

     0   :  { %v13766_v1 = vmov 0   ;;  %vm386_vm0 = vsmask.f32 7424  ;;  %vm738_vm1 = vcmask 1046528   ;;  %vm1837_vm2 = vcmask 261120   ;;  %s19888_s1 = inlined_call_operand.vmem [shape: bf16[3,3,384,128], index: 1, kind: input, shape index: {}]   ;;  %s19889_s0 = inlined_call_operand.vmem [shape: bf16[290,288], index: 0, kind: input, shape index: {}]   ;;  %s19890_s4 = inlined_call_operand.vmem [shape: bf16[288,288], index: 4, kind: input, shape index: {}]   ;;  %s19891_s2 = inlined_call_operand.vmem [shape: f32[1,288], index: 2, kind: input, shape index: {}]   ;;  %s19892_s3 = inlined_call_operand.vmem [shape: f32[1,288], index: 3, kind: input, shape index: {}]   ;;  %s19893_s5 = inlined_call_operand.vmem [shape: f32[256,288], index: 5, kind: output, shape index: {}]  }
   0x1   :  { %v13347_v0 = vld [vmem:[%s19888_s1 + $0x280] sm:$0xff]   ;;  %1603 = vst [vmem:[#allocation2 + $0x360] sm:$0xff] %v13766_v1  ;;  %1604 = vst [vmem:[#allocation2 + $0x368] sm:$0xff] %v13766_v1  ;;  %v13350_v4 = vld [vmem:[%s19888_s1 + $0x288] sm:$0xff]   ;;  %vm7769_vm3 = vcmask 1045504   ;;  %vm7865_vm4 = vcmask 259072  }
   0x2   :  { %1605 = vst [vmem:[#allocation2 + $0x370] sm:$0xff] %v13766_v1  ;;  %1606 = vst [vmem:[#allocation2 + $0x378] sm:$0xff] %v13766_v1  ;;  %v13348_v2 = vld [vmem:[%s19888_s1 + $0x2c0] sm:$0xff]   ;;  %10979 = vmatprep.subr.bf16.mxu0 %v13347_v0  ;;  %v13351_v5 = vld [vmem:[%s19888_s1 + $0x2c8] sm:$0xff]  }
   0x3   :  { %1607 = vst [vmem:[#allocation2 + $0x380] sm:$0xff] %v13766_v1  ;;  %1608 = vst [vmem:[#allocation2 + $0x388] sm:$0xff] %v13766_v1  ;;  %v13349_v3 = vld [vmem:[%s19888_s1 + $0x240] sm:$0xff]   ;;  %12333 = vmatprep.subr.bf16.mxu1 %v13348_v2  ;;  %v13352_v6 = vld [vmem:[%s19888_s1 + $0x248] sm:$0xff]  }
   0x4   :  { %1609 = vst [vmem:[#allocation2 + $0x390] sm:$0xff] %v13766_v1  ;;  %1610 = vst [vmem:[#allocation2 + $0x398] sm:$0xff] %v13766_v1  ;;  %10980 = vmatpush3.bf16.msra.mxu0 %v13349_v3  ;;  %12334 = vmatpush3.bf16.msra.mxu1 %v13348_v2  ;;  %v13353_v7 = vld [vmem:[%s19888_s1 + $0x290] sm:$0xff]   ;;  %v13356_v10 = vld [vmem:[%s19888_s1 + $0x298] sm:$0xff]  }
   0x5   :  { %1611 = vst [vmem:[#allocation2 + $0x3a0] sm:$0xff] %v13766_v1  ;;  %1612 = vst [vmem:[#allocation2 + $0x3a8] sm:$0xff] %v13766_v1  ;;  %10981 = vmatprep.subr.bf16.mxu0 %v13350_v4  ;;  %12335 = vmatprep.subr.bf16.mxu1 %v13351_v5  ;;  %v13354_v8 = vld [vmem:[%s19888_s1 + $0x2d0] sm:$0xff]   ;;  %v13357_v11 = vld [vmem:[%s19888_s1 + $0x2d8] sm:$0xff]  }
   0x6   :  { %1613 = vst [vmem:[#allocation2 + $0x3b0] sm:$0xff] %v13766_v1  ;;  %1614 = vst [vmem:[#allocation2 + $0x3b8] sm:$0xff] %v13766_v1  ;;  %v13355_v9 = vld [vmem:[%s19888_s1 + $0x250] sm:$0xff]   ;;  %v13358_v12 = vld [vmem:[%s19888_s1 + $0x258] sm:$0xff]  }
   0x7   :  { %1615 = vst [vmem:[#allocation2 + $0x3c0] sm:$0xff] %v13766_v1  ;;  %1616 = vst [vmem:[#allocation2 + $0x3c8] sm:$0xff] %v13766_v1  ;;  %v13359_v13 = vld [vmem:[%s19888_s1 + $0x2a0] sm:$0xff]   ;;  %v13362_v16 = vld [vmem:[%s19888_s1 + $0x2a8] sm:$0xff]  }
   0x8   :  { %1617 = vst [vmem:[#allocation2 + $0x3d0] sm:$0xff] %v13766_v1  ;;  %1618 = vst [vmem:[#allocation2 + $0x3d8] sm:$0xff] %v13766_v1  ;;  %10982 = vmatpush3.bf16.msra.mxu0 %v13352_v6  ;;  %12336 = vmatpush3.bf16.msra.mxu1 %v13351_v5  ;;  %v13360_v14 = vld [vmem:[%s19888_s1 + $0x2e0] sm:$0xff]   ;;  %v13363_v17 = vld [vmem:[%s19888_s1 + $0x2e8] sm:$0xff]  }
   0x9   :  { %1619 = vst [vmem:[#allocation2 + $0x3e0] sm:$0xff] %v13766_v1  ;;  %1620 = vst [vmem:[#allocation2 + $0x3e8] sm:$0xff] %v13766_v1  ;;  %10983 = vmatprep.subr.bf16.mxu0 %v13353_v7  ;;  %12337 = vmatprep.subr.bf16.mxu1 %v13354_v8  ;;  %v13361_v15 = vld [vmem:[%s19888_s1 + $0x260] sm:$0xff]   ;;  %v13364_v18 = vld [vmem:[%s19888_s1 + $0x268] sm:$0xff]  }
   0xa   :  { %1621 = vst [vmem:[#allocation2 + $0x3f0] sm:$0xff] %v13766_v1  ;;  %1622 = vst [vmem:[#allocation2 + $0x3f8] sm:$0xff] %v13766_v1  ;;  %v13365_v19 = vld [vmem:[%s19888_s1 + $0x2b0] sm:$0xff]   ;;  %v13368_v22 = vld [vmem:[%s19888_s1 + $0x2b8] sm:$0xff]  }
   0xb   :  { %1623 = vst [vmem:[#allocation2 + $0x400] sm:$0xff] %v13766_v1  ;;  %1624 = vst [vmem:[#allocation2 + $0x408] sm:$0xff] %v13766_v1  ;;  %v13366_v20 = vld [vmem:[%s19888_s1 + $0x2f0] sm:$0xff]   ;;  %v13369_v23 = vld [vmem:[%s19888_s1 + $0x2f8] sm:$0xff]  }
   0xc   :  { %1625 = vst [vmem:[#allocation2 + $0x410] sm:$0xff] %v13766_v1  ;;  %1626 = vst [vmem:[#allocation2 + $0x418] sm:$0xff] %v13766_v1  ;;  %10984 = vmatpush3.bf16.msra.mxu0 %v13355_v9  ;;  %12338 = vmatpush3.bf16.msra.mxu1 %v13354_v8  ;;  %v13367_v21 = vld [vmem:[%s19888_s1 + $0x270] sm:$0xff]   ;;  %v221_v24 = vld [vmem:[%s19889_s0 + $0x18] sm:$0xf] }
   0xd   :  { %1627 = vst [vmem:[#allocation2 + $0x420] sm:$0xff] %v13766_v1  ;;  %1628 = vst [vmem:[#allocation2 + $0x428] sm:$0xff] %v13766_v1  ;;  %10985 = vmatprep.subr.bf16.mxu0 %v13356_v10  ;;  %12339 = vmatprep.subr.bf16.mxu1 %v13357_v11  ;;  %v222_v25 = vld [vmem:[%s19889_s0 + $0x24] sm:$0xf]  ;;  %v223_v26 = vld [vmem:[%s19889_s0 + $0x30] sm:$0xf]  ;;  %v258_v28 = vmax.bf16 %v13766_v1, %v221_v24 }
   0xe   :  { %1629 = vst [vmem:[#allocation2 + $0x430] sm:$0xff] %v13766_v1  ;;  %1630 = vst [vmem:[#allocation2 + $0x438] sm:$0xff] %v13766_v1  ;;  %v224_v27 = vld [vmem:[%s19889_s0 + $0x3c] sm:$0xf]  ;;  %v259_v29 = vmax.bf16 %v13766_v1, %v222_v25  ;;  %v260_v30 = vmax.bf16 %v13766_v1, %v223_v26  ;;  %v573_v31 = vld [vmem:[%s19889_s0 + $0x18] sm:$0xf] }
   0xf   :  { %1631 = vst [vmem:[#allocation2 + $0x440] sm:$0xff] %v13766_v1  ;;  %1632 = vst [vmem:[#allocation2 + $0x448] sm:$0xff] %v13766_v1  ;;  %v574_v32 = vld [vmem:[%s19889_s0 + $0x24] sm:$0xf]  ;;  %v13370_v33 = vld [vmem:[%s19888_s1 + $0x278] sm:$0xff]   ;;  %v261_v34 = vmax.bf16 %v13766_v1, %v224_v27  ;;  %v610_v37 = vmax.bf16 %v13766_v1, %v573_v31 }
  0x10   :  { %1633 = vst [vmem:[#allocation2 + $0x450] sm:$0xff] %v13766_v1  ;;  %1634 = vst [vmem:[#allocation2 + $0x458] sm:$0xff] %v13766_v1  ;;  %10986 = vmatpush3.bf16.msra.mxu0 %v13358_v12  ;;  %12340 = vmatpush3.bf16.msra.mxu1 %v13357_v11  ;;  %v575_v35 = vld [vmem:[%s19889_s0 + $0x30] sm:$0xf]  ;;  %v576_v36 = vld [vmem:[%s19889_s0 + $0x3c] sm:$0xf]  ;;  %v611_v38 = vmax.bf16 %v13766_v1, %v574_v32  ;;  %v10144_v40 = vcombine.low %v258_v28, %v259_v29 }
  0x11   :  { %1635 = vst [vmem:[#allocation2 + $0x460] sm:$0xff] %v13766_v1  ;;  %1636 = vst [vmem:[#allocation2 + $0x468] sm:$0xff] %v13766_v1  ;;  %10987 = vmatprep.subr.bf16.mxu0 %v13359_v13  ;;  %12341 = vmatprep.subr.bf16.mxu1 %v13360_v14  ;;  %v23_v39 = vld [vmem:[%s19889_s0 + $0x18] sm:$0xf]  ;;  %v612_v41 = vmax.bf16 %v13766_v1, %v575_v35  ;;  %v613_v42 = vmax.bf16 %v13766_v1, %v576_v36  ;;  %v24_v43 = vld [vmem:[%s19889_s0 + $0x24] sm:$0xf] }
  0x12   :  { %1637 = vst [vmem:[#allocation2 + $0x470] sm:$0xff] %v13766_v1  ;;  %1638 = vst [vmem:[#allocation2 + $0x478] sm:$0xff] %v13766_v1  ;;  %v59_v44 = vmax.bf16 %v13766_v1, %v23_v39  ;;  %v577_v45 = vld [vmem:[%s19889_s0 + $0x48] sm:$0xf]  ;;  %v578_v46 = vld [vmem:[%s19889_s0 + $0x54] sm:$0xf]  ;;  %v10145_v47 = vcombine.low %v260_v30, %v261_v34  ;;  %v10163_v48 = vcombine.low %v610_v37, %v611_v38 }
  0x13   :  { %1639 = vst [vmem:[#allocation2 + $0x480] sm:$0xff] %v13766_v1  ;;  %1640 = vst [vmem:[#allocation2 + $0x488] sm:$0xff] %v13766_v1  ;;  %v60_v49 = vmax.bf16 %v13766_v1, %v24_v43  ;;  %v13371_v50 = vld [vmem:[%s19888_s1 + $0x4c0] sm:$0xff]   ;;  %v395_v51 = vshll.u32 %v10144_v40, 16  ;;  %v399_v52 = vshrl.u32 %v10144_v40, 16  ;;  %v10164_v53 = vcombine.low %v612_v41, %v613_v42  ;;  %v13374_v36 = vld [vmem:[%s19888_s1 + $0x488] sm:$0xff]  }
  0x14   :  { %1641 = vst [vmem:[#allocation2 + $0x490] sm:$0xff] %v13766_v1  ;;  %1642 = vst [vmem:[#allocation2 + $0x498] sm:$0xff] %v13766_v1  ;;  %10988 = vmatpush3.bf16.msra.mxu0 %v13361_v15  ;;  %12342 = vmatpush3.bf16.msra.mxu1 %v13360_v14  ;;  %v614_v54 = vmax.bf16 %v13766_v1, %v577_v45  ;;  %v403_v55 = vshll.u32 %v10145_v47, 16  ;;  %v13974_v56 = vrot.slane %v10163_v48, 1  ;;  %v225_v59 = vld [vmem:[%s19889_s0 + $0x48] sm:$0xf] }
  0x15   :  { %1643 = vst [vmem:[#allocation2 + $0x4a0] sm:$0xff] %v13766_v1  ;;  %1644 = vst [vmem:[#allocation2 + $0x4a8] sm:$0xff] %v13766_v1  ;;  %10989 = vmatprep.subr.bf16.mxu0 %v13362_v16  ;;  %12343 = vmatprep.subr.bf16.mxu1 %v13363_v17  ;;  %v10126_v57 = vcombine.low %v59_v44, %v60_v49  ;;  %v615_v58 = vmax.bf16 %v13766_v1, %v578_v46  ;;  %v13980_v60 = vrot.slane %v395_v51, 1  ;;  %v226_v62 = vld [vmem:[%s19889_s0 + $0x54] sm:$0xf]  ;;  %v13372_v4 = vld [vmem:[%s19888_s1 + $0x480] sm:$0xff]  }
  0x16   :  { %1645 = vst [vmem:[#allocation2 + $0x4b0] sm:$0xff] %v13766_v1  ;;  %1646 = vst [vmem:[#allocation2 + $0x4b8] sm:$0xff] %v13766_v1  ;;  %v742_v61 = vrot.slane %v10164_v53, 1  ;;  %v262_v63 = vmax.bf16 %v13766_v1, %v225_v59  ;;  %v407_v0 = vshrl.u32 %v10145_v47, 16  ;;  %v405_v2 = vrot.slane %v403_v55, 1  ;;  %v13375_v8 = vld [vmem:[%s19888_s1 + $0x40] sm:$0xff]  }
  0x17   :  { %1647 = vst [vmem:[#allocation2 + $0x4c0] sm:$0xff] %v13766_v1  ;;  %1648 = vst [vmem:[#allocation2 + $0x4c8] sm:$0xff] %v13766_v1  ;;  %v10165_v3 = vcombine.low %v614_v54, %v615_v58  ;;  %v263_v5 = vmax.bf16 %v13766_v1, %v226_v62  ;;  %v579_v6 = vld [vmem:[%s19889_s0 + $0x60] sm:$0xf]  ;;  %v580_v7 = vld [vmem:[%s19889_s0 + $0x6c] sm:$0xf]  ;;  %v401_v9 = vor.u32 %v399_v52, %v13980_v60 }
  0x18   :  { %1649 = vst [vmem:[#allocation2 + $0x4d0] sm:$0xff] %v13766_v1  ;;  %1650 = vst [vmem:[#allocation2 + $0x4d8] sm:$0xff] %v13766_v1  ;;  %10990 = vmatpush3.bf16.msra.mxu0 %v13364_v18  ;;  %12344 = vmatpush3.bf16.msra.mxu1 %v13363_v17  ;;  %v743_v10 = vsel %vm738_vm1, %v13974_v56, %v742_v61  ;;  %v616_v11 = vmax.bf16 %v13766_v1, %v579_v6  ;;  %v25_v13 = vld [vmem:[%s19889_s0 + $0x30] sm:$0xf]  ;;  %v26_v14 = vld [vmem:[%s19889_s0 + $0x3c] sm:$0xf] }
  0x19   :  { %1651 = vst [vmem:[#allocation2 + $0x4e0] sm:$0xff] %v13766_v1  ;;  %1652 = vst [vmem:[#allocation2 + $0x4e8] sm:$0xff] %v13766_v1  ;;  %10991 = vmatprep.subr.bf16.mxu0 %v13365_v19  ;;  %12345 = vmatprep.subr.bf16.mxu1 %v13366_v20  ;;  %v617_v12 = vmax.bf16 %v13766_v1, %v580_v7  ;;  %v581_v15 = vld [vmem:[%s19889_s0 + $0x78] sm:$0xf]  ;;  %v744_v16 = vrot.slane %v10165_v3, 1  ;;  %v10146_v17 = vcombine.low %v262_v63, %v263_v5  ;;  %v13377_v37 = vld [vmem:[%s19888_s1] sm:$0xff]  }
  0x1a   :  { %1653 = vst [vmem:[#allocation2 + $0x4f0] sm:$0xff] %v13766_v1  ;;  %1654 = vst [vmem:[#allocation2 + $0x4f8] sm:$0xff] %v13766_v1  ;;  %12349 = vmatprep.mubr.bf16.mxu1 %v743_v10  ;;  %v409_v18 = vor.u32 %v407_v0, %v405_v2  ;;  %v61_v19 = vmax.bf16 %v13766_v1, %v25_v13  ;;  %v62_v25 = vmax.bf16 %v13766_v1, %v26_v14  ;;  %v228_v27 = vld [vmem:[%s19889_s0 + $0x6c] sm:$0xf]  ;;  %v583_v28 = vld [vmem:[%s19889_s0 + $0x90] sm:$0xf] }
  0x1b   :  { %1655 = vst [vmem:[#allocation2 + $0x500] sm:$0xff] %v13766_v1  ;;  %1656 = vst [vmem:[#allocation2 + $0x508] sm:$0xff] %v13766_v1  ;;  %v10166_v24 = vcombine.low %v616_v11, %v617_v12  ;;  %v618_v26 = vmax.bf16 %v13766_v1, %v581_v15  ;;  %v584_v29 = vld [vmem:[%s19889_s0 + $0x9c] sm:$0xf]  ;;  %v745_v30 = vsel %vm738_vm1, %v742_v61, %v744_v16  ;;  %v411_v31 = vshll.u32 %v10146_v17, 16  ;;  %v13376_v48 = vld [vmem:[%s19888_s1 + $0x4d0] sm:$0xff]  }
  0x1c   :  { %10992 = vmatpush3.bf16.msra.mxu0 %v13367_v21  ;;  %12346 = vmatpush3.bf16.msra.mxu1 %v13366_v20  ;;  %202 = vst [vmem:[#allocation2 + $0x18] sm:$0xff] %v10126_v57  ;;  %795 = vst [vmem:[#allocation2 + $0x28] sm:$0xff] %v743_v10  ;;  %v582_v20 = vld [vmem:[%s19889_s0 + $0x84] sm:$0xf]  ;;  %v227_v21 = vld [vmem:[%s19889_s0 + $0x60] sm:$0xf]  ;;  %v14050_v39 = vcombine.low %v61_v19, %v62_v25  ;;  %v265_v40 = vmax.bf16 %v13766_v1, %v228_v27 }
  0x1d   :  { %10993 = vmatprep.subr.bf16.mxu0 %v13368_v22  ;;  %12347 = vmatprep.subr.bf16.mxu1 %v13369_v23  ;;  %v13373_v22 = vld [vmem:[%s19888_s1 + $0x4c8] sm:$0xff]   ;;  %v619_v32 = vmax.bf16 %v13766_v1, %v582_v20  ;;  %v28_v35 = vld [vmem:[%s19889_s0 + $0x54] sm:$0xf]  ;;  %796 = vst [vmem:[#allocation2 + $0x40] sm:$0xff] %v745_v30  ;;  %v746_v38 = vrot.slane %v10166_v24, 1  ;;  %v415_v41 = vshrl.u32 %v10146_v17, 16  ;;  %v620_v46 = vmax.bf16 %v13766_v1, %v583_v28 }
  0x1e   :  { %v27_v34 = vld [vmem:[%s19889_s0 + $0x48] sm:$0xf]  ;;  %v586_v43 = vld [vmem:[%s19889_s0 + $0xb4] sm:$0xf]  ;;  %v413_v44 = vrot.slane %v411_v31, 1  ;;  %v621_v47 = vmax.bf16 %v13766_v1, %v584_v29  ;;  %203 = vst [vmem:[#allocation2 + $0x30] sm:$0xff] %v14050_v39  ;;  %v64_v52 = vmax.bf16 %v13766_v1, %v28_v35 }
  0x1f   :  { %v585_v42 = vld [vmem:[%s19889_s0 + $0xa8] sm:$0xf]  ;;  %v10167_v45 = vcombine.low %v618_v26, %v619_v32  ;;  %v747_v49 = vsel %vm738_vm1, %v744_v16, %v746_v38  ;;  %v63_v51 = vmax.bf16 %v13766_v1, %v27_v34  ;;  %v229_v53 = vld [vmem:[%s19889_s0 + $0x78] sm:$0xf]  ;;  %v230_v59 = vld [vmem:[%s19889_s0 + $0x84] sm:$0xf]  ;;  %v623_v3 = vmax.bf16 %v13766_v1, %v586_v43 }
  0x20   :  { %10994 = vmatpush3.bf16.msra.mxu0 %v13370_v33  ;;  %12348 = vmatpush3.bf16.msra.mxu1 %v13369_v23  ;;  %v406_v23 = vsel %vm386_vm0, %v401_v9, %v405_v2  ;;  %v264_v33 = vmax.bf16 %v13766_v1, %v227_v21  ;;  %v14072_v54 = vsel %vm386_vm0, %v409_v18, %v413_v44  ;;  %v587_v61 = vld [vmem:[%s19889_s0 + $0xc0] sm:$0xf]  ;;  %v13379_v62 = vld [vmem:[%s19888_s1 + $0x48] sm:$0xff]   ;;  %v13378_v12 = vld [vmem:[%s19888_s1 + $0x490] sm:$0xff]  }
  0x21   :  { %11251 = vmatprep.subr.bf16.mxu0 %v13371_v50  ;;  %11115 = vmatprep.subr.bf16.mxu1 %v13375_v8  ;;  %554 = vst [vmem:[#allocation2 + $0x20] sm:$0xff] %v406_v23  ;;  %797 = vst [vmem:[#allocation2 + $0x58] sm:$0xff] %v747_v49  ;;  %v748_v55 = vrot.slane %v10167_v45, 1  ;;  %v10168_v58 = vcombine.low %v620_v46, %v621_v47  ;;  %v14085_v0 = vcombine.low %v63_v51, %v64_v52  ;;  %v29_v5 = vld [vmem:[%s19889_s0 + $0x60] sm:$0xf]  ;;  %v13380_v6 = vld [vmem:[%s19888_s1 + $0x8] sm:$0xff]  }
  0x22   :  { %2771 = vmatprep.mubr.bf16.mxu0 %v406_v23  ;;  %v10147_v50 = vcombine.low %v264_v33, %v265_v40  ;;  %555 = vst [vmem:[#allocation2 + $0x38] sm:$0xff] %v14072_v54  ;;  %v622_v2 = vmax.bf16 %v13766_v1, %v585_v42  ;;  %v266_v9 = vmax.bf16 %v13766_v1, %v229_v53  ;;  %v30_v11 = vld [vmem:[%s19889_s0 + $0x6c] sm:$0xf]  ;;  %v13381_v13 = vld [vmem:[%s19888_s1 + $0x50] sm:$0xff]   ;;  %v589_v18 = vld [vmem:[%s19889_s0 + $0xd8] sm:$0xf] }
  0x23   :  { %2772 = vmatmul.mubr.bf16.vlgmr.msra.gmra.mrb[0].mxu0 %v10126_v57  ;;  %12350 = vmatmul.mubr.bf16.vlgmr.msra.gmra.mrb[0].mxu1 %v745_v30  ;;  %v417_v57 = vor.u32 %v415_v41, %v413_v44  ;;  %v749_v7 = vsel %vm738_vm1, %v746_v38, %v748_v55  ;;  %v750_v8 = vrot.slane %v10168_v58, 1  ;;  %v267_v10 = vmax.bf16 %v13766_v1, %v230_v59  ;;  %v590_v19 = vld [vmem:[%s19889_s0 + $0xe4] sm:$0xf]  ;;  %v231_v24 = vld [vmem:[%s19889_s0 + $0x90] sm:$0xf]  ;;  %v13383_v40 = vld [vmem:[%s19888_s1 + $0x58] sm:$0xff]  }
  0x24   :  { %11252 = vmatpush3.bf16.msra.mxu0 %v13372_v4  ;;  %11116 = vmatpush3.bf16.msra.mxu1 %v13377_v37  ;;  %v419_v63 = vshll.u32 %v10147_v50, 16  ;;  %v588_v4 = vld [vmem:[%s19889_s0 + $0xcc] sm:$0xf]  ;;  %798 = vst [vmem:[#allocation2 + $0x70] sm:$0xff] %v749_v7  ;;  %204 = vst [vmem:[#allocation2 + $0x48] sm:$0xff] %v14085_v0  ;;  %v10169_v15 = vcombine.low %v622_v2, %v623_v3  ;;  %v423_v16 = vshrl.u32 %v10147_v50, 16 }
  0x25   :  { %11253 = vmatprep.subr.bf16.mxu0 %v13373_v22  ;;  %12353 = vmatprep.mubr.bf16.mxu1 %v747_v49  ;;  %v624_v17 = vmax.bf16 %v13766_v1, %v587_v61  ;;  %v751_v20 = vsel %vm738_vm1, %v748_v55, %v750_v8  ;;  %v10148_v21 = vcombine.low %v266_v9, %v267_v10  ;;  %v232_v25 = vld [vmem:[%s19889_s0 + $0x9c] sm:$0xf]  ;;  %v591_v26 = vld [vmem:[%s19889_s0 + $0xf0] sm:$0xf]  ;;  %v31_v32 = vld [vmem:[%s19889_s0 + $0x78] sm:$0xf] }
  0x26   :  { %2779 = vmatprep.mubr.bf16.mxu0 %v14072_v54  ;;  %11117 = vmatprep.subr.bf16.mxu1 %v13379_v62  ;;  %v421_v14 = vrot.slane %v419_v63, 1  ;;  %v625_v22 = vmax.bf16 %v13766_v1, %v588_v4  ;;  %v65_v23 = vmax.bf16 %v13766_v1, %v29_v5  ;;  %799 = vst [vmem:[#allocation2 + $0x88] sm:$0xff] %v751_v20  ;;  %v752_v28 = vrot.slane %v10169_v15, 1  ;;  %v592_v31 = vld [vmem:[%s19889_s0 + $0xfc] sm:$0xf]  ;;  %v13382_v33 = vld [vmem:[%s19888_s1 + $0x10] sm:$0xff]  }
  0x27   :  { %v66_v30 = vmax.bf16 %v13766_v1, %v30_v11  ;;  %v427_v34 = vshll.u32 %v10148_v21, 16  ;;  %v627_v37 = vmax.bf16 %v13766_v1, %v590_v19  ;;  %v32_v38 = vld [vmem:[%s19889_s0 + $0x84] sm:$0xf]  ;;  %v268_v43 = vmax.bf16 %v13766_v1, %v231_v24  ;;  %v594_v45 = vld [vmem:[%s19889_s0 + $0x114] sm:$0xf]  ;;  %v13384_v50 = vld [vmem:[%s19888_s1 + $0x18] sm:$0xff]  }
  0x28   :  { %11254 = vmatpush3.bf16.msra.mxu0 %v13374_v36  ;;  %11118 = vmatpush3.bf16.msra.mxu1 %v13380_v6  ;;  %v14132_v27 = vsel %vm386_vm0, %v417_v57, %v421_v14  ;;  %v425_v29 = vor.u32 %v423_v16, %v421_v14  ;;  %v10170_v35 = vcombine.low %v624_v17, %v625_v22  ;;  %v431_v49 = vshrl.u32 %v10148_v21, 16  ;;  %v13385_v62 = vld [vmem:[%s19888_s1 + $0x60] sm:$0xff]   ;;  %v13386_v5 = vld [vmem:[%s19888_s1 + $0x4d8] sm:$0xff]   ;;  %v234_v9 = vld [vmem:[%s19889_s0 + $0xb4] sm:$0xf] }
  0x29   :  { %11255 = vmatprep.subr.bf16.mxu0 %v13376_v48  ;;  %11119 = vmatprep.subr.bf16.mxu1 %v13381_v13  ;;  %556 = vst [vmem:[#allocation2 + $0x50] sm:$0xff] %v14132_v27  ;;  %v626_v36 = vmax.bf16 %v13766_v1, %v589_v18  ;;  %v753_v41 = vsel %vm738_vm1, %v750_v8, %v752_v28  ;;  %v429_v46 = vrot.slane %v427_v34, 1  ;;  %v233_v8 = vld [vmem:[%s19889_s0 + $0xa8] sm:$0xf]  ;;  %v595_v14 = vld [vmem:[%s19889_s0 + $0x120] sm:$0xf] }
  0x2a   :  { %v14158_v42 = vcombine.low %v65_v23, %v66_v30  ;;  %v269_v44 = vmax.bf16 %v13766_v1, %v232_v25  ;;  %800 = vst [vmem:[#allocation2 + $0xa0] sm:$0xff] %v753_v41  ;;  %v754_v47 = vrot.slane %v10170_v35, 1  ;;  %v628_v52 = vmax.bf16 %v13766_v1, %v591_v26  ;;  %v596_v15 = vld [vmem:[%s19889_s0 + $0x12c] sm:$0xf]  ;;  %v33_v19 = vld [vmem:[%s19889_s0 + $0x90] sm:$0xf] }
  0x2b   :  { %2780 = vmatmul.mubr.bf16.gmra.mrb[4].mxu0 %v14050_v39  ;;  %12354 = vmatmul.mubr.bf16.gmra.mrb[4].mxu1 %v749_v7  ;;  %v593_v39 = vld [vmem:[%s19889_s0 + $0x108] sm:$0xf]  ;;  %v10171_v48 = vcombine.low %v626_v36, %v627_v37  ;;  %v629_v53 = vmax.bf16 %v13766_v1, %v592_v31  ;;  %v67_v55 = vmax.bf16 %v13766_v1, %v31_v32  ;;  %v13387_v21 = vld [vmem:[%s19888_s1 + $0x20] sm:$0xff]   ;;  %v597_v26 = vld [vmem:[%s19889_s0 + $0x138] sm:$0xf] }
  0x2c   :  { %2787 = vmatprep.mubr.bf16.mxu0 %v14132_v27  ;;  %12357 = vmatprep.mubr.bf16.mxu1 %v751_v20  ;;  %205 = vst [vmem:[#allocation2 + $0x60] sm:$0xff] %v14158_v42  ;;  %v10149_v51 = vcombine.low %v268_v43, %v269_v44  ;;  %v14173_v57 = vsel %vm386_vm0, %v425_v29, %v429_v46  ;;  %v34_v20 = vld [vmem:[%s19889_s0 + $0x9c] sm:$0xf]  ;;  %v235_v44 = vld [vmem:[%s19889_s0 + $0xc0] sm:$0xf] }
  0x2d   :  { %11256 = vmatpush3.bf16.msra.mxu0 %v13378_v12  ;;  %11120 = vmatpush3.bf16.msra.mxu1 %v13382_v33  ;;  %v755_v58 = vsel %vm738_vm1, %v752_v28, %v754_v47  ;;  %v756_v59 = vrot.slane %v10171_v48, 1  ;;  %v433_v61 = vor.u32 %v431_v49, %v429_v46  ;;  %557 = vst [vmem:[#allocation2 + $0x68] sm:$0xff] %v14173_v57  ;;  %v598_v28 = vld [vmem:[%s19889_s0 + $0x144] sm:$0xf]  ;;  %v13388_v32 = vld [vmem:[%s19888_s1 + $0x498] sm:$0xff]   ;;  %v13389_v46 = vld [vmem:[%s19888_s1 + $0x68] sm:$0xff]  }
  0x2e   :  { %11121 = vmatprep.subr.bf16.mxu1 %v13383_v40  ;;  %801 = vst [vmem:[#allocation2 + $0xb8] sm:$0xff] %v755_v58  ;;  %v435_v63 = vshll.u32 %v10149_v51, 16  ;;  %v10172_v2 = vcombine.low %v628_v52, %v629_v53  ;;  %v68_v3 = vmax.bf16 %v13766_v1, %v32_v38  ;;  %v630_v4 = vmax.bf16 %v13766_v1, %v593_v39  ;;  %v13390_v52 = vld [vmem:[%s19888_s1 + $0x28] sm:$0xff]  }
  0x2f   :  { %v757_v6 = vsel %vm738_vm1, %v754_v47, %v756_v59  ;;  %v631_v7 = vmax.bf16 %v13766_v1, %v594_v45  ;;  %v270_v13 = vmax.bf16 %v13766_v1, %v233_v8  ;;  %v271_v16 = vmax.bf16 %v13766_v1, %v234_v9  ;;  %11257 = vmatprep.subr.bf16.mxu0 %v13386_v5  ;;  %v236_v45 = vld [vmem:[%s19889_s0 + $0xcc] sm:$0xf]  ;;  %v602_v5 = vld [vmem:[%s19889_s0 + $0x174] sm:$0xf] }
  0x30   :  { %802 = vst [vmem:[#allocation2 + $0xd0] sm:$0xff] %v757_v6  ;;  %v437_v10 = vrot.slane %v435_v63, 1  ;;  %v758_v11 = vrot.slane %v10172_v2, 1  ;;  %v14194_v12 = vcombine.low %v67_v55, %v68_v3  ;;  %v439_v17 = vshrl.u32 %v10149_v51, 16  ;;  %v600_v51 = vld [vmem:[%s19889_s0 + $0x15c] sm:$0xf] }
  0x31   :  { %11122 = vmatpush3.bf16.msra.mxu1 %v13384_v50  ;;  %v632_v18 = vmax.bf16 %v13766_v1, %v595_v14  ;;  %v633_v24 = vmax.bf16 %v13766_v1, %v596_v15  ;;  %v69_v25 = vmax.bf16 %v13766_v1, %v33_v19  ;;  %v10150_v30 = vcombine.low %v270_v13, %v271_v16  ;;  %v599_v50 = vld [vmem:[%s19889_s0 + $0x150] sm:$0xf]  ;;  %v13393_v19 = vld [vmem:[%s19888_s1 + $0x78] sm:$0xff]  }
  0x32   :  { %v14216_v22 = vsel %vm386_vm0, %v433_v61, %v437_v10  ;;  %v759_v23 = vsel %vm738_vm1, %v756_v59, %v758_v11  ;;  %206 = vst [vmem:[#allocation2 + $0x78] sm:$0xff] %v14194_v12  ;;  %11123 = vmatprep.subr.bf16.mxu1 %v13385_v62  ;;  %v70_v31 = vmax.bf16 %v13766_v1, %v34_v20  ;;  %v35_v61 = vld [vmem:[%s19889_s0 + $0xa8] sm:$0xf]  ;;  %v36_v62 = vld [vmem:[%s19889_s0 + $0xb4] sm:$0xf] }
  0x33   :  { %2788 = vmatmul.mubr.bf16.gmra.mrb[8].mxu0 %v14085_v0  ;;  %12358 = vmatmul.mubr.bf16.gmra.mrb[8].mxu1 %v753_v41  ;;  %v10173_v0 = vcombine.low %v630_v4, %v631_v7  ;;  %558 = vst [vmem:[#allocation2 + $0x80] sm:$0xff] %v14216_v22  ;;  %803 = vst [vmem:[#allocation2 + $0xe8] sm:$0xff] %v759_v23  ;;  %v441_v33 = vor.u32 %v439_v17, %v437_v10  ;;  %v443_v38 = vshll.u32 %v10150_v30, 16  ;;  %v601_v4 = vld [vmem:[%s19889_s0 + $0x168] sm:$0xf]  ;;  %v13392_v16 = vld [vmem:[%s19888_s1 + $0x30] sm:$0xff]  }
  0x34   :  { %2795 = vmatprep.mubr.bf16.mxu0 %v14173_v57  ;;  %12361 = vmatprep.mubr.bf16.mxu1 %v755_v58  ;;  %v10174_v34 = vcombine.low %v632_v18, %v633_v24  ;;  %v634_v35 = vmax.bf16 %v13766_v1, %v597_v26  ;;  %v635_v36 = vmax.bf16 %v13766_v1, %v598_v28  ;;  %v447_v40 = vshrl.u32 %v10150_v30, 16  ;;  %v603_v28 = vld [vmem:[%s19889_s0 + $0x180] sm:$0xf] }
  0x35   :  { %v760_v29 = vrot.slane %v10173_v0, 1  ;;  %11124 = vmatpush3.bf16.msra.mxu1 %v13387_v21  ;;  %v14238_v39 = vcombine.low %v69_v25, %v70_v31  ;;  %11258 = vmatpush3.bf16.msra.mxu0 %v13388_v32  ;;  %v445_v47 = vrot.slane %v443_v38, 1  ;;  %v272_v48 = vmax.bf16 %v13766_v1, %v235_v44  ;;  %v237_v21 = vld [vmem:[%s19889_s0 + $0xd8] sm:$0xf]  ;;  %v238_v25 = vld [vmem:[%s19889_s0 + $0xe4] sm:$0xf] }
  0x36   :  { %v762_v41 = vrot.slane %v10174_v34, 1  ;;  %v10175_v43 = vcombine.low %v634_v35, %v635_v36  ;;  %v273_v49 = vmax.bf16 %v13766_v1, %v236_v45  ;;  %v636_v58 = vmax.bf16 %v13766_v1, %v599_v50  ;;  %11125 = vmatprep.subr.bf16.mxu1 %v13389_v46  ;;  %v604_v31 = vld [vmem:[%s19889_s0 + $0x18c] sm:$0xf]  ;;  %v14330_v32 = vld [vmem:[#allocation2 + $0x360] sm:$0xff]  ;;  %v605_v38 = vld [vmem:[%s19889_s0 + $0x198] sm:$0xf] }
  0x37   :  { %v14236_v37 = vsel %vm738_vm1, %v758_v11, %v760_v29  ;;  %207 = vst [vmem:[#allocation2 + $0x90] sm:$0xff] %v14238_v39  ;;  %v637_v59 = vmax.bf16 %v13766_v1, %v600_v51  ;;  %v14277_v63 = vsel %vm386_vm0, %v441_v33, %v445_v47  ;;  %v449_v3 = vor.u32 %v447_v40, %v445_v47  ;;  %v37_v34 = vld [vmem:[%s19889_s0 + $0xc0] sm:$0xf]  ;;  %v38_v35 = vld [vmem:[%s19889_s0 + $0xcc] sm:$0xf] }
  0x38   :  { %804 = vst [vmem:[#allocation2 + $0x100] sm:$0xff] %v14236_v37  ;;  %v763_v53 = vsel %vm738_vm1, %v760_v29, %v762_v41  ;;  %v764_v55 = vrot.slane %v10175_v43, 1  ;;  %v10151_v2 = vcombine.low %v272_v48, %v273_v49  ;;  %559 = vst [vmem:[#allocation2 + $0x98] sm:$0xff] %v14277_v63  ;;  %v71_v8 = vmax.bf16 %v13766_v1, %v35_v61  ;;  %v13394_v29 = vld [vmem:[%s19888_s1 + $0x38] sm:$0xff]   ;;  %v606_v40 = vld [vmem:[%s19889_s0 + $0x1a4] sm:$0xf] }
  0x39   :  { %805 = vst [vmem:[#allocation2 + $0x118] sm:$0xff] %v763_v53  ;;  %v10176_v7 = vcombine.low %v636_v58, %v637_v59  ;;  %v72_v9 = vmax.bf16 %v13766_v1, %v36_v62  ;;  %v638_v11 = vmax.bf16 %v13766_v1, %v601_v4  ;;  %v639_v13 = vmax.bf16 %v13766_v1, %v602_v5  ;;  %v239_v51 = vld [vmem:[%s19889_s0 + $0xf0] sm:$0xf]  ;;  %v219_v59 = vld [vmem:[%s19889_s0] sm:$0xf] }
  0x3a   :  { %v451_v10 = vshll.u32 %v10151_v2, 16  ;;  %11126 = vmatpush3.bf16.msra.mxu1 %v13390_v52  ;;  %v455_v14 = vshrl.u32 %v10151_v2, 16  ;;  %v274_v26 = vmax.bf16 %v13766_v1, %v237_v21  ;;  %v275_v30 = vmax.bf16 %v13766_v1, %v238_v25  ;;  %v13395_v61 = vld [vmem:[%s19888_s1 + $0x4e0] sm:$0xff]   ;;  %v39_v5 = vld [vmem:[%s19889_s0 + $0xd8] sm:$0xf] }
  0x3b   :  { %2796 = vmatmul.mubr.bf16.gmra.mrb[12].mxu0 %v14158_v42  ;;  %12362 = vmatmul.mubr.bf16.gmra.mrb[12].mxu1 %v757_v6  ;;  %v13391_v42 = vld [vmem:[%s19888_s1 + $0x70] sm:$0xff]   ;;  %v14287_v6 = vsel %vm738_vm1, %v762_v41, %v764_v55  ;;  %v766_v15 = vrot.slane %v10176_v7, 1  ;;  %v14294_v0 = vcombine.low %v71_v8, %v72_v9  ;;  %v10177_v18 = vcombine.low %v638_v11, %v639_v13  ;;  %v40_v9 = vld [vmem:[%s19889_s0 + $0xe4] sm:$0xf]  ;;  %v21_v11 = vld [vmem:[%s19889_s0] sm:$0xf] }
  0x3c   :  { %2803 = vmatprep.mubr.bf16.mxu0 %v14216_v22  ;;  %12365 = vmatprep.mubr.bf16.mxu1 %v759_v23  ;;  %806 = vst [vmem:[#allocation2 + $0x130] sm:$0xff] %v14287_v6  ;;  %v453_v17 = vrot.slane %v451_v10, 1  ;;  %v640_v33 = vmax.bf16 %v14330_v32, %v603_v28  ;;  %v641_v36 = vmax.bf16 %v14330_v32, %v604_v31  ;;  %v22_v13 = vld [vmem:[%s19889_s0 + $0xc] sm:$0xf]  ;;  %v241_v21 = vld [vmem:[%s19889_s0 + $0x108] sm:$0xf] }
  0x3d   :  { %11127 = vmatprep.subr.bf16.mxu1 %v13391_v42  ;;  %v14303_v20 = vsel %vm738_vm1, %v764_v55, %v766_v15  ;;  %208 = vst [vmem:[#allocation2 + $0xa8] sm:$0xff] %v14294_v0  ;;  %v768_v24 = vrot.slane %v10177_v18, 1  ;;  %v10152_v41 = vcombine.low %v274_v26, %v275_v30  ;;  %v74_v43 = vmax.bf16 %v14330_v32, %v38_v35  ;;  %v240_v55 = vld [vmem:[%s19889_s0 + $0xfc] sm:$0xf]  ;;  %v242_v26 = vld [vmem:[%s19889_s0 + $0x114] sm:$0xf] }
  0x3e   :  { %v14310_v23 = vsel %vm386_vm0, %v449_v3, %v453_v17  ;;  %807 = vst [vmem:[#allocation2 + $0x148] sm:$0xff] %v14303_v20  ;;  %11128 = vmatpush3.bf16.msra.mxu1 %v13392_v16  ;;  %v642_v44 = vmax.bf16 %v14330_v32, %v605_v38  ;;  %v643_v45 = vmax.bf16 %v14330_v32, %v606_v40  ;;  %v220_v3 = vld [vmem:[%s19889_s0 + $0xc] sm:$0xf] }
  0x3f   :  { %560 = vst [vmem:[#allocation2 + $0xb0] sm:$0xff] %v14310_v23  ;;  %v14341_v1 = vsel %vm738_vm1, %v766_v15, %v768_v24  ;;  %11129 = vmatprep.subr.bf16.mxu1 %v13393_v19  ;;  %v457_v46 = vor.u32 %v455_v14, %v453_v17  ;;  %v10178_v47 = vcombine.low %v640_v33, %v641_v36  ;;  %v459_v48 = vshll.u32 %v10152_v41, 16  ;;  %v13396_v19 = vld [vmem:[%s19888_s1 + $0x4a0] sm:$0xff]   ;;  %v13397_v30 = vld [vmem:[%s19888_s1 + $0x4e8] sm:$0xff]   ;;  %v42_v36 = vld [vmem:[%s19889_s0 + $0xfc] sm:$0xf] }
  0x40   :  { %808 = vst [vmem:[#allocation2 + $0x160] sm:$0xff] %v14341_v1  ;;  %v14357_v50 = vcombine.low %v642_v44, %v643_v45  ;;  %v463_v52 = vshrl.u32 %v10152_v41, 16  ;;  %v276_v58 = vmax.bf16 %v14330_v32, %v239_v51  ;;  %v277_v2 = vmax.bf16 %v14330_v32, %v240_v55  ;;  %11259 = vmatprep.subr.bf16.mxu0 %v13395_v61  ;;  %v244_v44 = vld [vmem:[%s19889_s0 + $0x12c] sm:$0xf]  ;;  %v43_v45 = vld [vmem:[%s19889_s0 + $0x108] sm:$0xf] }
  0x41   :  { %v461_v62 = vrot.slane %v459_v48, 1  ;;  %v256_v4 = vmax.bf16 %v14330_v32, %v219_v59  ;;  %v257_v8 = vmax.bf16 %v14330_v32, %v220_v3  ;;  %v75_v10 = vmax.bf16 %v14330_v32, %v39_v5  ;;  %11260 = vmatpush3.bf16.msra.mxu0 %v13396_v19  ;;  %v245_v5 = vld [vmem:[%s19889_s0 + $0x138] sm:$0xf] }
  0x42   :  { %11130 = vmatpush3.bf16.msra.mxu1 %v13394_v29  ;;  %v772_v42 = vrot.slane %v14357_v50, 1  ;;  %v10153_v16 = vcombine.low %v276_v58, %v277_v2  ;;  %v76_v18 = vmax.bf16 %v14330_v32, %v40_v9  ;;  %v57_v25 = vmax.bf16 %v14330_v32, %v21_v11  ;;  %v41_v29 = vld [vmem:[%s19889_s0 + $0xf0] sm:$0xf]  ;;  %11261 = vmatprep.subr.bf16.mxu0 %v13397_v30 }
  0x43   :  { %2804 = vmatmul.mubr.bf16.gmra.mrb[16].mxu0 %v14194_v12  ;;  %12366 = vmatmul.mubr.bf16.gmra.mrb[16].mxu1 %v14236_v37  ;;  %v73_v37 = vmax.bf16 %v14330_v32, %v37_v34  ;;  %v14399_v14 = vsel %vm386_vm0, %v457_v46, %v461_v62  ;;  %v10143_v17 = vcombine.low %v256_v4, %v257_v8  ;;  %v246_v8 = vld [vmem:[%s19889_s0 + $0x144] sm:$0xf] }
  0x44   :  { %2811 = vmatprep.mubr.bf16.mxu0 %v14277_v63  ;;  %12369 = vmatprep.mubr.bf16.mxu1 %v763_v53  ;;  %v770_v53 = vrot.slane %v10178_v47, 1  ;;  %561 = vst [vmem:[#allocation2 + $0xc8] sm:$0xff] %v14399_v14  ;;  %v278_v28 = vmax.bf16 %v14330_v32, %v241_v21  ;;  %v14430_v34 = vcombine.low %v75_v10, %v76_v18  ;;  %v471_v41 = vshrl.u32 %v10153_v16, 16  ;;  %v248_v21 = vld [vmem:[%s19889_s0 + $0x15c] sm:$0xf] }
  0x45   :  { %v14355_v49 = vcombine.low %v73_v37, %v74_v43  ;;  %v388_v31 = vshrl.u32 %v10143_v17, 16  ;;  %v390_v33 = vshll.u32 %v10143_v17, 16  ;;  %v279_v35 = vmax.bf16 %v14330_v32, %v242_v26  ;;  %v243_v37 = vld [vmem:[%s19889_s0 + $0x120] sm:$0xf] }
  0x46   :  { %v14383_v7 = vsel %vm738_vm1, %v768_v24, %v770_v53  ;;  %v14405_v15 = vsel %vm738_vm1, %v770_v53, %v772_v42  ;;  %v467_v24 = vshll.u32 %v10153_v16, 16  ;;  %v77_v43 = vmax.bf16 %v14330_v32, %v41_v29  ;;  %210 = vst [vmem:[#allocation2 + $0xd8] sm:$0xff] %v14430_v34  ;;  %v13398_v53 = vld [vmem:[%s19888_s1 + $0x4a8] sm:$0xff]  }
  0x47   :  { %209 = vst [vmem:[#allocation2 + $0xc0] sm:$0xff] %v14355_v49  ;;  %809 = vst [vmem:[#allocation2 + $0x178] sm:$0xff] %v14383_v7  ;;  %v392_v46 = vrot.slane %v390_v33, 1  ;;  %v10154_v47 = vcombine.low %v278_v28, %v279_v35  ;;  %v78_v48 = vmax.bf16 %v14330_v32, %v42_v36  ;;  %v280_v51 = vmax.bf16 %v14330_v32, %v243_v37  ;;  %v46_v16 = vld [vmem:[%s19889_s0 + $0x12c] sm:$0xf] }
  0x48   :  { %810 = vst [vmem:[#allocation2 + $0x190] sm:$0xff] %v14405_v15  ;;  %v469_v38 = vrot.slane %v467_v24, 1  ;;  %v281_v59 = vmax.bf16 %v14330_v32, %v244_v44  ;;  %v79_v61 = vmax.bf16 %v14330_v32, %v43_v45  ;;  %11262 = vmatpush3.bf16.msra.mxu0 %v13398_v53  ;;  %v282_v11 = vmax.bf16 %v14330_v32, %v245_v5  ;;  %v47_v24 = vld [vmem:[%s19889_s0 + $0x138] sm:$0xf]  ;;  %v48_v28 = vld [vmem:[%s19889_s0 + $0x144] sm:$0xf] }
  0x49   :  { %v475_v2 = vshll.u32 %v10154_v47, 16  ;;  %v14463_v3 = vcombine.low %v77_v43, %v78_v48  ;;  %v479_v4 = vshrl.u32 %v10154_v47, 16  ;;  %v283_v18 = vmax.bf16 %v14330_v32, %v246_v8  ;;  %v249_v43 = vld [vmem:[%s19889_s0 + $0x168] sm:$0xf]  ;;  %v250_v44 = vld [vmem:[%s19889_s0 + $0x174] sm:$0xf] }
  0x4a   :  { %v473_v58 = vor.u32 %v471_v41, %v469_v38  ;;  %v10155_v9 = vcombine.low %v280_v51, %v281_v59  ;;  %v82_v26 = vmax.bf16 %v14330_v32, %v46_v16  ;;  %v285_v37 = vmax.bf16 %v14330_v32, %v248_v21  ;;  %v13400_v41 = vld [vmem:[%s19888_s1 + $0x4b0] sm:$0xff]  }
  0x4b   :  { %2812 = vmatmul.mubr.bf16.gmra.mrb[20].mxu0 %v14238_v39  ;;  %12370 = vmatmul.mubr.bf16.gmra.mrb[20].mxu1 %v14287_v6  ;;  %v465_v6 = vor.u32 %v463_v52, %v461_v62  ;;  %v44_v52 = vld [vmem:[%s19889_s0 + $0x114] sm:$0xf]  ;;  %v393_v62 = vor.u32 %v392_v46, %v388_v31  ;;  %v477_v17 = vrot.slane %v475_v2, 1  ;;  %211 = vst [vmem:[#allocation2 + $0xf0] sm:$0xff] %v14463_v3  ;;  %v49_v51 = vld [vmem:[%s19889_s0 + $0x150] sm:$0xf] }
  0x4c   :  { %2819 = vmatprep.mubr.bf16.mxu0 %v14310_v23  ;;  %12373 = vmatprep.mubr.bf16.mxu1 %v14303_v20  ;;  %v58_v20 = vmax.bf16 %v14330_v32, %v22_v13  ;;  %v80_v10 = vmax.bf16 %v14330_v32, %v44_v52  ;;  %v45_v13 = vld [vmem:[%s19889_s0 + $0x120] sm:$0xf]  ;;  %v10156_v31 = vcombine.low %v282_v11, %v283_v18  ;;  %v50_v52 = vld [vmem:[%s19889_s0 + $0x15c] sm:$0xf]  ;;  %v252_v2 = vld [vmem:[%s19889_s0 + $0x18c] sm:$0xf] }
  0x4d   :  { %v14458_v55 = vsel %vm386_vm0, %v465_v6, %v469_v38  ;;  %v247_v6 = vld [vmem:[%s19889_s0 + $0x150] sm:$0xf]  ;;  %v81_v19 = vmax.bf16 %v14330_v32, %v45_v13  ;;  %v14507_v29 = vsel %vm386_vm0, %v473_v58, %v477_v17  ;;  %v481_v30 = vor.u32 %v479_v4, %v477_v17  ;;  %v51_v4 = vld [vmem:[%s19889_s0 + $0x168] sm:$0xf]  ;;  %v52_v11 = vld [vmem:[%s19889_s0 + $0x174] sm:$0xf] }
  0x4e   :  { %v14439_v40 = vcombine.low %v57_v25, %v58_v20  ;;  %562 = vst [vmem:[#allocation2 + $0xe0] sm:$0xff] %v14458_v55  ;;  %v14500_v25 = vcombine.low %v79_v61, %v80_v10  ;;  %v487_v20 = vshrl.u32 %v10155_v9, 16  ;;  %v284_v33 = vmax.bf16 %v14330_v32, %v247_v6  ;;  %563 = vst [vmem:[#allocation2 + $0xf8] sm:$0xff] %v14507_v29  ;;  %v13401_v13 = vld [vmem:[%s19888_s1 + $0x4f8] sm:$0xff]  }
  0x4f   :  { %v14512_v36 = vcombine.low %v81_v19, %v82_v26  ;;  %v83_v38 = vmax.bf16 %v14330_v32, %v47_v24  ;;  %v491_v45 = vshll.u32 %v10156_v31, 16  ;;  %v495_v46 = vshrl.u32 %v10156_v31, 16 }
  0x50   :  { %212 = vst [vmem:[#allocation2 + $0x108] sm:$0xff] %v14500_v25  ;;  %v84_v47 = vmax.bf16 %v14330_v32, %v48_v28  ;;  %v286_v48 = vmax.bf16 %v14330_v32, %v249_v43  ;;  %v10157_v59 = vcombine.low %v284_v33, %v285_v37  ;;  %v287_v61 = vmax.bf16 %v14330_v32, %v250_v44  ;;  %v254_v28 = vld [vmem:[%s19889_s0 + $0x1a4] sm:$0xf]  ;;  %v53_v37 = vld [vmem:[%s19889_s0 + $0x180] sm:$0xf] }
  0x51   :  { %213 = vst [vmem:[#allocation2 + $0x120] sm:$0xff] %v14512_v36  ;;  %v493_v5 = vrot.slane %v491_v45, 1  ;;  %v86_v10 = vmax.bf16 %v14330_v32, %v50_v52  ;;  %v88_v31 = vmax.bf16 %v14330_v32, %v52_v11 }
  0x52   :  { %v14548_v8 = vcombine.low %v83_v38, %v84_v47  ;;  %v499_v16 = vshll.u32 %v10157_v59, 16  ;;  %v10158_v6 = vcombine.low %v286_v48, %v287_v61  ;;  %v503_v17 = vshrl.u32 %v10157_v59, 16  ;;  %v54_v38 = vld [vmem:[%s19889_s0 + $0x18c] sm:$0xf] }
  0x53   :  { %2820 = vmatmul.mubr.bf16.gmra.mrb[24].mxu0 %v14294_v0  ;;  %12374 = vmatmul.mubr.bf16.gmra.mrb[24].mxu1 %v14341_v1  ;;  %v398_v1 = vsel %vm386_vm0, %v393_v62, %v13980_v60  ;;  %v483_v60 = vshll.u32 %v10155_v9, 16  ;;  %v251_v62 = vld [vmem:[%s19889_s0 + $0x180] sm:$0xf]  ;;  %v85_v9 = vmax.bf16 %v14330_v32, %v49_v51  ;;  %v497_v21 = vor.u32 %v495_v46, %v493_v5 }
  0x54   :  { %2827 = vmatprep.mubr.bf16.mxu0 %v14399_v14  ;;  %12377 = vmatprep.mubr.bf16.mxu1 %v14383_v7  ;;  %v13399_v7 = vld [vmem:[%s19888_s1 + $0x4f0] sm:$0xff]   ;;  %v288_v18 = vmax.bf16 %v14330_v32, %v251_v62  ;;  %214 = vst [vmem:[#allocation2 + $0x138] sm:$0xff] %v14548_v8  ;;  %v511_v26 = vshrl.u32 %v10158_v6, 16  ;;  %v13403_v46 = vld [vmem:[%s19888_s1 + $0x340] sm:$0xff]   ;;  %v89_v51 = vmax.bf16 %v14330_v32, %v53_v37 }
  0x55   :  { %11263 = vmatprep.subr.bf16.mxu0 %v13399_v7  ;;  %v485_v35 = vrot.slane %v483_v60, 1  ;;  %v14566_v24 = vcombine.low %v85_v9, %v86_v10  ;;  %v253_v7 = vld [vmem:[%s19889_s0 + $0x198] sm:$0xf]  ;;  %v501_v60 = vrot.slane %v499_v16, 1  ;;  %v90_v52 = vmax.bf16 %v14330_v32, %v54_v38  ;;  %v13642_v9 = vld [vmem:[#allocation2 + $0x20] sm:$0xff] }
  0x56   :  { %11264 = vmatpush3.bf16.msra.mxu0 %v13400_v41  ;;  %v290_v33 = vmax.bf16 %v14330_v32, %v253_v7  ;;  %v13407_v16 = vld [vmem:[%s19888_s1 + $0x80] sm:$0xff]   ;;  %v572_v7 = vld [vmem:[%s19889_s0 + $0xc] sm:$0xf] }
  0x57   :  { %v14534_v53 = vsel %vm386_vm0, %v481_v30, %v485_v35  ;;  %v489_v58 = vor.u32 %v487_v20, %v485_v35  ;;  %v289_v20 = vmax.bf16 %v14330_v32, %v252_v2  ;;  %11265 = vmatprep.subr.bf16.mxu0 %v13401_v13  ;;  %215 = vst [vmem:[#allocation2 + $0x150] sm:$0xff] %v14566_v24  ;;  %v13646_v37 = vld [vmem:[#allocation2 + $0x60] sm:$0xff] }
  0x58   :  { %564 = vst [vmem:[#allocation2 + $0x110] sm:$0xff] %v14534_v53  ;;  %v87_v30 = vmax.bf16 %v14330_v32, %v51_v4  ;;  %v291_v35 = vmax.bf16 %v14330_v32, %v254_v28  ;;  %v14591_v41 = vsel %vm386_vm0, %v497_v21, %v501_v60  ;;  %v505_v43 = vor.u32 %v503_v17, %v501_v60  ;;  %v13411_v17 = vld [vmem:[%s19888_s1 + $0x90] sm:$0xff]   ;;  %v13412_v21 = vld [vmem:[%s19888_s1 + $0x98] sm:$0xff]   ;;  %v13416_v28 = vld [vmem:[%s19888_s1 + $0xa8] sm:$0xff]  }
  0x59   :  { %v14563_v19 = vsel %vm386_vm0, %v489_v58, %v493_v5  ;;  %v10159_v45 = vcombine.low %v288_v18, %v289_v20  ;;  %566 = vst [vmem:[#allocation2 + $0x140] sm:$0xff] %v14591_v41  ;;  %v14609_v4 = vcombine.low %v89_v51, %v90_v52  ;;  %12381 = vmatprep.subr.bf16.mxu1 %v13407_v16  ;;  %v13643_v18 = vld [vmem:[#allocation2 + $0x18] sm:$0xff]  ;;  %v13644_v20 = vld [vmem:[#allocation2 + $0x30] sm:$0xff]  ;;  %v56_v38 = vld [vmem:[%s19889_s0 + $0x1a4] sm:$0xf] }
  0x5a   :  { %565 = vst [vmem:[#allocation2 + $0x128] sm:$0xff] %v14563_v19  ;;  %v14597_v47 = vcombine.low %v87_v30, %v88_v31  ;;  %v14599_v48 = vcombine.low %v290_v33, %v291_v35  ;;  %v13417_v33 = vld [vmem:[%s19888_s1 + $0xb0] sm:$0xff]   ;;  %v13418_v35 = vld [vmem:[%s19888_s1 + $0xb8] sm:$0xff]  }
  0x5b   :  { %2828 = vmatmul.mubr.bf16.gmra.mrb[28].mxu0 %v14355_v49  ;;  %12378 = vmatmul.mubr.bf16.gmra.mrb[28].mxu1 %v14405_v15  ;;  %v13402_v15 = vld [vmem:[%s19888_s1 + $0x4b8] sm:$0xff]   ;;  %v515_v61 = vshll.u32 %v10159_v45, 16  ;;  %v519_v62 = vshrl.u32 %v10159_v45, 16  ;;  %217 = vst [vmem:[#allocation2 + $0x180] sm:$0xff] %v14609_v4  ;;  %v92_v45 = vmax.bf16 %v14330_v32, %v56_v38  ;;  %v14762_v38 = vld [vmem:[#allocation2 + $0x360] sm:$0xff] }
  0x5c   :  { %2835 = vmatprep.mubr.bf16.mxu0 %v14458_v55  ;;  %3237 = vmatprep.mubr.bf16.mxu1 %v398_v1  ;;  %v507_v1 = vshll.u32 %v10158_v6, 16  ;;  %216 = vst [vmem:[#allocation2 + $0x168] sm:$0xff] %v14597_v47  ;;  %v523_v2 = vshll.u32 %v14599_v48, 16  ;;  %v13410_v6 = vld [vmem:[%s19888_s1 + $0x88] sm:$0xff]  }
  0x5d   :  { %11266 = vmatpush3.bf16.msra.mxu0 %v13402_v15  ;;  %v517_v5 = vrot.slane %v515_v61, 1  ;;  %v571_v15 = vld [vmem:[%s19889_s0] sm:$0xe] }
  0x5e   :  { %v509_v44 = vrot.slane %v507_v1, 1  ;;  %11387 = vmatprep.subr.bf16.mxu0 %v13403_v46  ;;  %v14614_v10 = vrot.slane %v523_v2, 1  ;;  %v608_v60 = vmax.bf16 %v14330_v32, %v571_v15  ;;  %v609_v1 = vmax.bf16 %v14330_v32, %v572_v7  ;;  %v1014_v46 = vld [vmem:[%s19889_s0 + $0x28] sm:$0xf] }
  0x5f   :  { %v521_v13 = vor.u32 %v519_v62, %v517_v5  ;;  %v1051_v52 = vmax.bf16 %v14330_v32, %v1014_v46 }
  0x60   :  { %v14604_v58 = vsel %vm386_vm0, %v505_v43, %v509_v44  ;;  %v513_v59 = vor.u32 %v511_v26, %v509_v44  ;;  %v10162_v26 = vcombine.low %v608_v60, %v609_v1  ;;  %v1017_v60 = vld [vmem:[%s19889_s0 + $0x4c] sm:$0xf]  ;;  %v1018_v1 = vld [vmem:[%s19889_s0 + $0x58] sm:$0xf] }
  0x61   :  { %567 = vst [vmem:[#allocation2 + $0x158] sm:$0xff] %v14604_v58 }
  0x62   :  { %v14618_v11 = vsel %vm386_vm0, %v513_v59, %v517_v5  ;;  %v739_v30 = vrot.slane %v10162_v26, 1  ;;  %v3528_v59 = vld [vmem:[#allocation2 + $0x38] sm:$0xff]  ;;  %v1054_v26 = vmax.bf16 %v14330_v32, %v1017_v60 }
  0x63   :  { %2836 = vmatmul.mubr.bf16.gmra.mrb[32].mxu0 %v14430_v34  ;;  %3238 = vmatmul.mubr.bf16.vlgmr.msra.gmra.mrb[32].mxu1 %v14439_v40  ;;  %568 = vst [vmem:[#allocation2 + $0x170] sm:$0xff] %v14618_v11  ;;  %v14626_v40 = vsel %vm386_vm0, %v521_v13, %v14614_v10 }
  0x64   :  { %2843 = vmatprep.mubr.bf16.mxu0 %v14507_v29  ;;  %3245 = vmatprep.mubr.bf16.mxu1 %v13642_v9  ;;  %569 = vst [vmem:[#allocation2 + $0x188] sm:$0xff] %v14626_v40  ;;  %v14660_v31 = vsel %vm738_vm1, %v739_v30, %v13974_v56  ;;  %v14674_v56 = vld [vmem:[%s19888_s1 + $0x500] sm:$0xff]   ;;  %v3531_v30 = vld [vmem:[#allocation2 + $0x50] sm:$0xff] }
  0x65   :  { %12382 = vmatpush3.bf16.msra.mxu1 %v13407_v16 }
  0x66   :  { %12383 = vmatprep.subr.bf16.mxu1 %v13410_v6 }
  0x69   :  { %12384 = vmatpush3.bf16.msra.mxu1 %v13410_v6  ;;  %v3527_v6 = vld [vmem:[#allocation2 + $0x30] sm:$0xff] }
  0x6a   :  { %12385 = vmatprep.subr.bf16.mxu1 %v13411_v17 }
  0x6b   :  { %2844 = vmatmul.mubr.bf16.gmra.mrb[36].mxu0 %v14463_v3  ;;  %3246 = vmatmul.mubr.bf16.gmra.mrb[36].mxu1 %v13643_v18  ;;  %v814_v18 = vld [vmem:[%s19889_s0 + $0x1c] sm:$0xf] }
  0x6c   :  { %2851 = vmatprep.mubr.bf16.mxu0 %v14534_v53  ;;  %3253 = vmatprep.mubr.bf16.mxu1 %v14072_v54  ;;  %v13413_v54 = vld [vmem:[%s19888_s1 + $0xa0] sm:$0xff]  }
  0x6d   :  { %12386 = vmatpush3.bf16.msra.mxu1 %v13411_v17 }
  0x6e   :  { %12387 = vmatprep.subr.bf16.mxu1 %v13412_v21 }
  0x71   :  { %12388 = vmatpush3.bf16.msra.mxu1 %v13412_v21  ;;  %v850_v21 = vmax.bf16 %v14330_v32, %v814_v18  ;;  %v13420_v18 = vld [vmem:[%s19888_s1 + $0x320] sm:$0xff]  }
  0x72   :  { %12389 = vmatprep.subr.bf16.mxu1 %v13413_v54 }
  0x73   :  { %2852 = vmatmul.mubr.bf16.gmra.mrb[40].mxu0 %v14500_v25  ;;  %3254 = vmatmul.mubr.bf16.gmra.mrb[40].mxu1 %v13644_v20 }
  0x74   :  { %2859 = vmatprep.mubr.bf16.mxu0 %v14563_v19  ;;  %3261 = vmatprep.mubr.bf16.mxu1 %v14132_v27  ;;  %v13645_v27 = vld [vmem:[#allocation2 + $0x48] sm:$0xff] }
  0x75   :  { %12390 = vmatpush3.bf16.msra.mxu1 %v13413_v54  ;;  %v13405_v54 = vld [vmem:[%s19888_s1 + $0x348] sm:$0xff]  }
  0x76   :  { %12391 = vmatprep.subr.bf16.mxu1 %v13416_v28 }
  0x79   :  { %12392 = vmatpush3.bf16.msra.mxu1 %v13416_v28  ;;  %v1055_v28 = vmax.bf16 %v14330_v32, %v1018_v1  ;;  %v13648_v1 = vld [vmem:[#allocation2 + $0x80] sm:$0xff] }
  0x7a   :  { %12393 = vmatprep.subr.bf16.mxu1 %v13417_v33 }
  0x7b   :  { %2860 = vmatmul.mubr.bf16.gmra.mrb[44].mxu0 %v14512_v36  ;;  %3262 = vmatmul.mubr.bf16.gmra.mrb[44].mxu1 %v13645_v27  ;;  %v13406_v27 = vld [vmem:[%s19888_s1 + $0x308] sm:$0xff]  }
  0x7c   :  { %2867 = vmatprep.mubr.bf16.mxu0 %v14591_v41  ;;  %3269 = vmatprep.mubr.bf16.mxu1 %v14173_v57  ;;  %v255_v57 = vld [vmem:[%s19889_s0 + $0x1b0] sm:$0x1] }
  0x7d   :  { %12394 = vmatpush3.bf16.msra.mxu1 %v13417_v33 }
  0x7e   :  { %12395 = vmatprep.subr.bf16.mxu1 %v13418_v35 }
  0x81   :  { %12396 = vmatpush3.bf16.msra.mxu1 %v13418_v35  ;;  %v13408_v35 = vld [vmem:[%s19888_s1 + $0x350] sm:$0xff]  }
  0x82   :  { %12429 = vmatprep.subr.bf16.mxu1 %v14674_v56 }
  0x83   :  { %2868 = vmatmul.mubr.bf16.gmra.mrb[48].mxu0 %v14548_v8  ;;  %3270 = vmatmul.mubr.bf16.gmra.mrb[48].mxu1 %v13646_v37  ;;  %v292_v8 = vmax.bf16 %v14330_v32, %v255_v57  ;;  %v10202_v37 = vcombine.low %v1054_v26, %v1055_v28  ;;  %v821_v28 = vld [vmem:[%s19889_s0 + $0x70] sm:$0xf] }
  0x84   :  { %2875 = vmatprep.mubr.bf16.mxu0 %v14604_v58  ;;  %3277 = vmatprep.mubr.bf16.mxu1 %v14216_v22 }
  0x85   :  { %v10161_v22 = vcombine.low %v292_v8, %v292_v8  ;;  %v1202_v57 = vshll.u32 %v10202_v37, 16  ;;  %v816_v8 = vld [vmem:[%s19889_s0 + $0x34] sm:$0xf] }
  0x8b   :  { %2876 = vmatmul.mubr.bf16.gmra.mrb[52].mxu0 %v14566_v24  ;;  %3278 = vmatmul.mubr.bf16.gmra.mrb[52].mxu1 %v14194_v12  ;;  %v527_v12 = vshrl.u32 %v14599_v48, 16  ;;  %v531_v24 = vshll.u32 %v10161_v22, 16  ;;  %v1016_v48 = vld [vmem:[%s19889_s0 + $0x40] sm:$0xf] }
  0x8c   :  { %2883 = vmatprep.mubr.bf16.mxu0 %v14618_v11  ;;  %3285 = vmatprep.mubr.bf16.mxu1 %v14277_v63  ;;  %v55_v63 = vld [vmem:[%s19889_s0 + $0x198] sm:$0xf]  ;;  %v1053_v5 = vmax.bf16 %v14330_v32, %v1016_v48  ;;  %v817_v22 = vld [vmem:[%s19889_s0 + $0x40] sm:$0xf] }
  0x8d   :  { %v529_v43 = vor.u32 %v527_v12, %v14614_v10  ;;  %v533_v44 = vrot.slane %v531_v24, 1  ;;  %v3534_v12 = vld [vmem:[#allocation2 + $0x68] sm:$0xff] }
  0x8f   :  { %v534_v61 = vsel %vm386_vm0, %v529_v43, %v533_v44  ;;  %v1019_v43 = vld [vmem:[%s19889_s0 + $0x64] sm:$0xf]  ;;  %v1020_v44 = vld [vmem:[%s19889_s0 + $0x70] sm:$0xf] }
  0x90   :  { %570 = vst [vmem:[#allocation2 + $0x1a0] sm:$0xff] %v534_v61  ;;  %v1057_v48 = vmax.bf16 %v14762_v38, %v1020_v44  ;;  %v13419_v61 = vld [vmem:[%s19888_s1 + $0x360] sm:$0xff]  }
  0x93   :  { %2884 = vmatmul.mubr.bf16.gmra.mrb[56].mxu0 %v14597_v47  ;;  %3286 = vmatmul.mubr.bf16.gmra.mrb[56].mxu1 %v14238_v39  ;;  %v1013_v39 = vld [vmem:[%s19889_s0 + $0x1c] sm:$0xf]  ;;  %v1015_v47 = vld [vmem:[%s19889_s0 + $0x34] sm:$0xf] }
  0x94   :  { %2891 = vmatprep.mubr.bf16.mxu0 %v14626_v40  ;;  %3293 = vmatprep.mubr.bf16.mxu1 %v14310_v23  ;;  %v91_v23 = vmax.bf16 %v14330_v32, %v55_v63  ;;  %v1050_v51 = vmax.bf16 %v14330_v32, %v1013_v39  ;;  %v1052_v2 = vmax.bf16 %v14330_v32, %v1015_v47  ;;  %v1204_v63 = vrot.slane %v1202_v57, 1 }
  0x95   :  { %v853_v39 = vmax.bf16 %v14762_v38, %v817_v22  ;;  %v1056_v47 = vmax.bf16 %v14762_v38, %v1019_v43  ;;  %v13435_v43 = vld [vmem:[%s19888_s1 + $0x100] sm:$0xff]  }
  0x96   :  { %v10142_v62 = vcombine.low %v91_v23, %v92_v45  ;;  %v10200_v9 = vcombine.low %v1050_v51, %v1051_v52  ;;  %v10201_v10 = vcombine.low %v1052_v2, %v1053_v5  ;;  %v13409_v23 = vld [vmem:[%s19888_s1 + $0x310] sm:$0xff]   ;;  %v13414_v51 = vld [vmem:[%s19888_s1 + $0x358] sm:$0xff]  }
  0x97   :  { %v13415_v52 = vld [vmem:[%s19888_s1 + $0x318] sm:$0xff]  }
  0x98   :  { %218 = vst [vmem:[#allocation2 + $0x198] sm:$0xff] %v10142_v62  ;;  %v1186_v13 = vshll.u32 %v10200_v9, 16  ;;  %v1190_v16 = vshrl.u32 %v10200_v9, 16  ;;  %v1194_v40 = vshll.u32 %v10201_v10, 16  ;;  %v1206_v62 = vshrl.u32 %v10202_v37, 16  ;;  %v3533_v9 = vld [vmem:[#allocation2 + $0x60] sm:$0xff] }
  0x99   :  { %v819_v5 = vld [vmem:[%s19889_s0 + $0x58] sm:$0xf]  ;;  %v1024_v37 = vld [vmem:[%s19889_s0 + $0xa0] sm:$0xf] }
  0x9a   :  { %v14722_v17 = vrot.slane %v1186_v13, 1  ;;  %v1061_v22 = vmax.bf16 %v14762_v38, %v1024_v37 }
  0x9b   :  { %2892 = vmatmul.mubr.bf16.gmra.mrb[60].mxu0 %v14609_v4  ;;  %3294 = vmatmul.mubr.bf16.gmra.mrb[60].mxu1 %v14294_v0  ;;  %v815_v4 = vld [vmem:[%s19889_s0 + $0x28] sm:$0xf]  ;;  %v13404_v0 = vld [vmem:[%s19888_s1 + $0x300] sm:$0xff]  }
  0x9c   :  { %3301 = vmatprep.mubr.bf16.mxu1 %v14399_v14  ;;  %3800 = vmatprep.mubr.bf16.mxu0 %v3528_v59  ;;  %v1196_v14 = vrot.slane %v1194_v40, 1  ;;  %v851_v15 = vmax.bf16 %v14330_v32, %v815_v4  ;;  %v1192_v7 = vor.u32 %v1190_v16, %v14722_v17  ;;  %v1198_v32 = vshrl.u32 %v10201_v10, 16  ;;  %v1021_v40 = vld [vmem:[%s19889_s0 + $0x7c] sm:$0xf] }
  0x9d   :  { %v10203_v59 = vcombine.low %v1056_v47, %v1057_v48  ;;  %v1208_v10 = vor.u32 %v1206_v62, %v1204_v63  ;;  %v855_v16 = vmax.bf16 %v14762_v38, %v819_v5 }
  0x9e   :  { %v10182_v20 = vcombine.low %v850_v21, %v851_v15  ;;  %v1197_v33 = vsel %vm386_vm0, %v1192_v7, %v1196_v14  ;;  %v1200_v24 = vor.u32 %v1198_v32, %v1196_v14  ;;  %v1058_v14 = vmax.bf16 %v14762_v38, %v1021_v40  ;;  %v13421_v15 = vld [vmem:[%s19888_s1 + $0x368] sm:$0xff]   ;;  %v13425_v32 = vld [vmem:[%s19888_s1 + $0x330] sm:$0xff]  }
  0x9f   :  { %1345 = vst [vmem:[#allocation2 + $0x1d0] sm:$0xff] %v1197_v33  ;;  %v1210_v2 = vshll.u32 %v10203_v59, 16  ;;  %v13422_v7 = vld [vmem:[%s19888_s1 + $0x328] sm:$0xff]  }
  0xa0   :  { %994 = vst [vmem:[#allocation2 + $0x1c8] sm:$0xff] %v10182_v20  ;;  %v1205_v45 = vsel %vm386_vm0, %v1200_v24, %v1204_v63  ;;  %v1214_v20 = vshrl.u32 %v10203_v59, 16  ;;  %v13649_v24 = vld [vmem:[#allocation2 + $0x78] sm:$0xff] }
  0xa1   :  { %1346 = vst [vmem:[#allocation2 + $0x1e8] sm:$0xff] %v1205_v45  ;;  %v13431_v63 = vld [vmem:[%s19888_s1 + $0x338] sm:$0xff]   ;;  %v823_v45 = vld [vmem:[%s19889_s0 + $0x88] sm:$0xf] }
  0xa2   :  { %v859_v48 = vmax.bf16 %v14762_v38, %v823_v45 }
  0xa3   :  { %3302 = vmatmul.mubr.bf16.gmra.mrb[64].mxu1 %v14355_v49  ;;  %3801 = vmatmul.mubr.bf16.vlgmr.msra.gmra.mrb[64].mxu0 %v3527_v6  ;;  %v3530_v49 = vld [vmem:[#allocation2 + $0x48] sm:$0xff] }
  0xa4   :  { %11388 = vmatpush3.bf16.msra.mxu0 %v13404_v0  ;;  %3309 = vmatprep.mubr.bf16.mxu1 %v14458_v55  ;;  %v852_v55 = vmax.bf16 %v14762_v38, %v816_v8  ;;  %v1022_v6 = vld [vmem:[%s19889_s0 + $0x88] sm:$0xf] }
  0xa5   :  { %3808 = vmatprep.mubr.bf16.mxu0 %v3531_v30  ;;  %11389 = vmatprep.subr.bf16.mxu0 %v13405_v54  ;;  %v1059_v21 = vmax.bf16 %v14762_v38, %v1022_v6  ;;  %v13424_v54 = vld [vmem:[%s19888_s1 + $0x370] sm:$0xff]  }
  0xa6   :  { %v10183_v46 = vcombine.low %v852_v55, %v853_v39  ;;  %v13650_v39 = vld [vmem:[#allocation2 + $0x98] sm:$0xff] }
  0xa7   :  { %v10204_v60 = vcombine.low %v1058_v14, %v1059_v21 }
  0xa8   :  { %11390 = vmatpush3.bf16.msra.mxu0 %v13406_v27  ;;  %995 = vst [vmem:[#allocation2 + $0x1e0] sm:$0xff] %v10183_v46  ;;  %v857_v27 = vmax.bf16 %v14762_v38, %v821_v28  ;;  %v827_v28 = vld [vmem:[%s19889_s0 + $0xb8] sm:$0xf] }
  0xa9   :  { %11391 = vmatprep.subr.bf16.mxu0 %v13408_v35  ;;  %v1218_v26 = vshll.u32 %v10204_v60, 16  ;;  %v1023_v35 = vld [vmem:[%s19889_s0 + $0x94] sm:$0xf]  ;;  %v1222_v44 = vshrl.u32 %v10204_v60, 16  ;;  %v13654_v60 = vld [vmem:[#allocation2 + $0xa8] sm:$0xff] }
  0xaa   :  { %v1060_v8 = vmax.bf16 %v14762_v38, %v1023_v35  ;;  %v1030_v35 = vld [vmem:[%s19889_s0 + $0xe8] sm:$0xf] }
  0xab   :  { %3310 = vmatmul.mubr.bf16.gmra.mrb[68].mxu1 %v14430_v34  ;;  %3809 = vmatmul.mubr.bf16.gmra.mrb[68].mxu0 %v3530_v49  ;;  %v818_v34 = vld [vmem:[%s19889_s0 + $0x4c] sm:$0xf] }
  0xac   :  { %3317 = vmatprep.mubr.bf16.mxu1 %v14507_v29  ;;  %3816 = vmatprep.mubr.bf16.mxu0 %v3534_v12  ;;  %v1212_v29 = vrot.slane %v1210_v2, 1  ;;  %v854_v13 = vmax.bf16 %v14762_v38, %v818_v34  ;;  %v13430_v12 = vld [vmem:[%s19888_s1 + $0x378] sm:$0xff]   ;;  %v10205_v55 = vcombine.low %v1060_v8, %v1061_v22  ;;  %v13651_v34 = vld [vmem:[#allocation2 + $0x90] sm:$0xff]  ;;  %v13657_v22 = vld [vmem:[#allocation2 + $0xc0] sm:$0xff] }
  0xad   :  { %11392 = vmatpush3.bf16.msra.mxu0 %v13409_v23  ;;  %v14908_v8 = vld [vmem:[#allocation2 + $0x150] sm:$0xff] }
  0xae   :  { %11393 = vmatprep.subr.bf16.mxu0 %v13414_v51  ;;  %v1213_v4 = vsel %vm386_vm0, %v1208_v10, %v1212_v29  ;;  %v10184_v0 = vcombine.low %v854_v13, %v855_v16  ;;  %v1216_v30 = vor.u32 %v1214_v20, %v1212_v29  ;;  %v1226_v23 = vshll.u32 %v10205_v55, 16  ;;  %v1025_v51 = vld [vmem:[%s19889_s0 + $0xac] sm:$0xf]  ;;  %v824_v13 = vld [vmem:[%s19889_s0 + $0x94] sm:$0xf] }
  0xaf   :  { %1347 = vst [vmem:[#allocation2 + $0x200] sm:$0xff] %v1213_v4  ;;  %v1062_v62 = vmax.bf16 %v14762_v38, %v1025_v51  ;;  %v1230_v10 = vshrl.u32 %v10205_v55, 16  ;;  %v825_v16 = vld [vmem:[%s19889_s0 + $0xa0] sm:$0xf]  ;;  %v860_v6 = vmax.bf16 %v14762_v38, %v824_v13  ;;  %v1028_v4 = vld [vmem:[%s19889_s0 + $0xd0] sm:$0xf] }
  0xb0   :  { %996 = vst [vmem:[#allocation2 + $0x1f8] sm:$0xff] %v10184_v0  ;;  %v1032_v51 = vld [vmem:[%s19889_s0 + $0x100] sm:$0xf] }
  0xb1   :  { %11394 = vmatpush3.bf16.msra.mxu0 %v13415_v52  ;;  %v1026_v52 = vld [vmem:[%s19889_s0 + $0xb8] sm:$0xf] }
  0xb2   :  { %11395 = vmatprep.subr.bf16.mxu0 %v13419_v61  ;;  %v1063_v2 = vmax.bf16 %v14762_v38, %v1026_v52 }
  0xb3   :  { %3318 = vmatmul.mubr.bf16.gmra.mrb[72].mxu1 %v14463_v3  ;;  %3817 = vmatmul.mubr.bf16.gmra.mrb[72].mxu0 %v3533_v9  ;;  %v820_v3 = vld [vmem:[%s19889_s0 + $0x64] sm:$0xf]  ;;  %v13652_v9 = vld [vmem:[#allocation2 + $0xb0] sm:$0xff] }
  0xb4   :  { %3325 = vmatprep.mubr.bf16.mxu1 %v14534_v53  ;;  %3824 = vmatprep.mubr.bf16.mxu0 %v13648_v1  ;;  %v1220_v53 = vrot.slane %v1218_v26, 1  ;;  %v856_v33 = vmax.bf16 %v14762_v38, %v820_v3  ;;  %v10206_v5 = vcombine.low %v1062_v62, %v1063_v2  ;;  %v826_v3 = vld [vmem:[%s19889_s0 + $0xac] sm:$0xf]  ;;  %v1069_v62 = vmax.bf16 %v14762_v38, %v1032_v51 }
  0xb5   :  { %11396 = vmatpush3.bf16.msra.mxu0 %v13420_v18  ;;  %v861_v18 = vmax.bf16 %v14762_v38, %v825_v16 }
  0xb6   :  { %11397 = vmatprep.subr.bf16.mxu0 %v13421_v15  ;;  %v1221_v57 = vsel %vm386_vm0, %v1216_v30, %v1220_v53  ;;  %v10185_v49 = vcombine.low %v856_v33, %v857_v27  ;;  %v1224_v46 = vor.u32 %v1222_v44, %v1220_v53  ;;  %v1234_v29 = vshll.u32 %v10206_v5, 16 }
  0xb7   :  { %1348 = vst [vmem:[#allocation2 + $0x218] sm:$0xff] %v1221_v57  ;;  %v10187_v14 = vcombine.low %v860_v6, %v861_v18  ;;  %v1065_v15 = vmax.bf16 %v14762_v38, %v1028_v4  ;;  %v1238_v20 = vshrl.u32 %v10206_v5, 16  ;;  %v862_v33 = vmax.bf16 %v14762_v38, %v826_v3  ;;  %v1365_v5 = vld [vmem:[%s19889_s0 + $0x28] sm:$0xf]  ;;  %v13661_v6 = vld [vmem:[#allocation2 + $0xf8] sm:$0xff] }
  0xb8   :  { %997 = vst [vmem:[#allocation2 + $0x210] sm:$0xff] %v10185_v49  ;;  %v863_v27 = vmax.bf16 %v14762_v38, %v827_v28  ;;  %v1067_v49 = vmax.bf16 %v14762_v38, %v1030_v35  ;;  %v1402_v16 = vmax.bf16 %v14762_v38, %v1365_v5 }
  0xb9   :  { %11398 = vmatpush3.bf16.msra.mxu0 %v13422_v7  ;;  %v14887_v7 = vld [vmem:[#allocation2 + $0x138] sm:$0xff]  ;;  %999 = vst [vmem:[#allocation2 + $0x240] sm:$0xff] %v10187_v14 }
  0xba   :  { %11399 = vmatprep.subr.bf16.mxu0 %v13424_v54  ;;  %v13655_v54 = vld [vmem:[#allocation2 + $0xc8] sm:$0xff] }
  0xbb   :  { %3326 = vmatmul.mubr.bf16.gmra.mrb[76].mxu1 %v14500_v25  ;;  %3825 = vmatmul.mubr.bf16.gmra.mrb[76].mxu0 %v13649_v24  ;;  %v822_v25 = vld [vmem:[%s19889_s0 + $0x7c] sm:$0xf]  ;;  %v607_v24 = vld [vmem:[%s19889_s0 + $0x1b0] sm:$0x1] }
  0xbc   :  { %3333 = vmatprep.mubr.bf16.mxu1 %v14563_v19  ;;  %3832 = vmatprep.mubr.bf16.mxu0 %v13650_v39  ;;  %v1228_v19 = vrot.slane %v1226_v23, 1  ;;  %v858_v47 = vmax.bf16 %v14762_v38, %v822_v25  ;;  %v644_v55 = vmax.bf16 %v14762_v38, %v607_v24  ;;  %v828_v23 = vld [vmem:[%s19889_s0 + $0xc4] sm:$0xf]  ;;  %v829_v25 = vld [vmem:[%s19889_s0 + $0xd0] sm:$0xf] }
  0xbd   :  { %11400 = vmatpush3.bf16.msra.mxu0 %v13425_v32  ;;  %v10188_v32 = vcombine.low %v862_v33, %v863_v27  ;;  %v1033_v33 = vld [vmem:[%s19889_s0 + $0x10c] sm:$0xf]  ;;  %v1034_v27 = vld [vmem:[%s19889_s0 + $0x118] sm:$0xf]  ;;  %v1371_v24 = vld [vmem:[%s19889_s0 + $0x70] sm:$0xf] }
  0xbe   :  { %11401 = vmatprep.subr.bf16.mxu0 %v13430_v12  ;;  %v1229_v59 = vsel %vm386_vm0, %v1224_v46, %v1228_v19  ;;  %v10186_v61 = vcombine.low %v858_v47, %v859_v48  ;;  %v1232_v40 = vor.u32 %v1230_v10, %v1228_v19  ;;  %v10180_v44 = vcombine.low %v644_v55, %v644_v55  ;;  %v1031_v48 = vld [vmem:[%s19889_s0 + $0xf4] sm:$0xf]  ;;  %v14945_v10 = vld [vmem:[#allocation2 + $0x168] sm:$0xff] }
  0xbf   :  { %1349 = vst [vmem:[#allocation2 + $0x230] sm:$0xff] %v1229_v59  ;;  %1000 = vst [vmem:[#allocation2 + $0x258] sm:$0xff] %v10188_v32  ;;  %v864_v19 = vmax.bf16 %v14762_v38, %v828_v23  ;;  %v1070_v35 = vmax.bf16 %v14762_v38, %v1033_v33  ;;  %v13426_v32 = vld [vmem:[%s19888_s1 + $0x508] sm:$0xff]   ;;  %v13663_v55 = vld [vmem:[#allocation2 + $0xf0] sm:$0xff] }
  0xc0   :  { %998 = vst [vmem:[#allocation2 + $0x228] sm:$0xff] %v10186_v61  ;;  %v774_v47 = vrot.slane %v10180_v44, 1  ;;  %v1068_v61 = vmax.bf16 %v14762_v38, %v1031_v48  ;;  %v1408_v44 = vmax.bf16 %v14762_v38, %v1371_v24  ;;  %v1372_v23 = vld [vmem:[%s19889_s0 + $0x7c] sm:$0xf] }
  0xc1   :  { %11402 = vmatpush3.bf16.msra.mxu0 %v13431_v63  ;;  %v13658_v63 = vld [vmem:[#allocation2 + $0xe0] sm:$0xff] }
  0xc2   :  { %11523 = vmatprep.subr.bf16.mxu0 %v13435_v43  ;;  %v775_v2 = vsel %vm738_vm1, %v772_v42, %v774_v47  ;;  %v14948_v50 = vcombine.low %v1068_v61, %v1069_v62  ;;  %v1367_v42 = vld [vmem:[%s19889_s0 + $0x40] sm:$0xf]  ;;  %v1409_v47 = vmax.bf16 %v14762_v38, %v1372_v23  ;;  %v832_v61 = vld [vmem:[%s19889_s0 + $0xf4] sm:$0xf]  ;;  %v1038_v23 = vld [vmem:[%s19889_s0 + $0x148] sm:$0xf] }
  0xc3   :  { %3334 = vmatmul.mubr.bf16.gmra.mrb[80].mxu1 %v14512_v36  ;;  %3833 = vmatmul.mubr.bf16.gmra.mrb[80].mxu0 %v13651_v34  ;;  %v1236_v36 = vrot.slane %v1234_v29, 1  ;;  %v1364_v34 = vld [vmem:[%s19889_s0 + $0x1c] sm:$0xf]  ;;  %811 = vst [vmem:[#allocation2 + $0x1a8] sm:$0xff] %v775_v2  ;;  %v833_v62 = vld [vmem:[%s19889_s0 + $0x100] sm:$0xf]  ;;  %v868_v5 = vmax.bf16 %v14762_v38, %v832_v61 }
  0xc4   :  { %3341 = vmatprep.mubr.bf16.mxu1 %v14591_v41  ;;  %3840 = vmatprep.mubr.bf16.mxu0 %v13652_v9  ;;  %v1027_v41 = vld [vmem:[%s19889_s0 + $0xc4] sm:$0xf]  ;;  %v1366_v9 = vld [vmem:[%s19889_s0 + $0x34] sm:$0xf]  ;;  %v13660_v29 = vld [vmem:[#allocation2 + $0xd8] sm:$0xff]  ;;  %v1401_v13 = vmax.bf16 %v14762_v38, %v1364_v34  ;;  %v1258_v14 = vshll.u32 %v14948_v50, 16 }
  0xc5   :  { %v1237_v0 = vsel %vm386_vm0, %v1232_v40, %v1236_v36  ;;  %v1064_v21 = vmax.bf16 %v14762_v38, %v1027_v41  ;;  %v1240_v30 = vor.u32 %v1238_v20, %v1236_v36  ;;  %v1368_v40 = vld [vmem:[%s19889_s0 + $0x4c] sm:$0xf]  ;;  %v1369_v36 = vld [vmem:[%s19889_s0 + $0x58] sm:$0xf]  ;;  %v1403_v18 = vmax.bf16 %v14762_v38, %v1366_v9 }
  0xc6   :  { %1350 = vst [vmem:[#allocation2 + $0x248] sm:$0xff] %v1237_v0  ;;  %v1404_v41 = vmax.bf16 %v14762_v38, %v1367_v42  ;;  %v1405_v4 = vmax.bf16 %v14762_v38, %v1368_v40  ;;  %v1260_v20 = vrot.slane %v1258_v14, 1  ;;  %v1262_v48 = vshrl.u32 %v14948_v50, 16  ;;  %v1035_v50 = vld [vmem:[%s19889_s0 + $0x124] sm:$0xf]  ;;  %v13666_v14 = vld [vmem:[#allocation2 + $0x58] sm:$0xff] }
  0xc7   :  { %v10207_v1 = vcombine.low %v1064_v21, %v1065_v15  ;;  %v14966_v21 = vcombine.low %v1401_v13, %v1402_v16  ;;  %v1406_v15 = vmax.bf16 %v14762_v38, %v1369_v36  ;;  %v869_v9 = vmax.bf16 %v14762_v38, %v833_v62  ;;  %v1036_v42 = vld [vmem:[%s19889_s0 + $0x130] sm:$0xf] }
  0xc8   :  { %v1264_v2 = vor.u32 %v1262_v48, %v1260_v20  ;;  %v1072_v40 = vmax.bf16 %v14762_v38, %v1035_v50  ;;  %v1073_v36 = vmax.bf16 %v14762_v38, %v1036_v42  ;;  %v1378_v48 = vld [vmem:[%s19889_s0 + $0xc4] sm:$0xf] }
  0xc9   :  { %v1242_v26 = vshll.u32 %v10207_v1, 16  ;;  %v1246_v39 = vshrl.u32 %v10207_v1, 16  ;;  %v831_v1 = vld [vmem:[%s19889_s0 + $0xe8] sm:$0xf]  ;;  %v1415_v62 = vmax.bf16 %v14762_v38, %v1378_v48  ;;  %v838_v48 = vld [vmem:[%s19889_s0 + $0x13c] sm:$0xf] }
  0xcb   :  { %3342 = vmatmul.mubr.bf16.gmra.mrb[84].mxu1 %v14887_v7  ;;  %3841 = vmatmul.mubr.bf16.gmra.mrb[84].mxu0 %v13654_v60  ;;  %v1244_v53 = vrot.slane %v1242_v26, 1  ;;  %v10220_v60 = vcombine.low %v1403_v18, %v1404_v41  ;;  %v1530_v26 = vrot.slane %v14966_v21, 1  ;;  %v10191_v18 = vcombine.low %v868_v5, %v869_v9  ;;  %v13673_v5 = vld [vmem:[#allocation2 + $0x140] sm:$0xff]  ;;  %v1381_v9 = vld [vmem:[%s19889_s0 + $0xe8] sm:$0xf] }
  0xcc   :  { %3349 = vmatprep.mubr.bf16.mxu1 %v14604_v58  ;;  %3848 = vmatprep.mubr.bf16.mxu0 %v13655_v54  ;;  %v1029_v58 = vld [vmem:[%s19889_s0 + $0xdc] sm:$0xf]  ;;  %v13438_v21 = vld [vmem:[%s19888_s1 + $0xc8] sm:$0xff]  }
  0xcd   :  { %v1245_v37 = vsel %vm386_vm0, %v1240_v30, %v1244_v53  ;;  %v1066_v57 = vmax.bf16 %v14762_v38, %v1029_v58  ;;  %v1248_v45 = vor.u32 %v1246_v39, %v1244_v53  ;;  %v1532_v28 = vrot.slane %v10220_v60, 1  ;;  %1003 = vst [vmem:[#allocation2 + $0x2a0] sm:$0xff] %v10191_v18  ;;  %v837_v18 = vld [vmem:[%s19889_s0 + $0x130] sm:$0xf] }
  0xce   :  { %1351 = vst [vmem:[#allocation2 + $0x260] sm:$0xff] %v1245_v37  ;;  %v867_v30 = vmax.bf16 %v14762_v38, %v831_v1  ;;  %v10221_v53 = vcombine.low %v1405_v4, %v1406_v15  ;;  %v1071_v37 = vmax.bf16 %v14762_v38, %v1034_v27  ;;  %v1374_v4 = vld [vmem:[%s19889_s0 + $0x94] sm:$0xf]  ;;  %v13667_v15 = vld [vmem:[#allocation2 + $0x108] sm:$0xff]  ;;  %v15045_v60 = vcombine.low %v1072_v40, %v1073_v36 }
  0xcf   :  { %v10208_v12 = vcombine.low %v1066_v57, %v1067_v49  ;;  %v1533_v57 = vsel %vm738_vm1, %v1530_v26, %v1532_v28  ;;  %v13433_v36 = vld [vmem:[%s19888_s1 + $0x530] sm:$0xff]  }
  0xd0   :  { %1585 = vst [vmem:[#allocation2 + $0x1d8] sm:$0xff] %v1533_v57  ;;  %v14999_v39 = vcombine.low %v1070_v35, %v1071_v37  ;;  %v1274_v35 = vshll.u32 %v15045_v60, 16  ;;  %v835_v57 = vld [vmem:[%s19889_s0 + $0x118] sm:$0xf]  ;;  %v1278_v50 = vshrl.u32 %v15045_v60, 16 }
  0xd1   :  { %v1250_v43 = vshll.u32 %v10208_v12, 16  ;;  %v1254_v0 = vshrl.u32 %v10208_v12, 16  ;;  %v1370_v12 = vld [vmem:[%s19889_s0 + $0x64] sm:$0xf] }
  0xd2   :  { %v1266_v51 = vshll.u32 %v14999_v39, 16 }
  0xd3   :  { %3350 = vmatmul.mubr.bf16.gmra.mrb[88].mxu1 %v14908_v8  ;;  %3849 = vmatmul.mubr.bf16.gmra.mrb[88].mxu0 %v13657_v22  ;;  %v1252_v46 = vrot.slane %v1250_v43, 1  ;;  %v1534_v22 = vrot.slane %v10221_v53, 1  ;;  %v1407_v43 = vmax.bf16 %v14762_v38, %v1370_v12  ;;  %v1276_v12 = vrot.slane %v1274_v35, 1  ;;  %v13434_v35 = vld [vmem:[%s19888_s1 + $0x538] sm:$0xff]  }
  0xd4   :  { %3357 = vmatprep.mubr.bf16.mxu1 %v14618_v11  ;;  %3856 = vmatprep.mubr.bf16.mxu0 %v13658_v63  ;;  %v865_v11 = vmax.bf16 %v14762_v38, %v829_v25  ;;  %v13662_v63 = vld [vmem:[#allocation2 + $0x28] sm:$0xff]  ;;  %v13664_v25 = vld [vmem:[#allocation2 + $0x40] sm:$0xff]  ;;  %v1268_v34 = vrot.slane %v1266_v51, 1  ;;  %v1379_v51 = vld [vmem:[%s19889_s0 + $0xd0] sm:$0xf] }
  0xd5   :  { %v1253_v52 = vsel %vm386_vm0, %v1248_v45, %v1252_v46  ;;  %v1256_v54 = vor.u32 %v1254_v0, %v1252_v46  ;;  %v13665_v45 = vld [vmem:[#allocation2 + $0x110] sm:$0xff]  ;;  %v1375_v0 = vld [vmem:[%s19889_s0 + $0xa0] sm:$0xf] }
  0xd6   :  { %v10189_v59 = vcombine.low %v864_v19, %v865_v11  ;;  %1352 = vst [vmem:[#allocation2 + $0x278] sm:$0xff] %v1253_v52  ;;  %v13427_v46 = vld [vmem:[%s19888_s1 + $0x510] sm:$0xff]   ;;  %v1535_v19 = vsel %vm738_vm1, %v1532_v28, %v1534_v22  ;;  %v1373_v11 = vld [vmem:[%s19889_s0 + $0x88] sm:$0xf]  ;;  %v10222_v52 = vcombine.low %v1407_v43, %v1408_v44  ;;  %v1269_v13 = vsel %vm386_vm0, %v1264_v2, %v1268_v34  ;;  %v1037_v44 = vld [vmem:[%s19889_s0 + $0x13c] sm:$0xf] }
  0xd7   :  { %v1261_v58 = vsel %vm386_vm0, %v1256_v54, %v1260_v20  ;;  %1586 = vst [vmem:[#allocation2 + $0x1f0] sm:$0xff] %v1535_v19  ;;  %1354 = vst [vmem:[#allocation2 + $0x2a8] sm:$0xff] %v1269_v13  ;;  %v1412_v1 = vmax.bf16 %v14762_v38, %v1375_v0  ;;  %v1376_v54 = vld [vmem:[%s19889_s0 + $0xac] sm:$0xf]  ;;  %v1377_v20 = vld [vmem:[%s19889_s0 + $0xb8] sm:$0xf]  ;;  %v1075_v19 = vmax.bf16 %v14762_v38, %v1038_v23 }
  0xd8   :  { %1001 = vst [vmem:[#allocation2 + $0x270] sm:$0xff] %v10189_v59  ;;  %1353 = vst [vmem:[#allocation2 + $0x290] sm:$0xff] %v1261_v58  ;;  %v1410_v59 = vmax.bf16 %v14762_v38, %v1373_v11  ;;  %v13669_v28 = vld [vmem:[#allocation2 + $0x128] sm:$0xff]  ;;  %v1413_v33 = vmax.bf16 %v14762_v38, %v1376_v54  ;;  %v1414_v27 = vmax.bf16 %v14762_v38, %v1377_v20  ;;  %v1270_v58 = vshrl.u32 %v14999_v39, 16  ;;  %v1039_v20 = vld [vmem:[%s19889_s0 + $0x154] sm:$0xf] }
  0xd9   :  { %v871_v39 = vmax.bf16 %v14762_v38, %v835_v57  ;;  %v1416_v2 = vmax.bf16 %v14762_v38, %v1379_v51  ;;  %v1382_v57 = vld [vmem:[%s19889_s0 + $0xf4] sm:$0xf]  ;;  %v839_v51 = vld [vmem:[%s19889_s0 + $0x148] sm:$0xf] }
  0xdb   :  { %3358 = vmatmul.mubr.bf16.gmra.mrb[92].mxu1 %v14945_v10  ;;  %3857 = vmatmul.mubr.bf16.gmra.mrb[92].mxu0 %v13660_v29  ;;  %v10223_v29 = vcombine.low %v1409_v47, %v1410_v59  ;;  %v13671_v59 = vld [vmem:[#allocation2 + $0x120] sm:$0xff]  ;;  %v10226_v13 = vcombine.low %v1415_v62, %v1416_v2 }
  0xdc   :  { %12397 = vmatprep.mubr.bf16.mxu1 %v14660_v31  ;;  %3864 = vmatprep.mubr.bf16.mxu0 %v13661_v6  ;;  %v830_v31 = vld [vmem:[%s19889_s0 + $0xdc] sm:$0xf] }
  0xdd   :  { %v866_v3 = vmax.bf16 %v14762_v38, %v830_v31  ;;  %v13428_v6 = vld [vmem:[%s19888_s1 + $0x518] sm:$0xff]   ;;  %v1538_v41 = vrot.slane %v10223_v29, 1  ;;  %v1411_v31 = vmax.bf16 %v14762_v38, %v1374_v4  ;;  %v1280_v4 = vor.u32 %v1278_v50, %v1276_v12 }
  0xdf   :  { %v10190_v49 = vcombine.low %v866_v3, %v867_v30  ;;  %v13668_v3 = vld [vmem:[#allocation2 + $0x70] sm:$0xff]  ;;  %v13429_v30 = vld [vmem:[%s19888_s1 + $0x520] sm:$0xff]   ;;  %v10224_v37 = vcombine.low %v1411_v31, %v1412_v1  ;;  %v873_v1 = vmax.bf16 %v14762_v38, %v837_v18 }
  0xe1   :  { %1002 = vst [vmem:[#allocation2 + $0x288] sm:$0xff] %v10190_v49  ;;  %v15069_v49 = vcombine.low %v1413_v33, %v1414_v27  ;;  %v1540_v24 = vrot.slane %v10224_v37, 1  ;;  %v1076_v33 = vmax.bf16 %v14762_v38, %v1039_v20  ;;  %v1388_v20 = vld [vmem:[%s19889_s0 + $0x13c] sm:$0xf] }
  0xe3   :  { %12398 = vmatmul.mubr.bf16.vlgmr.msra.gmra.mrb[0].mxu1 %v13662_v63  ;;  %3865 = vmatmul.mubr.bf16.gmra.mrb[96].mxu0 %v13663_v55  ;;  %v13432_v55 = vld [vmem:[%s19888_s1 + $0x528] sm:$0xff]   ;;  %v1542_v43 = vrot.slane %v15069_v49, 1  ;;  %v1383_v49 = vld [vmem:[%s19889_s0 + $0x100] sm:$0xf] }
  0xe4   :  { %12401 = vmatprep.mubr.bf16.mxu1 %v13664_v25  ;;  %3872 = vmatprep.mubr.bf16.mxu0 %v13665_v45  ;;  %v1541_v45 = vsel %vm738_vm1, %v1538_v41, %v1540_v24 }
  0xe5   :  { %12430 = vmatpush3.bf16.msra.mxu1 %v14674_v56  ;;  %v1536_v56 = vrot.slane %v10222_v52, 1  ;;  %1589 = vst [vmem:[#allocation2 + $0x238] sm:$0xff] %v1541_v45  ;;  %v1543_v47 = vsel %vm738_vm1, %v1540_v24, %v1542_v43  ;;  %v13670_v52 = vld [vmem:[#allocation2 + $0x88] sm:$0xff]  ;;  %v1419_v24 = vmax.bf16 %v14762_v38, %v1382_v57 }
  0xe6   :  { %12431 = vmatprep.subr.bf16.mxu1 %v13426_v32  ;;  %1590 = vst [vmem:[#allocation2 + $0x250] sm:$0xff] %v1543_v47  ;;  %v15173_v47 = vld [vmem:[%s19888_s1 + $0x380] sm:$0xff]  }
  0xe7   :  { %v1537_v16 = vsel %vm738_vm1, %v1534_v22, %v1536_v56  ;;  %v1539_v53 = vsel %vm738_vm1, %v1536_v56, %v1538_v41  ;;  %v1272_v22 = vor.u32 %v1270_v58, %v1268_v34  ;;  %v1380_v34 = vld [vmem:[%s19889_s0 + $0xdc] sm:$0xf]  ;;  %v13672_v56 = vld [vmem:[#allocation2 + $0xa0] sm:$0xff] }
  0xe8   :  { %1587 = vst [vmem:[#allocation2 + $0x208] sm:$0xff] %v1537_v16  ;;  %1588 = vst [vmem:[#allocation2 + $0x220] sm:$0xff] %v1539_v53  ;;  %v1417_v29 = vmax.bf16 %v14762_v38, %v1380_v34  ;;  %v1418_v16 = vmax.bf16 %v14762_v38, %v1381_v9  ;;  %v874_v34 = vmax.bf16 %v14762_v38, %v838_v48  ;;  %v15186_v9 = vld [vmem:[#allocation2 + $0x360] sm:$0xff] }
  0xe9   :  { %12432 = vmatpush3.bf16.msra.mxu1 %v13426_v32  ;;  %v834_v32 = vld [vmem:[%s19889_s0 + $0x10c] sm:$0xf]  ;;  %v1277_v25 = vsel %vm386_vm0, %v1272_v22, %v1276_v12  ;;  %v13674_v22 = vld [vmem:[#allocation2 + $0xb8] sm:$0xff] }
  0xea   :  { %12433 = vmatprep.subr.bf16.mxu1 %v13427_v46  ;;  %v870_v63 = vmax.bf16 %v14762_v38, %v834_v32  ;;  %1355 = vst [vmem:[#allocation2 + $0x2c0] sm:$0xff] %v1277_v25  ;;  %v10227_v54 = vcombine.low %v1417_v29, %v1418_v16  ;;  %v875_v29 = vmax.bf16 %v15186_v9, %v839_v51 }
  0xeb   :  { %12402 = vmatmul.mubr.bf16.gmra.mrb[4].mxu1 %v13666_v14  ;;  %3873 = vmatmul.mubr.bf16.gmra.mrb[100].mxu0 %v13667_v15  ;;  %v1544_v14 = vrot.slane %v10226_v13, 1  ;;  %v1042_v13 = vld [vmem:[%s19889_s0 + $0x178] sm:$0xf] }
  0xec   :  { %12405 = vmatprep.mubr.bf16.mxu1 %v13668_v3  ;;  %3880 = vmatprep.mubr.bf16.mxu0 %v13669_v28  ;;  %v10192_v11 = vcombine.low %v870_v63, %v871_v39  ;;  %v1040_v3 = vld [vmem:[%s19889_s0 + $0x160] sm:$0xf]  ;;  %v1546_v32 = vrot.slane %v10227_v54, 1  ;;  %v1420_v63 = vmax.bf16 %v14762_v38, %v1383_v49  ;;  %v1385_v39 = vld [vmem:[%s19889_s0 + $0x118] sm:$0xf] }
  0xed   :  { %12434 = vmatpush3.bf16.msra.mxu1 %v13427_v46  ;;  %v1074_v46 = vmax.bf16 %v14762_v38, %v1037_v44  ;;  %v15131_v53 = vsel %vm738_vm1, %v1542_v43, %v1544_v14  ;;  %v1077_v27 = vmax.bf16 %v14762_v38, %v1040_v3  ;;  %v13675_v43 = vld [vmem:[#allocation2 + $0xd0] sm:$0xff]  ;;  %v13676_v44 = vld [vmem:[#allocation2 + $0x158] sm:$0xff]  ;;  %v1422_v25 = vmax.bf16 %v14762_v38, %v1385_v39  ;;  %v13679_v3 = vld [vmem:[#allocation2 + $0x100] sm:$0xff] }
  0xee   :  { %12435 = vmatprep.subr.bf16.mxu1 %v13428_v6  ;;  %1004 = vst [vmem:[#allocation2 + $0x2b8] sm:$0xff] %v10192_v11  ;;  %1591 = vst [vmem:[#allocation2 + $0x268] sm:$0xff] %v15131_v53 }
  0xef   :  { %v15094_v61 = vcombine.low %v1074_v46, %v1075_v19  ;;  %v15151_v12 = vcombine.low %v1076_v33, %v1077_v27  ;;  %v10228_v19 = vcombine.low %v1419_v24, %v1420_v63  ;;  %v1425_v33 = vmax.bf16 %v15186_v9, %v1388_v20  ;;  %v841_v24 = vld [vmem:[%s19889_s0 + $0x160] sm:$0xf] }
  0xf1   :  { %12436 = vmatpush3.bf16.msra.mxu1 %v13428_v6  ;;  %v1282_v42 = vshll.u32 %v15094_v61, 16  ;;  %v836_v6 = vld [vmem:[%s19889_s0 + $0x124] sm:$0xf]  ;;  %v1286_v45 = vshrl.u32 %v15094_v61, 16  ;;  %v1290_v46 = vshll.u32 %v15151_v12, 16  ;;  %v1548_v2 = vrot.slane %v10228_v19, 1 }
  0xf2   :  { %12437 = vmatprep.subr.bf16.mxu1 %v13429_v30  ;;  %v872_v15 = vmax.bf16 %v14762_v38, %v836_v6  ;;  %v1079_v6 = vmax.bf16 %v15186_v9, %v1042_v13  ;;  %v1294_v27 = vshrl.u32 %v15151_v12, 16  ;;  %v1044_v19 = vld [vmem:[%s19889_s0 + $0x190] sm:$0xf] }
  0xf3   :  { %12406 = vmatmul.mubr.bf16.gmra.mrb[8].mxu1 %v13670_v52  ;;  %3881 = vmatmul.mubr.bf16.gmra.mrb[104].mxu0 %v13671_v59  ;;  %v1284_v0 = vrot.slane %v1282_v42, 1  ;;  %v1292_v62 = vrot.slane %v1290_v46, 1  ;;  %v1041_v42 = vld [vmem:[%s19889_s0 + $0x16c] sm:$0xf]  ;;  %v1043_v46 = vld [vmem:[%s19889_s0 + $0x184] sm:$0xf] }
  0xf4   :  { %12409 = vmatprep.mubr.bf16.mxu1 %v13672_v56  ;;  %3888 = vmatprep.mubr.bf16.mxu0 %v13673_v5  ;;  %v15142_v37 = vcombine.low %v872_v15, %v873_v1  ;;  %v13678_v15 = vld [vmem:[#allocation2 + $0xe8] sm:$0xff] }
  0xf5   :  { %12438 = vmatpush3.bf16.msra.mxu1 %v13429_v30  ;;  %v15128_v30 = vsel %vm386_vm0, %v1280_v4, %v1284_v0  ;;  %v1288_v61 = vor.u32 %v1286_v45, %v1284_v0  ;;  %v1386_v0 = vld [vmem:[%s19889_s0 + $0x124] sm:$0xf] }
  0xf6   :  { %v10995_v40 = vpop.f32.mrb[0].mxu0  ;;  %12439 = vmatprep.subr.bf16.mxu1 %v13432_v55  ;;  %1356 = vst [vmem:[#allocation2 + $0x2d8] sm:$0xff] %v15128_v30  ;;  %1005 = vst [vmem:[#allocation2 + $0x2d0] sm:$0xff] %v15142_v37  ;;  %v1423_v1 = vmax.bf16 %v15186_v9, %v1386_v0  ;;  %v13683_v0 = vld [vmem:[#allocation2 + $0x188] sm:$0xff] }
  0xf7   :  { %v10996_v41 = vpop.f32.mrb[1].mxu0 }
  0xf8   :  { %v15118_v60 = vadd.f32 %v10996_v41, %v10995_v40  ;;  %v10998_v31 = vpop.f32.mrb[2].mxu0  ;;  %v15200_v40 = vsel %vm738_vm1, %v1546_v32, %v1548_v2  ;;  %v15209_v41 = vcombine.low %v874_v34, %v875_v29  ;;  %v1390_v34 = vld [vmem:[%s19889_s0 + $0x154] sm:$0xf]  ;;  %v13681_v29 = vld [vmem:[#allocation2 + $0x118] sm:$0xff] }
  0xf9   :  { %v10999_v28 = vpop.f32.mrb[3].mxu0  ;;  %12440 = vmatpush3.bf16.msra.mxu1 %v13432_v55  ;;  %v1384_v55 = vld [vmem:[%s19889_s0 + $0x10c] sm:$0xf]  ;;  %1593 = vst [vmem:[#allocation2 + $0x298] sm:$0xff] %v15200_v40 }
  0xfa   :  { %v15135_v58 = vadd.f32 %v10999_v28, %v10998_v31  ;;  %12441 = vmatprep.subr.bf16.mxu1 %v13433_v36  ;;  %v1421_v23 = vmax.bf16 %v14762_v38, %v1384_v55  ;;  %v15197_v38 = vsel %vm386_vm0, %v1288_v61, %v1292_v62  ;;  %v13680_v28 = vld [vmem:[#allocation2 + $0x170] sm:$0xff]  ;;  %1006 = vst [vmem:[#allocation2 + $0x2e8] sm:$0xff] %v15209_v41 }
  0xfb   :  { %12410 = vmatmul.mubr.bf16.gmra.mrb[12].mxu1 %v13674_v22  ;;  %3889 = vmatmul.mubr.bf16.gmra.mrb[108].mxu0 %v14887_v7  ;;  %v15163_v7 = vsel %vm738_vm1, %v1544_v14, %v1546_v32  ;;  %1357 = vst [vmem:[#allocation2 + $0x2f0] sm:$0xff] %v15197_v38  ;;  %v1387_v14 = vld [vmem:[%s19889_s0 + $0x130] sm:$0xf]  ;;  %v840_v22 = vld [vmem:[%s19889_s0 + $0x154] sm:$0xf]  ;;  %v1296_v55 = vor.u32 %v1294_v27, %v1292_v62 }
  0xfc   :  { %12413 = vmatprep.mubr.bf16.mxu1 %v13675_v43  ;;  %3896 = vmatprep.mubr.bf16.mxu0 %v13676_v44  ;;  %1592 = vst [vmem:[#allocation2 + $0x280] sm:$0xff] %v15163_v7  ;;  %v15181_v52 = vcombine.low %v1421_v23, %v1422_v25  ;;  %v1424_v54 = vmax.bf16 %v15186_v9, %v1387_v14 }
  0xfd   :  { %12442 = vmatpush3.bf16.msra.mxu1 %v13433_v36  ;;  %v1078_v36 = vmax.bf16 %v15186_v9, %v1041_v42  ;;  %v876_v12 = vmax.bf16 %v15186_v9, %v840_v22  ;;  %v877_v25 = vmax.bf16 %v15186_v9, %v841_v24  ;;  %v1427_v42 = vmax.bf16 %v15186_v9, %v1390_v34  ;;  %v13685_v34 = vld [vmem:[#allocation2 + $0x180] sm:$0xff] }
  0xfe   :  { %v11001_v11 = vpop.f32.mrb[4].mxu0  ;;  %12443 = vmatprep.subr.bf16.mxu1 %v13434_v35  ;;  %v1550_v50 = vrot.slane %v15181_v52, 1  ;;  %v10230_v32 = vcombine.low %v1423_v1, %v1424_v54  ;;  %v1080_v52 = vmax.bf16 %v15186_v9, %v1043_v46 }
  0xff   :  { %v11002_v59 = vpop.f32.mrb[5].mxu0  ;;  %v15222_v31 = vcombine.low %v1078_v36, %v1079_v6  ;;  %v15265_v62 = vcombine.low %v876_v12, %v877_v25  ;;  %v1393_v36 = vld [vmem:[%s19889_s0 + $0x178] sm:$0xf]  ;;  %v13682_v6 = vld [vmem:[#allocation2 + $0x130] sm:$0xff] }
 0x100   :  { %v15184_v56 = vadd.f32 %v11002_v59, %v11001_v11  ;;  %v11004_v5 = vpop.f32.mrb[6].mxu0  ;;  %v15212_v4 = vsel %vm738_vm1, %v1548_v2, %v1550_v50  ;;  %v1552_v43 = vrot.slane %v10230_v32, 1  ;;  %v1081_v59 = vmax.bf16 %v15186_v9, %v1044_v19 }
 0x101   :  { %v11005_v16 = vpop.f32.mrb[7].mxu0  ;;  %12444 = vmatpush3.bf16.msra.mxu1 %v13434_v35  ;;  %1594 = vst [vmem:[#allocation2 + $0x2b0] sm:$0xff] %v15212_v4  ;;  %v1298_v35 = vshll.u32 %v15222_v31, 16  ;;  %1007 = vst [vmem:[#allocation2 + $0x300] sm:$0xff] %v15265_v62  ;;  %v1302_v1 = vshrl.u32 %v15222_v31, 16 }
 0x102   :  { %v15204_v18 = vadd.f32 %v11005_v16, %v11004_v5  ;;  %12477 = vmatprep.subr.bf16.mxu1 %v15173_v47  ;;  %v15257_v51 = vsel %vm738_vm1, %v1550_v50, %v1552_v43  ;;  %v1391_v5 = vld [vmem:[%s19889_s0 + $0x160] sm:$0xf]  ;;  %v15274_v50 = vcombine.low %v1080_v52, %v1081_v59  ;;  %v1392_v16 = vld [vmem:[%s19889_s0 + $0x16c] sm:$0xf]  ;;  %v1394_v52 = vld [vmem:[%s19889_s0 + $0x184] sm:$0xf] }
 0x103   :  { %12414 = vmatmul.mubr.bf16.gmra.mrb[16].mxu1 %v13678_v15  ;;  %3897 = vmatmul.mubr.bf16.gmra.mrb[112].mxu0 %v14908_v8  ;;  %v1389_v8 = vld [vmem:[%s19889_s0 + $0x148] sm:$0xf]  ;;  %v1300_v39 = vrot.slane %v1298_v35, 1  ;;  %1595 = vst [vmem:[#allocation2 + $0x2c8] sm:$0xff] %v15257_v51  ;;  %v1428_v13 = vmax.bf16 %v15186_v9, %v1391_v5  ;;  %v1429_v14 = vmax.bf16 %v15186_v9, %v1392_v16  ;;  %v1395_v59 = vld [vmem:[%s19889_s0 + $0x190] sm:$0xf] }
 0x104   :  { %12417 = vmatprep.mubr.bf16.mxu1 %v13679_v3  ;;  %3904 = vmatprep.mubr.bf16.mxu0 %v13680_v28  ;;  %v1426_v57 = vmax.bf16 %v15186_v9, %v1389_v8  ;;  %v1430_v15 = vmax.bf16 %v15186_v9, %v1393_v36  ;;  %v1306_v54 = vshll.u32 %v15274_v50, 16  ;;  %v842_v28 = vld [vmem:[%s19889_s0 + $0x16c] sm:$0xf]  ;;  %v843_v8 = vld [vmem:[%s19889_s0 + $0x178] sm:$0xf]  ;;  %v13686_v16 = vld [vmem:[#allocation2 + $0x160] sm:$0xff] }
 0x105   :  { %v15254_v48 = vsel %vm386_vm0, %v1296_v55, %v1300_v39  ;;  %v10232_v20 = vcombine.low %v1427_v42, %v1428_v13  ;;  %v1304_v35 = vor.u32 %v1302_v1, %v1300_v39  ;;  %v878_v31 = vmax.bf16 %v15186_v9, %v842_v28  ;;  %v1045_v55 = vld [vmem:[%s19889_s0 + $0x19c] sm:$0xf]  ;;  %v13687_v36 = vld [vmem:[#allocation2 + $0x1a0] sm:$0xff]  ;;  %v845_v28 = vld [vmem:[%s19889_s0 + $0x190] sm:$0xf] }
 0x106   :  { %v11007_v49 = vpop.f32.mrb[8].mxu0  ;;  %v10231_v45 = vcombine.low %v1425_v33, %v1426_v57  ;;  %1358 = vst [vmem:[#allocation2 + $0x308] sm:$0xff] %v15254_v48  ;;  %v15299_v33 = vcombine.low %v1429_v14, %v1430_v15  ;;  %v1308_v32 = vrot.slane %v1306_v54, 1  ;;  %v879_v24 = vmax.bf16 %v15186_v9, %v843_v8  ;;  %v1396_v13 = vld [vmem:[%s19889_s0 + $0x19c] sm:$0xf] }
 0x107   :  { %v11008_v63 = vpop.f32.mrb[9].mxu0  ;;  %v1556_v57 = vrot.slane %v10232_v20, 1  ;;  %v1082_v25 = vmax.bf16 %v15186_v9, %v1045_v55  ;;  %v1432_v42 = vmax.bf16 %v15186_v9, %v1395_v59  ;;  %v1310_v14 = vshrl.u32 %v15274_v50, 16 }
 0x108   :  { %v15244_v44 = vadd.f32 %v11008_v63, %v11007_v49  ;;  %v11010_v23 = vpop.f32.mrb[10].mxu0  ;;  %v1554_v2 = vrot.slane %v10231_v45, 1  ;;  %v1558_v63 = vrot.slane %v15299_v33, 1  ;;  %v15313_v12 = vsel %vm386_vm0, %v1304_v35, %v1308_v32 }
 0x109   :  { %v11011_v11 = vpop.f32.mrb[11].mxu0  ;;  %1359 = vst [vmem:[#allocation2 + $0x320] sm:$0xff] %v15313_v12  ;;  %v15324_v19 = vcombine.low %v878_v31, %v879_v24  ;;  %v1312_v33 = vor.u32 %v1310_v14, %v1308_v32  ;;  %v881_v24 = vmax.bf16 %v15186_v9, %v845_v28  ;;  %v1012_v32 = vld [vmem:[%s19889_s0 + $0x10] sm:$0xf]  ;;  %v812_v28 = vld [vmem:[%s19889_s0 + $0x4] sm:$0xf] }
 0x10a   :  { %v15261_v61 = vadd.f32 %v11011_v11, %v11010_v23  ;;  %v15316_v23 = vsel %vm738_vm1, %v1554_v2, %v1556_v57  ;;  %v15327_v11 = vsel %vm738_vm1, %v1556_v57, %v1558_v63  ;;  %v1011_v57 = vld [vmem:[%s19889_s0 + $0x4] sm:$0xf]  ;;  %v1049_v59 = vmax.bf16 %v15186_v9, %v1012_v32  ;;  %v15395_v14 = vld [vmem:[#allocation2 + $0x1d0] sm:$0xff] }
 0x10b   :  { %12418 = vmatmul.mubr.bf16.gmra.mrb[20].mxu1 %v13681_v29  ;;  %3905 = vmatmul.mubr.bf16.gmra.mrb[116].mxu0 %v14945_v10  ;;  %v15286_v10 = vsel %vm738_vm1, %v1552_v43, %v1554_v2  ;;  %v1046_v43 = vld [vmem:[%s19889_s0 + $0x1a8] sm:$0xf]  ;;  %1597 = vst [vmem:[#allocation2 + $0x2f8] sm:$0xff] %v15316_v23  ;;  %1598 = vst [vmem:[#allocation2 + $0x310] sm:$0xff] %v15327_v11  ;;  %v1431_v29 = vmax.bf16 %v15186_v9, %v1394_v52 }
 0x10c   :  { %12421 = vmatprep.mubr.bf16.mxu1 %v13682_v6  ;;  %3912 = vmatprep.mubr.bf16.mxu0 %v13683_v0  ;;  %1596 = vst [vmem:[#allocation2 + $0x2e0] sm:$0xff] %v15286_v10  ;;  %v1083_v45 = vmax.bf16 %v15186_v9, %v1046_v43  ;;  %v13684_v2 = vld [vmem:[#allocation2 + $0x148] sm:$0xff]  ;;  %1008 = vst [vmem:[#allocation2 + $0x318] sm:$0xff] %v15324_v19  ;;  %v1433_v0 = vmax.bf16 %v15186_v9, %v1396_v13  ;;  %v13688_v13 = vld [vmem:[#allocation2 + $0x178] sm:$0xff] }
 0x10d   :  { %v1397_v6 = vld [vmem:[%s19889_s0 + $0x1a8] sm:$0xf]  ;;  %v10234_v1 = vcombine.low %v1431_v29, %v1432_v42  ;;  %v1048_v43 = vmax.bf16 %v15186_v9, %v1011_v57  ;;  %v1362_v42 = vld [vmem:[%s19889_s0 + $0x4] sm:$0xe]  ;;  %20055 = vst [vmem:[#allocation6_spill] sm:$0xff] %v15395_v14 }
 0x10e   :  { %v11013_v3 = vpop.f32.mrb[12].mxu0  ;;  %v15336_v5 = vcombine.low %v1082_v25, %v1083_v45  ;;  %v1434_v54 = vmax.bf16 %v15186_v9, %v1397_v6  ;;  %v3529_v25 = vld [vmem:[#allocation2 + $0x40] sm:$0xff]  ;;  %v1399_v6 = vmax.bf16 %v15186_v9, %v1362_v42  ;;  %v13437_v42 = vld [vmem:[%s19888_s1 + $0x108] sm:$0xff]  }
 0x10f   :  { %v11014_v27 = vpop.f32.mrb[13].mxu0  ;;  %v1560_v35 = vrot.slane %v10234_v1, 1 }
 0x110   :  { %v15302_v49 = vadd.f32 %v11014_v27, %v11013_v3  ;;  %v11016_v22 = vpop.f32.mrb[14].mxu0  ;;  %20052 = vst [vmem:[#allocation3_spill] sm:$0xff] %v15336_v5  ;;  %v1314_v15 = vshll.u32 %v15336_v5, 16  ;;  %v844_v3 = vld [vmem:[%s19889_s0 + $0x184] sm:$0xf]  ;;  %v15366_v55 = vcombine.low %v1433_v0, %v1434_v54  ;;  %v3559_v5 = vld [vmem:[#allocation2 + $0x130] sm:$0xff] }
 0x111   :  { %v11017_v39 = vpop.f32.mrb[15].mxu0  ;;  %v880_v50 = vmax.bf16 %v15186_v9, %v844_v3  ;;  %v15377_v52 = vsel %vm738_vm1, %v1558_v63, %v1560_v35  ;;  %v1363_v63 = vld [vmem:[%s19889_s0 + $0x10] sm:$0xf] }
 0x112   :  { %v15320_v46 = vadd.f32 %v11017_v39, %v11016_v22  ;;  %v15357_v27 = vrot.slane %v1314_v15, 1  ;;  %20054 = vst [vmem:[#allocation5_spill] sm:$0xff] %v15366_v55  ;;  %1599 = vst [vmem:[#allocation2 + $0x328] sm:$0xff] %v15377_v52  ;;  %v19894_v29 = vrot.slane %v15366_v55, 1  ;;  %v1400_v0 = vmax.bf16 %v15186_v9, %v1363_v63  ;;  %v3553_v55 = vld [vmem:[#allocation2 + $0x100] sm:$0xff] }
 0x113   :  { %12422 = vmatmul.mubr.bf16.gmra.mrb[24].mxu1 %v13684_v2  ;;  %3913 = vmatmul.mubr.bf16.gmra.mrb[120].mxu0 %v13685_v34  ;;  %v15384_v34 = vcombine.low %v880_v50, %v881_v24 }
 0x114   :  { %12425 = vmatprep.mubr.bf16.mxu1 %v13686_v16  ;;  %3920 = vmatprep.mubr.bf16.mxu0 %v13687_v36  ;;  %20053 = vst [vmem:[#allocation4_spill] sm:$0xff] %v15357_v27  ;;  %v15374_v45 = vsel %vm386_vm0, %v1312_v33, %v15357_v27  ;;  %v13689_v16 = vld [vmem:[#allocation2 + $0x198] sm:$0xff]  ;;  %v10199_v36 = vcombine.low %v1048_v43, %v1049_v59  ;;  %v3535_v59 = vld [vmem:[#allocation2 + $0x70] sm:$0xff] }
 0x115   :  { %1360 = vst [vmem:[#allocation2 + $0x338] sm:$0xff] %v15374_v45  ;;  %1009 = vst [vmem:[#allocation2 + $0x330] sm:$0xff] %v15384_v34  ;;  %v15402_v15 = vsel %vm738_vm1, %v1560_v35, %v19894_v29  ;;  %v848_v35 = vmax.bf16 %v15186_v9, %v812_v28  ;;  %v3532_v43 = vld [vmem:[#allocation2 + $0x58] sm:$0xff]  ;;  %v3538_v28 = vld [vmem:[#allocation2 + $0x88] sm:$0xff] }
 0x116   :  { %v11019_v20 = vpop.f32.mrb[16].mxu0  ;;  %1600 = vst [vmem:[#allocation2 + $0x340] sm:$0xff] %v15402_v15  ;;  %v1179_v1 = vshrl.u32 %v10199_v36, 16  ;;  %v1181_v54 = vshll.u32 %v10199_v36, 16  ;;  %v15430_v36 = vld [vmem:[#allocation2 + $0x1c8] sm:$0xff] }
 0x117   :  { %v11020_v8 = vpop.f32.mrb[17].mxu0  ;;  %20057 = vst [vmem:[#allocation8_spill] sm:$0xff] %v15430_v36 }
 0x118   :  { %v15363_v31 = vadd.f32 %v11020_v8, %v11019_v20  ;;  %v11022_v22 = vpop.f32.mrb[18].mxu0  ;;  %v10218_v20 = vcombine.low %v1399_v6, %v1400_v0  ;;  %v813_v8 = vld [vmem:[%s19889_s0 + $0x10] sm:$0xf]  ;;  %v1183_v50 = vrot.slane %v1181_v54, 1  ;;  %v13442_v6 = vld [vmem:[%s19888_s1 + $0x388] sm:$0xff]  }
 0x119   :  { %v11023_v39 = vpop.f32.mrb[19].mxu0 }
 0x11a   :  { %v15380_v2 = vadd.f32 %v11023_v39, %v11022_v22  ;;  %v1529_v57 = vrot.slane %v10218_v20, 1  ;;  %v849_v22 = vmax.bf16 %v15186_v9, %v813_v8  ;;  %v13436_v39 = vld [vmem:[%s19888_s1 + $0xc0] sm:$0xff]   ;;  %v1184_v63 = vor.u32 %v1183_v50, %v1179_v1  ;;  %v13440_v1 = vld [vmem:[%s19888_s1 + $0x110] sm:$0xff]  }
 0x11b   :  { %12426 = vmatmul.mubr.bf16.gmra.mrb[28].mxu1 %v13688_v13  ;;  %3921 = vmatmul.mubr.bf16.gmra.mrb[124].mxu0 %v13689_v16  ;;  %v13441_v50 = vld [vmem:[%s19888_s1 + $0xd0] sm:$0xff]  }
 0x11c   :  { %12445 = vmatprep.mubr.bf16.mxu1 %v3529_v25  ;;  %4447 = vmatprep.mubr.bf16.mxu0 %v15395_v14  ;;  %v15424_v13 = vsel %vm738_vm1, %v1529_v57, %v1530_v26  ;;  %v15426_v9 = vcombine.low %v848_v35, %v849_v22  ;;  %v15438_v0 = vsel %vm386_vm0, %v1184_v63, %v14722_v17  ;;  %v15443_v26 = vld [vmem:[#allocation2 + $0x1e8] sm:$0xff]  ;;  %v13443_v57 = vld [vmem:[%s19888_s1 + $0x390] sm:$0xff]   ;;  %v15463_v22 = vld [vmem:[#allocation2 + $0x1e0] sm:$0xff] }
 0x11d   :  { %20058 = vst [vmem:[#allocation9_spill] sm:$0xff] %v15443_v26  ;;  %20059 = vst [vmem:[#allocation10_spill] sm:$0xff] %v15463_v22 }
 0x11e   :  { %v11025_v3 = vpop.f32.mrb[20].mxu0  ;;  %20056 = vst [vmem:[#allocation7_spill] sm:$0xff] %v15426_v9 }
 0x11f   :  { %v11026_v33 = vpop.f32.mrb[21].mxu0 }
 0x120   :  { %v15413_v24 = vadd.f32 %v11026_v33, %v11025_v3  ;;  %v11028_v32 = vpop.f32.mrb[22].mxu0  ;;  %v3541_v33 = vld [vmem:[#allocation2 + $0xa0] sm:$0xff] }
 0x121   :  { %v11029_v25 = vpop.f32.mrb[23].mxu0 }
 0x122   :  { %v15428_v16 = vadd.f32 %v11029_v25, %v11028_v32  ;;  %v13444_v32 = vld [vmem:[%s19888_s1 + $0x398] sm:$0xff]  }
 0x123   :  { %12446 = vmatmul.mubr.bf16.vlgmr.msra.gmra.mrb[0].mxu1 %v3532_v43  ;;  %4448 = vmatmul.mubr.bf16.vlgmr.msra.gmra.mrb[128].mxu0 %v15430_v36  ;;  %v15469_v43 = vld [vmem:[#allocation2 + $0x200] sm:$0xff] }
 0x124   :  { %11524 = vmatpush3.bf16.msra.mxu0 %v13436_v39  ;;  %12449 = vmatprep.mubr.bf16.mxu1 %v3535_v59  ;;  %20060 = vst [vmem:[#allocation11_spill] sm:$0xff] %v15469_v43  ;;  %v13447_v39 = vld [vmem:[%s19888_s1 + $0xd8] sm:$0xff]   ;;  %v13451_v59 = vld [vmem:[%s19888_s1 + $0x120] sm:$0xff]  }
 0x125   :  { %4455 = vmatprep.mubr.bf16.mxu0 %v15443_v26  ;;  %11525 = vmatprep.subr.bf16.mxu0 %v13437_v42 }
 0x126   :  { %v11031_v54 = vpop.f32.mrb[24].mxu0  ;;  %12478 = vmatpush3.bf16.msra.mxu1 %v15173_v47  ;;  %v13446_v47 = vld [vmem:[%s19888_s1 + $0x118] sm:$0xff]  }
 0x127   :  { %v11032_v17 = vpop.f32.mrb[25].mxu0  ;;  %12479 = vmatprep.subr.bf16.mxu1 %v13442_v6 }
 0x128   :  { %v15450_v20 = vadd.f32 %v11032_v17, %v11031_v54  ;;  %v11034_v3 = vpop.f32.mrb[26].mxu0  ;;  %11526 = vmatpush3.bf16.msra.mxu0 %v13438_v21  ;;  %v3544_v21 = vld [vmem:[#allocation2 + $0xb8] sm:$0xff]  ;;  %v3547_v54 = vld [vmem:[#allocation2 + $0xd0] sm:$0xff]  ;;  %v13445_v17 = vld [vmem:[%s19888_s1 + $0x3a0] sm:$0xff]  }
 0x129   :  { %v11035_v8 = vpop.f32.mrb[27].mxu0  ;;  %11527 = vmatprep.subr.bf16.mxu0 %v13440_v1 }
 0x12a   :  { %v15458_v35 = vadd.f32 %v11035_v8, %v11034_v3  ;;  %12480 = vmatpush3.bf16.msra.mxu1 %v13442_v6  ;;  %v13452_v3 = vld [vmem:[%s19888_s1 + $0xe0] sm:$0xff]   ;;  %v13453_v8 = vld [vmem:[%s19888_s1 + $0x128] sm:$0xff]  }
 0x12b   :  { %12450 = vmatmul.mubr.bf16.gmra.mrb[4].mxu1 %v3538_v28  ;;  %4456 = vmatmul.mubr.bf16.gmra.mrb[132].mxu0 %v15463_v22  ;;  %v13702_v22 = vld [vmem:[#allocation2 + $0x260] sm:$0xff] }
 0x12c   :  { %12453 = vmatprep.mubr.bf16.mxu1 %v3541_v33  ;;  %4463 = vmatprep.mubr.bf16.mxu0 %v15469_v43  ;;  %v15491_v33 = vld [vmem:[#allocation2 + $0x1f8] sm:$0xff] }
 0x12d   :  { %11528 = vmatpush3.bf16.msra.mxu0 %v13441_v50  ;;  %12481 = vmatprep.subr.bf16.mxu1 %v13443_v57  ;;  %20061 = vst [vmem:[#allocation12_spill] sm:$0xff] %v15491_v33  ;;  %v13448_v50 = vld [vmem:[%s19888_s1 + $0x3a8] sm:$0xff]  }
 0x12e   :  { %v11037_v25 = vpop.f32.mrb[28].mxu0  ;;  %12482 = vmatpush3.bf16.msra.mxu1 %v13443_v57  ;;  %11529 = vmatprep.subr.bf16.mxu0 %v13446_v47  ;;  %v13696_v57 = vld [vmem:[#allocation2 + $0x218] sm:$0xff]  ;;  %v13454_v47 = vld [vmem:[%s19888_s1 + $0xe8] sm:$0xff]  }
 0x12f   :  { %v11038_v42 = vpop.f32.mrb[29].mxu0  ;;  %12483 = vmatprep.subr.bf16.mxu1 %v13444_v32 }
 0x130   :  { %v15478_v63 = vadd.f32 %v11038_v42, %v11037_v25  ;;  %v11040_v6 = vpop.f32.mrb[30].mxu0  ;;  %v13455_v25 = vld [vmem:[%s19888_s1 + $0x130] sm:$0xff]  }
 0x131   :  { %v11041_v1 = vpop.f32.mrb[31].mxu0  ;;  %11530 = vmatpush3.bf16.msra.mxu0 %v13447_v39 }
 0x132   :  { %v15486_v28 = vadd.f32 %v11041_v1, %v11040_v6  ;;  %12484 = vmatpush3.bf16.msra.mxu1 %v13444_v32  ;;  %11531 = vmatprep.subr.bf16.mxu0 %v13451_v59 }
 0x133   :  { %12454 = vmatmul.mubr.bf16.gmra.mrb[8].mxu1 %v3544_v21  ;;  %4464 = vmatmul.mubr.bf16.gmra.mrb[136].mxu0 %v15491_v33 }
 0x134   :  { %12457 = vmatprep.mubr.bf16.mxu1 %v3547_v54  ;;  %4471 = vmatprep.mubr.bf16.mxu0 %v13696_v57 }
 0x135   :  { %12485 = vmatprep.subr.bf16.mxu1 %v13445_v17  ;;  %11532 = vmatpush3.bf16.msra.mxu0 %v13452_v3  ;;  %v3550_v3 = vld [vmem:[#allocation2 + $0xe8] sm:$0xff] }
 0x136   :  { %v11043_v32 = vpop.f32.mrb[32].mxu0  ;;  %v11131_v39 = vpop.f32.mrb[32].mxu1  ;;  %12486 = vmatpush3.bf16.msra.mxu1 %v13445_v17  ;;  %11533 = vmatprep.subr.bf16.mxu0 %v13453_v8  ;;  %v13449_v17 = vld [vmem:[%s19888_s1 + $0x3b0] sm:$0xff]  }
 0x137   :  { %v11044_v59 = vpop.f32.mrb[33].mxu0  ;;  %v11132_v42 = vpop.f32.mrb[33].mxu1  ;;  %12487 = vmatprep.subr.bf16.mxu1 %v13448_v50  ;;  %v13457_v8 = vld [vmem:[%s19888_s1 + $0xf0] sm:$0xff]  }
 0x138   :  { %v15503_v6 = vadd.f32 %v11044_v59, %v11043_v32  ;;  %v11133_v21 = vadd.f32 %v11132_v42, %v11131_v39  ;;  %v11046_v1 = vpop.f32.mrb[34].mxu0  ;;  %v11134_v54 = vpop.f32.mrb[34].mxu1  ;;  %v13461_v39 = vld [vmem:[%s19888_s1 + $0x138] sm:$0xff]   ;;  %v13697_v42 = vld [vmem:[#allocation2 + $0x210] sm:$0xff] }
 0x139   :  { %v11047_v57 = vpop.f32.mrb[35].mxu0  ;;  %v11135_v29 = vpop.f32.mrb[35].mxu1  ;;  %11534 = vmatpush3.bf16.msra.mxu0 %v13454_v47  ;;  %v13450_v47 = vld [vmem:[%s19888_s1 + $0x3b8] sm:$0xff]  }
 0x13a   :  { %v15511_v27 = vadd.f32 %v11047_v57, %v11046_v1  ;;  %v11136_v32 = vadd.f32 %v11135_v29, %v11134_v54  ;;  %12488 = vmatpush3.bf16.msra.mxu1 %v13448_v50  ;;  %11535 = vmatprep.subr.bf16.mxu0 %v13455_v25  ;;  %v15517_v59 = vadd.f32 %v11133_v21, %v15118_v60  ;;  %v13698_v1 = vld [vmem:[#allocation2 + $0x230] sm:$0xff]  ;;  %v13463_v60 = vld [vmem:[%s19888_s1 + $0xf8] sm:$0xff]   ;;  %v13467_v21 = vld [vmem:[%s19888_s1 + $0x400] sm:$0xff]  }
 0x13b   :  { %12458 = vmatmul.mubr.bf16.gmra.mrb[12].mxu1 %v3550_v3  ;;  %4472 = vmatmul.mubr.bf16.gmra.mrb[140].mxu0 %v13697_v42 }
 0x13c   :  { %12461 = vmatprep.mubr.bf16.mxu1 %v3553_v55  ;;  %4479 = vmatprep.mubr.bf16.mxu0 %v13698_v1  ;;  %v15523_v29 = vadd.f32 %v11136_v32, %v15135_v58  ;;  %v3556_v32 = vld [vmem:[#allocation2 + $0x118] sm:$0xff] }
 0x13d   :  { %12489 = vmatprep.subr.bf16.mxu1 %v13449_v17  ;;  %11536 = vmatpush3.bf16.msra.mxu0 %v13457_v8 }
 0x13e   :  { %v11049_v50 = vpop.f32.mrb[36].mxu0  ;;  %v11137_v25 = vpop.f32.mrb[36].mxu1  ;;  %12490 = vmatpush3.bf16.msra.mxu1 %v13449_v17  ;;  %11537 = vmatprep.subr.bf16.mxu0 %v13461_v39  ;;  %v15536_v17 = vld [vmem:[%s19888_s1 + $0x140] sm:$0xff]  }
 0x13f   :  { %v11050_v55 = vpop.f32.mrb[37].mxu0  ;;  %v11138_v54 = vpop.f32.mrb[37].mxu1  ;;  %12491 = vmatprep.subr.bf16.mxu1 %v13450_v47 }
 0x140   :  { %v15531_v3 = vadd.f32 %v11050_v55, %v11049_v50  ;;  %v11139_v58 = vadd.f32 %v11138_v54, %v11137_v25  ;;  %v11052_v57 = vpop.f32.mrb[38].mxu0  ;;  %v11140_v8 = vpop.f32.mrb[38].mxu1  ;;  %v13699_v25 = vld [vmem:[#allocation2 + $0x228] sm:$0xff] }
 0x141   :  { %v11053_v42 = vpop.f32.mrb[39].mxu0  ;;  %v11141_v1 = vpop.f32.mrb[39].mxu1  ;;  %11538 = vmatpush3.bf16.msra.mxu0 %v13463_v60  ;;  %v13700_v55 = vld [vmem:[#allocation2 + $0x248] sm:$0xff] }
 0x142   :  { %v15538_v39 = vadd.f32 %v11053_v42, %v11052_v57  ;;  %v11142_v33 = vadd.f32 %v11141_v1, %v11140_v8  ;;  %12492 = vmatpush3.bf16.msra.mxu1 %v13450_v47  ;;  %11795 = vmatprep.subr.bf16.mxu0 %v13467_v21  ;;  %v15541_v50 = vadd.f32 %v11139_v58, %v15184_v56 }
 0x143   :  { %12462 = vmatmul.mubr.bf16.gmra.mrb[16].mxu1 %v3556_v32  ;;  %4480 = vmatmul.mubr.bf16.gmra.mrb[144].mxu0 %v13699_v25  ;;  %v3562_v32 = vld [vmem:[#allocation2 + $0x148] sm:$0xff] }
 0x144   :  { %12465 = vmatprep.mubr.bf16.mxu1 %v3559_v5  ;;  %4487 = vmatprep.mubr.bf16.mxu0 %v13700_v55  ;;  %v15544_v54 = vadd.f32 %v11142_v33, %v15204_v18  ;;  %v3565_v5 = vld [vmem:[#allocation2 + $0x160] sm:$0xff] }
 0x145   :  { %12525 = vmatprep.subr.bf16.mxu1 %v15536_v17  ;;  %v13701_v33 = vld [vmem:[#allocation2 + $0x240] sm:$0xff] }
 0x146   :  { %v11055_v60 = vpop.f32.mrb[40].mxu0  ;;  %v11143_v57 = vpop.f32.mrb[40].mxu1 }
 0x147   :  { %v11056_v42 = vpop.f32.mrb[41].mxu0  ;;  %v11144_v8 = vpop.f32.mrb[41].mxu1 }
 0x148   :  { %v15547_v47 = vadd.f32 %v11056_v42, %v11055_v60  ;;  %v11145_v21 = vadd.f32 %v11144_v8, %v11143_v57  ;;  %v11058_v56 = vpop.f32.mrb[42].mxu0  ;;  %v11146_v58 = vpop.f32.mrb[42].mxu1 }
 0x149   :  { %v11059_v1 = vpop.f32.mrb[43].mxu0  ;;  %v11147_v25 = vpop.f32.mrb[43].mxu1 }
 0x14a   :  { %v15549_v43 = vadd.f32 %v11059_v1, %v11058_v56  ;;  %v11148_v55 = vadd.f32 %v11147_v25, %v11146_v58  ;;  %v15552_v18 = vadd.f32 %v11145_v21, %v15244_v44  ;;  %v3568_v44 = vld [vmem:[#allocation2 + $0x178] sm:$0xff]  ;;  %v3571_v25 = vld [vmem:[#allocation2 + $0x190] sm:$0xff] }
 0x14b   :  { %12466 = vmatmul.mubr.bf16.gmra.mrb[20].mxu1 %v3562_v32  ;;  %4488 = vmatmul.mubr.bf16.gmra.mrb[148].mxu0 %v13701_v33 }
 0x14c   :  { %12469 = vmatprep.mubr.bf16.mxu1 %v3565_v5  ;;  %4495 = vmatprep.mubr.bf16.mxu0 %v13702_v22  ;;  %v15555_v60 = vadd.f32 %v11148_v55, %v15261_v61  ;;  %v13703_v61 = vld [vmem:[#allocation2 + $0x258] sm:$0xff] }
 0x14d   :  { %v13704_v55 = vld [vmem:[#allocation2 + $0x278] sm:$0xff] }
 0x14e   :  { %v11061_v57 = vpop.f32.mrb[44].mxu0  ;;  %v11149_v42 = vpop.f32.mrb[44].mxu1 }
 0x14f   :  { %v11062_v8 = vpop.f32.mrb[45].mxu0  ;;  %v11150_v26 = vpop.f32.mrb[45].mxu1 }
 0x150   :  { %v15557_v36 = vadd.f32 %v11062_v8, %v11061_v57  ;;  %v11151_v56 = vadd.f32 %v11150_v26, %v11149_v42  ;;  %v11064_v58 = vpop.f32.mrb[46].mxu0  ;;  %v11152_v1 = vpop.f32.mrb[46].mxu1 }
 0x151   :  { %v11065_v21 = vpop.f32.mrb[47].mxu0  ;;  %v11153_v32 = vpop.f32.mrb[47].mxu1 }
 0x152   :  { %v15559_v33 = vadd.f32 %v11065_v21, %v11064_v58  ;;  %v11154_v5 = vadd.f32 %v11153_v32, %v11152_v1  ;;  %v15562_v22 = vadd.f32 %v11151_v56, %v15302_v49 }
 0x153   :  { %12470 = vmatmul.mubr.bf16.gmra.mrb[24].mxu1 %v3568_v44  ;;  %4496 = vmatmul.mubr.bf16.gmra.mrb[152].mxu0 %v13703_v61  ;;  %v13705_v61 = vld [vmem:[#allocation2 + $0x1a8] sm:$0xff] }
 0x154   :  { %12473 = vmatprep.mubr.bf16.mxu1 %v3571_v25  ;;  %4503 = vmatprep.mubr.bf16.mxu0 %v13704_v55  ;;  %v15565_v26 = vadd.f32 %v11154_v5, %v15320_v46  ;;  %v13706_v46 = vld [vmem:[#allocation2 + $0x270] sm:$0xff]  ;;  %v15574_v55 = vld [vmem:[#allocation2 + $0x1d8] sm:$0xff] }
 0x155   :  { %v13707_v5 = vld [vmem:[#allocation2 + $0x290] sm:$0xff]  ;;  %20063 = vst [vmem:[#allocation14_spill] sm:$0xff] %v15574_v55 }
 0x156   :  { %v11067_v57 = vpop.f32.mrb[48].mxu0  ;;  %v11155_v42 = vpop.f32.mrb[48].mxu1 }
 0x157   :  { %v11068_v8 = vpop.f32.mrb[49].mxu0  ;;  %v11156_v14 = vpop.f32.mrb[49].mxu1 }
 0x158   :  { %v15567_v9 = vadd.f32 %v11068_v8, %v11067_v57  ;;  %v11157_v58 = vadd.f32 %v11156_v14, %v11155_v42  ;;  %v11070_v1 = vpop.f32.mrb[50].mxu0  ;;  %v11158_v21 = vpop.f32.mrb[50].mxu1 }
 0x159   :  { %v11071_v49 = vpop.f32.mrb[51].mxu0  ;;  %v11159_v56 = vpop.f32.mrb[51].mxu1 }
 0x15a   :  { %v15569_v44 = vadd.f32 %v11071_v49, %v11070_v1  ;;  %v11160_v32 = vadd.f32 %v11159_v56, %v11158_v21  ;;  %v15572_v25 = vadd.f32 %v11157_v58, %v15363_v31 }
 0x15b   :  { %12474 = vmatmul.mubr.bf16.gmra.mrb[28].mxu1 %v13705_v61  ;;  %4504 = vmatmul.mubr.bf16.gmra.mrb[156].mxu0 %v13706_v46 }
 0x15c   :  { %20062 = vst [vmem:[#allocation13_spill] sm:$0xff] %v15569_v44  ;;  %4511 = vmatprep.mubr.bf16.mxu0 %v13707_v5  ;;  %12493 = vmatprep.mubr.bf16.mxu1 %v15574_v55  ;;  %v15578_v14 = vadd.f32 %v11160_v32, %v15380_v2  ;;  %v13458_v55 = vld [vmem:[%s19888_s1 + $0x148] sm:$0xff]   ;;  %v15590_v44 = vld [vmem:[#allocation2 + $0x1f0] sm:$0xff] }
 0x15d   :  { %v13709_v32 = vld [vmem:[#allocation2 + $0x288] sm:$0xff]  ;;  %20065 = vst [vmem:[#allocation16_spill] sm:$0xff] %v15590_v44 }
 0x15e   :  { %v11073_v57 = vpop.f32.mrb[52].mxu0  ;;  %v11161_v42 = vpop.f32.mrb[52].mxu1 }
 0x15f   :  { %v11074_v8 = vpop.f32.mrb[53].mxu0  ;;  %v11162_v1 = vpop.f32.mrb[53].mxu1 }
 0x160   :  { %v15580_v21 = vadd.f32 %v11074_v8, %v11073_v57  ;;  %v11163_v31 = vadd.f32 %v11162_v1, %v11161_v42  ;;  %v11076_v58 = vpop.f32.mrb[54].mxu0  ;;  %v11164_v49 = vpop.f32.mrb[54].mxu1  ;;  %v13711_v57 = vld [vmem:[#allocation2 + $0x2a8] sm:$0xff] }
 0x161   :  { %v11077_v56 = vpop.f32.mrb[55].mxu0  ;;  %v11165_v61 = vpop.f32.mrb[55].mxu1  ;;  %v15593_v42 = vld [vmem:[#allocation2 + $0x208] sm:$0xff] }
 0x162   :  { %v15582_v46 = vadd.f32 %v11077_v56, %v11076_v58  ;;  %v11166_v5 = vadd.f32 %v11165_v61, %v11164_v49  ;;  %v15588_v2 = vadd.f32 %v11163_v31, %v15413_v24  ;;  %20066 = vst [vmem:[#allocation17_spill] sm:$0xff] %v15593_v42  ;;  %v13459_v31 = vld [vmem:[%s19888_s1 + $0x150] sm:$0xff]  }
 0x163   :  { %4512 = vmatmul.mubr.bf16.gmra.mrb[160].mxu0 %v13709_v32  ;;  %12494 = vmatmul.mubr.bf16.vlgmr.msra.gmra.mrb[96].mxu1 %v15590_v44 }
 0x164   :  { %20064 = vst [vmem:[#allocation15_spill] sm:$0xff] %v15582_v46  ;;  %4519 = vmatprep.mubr.bf16.mxu0 %v13711_v57  ;;  %12497 = vmatprep.mubr.bf16.mxu1 %v15593_v42  ;;  %v15597_v8 = vadd.f32 %v11166_v5, %v15428_v16  ;;  %v13460_v5 = vld [vmem:[%s19888_s1 + $0x158] sm:$0xff]  }
 0x165   :  { %12526 = vmatpush3.bf16.msra.mxu1 %v15536_v17 }
 0x166   :  { %20067 = vst [vmem:[#allocation18_spill] sm:$0xff] %v15597_v8  ;;  %v11079_v1 = vpop.f32.mrb[56].mxu0  ;;  %v11167_v24 = vpop.f32.mrb[56].mxu1  ;;  %12527 = vmatprep.subr.bf16.mxu1 %v13458_v55  ;;  %v13713_v8 = vld [vmem:[#allocation2 + $0x2a0] sm:$0xff] }
 0x167   :  { %v11080_v58 = vpop.f32.mrb[57].mxu0  ;;  %v11168_v49 = vpop.f32.mrb[57].mxu1 }
 0x168   :  { %v15603_v56 = vadd.f32 %v11080_v58, %v11079_v1  ;;  %v11169_v61 = vadd.f32 %v11168_v49, %v11167_v24  ;;  %v11082_v32 = vpop.f32.mrb[58].mxu0  ;;  %v11170_v57 = vpop.f32.mrb[58].mxu1  ;;  %v15613_v1 = vld [vmem:[#allocation2 + $0x220] sm:$0xff] }
 0x169   :  { %v11083_v42 = vpop.f32.mrb[59].mxu0  ;;  %v11171_v44 = vpop.f32.mrb[59].mxu1  ;;  %12528 = vmatpush3.bf16.msra.mxu1 %v13458_v55  ;;  %20069 = vst [vmem:[#allocation20_spill] sm:$0xff] %v15613_v1  ;;  %v13715_v24 = vld [vmem:[#allocation2 + $0x2c0] sm:$0xff]  ;;  %v15616_v55 = vld [vmem:[#allocation2 + $0x238] sm:$0xff] }
 0x16a   :  { %v15605_v16 = vadd.f32 %v11083_v42, %v11082_v32  ;;  %v11172_v17 = vadd.f32 %v11171_v44, %v11170_v57  ;;  %12529 = vmatprep.subr.bf16.mxu1 %v13459_v31  ;;  %v15611_v46 = vadd.f32 %v11169_v61, %v15450_v20  ;;  %20070 = vst [vmem:[#allocation21_spill] sm:$0xff] %v15616_v55  ;;  %v13462_v20 = vld [vmem:[%s19888_s1 + $0x160] sm:$0xff]  }
 0x16b   :  { %4520 = vmatmul.mubr.bf16.gmra.mrb[164].mxu0 %v13713_v8  ;;  %12498 = vmatmul.mubr.bf16.gmra.mrb[100].mxu1 %v15613_v1  ;;  %v13717_v1 = vld [vmem:[#allocation2 + $0x2b8] sm:$0xff] }
 0x16c   :  { %20068 = vst [vmem:[#allocation19_spill] sm:$0xff] %v15605_v16  ;;  %4527 = vmatprep.mubr.bf16.mxu0 %v13715_v24  ;;  %12501 = vmatprep.mubr.bf16.mxu1 %v15616_v55  ;;  %v15620_v44 = vadd.f32 %v11172_v17, %v15458_v35  ;;  %v13464_v17 = vld [vmem:[%s19888_s1 + $0x168] sm:$0xff]  }
 0x16d   :  { %12530 = vmatpush3.bf16.msra.mxu1 %v13459_v31 }
 0x16e   :  { %20071 = vst [vmem:[#allocation22_spill] sm:$0xff] %v15620_v44  ;;  %v11085_v42 = vpop.f32.mrb[60].mxu0  ;;  %v11173_v58 = vpop.f32.mrb[60].mxu1  ;;  %12531 = vmatprep.subr.bf16.mxu1 %v13460_v5 }
 0x16f   :  { %v11086_v8 = vpop.f32.mrb[61].mxu0  ;;  %v11174_v49 = vpop.f32.mrb[61].mxu1 }
 0x170   :  { %v15625_v61 = vadd.f32 %v11086_v8, %v11085_v42  ;;  %v11175_v32 = vadd.f32 %v11174_v49, %v11173_v58  ;;  %v11088_v57 = vpop.f32.mrb[62].mxu0  ;;  %v11176_v24 = vpop.f32.mrb[62].mxu1  ;;  %v15635_v42 = vld [vmem:[#allocation2 + $0x250] sm:$0xff] }
 0x171   :  { %v11089_v16 = vpop.f32.mrb[63].mxu0  ;;  %v11177_v55 = vpop.f32.mrb[63].mxu1  ;;  %12532 = vmatpush3.bf16.msra.mxu1 %v13460_v5 }
 0x172   :  { %v15627_v35 = vadd.f32 %v11089_v16, %v11088_v57  ;;  %v11178_v31 = vadd.f32 %v11177_v55, %v11176_v24  ;;  %12533 = vmatprep.subr.bf16.mxu1 %v13462_v20  ;;  %v15633_v44 = vadd.f32 %v11175_v32, %v15478_v63  ;;  %v13465_v63 = vld [vmem:[%s19888_s1 + $0x170] sm:$0xff]  }
 0x173   :  { %4528 = vmatmul.mubr.bf16.gmra.mrb[168].mxu0 %v13717_v1  ;;  %12502 = vmatmul.mubr.bf16.gmra.mrb[104].mxu1 %v15635_v42 }
 0x174   :  { %20072 = vst [vmem:[#allocation23_spill] sm:$0xff] %v15627_v35  ;;  %4535 = vmatprep.mubr.bf16.mxu0 %v15128_v30  ;;  %12505 = vmatprep.mubr.bf16.mxu1 %v15131_v53  ;;  %v15641_v16 = vadd.f32 %v11178_v31, %v15486_v28  ;;  %v13466_v28 = vld [vmem:[%s19888_s1 + $0x178] sm:$0xff]  }
 0x175   :  { %12534 = vmatpush3.bf16.msra.mxu1 %v13462_v20 }
 0x176   :  { %v11179_v5 = vpop.f32.mrb[64].mxu1  ;;  %v11267_v55 = vpop.f32.mrb[64].mxu0  ;;  %12535 = vmatprep.subr.bf16.mxu1 %v13464_v17 }
 0x177   :  { %v11180_v1 = vpop.f32.mrb[65].mxu1  ;;  %v11268_v58 = vpop.f32.mrb[65].mxu0 }
 0x178   :  { %v11181_v8 = vadd.f32 %v11180_v1, %v11179_v5  ;;  %v11182_v49 = vpop.f32.mrb[66].mxu1  ;;  %v11270_v32 = vpop.f32.mrb[66].mxu0  ;;  %v11269_v57 = vadd.f32 %v11268_v58, %v11267_v55 }
 0x179   :  { %v11183_v30 = vpop.f32.mrb[67].mxu1  ;;  %v11271_v24 = vpop.f32.mrb[67].mxu0  ;;  %12536 = vmatpush3.bf16.msra.mxu1 %v13464_v17 }
 0x17a   :  { %v11184_v53 = vadd.f32 %v11183_v30, %v11182_v49  ;;  %12537 = vmatprep.subr.bf16.mxu1 %v13465_v63  ;;  %v15650_v20 = vadd.f32 %v15517_v59, %v11269_v57  ;;  %v11272_v31 = vadd.f32 %v11271_v24, %v11270_v32  ;;  %v15653_v35 = vadd.f32 %v11181_v8, %v15503_v6 }
 0x17b   :  { %4536 = vmatmul.mubr.bf16.gmra.mrb[172].mxu0 %v15142_v37  ;;  %12506 = vmatmul.mubr.bf16.gmra.mrb[108].mxu1 %v15163_v7  ;;  %v13471_v37 = vld [vmem:[%s19888_s1 + $0x580] sm:$0xff]  }
 0x17c   :  { %4543 = vmatprep.mubr.bf16.mxu0 %v15197_v38  ;;  %12509 = vmatprep.mubr.bf16.mxu1 %v15200_v40  ;;  %v15660_v17 = vadd.f32 %v15523_v29, %v11272_v31  ;;  %v15663_v5 = vadd.f32 %v11184_v53, %v15511_v27 }
 0x17d   :  { %12538 = vmatpush3.bf16.msra.mxu1 %v13465_v63 }
 0x17e   :  { %v11185_v59 = vpop.f32.mrb[68].mxu1  ;;  %v11273_v55 = vpop.f32.mrb[68].mxu0  ;;  %12539 = vmatprep.subr.bf16.mxu1 %v13466_v28 }
 0x17f   :  { %v11186_v6 = vpop.f32.mrb[69].mxu1  ;;  %v11274_v7 = vpop.f32.mrb[69].mxu0 }
 0x180   :  { %v11187_v1 = vadd.f32 %v11186_v6, %v11185_v59  ;;  %v11188_v38 = vpop.f32.mrb[70].mxu1  ;;  %v11276_v58 = vpop.f32.mrb[70].mxu0  ;;  %v11275_v40 = vadd.f32 %v11274_v7, %v11273_v55 }
 0x181   :  { %v11189_v8 = vpop.f32.mrb[71].mxu1  ;;  %v11277_v29 = vpop.f32.mrb[71].mxu0  ;;  %12540 = vmatpush3.bf16.msra.mxu1 %v13466_v28 }
 0x182   :  { %v11190_v49 = vadd.f32 %v11189_v8, %v11188_v38  ;;  %11659 = vmatprep.subr.bf16.mxu1 %v13471_v37  ;;  %v15669_v27 = vadd.f32 %v15541_v50, %v11275_v40  ;;  %v11278_v63 = vadd.f32 %v11277_v29, %v11276_v58  ;;  %v15672_v32 = vadd.f32 %v11187_v1, %v15531_v3 }
 0x183   :  { %4544 = vmatmul.mubr.bf16.gmra.mrb[176].mxu0 %v15209_v41  ;;  %12510 = vmatmul.mubr.bf16.gmra.mrb[112].mxu1 %v15212_v4 }
 0x184   :  { %4551 = vmatprep.mubr.bf16.mxu0 %v15254_v48  ;;  %12513 = vmatprep.mubr.bf16.mxu1 %v15257_v51  ;;  %v15679_v57 = vadd.f32 %v15544_v54, %v11278_v63  ;;  %v15682_v30 = vadd.f32 %v11190_v49, %v15538_v39  ;;  %v1859_v49 = vld [vmem:[%s19889_s0 + $0x2c] sm:$0xf]  ;;  %v15714_v63 = vld [vmem:[#allocation2 + $0x360] sm:$0xff] }
 0x186   :  { %v11191_v50 = vpop.f32.mrb[72].mxu1  ;;  %v11279_v24 = vpop.f32.mrb[72].mxu0 }
 0x187   :  { %v11192_v53 = vpop.f32.mrb[73].mxu1  ;;  %v11280_v28 = vpop.f32.mrb[73].mxu0 }
 0x188   :  { %v11193_v3 = vadd.f32 %v11192_v53, %v11191_v50  ;;  %v11194_v31 = vpop.f32.mrb[74].mxu1  ;;  %v11282_v59 = vpop.f32.mrb[74].mxu0  ;;  %v11281_v41 = vadd.f32 %v11280_v28, %v11279_v24  ;;  %v1896_v50 = vmax.bf16 %v15714_v63, %v1859_v49 }
 0x189   :  { %v11195_v55 = vpop.f32.mrb[75].mxu1  ;;  %v11283_v4 = vpop.f32.mrb[75].mxu0 }
 0x18a   :  { %v11196_v37 = vadd.f32 %v11195_v55, %v11194_v31  ;;  %v15685_v48 = vadd.f32 %v15552_v18, %v11281_v41  ;;  %v11284_v51 = vadd.f32 %v11283_v4, %v11282_v59  ;;  %v15688_v54 = vadd.f32 %v11193_v3, %v15547_v47 }
 0x18b   :  { %4552 = vmatmul.mubr.bf16.gmra.mrb[180].mxu0 %v15265_v62  ;;  %12514 = vmatmul.mubr.bf16.gmra.mrb[116].mxu1 %v15286_v10 }
 0x18c   :  { %4559 = vmatprep.mubr.bf16.mxu0 %v15313_v12  ;;  %12517 = vmatprep.mubr.bf16.mxu1 %v15316_v23  ;;  %v15695_v39 = vadd.f32 %v15555_v60, %v11284_v51  ;;  %v15698_v6 = vadd.f32 %v11196_v37, %v15549_v43  ;;  %v1858_v43 = vld [vmem:[%s19889_s0 + $0x20] sm:$0xf] }
 0x18e   :  { %v11197_v18 = vpop.f32.mrb[76].mxu1  ;;  %v11285_v7 = vpop.f32.mrb[76].mxu0 }
 0x18f   :  { %v11198_v1 = vpop.f32.mrb[77].mxu1  ;;  %v11286_v38 = vpop.f32.mrb[77].mxu0 }
 0x190   :  { %v11199_v47 = vadd.f32 %v11198_v1, %v11197_v18  ;;  %v11200_v58 = vpop.f32.mrb[78].mxu1  ;;  %v11288_v40 = vpop.f32.mrb[78].mxu0  ;;  %v11287_v62 = vadd.f32 %v11286_v38, %v11285_v7 }
 0x191   :  { %v11201_v8 = vpop.f32.mrb[79].mxu1  ;;  %v11289_v10 = vpop.f32.mrb[79].mxu0 }
 0x192   :  { %v11202_v29 = vadd.f32 %v11201_v8, %v11200_v58  ;;  %v15701_v12 = vadd.f32 %v15562_v22, %v11287_v62  ;;  %v11290_v23 = vadd.f32 %v11289_v10, %v11288_v40  ;;  %v15704_v60 = vadd.f32 %v11199_v47, %v15557_v36  ;;  %v1659_v62 = vld [vmem:[%s19889_s0 + $0x20] sm:$0xf]  ;;  %v1660_v8 = vld [vmem:[%s19889_s0 + $0x2c] sm:$0xf] }
 0x193   :  { %4560 = vmatmul.mubr.bf16.gmra.mrb[184].mxu0 %v15324_v19  ;;  %12518 = vmatmul.mubr.bf16.gmra.mrb[120].mxu1 %v15327_v11  ;;  %v1895_v22 = vmax.bf16 %v15714_v63, %v1858_v43  ;;  %v1860_v19 = vld [vmem:[%s19889_s0 + $0x38] sm:$0xf]  ;;  %v1861_v11 = vld [vmem:[%s19889_s0 + $0x44] sm:$0xf]  ;;  %v1696_v43 = vmax.bf16 %v15714_v63, %v1660_v8  ;;  %v20075_v8 = vld [vmem:[#allocation14_spill] sm:$0xff] }
 0x194   :  { %4567 = vmatprep.mubr.bf16.mxu0 %v15374_v45  ;;  %12521 = vmatprep.mubr.bf16.mxu1 %v15377_v52  ;;  %v15721_v36 = vadd.f32 %v15565_v26, %v11290_v23  ;;  %v15724_v24 = vadd.f32 %v11202_v29, %v15559_v33  ;;  %v1897_v53 = vmax.bf16 %v15714_v63, %v1860_v19 }
 0x195   :  { %v1898_v45 = vmax.bf16 %v15714_v63, %v1861_v11  ;;  %v10256_v28 = vcombine.low %v1895_v22, %v1896_v50  ;;  %v1695_v23 = vmax.bf16 %v15714_v63, %v1659_v62  ;;  %v20074_v62 = vld [vmem:[#allocation7_spill] sm:$0xff] }
 0x196   :  { %v11203_v52 = vpop.f32.mrb[80].mxu1  ;;  %v11291_v3 = vpop.f32.mrb[80].mxu0 }
 0x197   :  { %v11204_v26 = vpop.f32.mrb[81].mxu1  ;;  %v11292_v31 = vpop.f32.mrb[81].mxu0  ;;  %v10257_v59 = vcombine.low %v1897_v53, %v1898_v45  ;;  %v2031_v33 = vshll.u32 %v10256_v28, 16  ;;  %v2035_v1 = vshrl.u32 %v10256_v28, 16 }
 0x198   :  { %v11205_v41 = vadd.f32 %v11204_v26, %v11203_v52  ;;  %v11206_v55 = vpop.f32.mrb[82].mxu1  ;;  %v11294_v4 = vpop.f32.mrb[82].mxu0  ;;  %v11293_v37 = vadd.f32 %v11292_v31, %v11291_v3  ;;  %v13468_v26 = vld [vmem:[%s19888_s1 + $0x3c0] sm:$0xff]  }
 0x199   :  { %v11207_v51 = vpop.f32.mrb[83].mxu1  ;;  %v11295_v18 = vpop.f32.mrb[83].mxu0  ;;  %v15734_v7 = vrot.slane %v2031_v33, 1  ;;  %v2039_v38 = vshll.u32 %v10257_v59, 16 }
 0x19a   :  { %v11208_v47 = vadd.f32 %v11207_v51, %v11206_v55  ;;  %v15737_v58 = vadd.f32 %v15572_v25, %v11293_v37  ;;  %v11296_v40 = vadd.f32 %v11295_v18, %v11294_v4  ;;  %v15746_v10 = vadd.f32 %v11205_v41, %v15567_v9  ;;  %v20073_v9 = vld [vmem:[#allocation13_spill] sm:$0xff]  ;;  %v13469_v4 = vld [vmem:[%s19888_s1 + $0x408] sm:$0xff]  }
 0x19b   :  { %4568 = vmatmul.mubr.bf16.gmra.mrb[188].mxu0 %v15384_v34  ;;  %12522 = vmatmul.mubr.bf16.gmra.mrb[124].mxu1 %v15402_v15  ;;  %v2037_v29 = vor.u32 %v2035_v1, %v15734_v7  ;;  %v2041_v25 = vrot.slane %v2039_v38, 1  ;;  %v1862_v34 = vld [vmem:[%s19889_s0 + $0x50] sm:$0xf]  ;;  %v1863_v15 = vld [vmem:[%s19889_s0 + $0x5c] sm:$0xf]  ;;  %v2043_v37 = vshrl.u32 %v10257_v59, 16 }
 0x19c   :  { %4913 = vmatprep.mubr.bf16.mxu0 %v15438_v0  ;;  %12541 = vmatprep.mubr.bf16.mxu1 %v15424_v13  ;;  %v15756_v49 = vadd.f32 %v15578_v14, %v11296_v40  ;;  %v15759_v22 = vadd.f32 %v11208_v47, %v20073_v9  ;;  %v10238_v0 = vcombine.low %v1695_v23, %v1696_v43  ;;  %v13473_v18 = vld [vmem:[%s19888_s1 + $0x540] sm:$0xff]   ;;  %v1661_v40 = vld [vmem:[%s19889_s0 + $0x38] sm:$0xf]  ;;  %v20076_v9 = vld [vmem:[#allocation6_spill] sm:$0xff] }
 0x19d   :  { %v2042_v50 = vsel %vm386_vm0, %v2037_v29, %v2041_v25  ;;  %v1899_v13 = vmax.bf16 %v15714_v63, %v1862_v34  ;;  %v1900_v11 = vmax.bf16 %v15714_v63, %v1863_v15  ;;  %v1662_v59 = vld [vmem:[%s19889_s0 + $0x44] sm:$0xf]  ;;  %v2045_v29 = vor.u32 %v2043_v37, %v2041_v25  ;;  %v13470_v34 = vld [vmem:[%s19888_s1 + $0x3c8] sm:$0xff]  }
 0x19e   :  { %v11209_v19 = vpop.f32.mrb[84].mxu1  ;;  %v11297_v14 = vpop.f32.mrb[84].mxu0  ;;  %2190 = vst.msk [vmem:[#allocation2 + $0x380] sm:$0xff] %vm1837_vm2, %v2042_v50  ;;  %1839 = vst.msk [vmem:[#allocation2 + $0x378] sm:$0xff] %vm1837_vm2, %v10238_v0  ;;  %v1697_v23 = vmax.bf16 %v15714_v63, %v1661_v40  ;;  %v1698_v43 = vmax.bf16 %v15714_v63, %v1662_v59  ;;  %v20077_v15 = vld [vmem:[#allocation18_spill] sm:$0xff]  ;;  %v20078_v0 = vld [vmem:[#allocation15_spill] sm:$0xff] }
 0x19f   :  { %v11210_v53 = vpop.f32.mrb[85].mxu1  ;;  %v11298_v45 = vpop.f32.mrb[85].mxu0  ;;  %v15775_v33 = vcombine.low %v1899_v13, %v1900_v11  ;;  %v1864_v25 = vld [vmem:[%s19889_s0 + $0x68] sm:$0xf]  ;;  %v13472_v11 = vld [vmem:[%s19888_s1 + $0x410] sm:$0xff]  }
 0x1a0   :  { %v11211_v28 = vadd.f32 %v11210_v53, %v11209_v19  ;;  %v11212_v52 = vpop.f32.mrb[86].mxu1  ;;  %v11300_v3 = vpop.f32.mrb[86].mxu0  ;;  %v11299_v31 = vadd.f32 %v11298_v45, %v11297_v14  ;;  %v1865_v19 = vld [vmem:[%s19889_s0 + $0x74] sm:$0xf]  ;;  %v20079_v14 = vld [vmem:[#allocation16_spill] sm:$0xff]  ;;  %v10239_v45 = vcombine.low %v1697_v23, %v1698_v43 }
 0x1a1   :  { %v11213_v41 = vpop.f32.mrb[87].mxu1  ;;  %v11301_v55 = vpop.f32.mrb[87].mxu0 }
 0x1a2   :  { %v11214_v51 = vadd.f32 %v11213_v41, %v11212_v52  ;;  %v15784_v1 = vadd.f32 %v15588_v2, %v11299_v31  ;;  %v11302_v38 = vadd.f32 %v11301_v55, %v11300_v3  ;;  %v15787_v47 = vadd.f32 %v11211_v28, %v15580_v21  ;;  %v13475_v2 = vld [vmem:[%s19888_s1 + $0x588] sm:$0xff]   ;;  %1840 = vst.msk [vmem:[#allocation2 + $0x390] sm:$0xff] %vm1837_vm2, %v10239_v45 }
 0x1a3   :  { %4914 = vmatmul.mubr.bf16.vlgmr.msra.gmra.mrb[192].mxu0 %v20074_v62  ;;  %12542 = vmatmul.mubr.bf16.vlgmr.msra.gmra.mrb[96].mxu1 %v20075_v8  ;;  %v2047_v21 = vshll.u32 %v15775_v33, 16  ;;  %v1901_v28 = vmax.bf16 %v15714_v63, %v1864_v25  ;;  %v1902_v52 = vmax.bf16 %v15714_v63, %v1865_v19  ;;  %v13476_v31 = vld [vmem:[%s19888_s1 + $0x548] sm:$0xff]   ;;  %v1663_v25 = vld [vmem:[%s19889_s0 + $0x50] sm:$0xf]  ;;  %v20080_v19 = vld [vmem:[#allocation8_spill] sm:$0xff] }
 0x1a4   :  { %11796 = vmatpush3.bf16.msra.mxu0 %v13468_v26  ;;  %4921 = vmatprep.mubr.bf16.mxu0 %v20076_v9  ;;  %v15808_v50 = vadd.f32 %v20077_v15, %v11302_v38  ;;  %v15811_v13 = vadd.f32 %v11214_v51, %v20078_v0  ;;  %v13482_v9 = vld [vmem:[%s19888_s1 + $0x418] sm:$0xff]  }
 0x1a5   :  { %12545 = vmatprep.mubr.bf16.mxu1 %v20079_v14  ;;  %11797 = vmatprep.subr.bf16.mxu0 %v13469_v4  ;;  %v2049_v53 = vrot.slane %v2047_v21, 1  ;;  %v15830_v37 = vcombine.low %v1901_v28, %v1902_v52  ;;  %v2051_v21 = vshrl.u32 %v15775_v33, 16  ;;  %v1664_v33 = vld [vmem:[%s19889_s0 + $0x5c] sm:$0xf]  ;;  %v20081_v14 = vld [vmem:[#allocation17_spill] sm:$0xff] }
 0x1a6   :  { %v11215_v3 = vpop.f32.mrb[88].mxu1  ;;  %v11303_v26 = vpop.f32.mrb[88].mxu0  ;;  %11660 = vmatpush3.bf16.msra.mxu1 %v13473_v18  ;;  %v13474_v18 = vld [vmem:[%s19888_s1 + $0x3d0] sm:$0xff]   ;;  %v1700_v28 = vmax.bf16 %v15714_v63, %v1664_v33  ;;  %v20082_v52 = vld [vmem:[#allocation9_spill] sm:$0xff] }
 0x1a7   :  { %v11216_v41 = vpop.f32.mrb[89].mxu1  ;;  %v11304_v55 = vpop.f32.mrb[89].mxu0  ;;  %11661 = vmatprep.subr.bf16.mxu1 %v13475_v2  ;;  %v2050_v4 = vsel %vm386_vm0, %v2045_v29, %v2049_v53  ;;  %v13477_v2 = vld [vmem:[%s19888_s1 + $0x590] sm:$0xff]   ;;  %v2055_v23 = vshll.u32 %v15830_v37, 16 }
 0x1a8   :  { %v11217_v51 = vadd.f32 %v11216_v41, %v11215_v3  ;;  %v11218_v38 = vpop.f32.mrb[90].mxu1  ;;  %v11306_v40 = vpop.f32.mrb[90].mxu0  ;;  %11798 = vmatpush3.bf16.msra.mxu0 %v13470_v34  ;;  %v11305_v59 = vadd.f32 %v11304_v55, %v11303_v26  ;;  %2191 = vst.msk [vmem:[#allocation2 + $0x398] sm:$0xff] %vm1837_vm2, %v2050_v4  ;;  %v13478_v29 = vld [vmem:[%s19888_s1 + $0x550] sm:$0xff]   ;;  %v20083_v3 = vld [vmem:[#allocation20_spill] sm:$0xff]  ;;  %v20084_v26 = vld [vmem:[#allocation22_spill] sm:$0xff] }
 0x1a9   :  { %v11219_v62 = vpop.f32.mrb[91].mxu1  ;;  %v11307_v8 = vpop.f32.mrb[91].mxu0  ;;  %11799 = vmatprep.subr.bf16.mxu0 %v13472_v11  ;;  %v2053_v11 = vor.u32 %v2051_v21, %v2049_v53  ;;  %v2057_v45 = vrot.slane %v2055_v23, 1  ;;  %v20085_v41 = vld [vmem:[#allocation19_spill] sm:$0xff]  ;;  %v1866_v4 = vld [vmem:[%s19889_s0 + $0x80] sm:$0xf] }
 0x1aa   :  { %v11220_v43 = vadd.f32 %v11219_v62, %v11218_v38  ;;  %11662 = vmatpush3.bf16.msra.mxu1 %v13476_v31  ;;  %v15848_v34 = vadd.f32 %v15611_v46, %v11305_v59  ;;  %v11308_v15 = vadd.f32 %v11307_v8, %v11306_v40  ;;  %v15851_v0 = vadd.f32 %v11217_v51, %v15603_v56  ;;  %v13479_v46 = vld [vmem:[%s19888_s1 + $0x598] sm:$0xff]   ;;  %v1867_v53 = vld [vmem:[%s19889_s0 + $0x8c] sm:$0xf] }
 0x1ab   :  { %4922 = vmatmul.mubr.bf16.gmra.mrb[196].mxu0 %v20080_v19  ;;  %12546 = vmatmul.mubr.bf16.gmra.mrb[100].mxu1 %v20081_v14  ;;  %v1699_v56 = vmax.bf16 %v15714_v63, %v1663_v25  ;;  %v13484_v51 = vld [vmem:[%s19888_s1 + $0x3d8] sm:$0xff]   ;;  %v2058_v38 = vsel %vm386_vm0, %v2053_v11, %v2057_v45  ;;  %v1903_v59 = vmax.bf16 %v15714_v63, %v1866_v4  ;;  %v13481_v11 = vld [vmem:[%s19888_s1 + $0x5a0] sm:$0xff]  }
 0x1ac   :  { %4929 = vmatprep.mubr.bf16.mxu0 %v20082_v52  ;;  %12549 = vmatprep.mubr.bf16.mxu1 %v20083_v3  ;;  %v15869_v31 = vadd.f32 %v20084_v26, %v11308_v15  ;;  %v15872_v55 = vadd.f32 %v11220_v43, %v20085_v41  ;;  %v13480_v21 = vld [vmem:[%s19888_s1 + $0x558] sm:$0xff]   ;;  %2192 = vst.msk [vmem:[#allocation2 + $0x3b0] sm:$0xff] %vm1837_vm2, %v2058_v38  ;;  %v13493_v3 = vld [vmem:[%s19888_s1 + $0x428] sm:$0xff]   ;;  %v20087_v38 = vld [vmem:[#allocation21_spill] sm:$0xff] }
 0x1ad   :  { %11800 = vmatpush3.bf16.msra.mxu0 %v13474_v18  ;;  %11663 = vmatprep.subr.bf16.mxu1 %v13477_v2  ;;  %v10240_v40 = vcombine.low %v1699_v56, %v1700_v28  ;;  %v13491_v18 = vld [vmem:[%s19888_s1 + $0x420] sm:$0xff]   ;;  %v1904_v2 = vmax.bf16 %v15714_v63, %v1867_v53  ;;  %v2059_v28 = vshrl.u32 %v15830_v37, 16  ;;  %v1665_v53 = vld [vmem:[%s19889_s0 + $0x68] sm:$0xf]  ;;  %v1666_v37 = vld [vmem:[%s19889_s0 + $0x74] sm:$0xf] }
 0x1ae   :  { %v11221_v62 = vpop.f32.mrb[92].mxu1  ;;  %v11309_v8 = vpop.f32.mrb[92].mxu0  ;;  %11664 = vmatpush3.bf16.msra.mxu1 %v13478_v29  ;;  %11801 = vmatprep.subr.bf16.mxu0 %v13482_v9  ;;  %v13483_v56 = vld [vmem:[%s19888_s1 + $0x560] sm:$0xff]  }
 0x1af   :  { %v11222_v23 = vpop.f32.mrb[93].mxu1  ;;  %v11310_v43 = vpop.f32.mrb[93].mxu0  ;;  %11665 = vmatprep.subr.bf16.mxu1 %v13479_v46  ;;  %1841 = vst.msk [vmem:[#allocation2 + $0x3a8] sm:$0xff] %vm1837_vm2, %v10240_v40  ;;  %v15894_v19 = vcombine.low %v1903_v59, %v1904_v2  ;;  %v13492_v46 = vld [vmem:[%s19888_s1 + $0x3e0] sm:$0xff]   ;;  %v2061_v59 = vor.u32 %v2059_v28, %v2057_v45 }
 0x1b0   :  { %v11223_v15 = vadd.f32 %v11222_v23, %v11221_v62  ;;  %v11224_v29 = vpop.f32.mrb[94].mxu1  ;;  %v11312_v25 = vpop.f32.mrb[94].mxu0  ;;  %v11311_v33 = vadd.f32 %v11310_v43, %v11309_v8  ;;  %v1701_v62 = vmax.bf16 %v15714_v63, %v1665_v53  ;;  %v20088_v8 = vld [vmem:[#allocation11_spill] sm:$0xff]  ;;  %v1702_v43 = vmax.bf16 %v15714_v63, %v1666_v37  ;;  %v1869_v45 = vld [vmem:[%s19889_s0 + $0xa4] sm:$0xf] }
 0x1b1   :  { %v11225_v9 = vpop.f32.mrb[95].mxu1  ;;  %v11313_v14 = vpop.f32.mrb[95].mxu0  ;;  %11802 = vmatpush3.bf16.msra.mxu0 %v13484_v51  ;;  %v2063_v4 = vshll.u32 %v15894_v19, 16  ;;  %v20086_v51 = vld [vmem:[#allocation10_spill] sm:$0xff]  ;;  %v2067_v53 = vshrl.u32 %v15894_v19, 16 }
 0x1b2   :  { %v11226_v52 = vadd.f32 %v11225_v9, %v11224_v29  ;;  %11666 = vmatpush3.bf16.msra.mxu1 %v13480_v21  ;;  %11803 = vmatprep.subr.bf16.mxu0 %v13491_v18  ;;  %v15910_v26 = vadd.f32 %v15633_v44, %v11311_v33  ;;  %v11314_v41 = vadd.f32 %v11313_v14, %v11312_v25  ;;  %v13485_v44 = vld [vmem:[%s19888_s1 + $0x5a8] sm:$0xff]   ;;  %v20089_v18 = vld [vmem:[#allocation23_spill] sm:$0xff] }
 0x1b3   :  { %4930 = vmatmul.mubr.bf16.gmra.mrb[200].mxu0 %v20086_v51  ;;  %12550 = vmatmul.mubr.bf16.gmra.mrb[104].mxu1 %v20087_v38  ;;  %v15925_v40 = vadd.f32 %v11223_v15, %v15625_v61  ;;  %v2065_v23 = vrot.slane %v2063_v4, 1  ;;  %v1868_v61 = vld [vmem:[%s19889_s0 + $0x98] sm:$0xf]  ;;  %v1906_v15 = vmax.bf16 %v15714_v63, %v1869_v45  ;;  %v13486_v25 = vld [vmem:[%s19888_s1 + $0x568] sm:$0xff]   ;;  %v13495_v33 = vld [vmem:[%s19888_s1 + $0x430] sm:$0xff]   ;;  %v10241_v14 = vcombine.low %v1701_v62, %v1702_v43 }
 0x1b4   :  { %4937 = vmatprep.mubr.bf16.mxu0 %v20088_v8  ;;  %12553 = vmatprep.mubr.bf16.mxu1 %v15635_v42  ;;  %v15931_v21 = vadd.f32 %v15641_v16, %v11314_v41  ;;  %v15934_v2 = vadd.f32 %v11226_v52, %v20089_v18  ;;  %v13494_v42 = vld [vmem:[%s19888_s1 + $0x3e8] sm:$0xff]   ;;  %v1905_v16 = vmax.bf16 %v15714_v63, %v1868_v61  ;;  %v13488_v41 = vld [vmem:[%s19888_s1 + $0x570] sm:$0xff]   ;;  %v13497_v38 = vld [vmem:[%s19888_s1 + $0x438] sm:$0xff]  }
 0x1b5   :  { %11667 = vmatprep.subr.bf16.mxu1 %v13481_v11  ;;  %11804 = vmatpush3.bf16.msra.mxu0 %v13492_v46  ;;  %v2066_v9 = vsel %vm386_vm0, %v2061_v59, %v2065_v23  ;;  %1842 = vst.msk [vmem:[#allocation2 + $0x3c0] sm:$0xff] %vm1837_vm2, %v10241_v14  ;;  %v13496_v4 = vld [vmem:[%s19888_s1 + $0x3f0] sm:$0xff]   ;;  %v1667_v59 = vld [vmem:[%s19889_s0 + $0x80] sm:$0xf]  ;;  %v1668_v19 = vld [vmem:[%s19889_s0 + $0x8c] sm:$0xf]  ;;  %v2069_v43 = vor.u32 %v2067_v53, %v2065_v23 }
 0x1b6   :  { %v11315_v29 = vpop.f32.mrb[96].mxu0  ;;  %11668 = vmatpush3.bf16.msra.mxu1 %v13483_v56  ;;  %11805 = vmatprep.subr.bf16.mxu0 %v13493_v3  ;;  %2193 = vst.msk [vmem:[#allocation2 + $0x3c8] sm:$0xff] %vm1837_vm2, %v2066_v9  ;;  %v15956_v46 = vcombine.low %v1905_v16, %v1906_v15  ;;  %v13487_v3 = vld [vmem:[%s19888_s1 + $0x5b0] sm:$0xff]   ;;  %v20090_v62 = vld [vmem:[#allocation12_spill] sm:$0xff]  ;;  %v13720_v8 = vld [vmem:[#allocation2 + $0x268] sm:$0xff]  ;;  %v1704_v45 = vmax.bf16 %v15714_v63, %v1668_v19 }
 0x1b7   :  { %v11316_v11 = vpop.f32.mrb[97].mxu0  ;;  %11669 = vmatprep.subr.bf16.mxu1 %v13485_v44  ;;  %v13489_v18 = vld [vmem:[%s19888_s1 + $0x5b8] sm:$0xff]   ;;  %v13722_v16 = vld [vmem:[#allocation2 + $0x280] sm:$0xff] }
 0x1b8   :  { %v11317_v28 = vadd.f32 %v11316_v11, %v11315_v29  ;;  %v11318_v56 = vpop.f32.mrb[98].mxu0  ;;  %v2071_v37 = vshll.u32 %v15956_v46, 16  ;;  %v1870_v29 = vld [vmem:[%s19889_s0 + $0xb0] sm:$0xf]  ;;  %v1871_v23 = vld [vmem:[%s19889_s0 + $0xbc] sm:$0xf] }
 0x1b9   :  { %v11319_v52 = vpop.f32.mrb[99].mxu0  ;;  %11806 = vmatpush3.bf16.msra.mxu0 %v13494_v42  ;;  %v13721_v42 = vld [vmem:[#allocation2 + $0x218] sm:$0xff] }
 0x1ba   :  { %v11320_v51 = vadd.f32 %v11319_v52, %v11318_v56  ;;  %11670 = vmatpush3.bf16.msra.mxu1 %v13486_v25  ;;  %11807 = vmatprep.subr.bf16.mxu0 %v13495_v33  ;;  %v15974_v44 = vadd.f32 %v15653_v35, %v11317_v28  ;;  %v2073_v61 = vrot.slane %v2071_v37, 1  ;;  %v1703_v35 = vmax.bf16 %v15714_v63, %v1667_v59  ;;  %v13498_v25 = vld [vmem:[%s19888_s1 + $0x3f8] sm:$0xff]   ;;  %v16008_v28 = vld [vmem:[%s19888_s1 + $0x440] sm:$0xff]  }
 0x1bb   :  { %4938 = vmatmul.mubr.bf16.gmra.mrb[204].mxu0 %v20090_v62  ;;  %12554 = vmatmul.mubr.bf16.gmra.mrb[108].mxu1 %v13720_v8  ;;  %v13490_v11 = vld [vmem:[%s19888_s1 + $0x578] sm:$0xff]   ;;  %v1908_v56 = vmax.bf16 %v15714_v63, %v1871_v23  ;;  %v2075_v37 = vshrl.u32 %v15956_v46, 16  ;;  %v1670_v62 = vld [vmem:[%s19889_s0 + $0xa4] sm:$0xf]  ;;  %v13723_v8 = vld [vmem:[#allocation2 + $0x210] sm:$0xff] }
 0x1bc   :  { %4945 = vmatprep.mubr.bf16.mxu0 %v13721_v42  ;;  %12557 = vmatprep.mubr.bf16.mxu1 %v13722_v16  ;;  %v15989_v15 = vadd.f32 %v15663_v5, %v11320_v51  ;;  %v2074_v33 = vsel %vm386_vm0, %v2069_v43, %v2073_v61  ;;  %v10242_v9 = vcombine.low %v1703_v35, %v1704_v45  ;;  %v1669_v19 = vld [vmem:[%s19889_s0 + $0x98] sm:$0xf]  ;;  %v13725_v35 = vld [vmem:[#allocation2 + $0x230] sm:$0xff]  ;;  %v16038_v23 = vld [vmem:[%s19888_s1 + $0x5c0] sm:$0xff]  }
 0x1bd   :  { %11671 = vmatprep.subr.bf16.mxu1 %v13487_v3  ;;  %11808 = vmatpush3.bf16.msra.mxu0 %v13496_v4  ;;  %v1907_v5 = vmax.bf16 %v15714_v63, %v1870_v29  ;;  %2194 = vst.msk [vmem:[#allocation2 + $0x3e0] sm:$0xff] %vm1837_vm2, %v2074_v33  ;;  %v2077_v46 = vor.u32 %v2075_v37, %v2073_v61  ;;  %v13726_v45 = vld [vmem:[#allocation2 + $0x2b0] sm:$0xff]  ;;  %v1872_v29 = vld [vmem:[%s19889_s0 + $0xc8] sm:$0xf] }
 0x1be   :  { %v11321_v14 = vpop.f32.mrb[100].mxu0  ;;  %11672 = vmatpush3.bf16.msra.mxu1 %v13488_v41  ;;  %11809 = vmatprep.subr.bf16.mxu0 %v13497_v38  ;;  %1843 = vst.msk [vmem:[#allocation2 + $0x3d8] sm:$0xff] %vm1837_vm2, %v10242_v9  ;;  %v1705_v43 = vmax.bf16 %v15714_v63, %v1669_v19  ;;  %v1873_v61 = vld [vmem:[%s19889_s0 + $0xd4] sm:$0xf]  ;;  %v1909_v33 = vmax.bf16 %v15714_v63, %v1872_v29  ;;  %v1672_v19 = vld [vmem:[%s19889_s0 + $0xbc] sm:$0xf] }
 0x1bf   :  { %v11322_v52 = vpop.f32.mrb[101].mxu0  ;;  %11673 = vmatprep.subr.bf16.mxu1 %v13489_v18  ;;  %v10262_v4 = vcombine.low %v1907_v5, %v1908_v56  ;;  %v13724_v18 = vld [vmem:[#allocation2 + $0x298] sm:$0xff] }
 0x1c0   :  { %v11323_v3 = vadd.f32 %v11322_v52, %v11321_v14  ;;  %v11324_v41 = vpop.f32.mrb[102].mxu0 }
 0x1c1   :  { %v11325_v53 = vpop.f32.mrb[103].mxu0  ;;  %11810 = vmatpush3.bf16.msra.mxu0 %v13498_v25  ;;  %v2079_v59 = vshll.u32 %v10262_v4, 16 }
 0x1c2   :  { %v11326_v51 = vadd.f32 %v11325_v53, %v11324_v41  ;;  %11674 = vmatpush3.bf16.msra.mxu1 %v13490_v11  ;;  %v16015_v38 = vadd.f32 %v15672_v32, %v11323_v3  ;;  %12621 = vmatprep.subr.bf16.mxu0 %v16008_v28  ;;  %v1706_v32 = vmax.bf16 %v15714_v63, %v1670_v62  ;;  %v2083_v41 = vshrl.u32 %v10262_v4, 16  ;;  %v13727_v62 = vld [vmem:[#allocation2 + $0x228] sm:$0xff] }
 0x1c3   :  { %4946 = vmatmul.mubr.bf16.gmra.mrb[208].mxu0 %v13723_v8  ;;  %12558 = vmatmul.mubr.bf16.gmra.mrb[112].mxu1 %v13724_v18  ;;  %v2081_v16 = vrot.slane %v2079_v59, 1  ;;  %v1671_v59 = vld [vmem:[%s19889_s0 + $0xb0] sm:$0xf]  ;;  %v13728_v8 = vld [vmem:[#allocation2 + $0x2c8] sm:$0xff] }
 0x1c4   :  { %4953 = vmatprep.mubr.bf16.mxu0 %v13725_v35  ;;  %12561 = vmatprep.mubr.bf16.mxu1 %v13726_v45  ;;  %v16027_v42 = vadd.f32 %v15682_v30, %v11326_v51  ;;  %v10243_v25 = vcombine.low %v1705_v43, %v1706_v32  ;;  %v1910_v30 = vmax.bf16 %v15714_v63, %v1873_v61  ;;  %v13730_v32 = vld [vmem:[#allocation2 + $0x2e0] sm:$0xff] }
 0x1c5   :  { %v2082_v5 = vsel %vm386_vm0, %v2077_v46, %v2081_v16  ;;  %12573 = vmatprep.subr.bf16.mxu1 %v16038_v23  ;;  %v2085_v18 = vor.u32 %v2083_v41, %v2081_v16  ;;  %v1707_v4 = vmax.bf16 %v15714_v63, %v1671_v59  ;;  %v1708_v43 = vmax.bf16 %v15714_v63, %v1672_v19  ;;  %v1874_v45 = vld [vmem:[%s19889_s0 + $0xe0] sm:$0xf]  ;;  %v1875_v16 = vld [vmem:[%s19889_s0 + $0xec] sm:$0xf]  ;;  %v1674_v59 = vld [vmem:[%s19889_s0 + $0xd4] sm:$0xf] }
 0x1c6   :  { %v11327_v9 = vpop.f32.mrb[104].mxu0  ;;  %2195 = vst.msk [vmem:[#allocation2 + $0x3f8] sm:$0xff] %vm1837_vm2, %v2082_v5  ;;  %1844 = vst.msk [vmem:[#allocation2 + $0x3f0] sm:$0xff] %vm1837_vm2, %v10243_v25  ;;  %v10263_v11 = vcombine.low %v1909_v33, %v1910_v30  ;;  %v1911_v25 = vmax.bf16 %v15714_v63, %v1874_v45  ;;  %v1912_v33 = vmax.bf16 %v15714_v63, %v1875_v16  ;;  %v13731_v19 = vld [vmem:[#allocation2 + $0x240] sm:$0xff] }
 0x1c7   :  { %v11328_v14 = vpop.f32.mrb[105].mxu0  ;;  %v10244_v61 = vcombine.low %v1707_v4, %v1708_v43  ;;  %v1710_v4 = vmax.bf16 %v15714_v63, %v1674_v59  ;;  %v13734_v43 = vld [vmem:[#allocation2 + $0x310] sm:$0xff]  ;;  %v1877_v45 = vld [vmem:[%s19889_s0 + $0x104] sm:$0xf] }
 0x1c8   :  { %v11329_v56 = vadd.f32 %v11328_v14, %v11327_v9  ;;  %v11330_v52 = vpop.f32.mrb[106].mxu0  ;;  %v2087_v53 = vshll.u32 %v10263_v11, 16  ;;  %v16071_v9 = vcombine.low %v1911_v25, %v1912_v33  ;;  %v1914_v33 = vmax.bf16 %v15714_v63, %v1877_v45 }
 0x1c9   :  { %v11331_v3 = vpop.f32.mrb[107].mxu0  ;;  %1845 = vst.msk [vmem:[#allocation2 + $0x408] sm:$0xff] %vm1837_vm2, %v10244_v61 }
 0x1ca   :  { %v11332_v37 = vadd.f32 %v11331_v3, %v11330_v52  ;;  %v16047_v51 = vadd.f32 %v15688_v54, %v11329_v56  ;;  %v2089_v46 = vrot.slane %v2087_v53, 1  ;;  %v13729_v54 = vld [vmem:[#allocation2 + $0x248] sm:$0xff]  ;;  %v2091_v52 = vshrl.u32 %v10263_v11, 16 }
 0x1cb   :  { %4954 = vmatmul.mubr.bf16.gmra.mrb[212].mxu0 %v13727_v62  ;;  %12562 = vmatmul.mubr.bf16.gmra.mrb[116].mxu1 %v13728_v8  ;;  %v2095_v3 = vshll.u32 %v16071_v9, 16  ;;  %v13732_v62 = vld [vmem:[#allocation2 + $0x2f8] sm:$0xff] }
 0x1cc   :  { %4961 = vmatprep.mubr.bf16.mxu0 %v13729_v54  ;;  %12565 = vmatprep.mubr.bf16.mxu1 %v13730_v32  ;;  %v16058_v35 = vadd.f32 %v15698_v6, %v11332_v37  ;;  %v2090_v29 = vsel %vm386_vm0, %v2085_v18, %v2089_v46  ;;  %v1673_v37 = vld [vmem:[%s19889_s0 + $0xc8] sm:$0xf]  ;;  %v2093_v8 = vor.u32 %v2091_v52, %v2089_v46  ;;  %v1047_v32 = vld [vmem:[%s19889_s0 + $0x1b4] sm:$0x1]  ;;  %v1876_v46 = vld [vmem:[%s19889_s0 + $0xf8] sm:$0xf] }
 0x1cd   :  { %2196 = vst.msk [vmem:[#allocation2 + $0x410] sm:$0xff] %vm1837_vm2, %v2090_v29  ;;  %v2097_v11 = vrot.slane %v2095_v3, 1  ;;  %v1709_v18 = vmax.bf16 %v15714_v63, %v1673_v37  ;;  %v1084_v16 = vmax.bf16 %v15714_v63, %v1047_v32  ;;  %v5204_v3 = vld [vmem:[#allocation2 + $0x1e8] sm:$0xff] }
 0x1ce   :  { %v11333_v30 = vpop.f32.mrb[108].mxu0  ;;  %v13736_v32 = vld [vmem:[#allocation2 + $0x328] sm:$0xff] }
 0x1cf   :  { %v11334_v6 = vpop.f32.mrb[109].mxu0  ;;  %v2098_v29 = vsel %vm386_vm0, %v2093_v8, %v2097_v11  ;;  %v10245_v61 = vcombine.low %v1709_v18, %v1710_v4  ;;  %v846_v18 = vld [vmem:[%s19889_s0 + $0x19c] sm:$0xf]  ;;  %v847_v4 = vld [vmem:[%s19889_s0 + $0x1a8] sm:$0xf] }
 0x1d0   :  { %v11335_v5 = vadd.f32 %v11334_v6, %v11333_v30  ;;  %v11336_v14 = vpop.f32.mrb[110].mxu0  ;;  %2197 = vst.msk [vmem:[#allocation2 + $0x428] sm:$0xff] %vm1837_vm2, %v2098_v29  ;;  %v10217_v6 = vcombine.low %v1084_v16, %v1084_v16  ;;  %v882_v16 = vmax.bf16 %v15714_v63, %v846_v18  ;;  %v1675_v29 = vld [vmem:[%s19889_s0 + $0xe0] sm:$0xf] }
 0x1d1   :  { %v11337_v56 = vpop.f32.mrb[111].mxu0  ;;  %1846 = vst.msk [vmem:[#allocation2 + $0x420] sm:$0xff] %vm1837_vm2, %v10245_v61  ;;  %v1676_v61 = vld [vmem:[%s19889_s0 + $0xec] sm:$0xf] }
 0x1d2   :  { %v11338_v41 = vadd.f32 %v11337_v56, %v11336_v14  ;;  %v16075_v53 = vadd.f32 %v15704_v60, %v11335_v5  ;;  %v13733_v60 = vld [vmem:[#allocation2 + $0x260] sm:$0xff]  ;;  %v1322_v59 = vshll.u32 %v10217_v6, 16  ;;  %v1711_v6 = vmax.bf16 %v15714_v63, %v1675_v29 }
 0x1d3   :  { %4962 = vmatmul.mubr.bf16.gmra.mrb[216].mxu0 %v13731_v19  ;;  %12566 = vmatmul.mubr.bf16.gmra.mrb[120].mxu1 %v13732_v62  ;;  %v2099_v19 = vshrl.u32 %v16071_v9, 16 }
 0x1d4   :  { %4969 = vmatprep.mubr.bf16.mxu0 %v13733_v60  ;;  %12569 = vmatprep.mubr.bf16.mxu1 %v13734_v43  ;;  %v16086_v54 = vadd.f32 %v15724_v24, %v11338_v41  ;;  %v1913_v24 = vmax.bf16 %v15714_v63, %v1876_v46  ;;  %v20091_v41 = vld [vmem:[#allocation3_spill] sm:$0xff]  ;;  %v13735_v43 = vld [vmem:[#allocation2 + $0x258] sm:$0xff]  ;;  %v1324_v9 = vrot.slane %v1322_v59, 1 }
 0x1d5   :  { %v1318_v37 = vshrl.u32 %v20091_v41, 16  ;;  %v20092_v46 = vld [vmem:[#allocation4_spill] sm:$0xff] }
 0x1d6   :  { %v11339_v25 = vpop.f32.mrb[112].mxu0  ;;  %v10265_v56 = vcombine.low %v1913_v24, %v1914_v33  ;;  %v13737_v24 = vld [vmem:[#allocation2 + $0x278] sm:$0xff]  ;;  %v2101_v33 = vor.u32 %v2099_v19, %v2097_v11 }
 0x1d7   :  { %v11340_v30 = vpop.f32.mrb[113].mxu0  ;;  %v1320_v45 = vor.u32 %v1318_v37, %v20092_v46  ;;  %v5207_v46 = vld [vmem:[#allocation2 + $0x200] sm:$0xff] }
 0x1d8   :  { %v11341_v5 = vadd.f32 %v11340_v30, %v11339_v25  ;;  %v11342_v14 = vpop.f32.mrb[114].mxu0  ;;  %v2103_v60 = vshll.u32 %v10265_v56, 16 }
 0x1d9   :  { %v11343_v52 = vpop.f32.mrb[115].mxu0 }
 0x1da   :  { %v11344_v62 = vadd.f32 %v11343_v52, %v11342_v14  ;;  %v16106_v8 = vadd.f32 %v15746_v10, %v11341_v5  ;;  %v883_v10 = vmax.bf16 %v15714_v63, %v847_v4  ;;  %v2105_v30 = vrot.slane %v2103_v60, 1  ;;  %v1878_v5 = vld [vmem:[%s19889_s0 + $0x110] sm:$0xf]  ;;  %v1879_v14 = vld [vmem:[%s19889_s0 + $0x11c] sm:$0xf]  ;;  %v5203_v60 = vld [vmem:[#allocation2 + $0x1e0] sm:$0xff] }
 0x1db   :  { %4970 = vmatmul.mubr.bf16.gmra.mrb[220].mxu0 %v13735_v43  ;;  %12570 = vmatmul.mubr.bf16.gmra.mrb[124].mxu1 %v13736_v32  ;;  %v1325_v52 = vsel %vm386_vm0, %v1320_v45, %v1324_v9  ;;  %v1916_v59 = vmax.bf16 %v15714_v63, %v1879_v14  ;;  %v2107_v45 = vshrl.u32 %v10265_v56, 16  ;;  %v1678_v56 = vld [vmem:[%s19889_s0 + $0x104] sm:$0xf] }
 0x1dc   :  { %4977 = vmatprep.mubr.bf16.mxu0 %v13737_v24  ;;  %5476 = vmatprep.mubr.bf16.mxu1 %v5204_v3  ;;  %v16124_v25 = vadd.f32 %v15759_v22, %v11344_v62  ;;  %v10198_v41 = vcombine.low %v882_v16, %v883_v10  ;;  %v1712_v3 = vmax.bf16 %v15714_v63, %v1676_v61  ;;  %v13503_v10 = vld [vmem:[%s19888_s1 + $0x5c8] sm:$0xff]   ;;  %v1677_v61 = vld [vmem:[%s19889_s0 + $0xf8] sm:$0xf]  ;;  %v13738_v24 = vld [vmem:[#allocation2 + $0x270] sm:$0xff] }
 0x1dd   :  { %v1915_v22 = vmax.bf16 %v15714_v63, %v1878_v5  ;;  %1361 = vst [vmem:[#allocation2 + $0x350] sm:$0xff] %v1325_v52  ;;  %v2106_v11 = vsel %vm386_vm0, %v2101_v33, %v2105_v30  ;;  %v2109_v33 = vor.u32 %v2107_v45, %v2105_v30  ;;  %v1714_v52 = vmax.bf16 %v15714_v63, %v1678_v56  ;;  %v1881_v30 = vld [vmem:[%s19889_s0 + $0x134] sm:$0xf] }
 0x1de   :  { %v11345_v37 = vpop.f32.mrb[116].mxu0  ;;  %1010 = vst [vmem:[#allocation2 + $0x348] sm:$0xff] %v10198_v41  ;;  %2198 = vst.msk [vmem:[#allocation2 + $0x440] sm:$0xff] %vm1837_vm2, %v2106_v11  ;;  %v10246_v62 = vcombine.low %v1711_v6, %v1712_v3  ;;  %v13739_v6 = vld [vmem:[#allocation2 + $0x290] sm:$0xff]  ;;  %v1880_v41 = vld [vmem:[%s19889_s0 + $0x128] sm:$0xf] }
 0x1df   :  { %v11346_v19 = vpop.f32.mrb[117].mxu0  ;;  %v10266_v43 = vcombine.low %v1915_v22, %v1916_v59  ;;  %v1917_v3 = vmax.bf16 %v15714_v63, %v1880_v41  ;;  %v1918_v22 = vmax.bf16 %v15714_v63, %v1881_v30  ;;  %v1882_v41 = vld [vmem:[%s19889_s0 + $0x140] sm:$0xf] }
 0x1e0   :  { %v11347_v18 = vadd.f32 %v11346_v19, %v11345_v37  ;;  %v11348_v4 = vpop.f32.mrb[118].mxu0  ;;  %1847 = vst.msk [vmem:[#allocation2 + $0x438] sm:$0xff] %vm1837_vm2, %v10246_v62 }
 0x1e1   :  { %v11349_v32 = vpop.f32.mrb[119].mxu0  ;;  %v2111_v29 = vshll.u32 %v10266_v43, 16  ;;  %v10267_v62 = vcombine.low %v1917_v3, %v1918_v22  ;;  %v1919_v3 = vmax.bf16 %v15714_v63, %v1882_v41  ;;  %v1884_v41 = vld [vmem:[%s19889_s0 + $0x158] sm:$0xf] }
 0x1e2   :  { %v11350_v9 = vadd.f32 %v11349_v32, %v11348_v4  ;;  %v16141_v16 = vadd.f32 %v15787_v47, %v11347_v18  ;;  %v1713_v47 = vmax.bf16 %v15714_v63, %v1677_v61  ;;  %v5210_v32 = vld [vmem:[#allocation2 + $0x218] sm:$0xff] }
 0x1e3   :  { %4978 = vmatmul.mubr.bf16.gmra.mrb[224].mxu0 %v13738_v24  ;;  %5477 = vmatmul.mubr.bf16.vlgmr.msra.gmra.mrb[128].mxu1 %v5203_v60  ;;  %v2113_v14 = vrot.slane %v2111_v29, 1  ;;  %v2119_v45 = vshll.u32 %v10267_v62, 16  ;;  %v13505_v61 = vld [vmem:[%s19888_s1 + $0x5d8] sm:$0xff]   ;;  %v1679_v24 = vld [vmem:[%s19889_s0 + $0x110] sm:$0xf] }
 0x1e4   :  { %4985 = vmatprep.mubr.bf16.mxu0 %v13739_v6  ;;  %5484 = vmatprep.mubr.bf16.mxu1 %v5207_v46  ;;  %v16154_v5 = vadd.f32 %v15811_v13, %v11350_v9  ;;  %v13504_v13 = vld [vmem:[%s19888_s1 + $0x5d0] sm:$0xff]   ;;  %v10247_v59 = vcombine.low %v1713_v47, %v1714_v52  ;;  %v2115_v46 = vshrl.u32 %v10266_v43, 16  ;;  %v1680_v43 = vld [vmem:[%s19889_s0 + $0x11c] sm:$0xf]  ;;  %v13741_v47 = vld [vmem:[#allocation2 + $0x2a8] sm:$0xff] }
 0x1e5   :  { %12574 = vmatpush3.bf16.msra.mxu1 %v16038_v23  ;;  %v2114_v11 = vsel %vm386_vm0, %v2109_v33, %v2113_v14  ;;  %v5206_v23 = vld [vmem:[#allocation2 + $0x1f8] sm:$0xff]  ;;  %v13740_v33 = vld [vmem:[#allocation2 + $0x288] sm:$0xff]  ;;  %v1716_v52 = vmax.bf16 %v15714_v63, %v1680_v43  ;;  %v1682_v43 = vld [vmem:[%s19889_s0 + $0x134] sm:$0xf] }
 0x1e6   :  { %v11351_v37 = vpop.f32.mrb[120].mxu0  ;;  %12575 = vmatprep.subr.bf16.mxu1 %v13503_v10  ;;  %2199 = vst.msk [vmem:[#allocation2 + $0x458] sm:$0xff] %vm1837_vm2, %v2114_v11  ;;  %1848 = vst.msk [vmem:[#allocation2 + $0x450] sm:$0xff] %vm1837_vm2, %v10247_v59  ;;  %v2117_v56 = vor.u32 %v2115_v46, %v2113_v14  ;;  %v1883_v14 = vld [vmem:[%s19889_s0 + $0x14c] sm:$0xf] }
 0x1e7   :  { %v11352_v19 = vpop.f32.mrb[121].mxu0  ;;  %v1920_v22 = vmax.bf16 %v15714_v63, %v1883_v14 }
 0x1e8   :  { %v11353_v18 = vadd.f32 %v11352_v19, %v11351_v37  ;;  %v11354_v4 = vpop.f32.mrb[122].mxu0 }
 0x1e9   :  { %v11355_v60 = vpop.f32.mrb[123].mxu0  ;;  %12576 = vmatpush3.bf16.msra.mxu1 %v13503_v10  ;;  %v2121_v10 = vrot.slane %v2119_v45, 1  ;;  %v16202_v19 = vcombine.low %v1919_v3, %v1920_v22 }
 0x1ea   :  { %v11356_v9 = vadd.f32 %v11355_v60, %v11354_v4  ;;  %v16173_v29 = vadd.f32 %v15851_v0, %v11353_v18  ;;  %12577 = vmatprep.subr.bf16.mxu1 %v13504_v13  ;;  %v1715_v0 = vmax.bf16 %v15714_v63, %v1679_v24  ;;  %v5209_v4 = vld [vmem:[#allocation2 + $0x210] sm:$0xff]  ;;  %v13508_v24 = vld [vmem:[%s19888_s1 + $0x5e8] sm:$0xff]  }
 0x1eb   :  { %4986 = vmatmul.mubr.bf16.gmra.mrb[228].mxu0 %v13740_v33  ;;  %5485 = vmatmul.mubr.bf16.gmra.mrb[132].mxu1 %v5206_v23  ;;  %v2122_v30 = vsel %vm386_vm0, %v2117_v56, %v2121_v10  ;;  %v5213_v60 = vld [vmem:[#allocation2 + $0x230] sm:$0xff]  ;;  %v2127_v46 = vshll.u32 %v16202_v19, 16  ;;  %v1681_v33 = vld [vmem:[%s19889_s0 + $0x128] sm:$0xf]  ;;  %v13742_v56 = vld [vmem:[#allocation2 + $0x2a0] sm:$0xff] }
 0x1ec   :  { %4993 = vmatprep.mubr.bf16.mxu0 %v13741_v47  ;;  %5492 = vmatprep.mubr.bf16.mxu1 %v5210_v32  ;;  %v16186_v6 = vadd.f32 %v15872_v55, %v11356_v9  ;;  %v13506_v55 = vld [vmem:[%s19888_s1 + $0x5e0] sm:$0xff]   ;;  %2200 = vst.msk [vmem:[#allocation2 + $0x470] sm:$0xff] %vm1837_vm2, %v2122_v30  ;;  %v10248_v11 = vcombine.low %v1715_v0, %v1716_v52  ;;  %v2123_v32 = vshrl.u32 %v10267_v62, 16 }
 0x1ed   :  { %12578 = vmatpush3.bf16.msra.mxu1 %v13504_v13  ;;  %v2129_v62 = vrot.slane %v2127_v46, 1  ;;  %v13743_v0 = vld [vmem:[#allocation2 + $0x2c0] sm:$0xff]  ;;  %v1718_v52 = vmax.bf16 %v15714_v63, %v1682_v43  ;;  %v1921_v30 = vmax.bf16 %v15714_v63, %v1884_v41  ;;  %v13510_v43 = vld [vmem:[%s19888_s1 + $0x5f8] sm:$0xff]  }
 0x1ee   :  { %v11357_v37 = vpop.f32.mrb[124].mxu0  ;;  %12579 = vmatprep.subr.bf16.mxu1 %v13505_v61  ;;  %1849 = vst.msk [vmem:[#allocation2 + $0x468] sm:$0xff] %vm1837_vm2, %v10248_v11  ;;  %v16266_v41 = vld [vmem:[#allocation2 + $0x360] sm:$0xff] }
 0x1ef   :  { %v11358_v59 = vpop.f32.mrb[125].mxu0 }
 0x1f0   :  { %v11359_v18 = vadd.f32 %v11358_v59, %v11357_v37  ;;  %v11360_v13 = vpop.f32.mrb[126].mxu0  ;;  %v13509_v37 = vld [vmem:[%s19888_s1 + $0x5f0] sm:$0xff]  }
 0x1f1   :  { %v11361_v23 = vpop.f32.mrb[127].mxu0  ;;  %12580 = vmatpush3.bf16.msra.mxu1 %v13505_v61  ;;  %v2125_v61 = vor.u32 %v2123_v32, %v2121_v10  ;;  %v1885_v10 = vld [vmem:[%s19889_s0 + $0x164] sm:$0xf]  ;;  %v5212_v32 = vld [vmem:[#allocation2 + $0x228] sm:$0xff] }
 0x1f2   :  { %v11362_v45 = vadd.f32 %v11361_v23, %v11360_v13  ;;  %v16207_v9 = vadd.f32 %v15925_v40, %v11359_v18  ;;  %12581 = vmatprep.subr.bf16.mxu1 %v13506_v55  ;;  %v1717_v40 = vmax.bf16 %v15714_v63, %v1681_v33  ;;  %v1922_v3 = vmax.bf16 %v15714_v63, %v1885_v10  ;;  %v5216_v33 = vld [vmem:[#allocation2 + $0x248] sm:$0xff] }
 0x1f3   :  { %4994 = vmatmul.mubr.bf16.gmra.mrb[232].mxu0 %v13742_v56  ;;  %5493 = vmatmul.mubr.bf16.gmra.mrb[136].mxu1 %v5209_v4  ;;  %v2130_v14 = vsel %vm386_vm0, %v2125_v61, %v2129_v62  ;;  %v2131_v56 = vshrl.u32 %v16202_v19, 16 }
 0x1f4   :  { %5001 = vmatprep.mubr.bf16.mxu0 %v13743_v0  ;;  %5500 = vmatprep.mubr.bf16.mxu1 %v5213_v60  ;;  %v16220_v47 = vadd.f32 %v15934_v2, %v11362_v45  ;;  %2201 = vst.msk [vmem:[#allocation2 + $0x488] sm:$0xff] %vm1837_vm2, %v2130_v14  ;;  %v10249_v11 = vcombine.low %v1717_v40, %v1718_v52  ;;  %v13744_v0 = vld [vmem:[#allocation2 + $0x2b8] sm:$0xff] }
 0x1f5   :  { %12582 = vmatpush3.bf16.msra.mxu1 %v13506_v55  ;;  %v16239_v13 = vcombine.low %v1921_v30, %v1922_v3  ;;  %v2133_v19 = vor.u32 %v2131_v56, %v2129_v62  ;;  %v1886_v30 = vld [vmem:[%s19889_s0 + $0x170] sm:$0xf]  ;;  %v1887_v62 = vld [vmem:[%s19889_s0 + $0x17c] sm:$0xf]  ;;  %v5215_v56 = vld [vmem:[#allocation2 + $0x240] sm:$0xff] }
 0x1f6   :  { %v12447_v22 = vpop.f32.mrb[0].mxu1  ;;  %v11403_v2 = vpop.f32.mrb[128].mxu0  ;;  %12583 = vmatprep.subr.bf16.mxu1 %v13508_v24  ;;  %1850 = vst.msk [vmem:[#allocation2 + $0x480] sm:$0xff] %vm1837_vm2, %v10249_v11  ;;  %v1923_v3 = vmax.bf16 %v16266_v41, %v1886_v30 }
 0x1f7   :  { %v16237_v59 = vadd.f32 %v15669_v27, %v12447_v22  ;;  %v3963_v55 = vpop.f32.mrb[1].mxu1  ;;  %v11404_v18 = vpop.f32.mrb[129].mxu0  ;;  %v2135_v40 = vshll.u32 %v16239_v13, 16 }
 0x1f8   :  { %v16242_v4 = vadd.f32 %v15650_v20, %v3963_v55  ;;  %v16244_v63 = vadd.f32 %v11404_v18, %v11403_v2  ;;  %v12448_v23 = vpop.f32.mrb[2].mxu1  ;;  %v11406_v60 = vpop.f32.mrb[130].mxu0  ;;  %v1924_v18 = vmax.bf16 %v16266_v41, %v1887_v62 }
 0x1f9   :  { %20093 = vst [vmem:[#allocation13_spill] sm:$0xff] %v16237_v59  ;;  %v16248_v46 = vadd.f32 %v15679_v57, %v12448_v23  ;;  %v3966_v45 = vpop.f32.mrb[3].mxu1  ;;  %v11407_v27 = vpop.f32.mrb[131].mxu0  ;;  %12584 = vmatpush3.bf16.msra.mxu1 %v13508_v24  ;;  %v1683_v57 = vld [vmem:[%s19889_s0 + $0x140] sm:$0xf]  ;;  %v13745_v24 = vld [vmem:[#allocation2 + $0x2d8] sm:$0xff] }
 0x1fa   :  { %20094 = vst [vmem:[#allocation7_spill] sm:$0xff] %v16242_v4  ;;  %v16252_v61 = vadd.f32 %v15660_v17, %v3966_v45  ;;  %v16254_v20 = vadd.f32 %v11407_v27, %v11406_v60  ;;  %12585 = vmatprep.subr.bf16.mxu1 %v13509_v37  ;;  %v1684_v17 = vld [vmem:[%s19889_s0 + $0x14c] sm:$0xf]  ;;  %v2137_v52 = vrot.slane %v2135_v40, 1  ;;  %v1719_v10 = vmax.bf16 %v16266_v41, %v1683_v57 }
 0x1fb   :  { %20095 = vst [vmem:[#allocation14_spill] sm:$0xff] %v16248_v46  ;;  %5002 = vmatmul.mubr.bf16.gmra.mrb[236].mxu0 %v13744_v0  ;;  %5501 = vmatmul.mubr.bf16.gmra.mrb[140].mxu1 %v5212_v32  ;;  %v1720_v14 = vmax.bf16 %v16266_v41, %v1684_v17  ;;  %v5219_v0 = vld [vmem:[#allocation2 + $0x260] sm:$0xff] }
 0x1fc   :  { %20096 = vst [vmem:[#allocation6_spill] sm:$0xff] %v16252_v61  ;;  %5009 = vmatprep.mubr.bf16.mxu0 %v13745_v24  ;;  %5508 = vmatprep.mubr.bf16.mxu1 %v5216_v33  ;;  %v2138_v11 = vsel %vm386_vm0, %v2133_v19, %v2137_v52  ;;  %v16292_v19 = vcombine.low %v1923_v3, %v1924_v18  ;;  %v13747_v24 = vld [vmem:[#allocation2 + $0x2d0] sm:$0xff]  ;;  %v5227_v61 = vld [vmem:[#allocation2 + $0x2a0] sm:$0xff] }
 0x1fd   :  { %12586 = vmatpush3.bf16.msra.mxu1 %v13509_v37  ;;  %v10250_v55 = vcombine.low %v1719_v10, %v1720_v14  ;;  %2202 = vst.msk [vmem:[#allocation2 + $0x4a0] sm:$0xff] %vm1837_vm2, %v2138_v11  ;;  %v13748_v10 = vld [vmem:[#allocation2 + $0x2f0] sm:$0xff]  ;;  %v2139_v14 = vshrl.u32 %v16239_v13, 16 }
 0x1fe   :  { %v12451_v22 = vpop.f32.mrb[4].mxu1  ;;  %v11409_v2 = vpop.f32.mrb[132].mxu0  ;;  %12587 = vmatprep.subr.bf16.mxu1 %v13510_v43 }
 0x1ff   :  { %v16280_v23 = vadd.f32 %v15701_v12, %v12451_v22  ;;  %v3979_v60 = vpop.f32.mrb[5].mxu1  ;;  %v11410_v32 = vpop.f32.mrb[133].mxu0  ;;  %1851 = vst.msk [vmem:[#allocation2 + $0x498] sm:$0xff] %vm1837_vm2, %v10250_v55 }
 0x200   :  { %v16284_v45 = vadd.f32 %v15685_v48, %v3979_v60  ;;  %v16286_v37 = vadd.f32 %v11410_v32, %v11409_v2  ;;  %v12452_v27 = vpop.f32.mrb[6].mxu1  ;;  %v11412_v33 = vpop.f32.mrb[134].mxu0  ;;  %v5218_v60 = vld [vmem:[#allocation2 + $0x258] sm:$0xff] }
 0x201   :  { %20097 = vst [vmem:[#allocation18_spill] sm:$0xff] %v16280_v23  ;;  %v16290_v40 = vadd.f32 %v15721_v36, %v12452_v27  ;;  %v3982_v57 = vpop.f32.mrb[7].mxu1  ;;  %v11413_v12 = vpop.f32.mrb[135].mxu0  ;;  %12588 = vmatpush3.bf16.msra.mxu1 %v13510_v43  ;;  %v13514_v36 = vld [vmem:[%s19888_s1 + $0x1c0] sm:$0xff]   ;;  %v2143_v43 = vshll.u32 %v16292_v19, 16  ;;  %v5222_v27 = vld [vmem:[#allocation2 + $0x278] sm:$0xff] }
 0x202   :  { %20098 = vst [vmem:[#allocation15_spill] sm:$0xff] %v16284_v45  ;;  %v16295_v17 = vadd.f32 %v15695_v39, %v3982_v57  ;;  %v16297_v48 = vadd.f32 %v11413_v12, %v11412_v33  ;;  %11931 = vmatprep.subr.bf16.mxu1 %v13514_v36  ;;  %v2141_v33 = vor.u32 %v2139_v14, %v2137_v52 }
 0x203   :  { %20099 = vst [vmem:[#allocation16_spill] sm:$0xff] %v16290_v40  ;;  %5010 = vmatmul.mubr.bf16.gmra.mrb[240].mxu0 %v13747_v24  ;;  %5509 = vmatmul.mubr.bf16.gmra.mrb[144].mxu1 %v5215_v56  ;;  %v16312_v56 = vrot.slane %v2143_v43, 1  ;;  %v2237_v40 = vld [vmem:[%s19889_s0 + $0x170] sm:$0xf] }
 0x204   :  { %20100 = vst [vmem:[#allocation8_spill] sm:$0xff] %v16295_v17  ;;  %5017 = vmatprep.mubr.bf16.mxu0 %v13748_v10  ;;  %5516 = vmatprep.mubr.bf16.mxu1 %v5219_v0  ;;  %v13750_v0 = vld [vmem:[#allocation2 + $0x308] sm:$0xff]  ;;  %v16822_v46 = vld [vmem:[#allocation2 + $0x4a0] sm:$0xff] }
 0x205   :  { %v2146_v24 = vsel %vm386_vm0, %v2141_v33, %v16312_v56  ;;  %20135 = vst [vmem:[#allocation42_spill] sm:$0xff] %v16822_v46 }
 0x206   :  { %v12455_v30 = vpop.f32.mrb[8].mxu1  ;;  %v11415_v62 = vpop.f32.mrb[136].mxu0  ;;  %2203 = vst.msk [vmem:[#allocation2 + $0x4b8] sm:$0xff] %vm1837_vm2, %v2146_v24 }
 0x207   :  { %v16305_v39 = vadd.f32 %v15784_v1, %v12455_v30  ;;  %v3995_v3 = vpop.f32.mrb[9].mxu1  ;;  %v11416_v22 = vpop.f32.mrb[137].mxu0 }
 0x208   :  { %v16308_v2 = vadd.f32 %v15737_v58, %v3995_v3  ;;  %v16310_v11 = vadd.f32 %v11416_v22, %v11415_v62  ;;  %v12456_v55 = vpop.f32.mrb[10].mxu1  ;;  %v11418_v18 = vpop.f32.mrb[138].mxu0  ;;  %v13749_v58 = vld [vmem:[#allocation2 + $0x2e8] sm:$0xff] }
 0x209   :  { %20101 = vst [vmem:[#allocation17_spill] sm:$0xff] %v16305_v39  ;;  %v3998_v32 = vpop.f32.mrb[11].mxu1  ;;  %v11419_v13 = vpop.f32.mrb[139].mxu0  ;;  %v16315_v57 = vadd.f32 %v15808_v50, %v12456_v55 }
 0x20a   :  { %20102 = vst [vmem:[#allocation9_spill] sm:$0xff] %v16308_v2  ;;  %v16318_v1 = vadd.f32 %v15756_v49, %v3998_v32  ;;  %v16320_v12 = vadd.f32 %v11419_v13, %v11418_v18  ;;  %v1685_v49 = vld [vmem:[%s19889_s0 + $0x158] sm:$0xf]  ;;  %v5221_v18 = vld [vmem:[#allocation2 + $0x270] sm:$0xff] }
 0x20b   :  { %20103 = vst [vmem:[#allocation20_spill] sm:$0xff] %v16315_v57  ;;  %5018 = vmatmul.mubr.bf16.gmra.mrb[244].mxu0 %v13749_v58  ;;  %5517 = vmatmul.mubr.bf16.gmra.mrb[148].mxu1 %v5218_v60  ;;  %v1686_v60 = vld [vmem:[%s19889_s0 + $0x164] sm:$0xf]  ;;  %v5225_v32 = vld [vmem:[#allocation2 + $0x290] sm:$0xff]  ;;  %v1721_v13 = vmax.bf16 %v16266_v41, %v1685_v49 }
 0x20c   :  { %20104 = vst [vmem:[#allocation22_spill] sm:$0xff] %v16318_v1  ;;  %5025 = vmatprep.mubr.bf16.mxu0 %v13750_v0  ;;  %5524 = vmatprep.mubr.bf16.mxu1 %v5222_v27  ;;  %v13751_v27 = vld [vmem:[#allocation2 + $0x300] sm:$0xff]  ;;  %v1722_v0 = vmax.bf16 %v16266_v41, %v1686_v60  ;;  %v5228_v60 = vld [vmem:[#allocation2 + $0x2a8] sm:$0xff]  ;;  %v5245_v1 = vld [vmem:[#allocation2 + $0x330] sm:$0xff] }
 0x20d   :  { %v13752_v58 = vld [vmem:[#allocation2 + $0x320] sm:$0xff] }
 0x20e   :  { %v12459_v52 = vpop.f32.mrb[12].mxu1  ;;  %v11421_v10 = vpop.f32.mrb[140].mxu0 }
 0x20f   :  { %v4011_v50 = vpop.f32.mrb[13].mxu1  ;;  %v11422_v36 = vpop.f32.mrb[141].mxu0  ;;  %v16329_v14 = vadd.f32 %v15910_v26, %v12459_v52 }
 0x210   :  { %v16332_v43 = vadd.f32 %v15848_v34, %v4011_v50  ;;  %v12460_v30 = vpop.f32.mrb[14].mxu1  ;;  %v11424_v62 = vpop.f32.mrb[142].mxu0  ;;  %v16334_v3 = vadd.f32 %v11422_v36, %v11421_v10  ;;  %v10251_v10 = vcombine.low %v1721_v13, %v1722_v0  ;;  %v13753_v13 = vld [vmem:[#allocation2 + $0x318] sm:$0xff] }
 0x211   :  { %20105 = vst [vmem:[#allocation19_spill] sm:$0xff] %v16329_v14  ;;  %v4014_v22 = vpop.f32.mrb[15].mxu1  ;;  %v11425_v55 = vpop.f32.mrb[143].mxu0  ;;  %v16341_v26 = vadd.f32 %v15931_v21, %v12460_v30 }
 0x212   :  { %20106 = vst [vmem:[#allocation10_spill] sm:$0xff] %v16332_v43  ;;  %v16344_v34 = vadd.f32 %v15869_v31, %v4014_v22  ;;  %v16346_v33 = vadd.f32 %v11425_v55, %v11424_v62  ;;  %1852 = vst.msk [vmem:[#allocation2 + $0x4b0] sm:$0xff] %vm1837_vm2, %v10251_v10  ;;  %v5224_v55 = vld [vmem:[#allocation2 + $0x288] sm:$0xff]  ;;  %v2224_v43 = vld [vmem:[%s19889_s0 + $0xd4] sm:$0xf] }
 0x213   :  { %20107 = vst [vmem:[#allocation21_spill] sm:$0xff] %v16341_v26  ;;  %5026 = vmatmul.mubr.bf16.gmra.mrb[248].mxu0 %v13751_v27  ;;  %5525 = vmatmul.mubr.bf16.gmra.mrb[152].mxu1 %v5221_v18  ;;  %v16570_v26 = vld [vmem:[#allocation2 + $0x410] sm:$0xff] }
 0x214   :  { %20108 = vst [vmem:[#allocation11_spill] sm:$0xff] %v16344_v34  ;;  %5033 = vmatprep.mubr.bf16.mxu0 %v13752_v58  ;;  %5532 = vmatprep.mubr.bf16.mxu1 %v5225_v32  ;;  %v5802_v32 = vld [vmem:[#allocation2 + $0x380] sm:$0xff] }
 0x216   :  { %v12463_v24 = vpop.f32.mrb[16].mxu1  ;;  %v11427_v52 = vpop.f32.mrb[144].mxu0 }
 0x217   :  { %v4027_v50 = vpop.f32.mrb[17].mxu1  ;;  %v11428_v36 = vpop.f32.mrb[145].mxu0  ;;  %v16351_v31 = vadd.f32 %v16015_v38, %v12463_v24 }
 0x218   :  { %v12464_v21 = vpop.f32.mrb[18].mxu1  ;;  %v11430_v49 = vpop.f32.mrb[146].mxu0  ;;  %v16354_v30 = vadd.f32 %v15974_v44, %v4027_v50  ;;  %v16356_v18 = vadd.f32 %v11428_v36, %v11427_v52 }
 0x219   :  { %20109 = vst [vmem:[#allocation23_spill] sm:$0xff] %v16351_v31  ;;  %v4030_v62 = vpop.f32.mrb[19].mxu1  ;;  %v11431_v22 = vpop.f32.mrb[147].mxu0  ;;  %v16359_v27 = vadd.f32 %v16027_v42, %v12464_v21 }
 0x21a   :  { %20110 = vst [vmem:[#allocation12_spill] sm:$0xff] %v16354_v30  ;;  %v16362_v58 = vadd.f32 %v15989_v15, %v4030_v62  ;;  %v16364_v38 = vadd.f32 %v11431_v22, %v11430_v49  ;;  %v5231_v15 = vld [vmem:[#allocation2 + $0x2c0] sm:$0xff]  ;;  %v5805_v62 = vld [vmem:[#allocation2 + $0x398] sm:$0xff]  ;;  %v13500_v49 = vld [vmem:[%s19888_s1 + $0x448] sm:$0xff]  }
 0x21b   :  { %5034 = vmatmul.mubr.bf16.gmra.mrb[252].mxu0 %v13753_v13  ;;  %20111 = vst [vmem:[#allocation3_spill] sm:$0xff] %v16359_v27  ;;  %5533 = vmatmul.mubr.bf16.gmra.mrb[156].mxu1 %v5224_v55  ;;  %v5801_v13 = vld [vmem:[#allocation2 + $0x378] sm:$0xff] }
 0x21c   :  { %20112 = vst [vmem:[#allocation4_spill] sm:$0xff] %v16362_v58  ;;  %5540 = vmatprep.mubr.bf16.mxu1 %v5228_v60  ;;  %6123 = vmatprep.mubr.bf16.mxu0 %v5802_v32  ;;  %v13502_v32 = vld [vmem:[%s19888_s1 + $0x450] sm:$0xff]   ;;  %v2217_v58 = vld [vmem:[%s19889_s0 + $0x80] sm:$0xf] }
 0x21e   :  { %v12467_v44 = vpop.f32.mrb[20].mxu1  ;;  %v11433_v0 = vpop.f32.mrb[148].mxu0 }
 0x21f   :  { %v16367_v24 = vadd.f32 %v16075_v53, %v12467_v44  ;;  %v4043_v52 = vpop.f32.mrb[21].mxu1  ;;  %v11434_v10 = vpop.f32.mrb[149].mxu0 }
 0x220   :  { %v12468_v50 = vpop.f32.mrb[22].mxu1  ;;  %v11436_v36 = vpop.f32.mrb[150].mxu0  ;;  %v16373_v22 = vadd.f32 %v16047_v51, %v4043_v52  ;;  %v16375_v53 = vadd.f32 %v11434_v10, %v11433_v0 }
 0x221   :  { %20113 = vst [vmem:[#allocation24_spill] sm:$0xff] %v16367_v24  ;;  %v4046_v42 = vpop.f32.mrb[23].mxu1  ;;  %v11437_v21 = vpop.f32.mrb[151].mxu0  ;;  %v16378_v55 = vadd.f32 %v16086_v54, %v12468_v50  ;;  %v5804_v50 = vld [vmem:[#allocation2 + $0x390] sm:$0xff] }
 0x222   :  { %20114 = vst [vmem:[#allocation25_spill] sm:$0xff] %v16373_v22  ;;  %v16382_v60 = vadd.f32 %v16058_v35, %v4046_v42  ;;  %v16387_v51 = vadd.f32 %v11437_v21, %v11436_v36  ;;  %v5230_v42 = vld [vmem:[#allocation2 + $0x2b8] sm:$0xff]  ;;  %v5243_v22 = vld [vmem:[#allocation2 + $0x320] sm:$0xff] }
 0x223   :  { %6124 = vmatmul.mubr.bf16.vlgmr.msra.gmra.mrb[0].mxu0 %v5801_v13  ;;  %20115 = vst [vmem:[#allocation26_spill] sm:$0xff] %v16378_v55  ;;  %5541 = vmatmul.mubr.bf16.gmra.mrb[160].mxu1 %v5227_v61  ;;  %v13507_v36 = vld [vmem:[%s19888_s1 + $0x458] sm:$0xff]  }
 0x224   :  { %12622 = vmatpush3.bf16.msra.mxu0 %v16008_v28  ;;  %20116 = vst [vmem:[#allocation27_spill] sm:$0xff] %v16382_v60  ;;  %5548 = vmatprep.mubr.bf16.mxu1 %v5231_v15  ;;  %v5234_v15 = vld [vmem:[#allocation2 + $0x2d8] sm:$0xff] }
 0x225   :  { %6131 = vmatprep.mubr.bf16.mxu0 %v5805_v62  ;;  %12623 = vmatprep.subr.bf16.mxu0 %v13500_v49  ;;  %v5808_v62 = vld [vmem:[#allocation2 + $0x3b0] sm:$0xff] }
 0x226   :  { %v12471_v44 = vpop.f32.mrb[24].mxu1  ;;  %v11439_v0 = vpop.f32.mrb[152].mxu0 }
 0x227   :  { %v4059_v52 = vpop.f32.mrb[25].mxu1  ;;  %v11440_v54 = vpop.f32.mrb[153].mxu0  ;;  %v16390_v28 = vadd.f32 %v16141_v16, %v12471_v44 }
 0x228   :  { %v12472_v10 = vpop.f32.mrb[26].mxu1  ;;  %v11442_v61 = vpop.f32.mrb[154].mxu0  ;;  %12624 = vmatpush3.bf16.msra.mxu0 %v13500_v49  ;;  %v16396_v21 = vadd.f32 %v16106_v8, %v4059_v52  ;;  %v16398_v4 = vadd.f32 %v11440_v54, %v11439_v0  ;;  %v13511_v8 = vld [vmem:[%s19888_s1 + $0x460] sm:$0xff]   ;;  %v5807_v52 = vld [vmem:[#allocation2 + $0x3a8] sm:$0xff] }
 0x229   :  { %20117 = vst [vmem:[#allocation28_spill] sm:$0xff] %v16390_v28  ;;  %v4062_v35 = vpop.f32.mrb[27].mxu1  ;;  %v11443_v13 = vpop.f32.mrb[155].mxu0  ;;  %12625 = vmatprep.subr.bf16.mxu0 %v13502_v32  ;;  %v16401_v16 = vadd.f32 %v16154_v5, %v12472_v10 }
 0x22a   :  { %20118 = vst [vmem:[#allocation29_spill] sm:$0xff] %v16396_v21  ;;  %v16404_v49 = vadd.f32 %v16124_v25, %v4062_v35  ;;  %v16406_v44 = vadd.f32 %v11443_v13, %v11442_v61  ;;  %v5233_v61 = vld [vmem:[#allocation2 + $0x2d0] sm:$0xff]  ;;  %v5811_v35 = vld [vmem:[#allocation2 + $0x3c8] sm:$0xff] }
 0x22b   :  { %6132 = vmatmul.mubr.bf16.gmra.mrb[4].mxu0 %v5804_v50  ;;  %5549 = vmatmul.mubr.bf16.gmra.mrb[164].mxu1 %v5230_v42  ;;  %20119 = vst [vmem:[#allocation30_spill] sm:$0xff] %v16401_v16  ;;  %v5237_v13 = vld [vmem:[#allocation2 + $0x2f0] sm:$0xff] }
 0x22c   :  { %20120 = vst [vmem:[#allocation31_spill] sm:$0xff] %v16404_v49  ;;  %5556 = vmatprep.mubr.bf16.mxu1 %v5234_v15  ;;  %6139 = vmatprep.mubr.bf16.mxu0 %v5808_v62  ;;  %v1889_v62 = vld [vmem:[%s19889_s0 + $0x194] sm:$0xf] }
 0x22d   :  { %12626 = vmatpush3.bf16.msra.mxu0 %v13502_v32  ;;  %v1888_v32 = vld [vmem:[%s19889_s0 + $0x188] sm:$0xf] }
 0x22e   :  { %v12475_v50 = vpop.f32.mrb[28].mxu1  ;;  %v11445_v28 = vpop.f32.mrb[156].mxu0  ;;  %12627 = vmatprep.subr.bf16.mxu0 %v13507_v36 }
 0x22f   :  { %v4075_v24 = vpop.f32.mrb[29].mxu1  ;;  %v11446_v55 = vpop.f32.mrb[157].mxu0  ;;  %v16412_v5 = vadd.f32 %v16207_v9, %v12475_v50  ;;  %v13512_v9 = vld [vmem:[%s19888_s1 + $0x468] sm:$0xff]  }
 0x230   :  { %v12476_v0 = vpop.f32.mrb[30].mxu1  ;;  %v11448_v25 = vpop.f32.mrb[158].mxu0  ;;  %v16418_v42 = vadd.f32 %v16173_v29, %v4075_v24  ;;  %v16420_v15 = vadd.f32 %v11446_v55, %v11445_v28  ;;  %v1925_v29 = vmax.bf16 %v16266_v41, %v1888_v32  ;;  %v1890_v32 = vld [vmem:[%s19889_s0 + $0x1a0] sm:$0xf] }
 0x231   :  { %20121 = vst [vmem:[#allocation32_spill] sm:$0xff] %v16412_v5  ;;  %v4078_v54 = vpop.f32.mrb[31].mxu1  ;;  %v11449_v10 = vpop.f32.mrb[159].mxu0  ;;  %12628 = vmatpush3.bf16.msra.mxu0 %v13507_v36  ;;  %v16429_v50 = vadd.f32 %v16220_v47, %v12476_v0  ;;  %v1926_v36 = vmax.bf16 %v16266_v41, %v1889_v62  ;;  %v13513_v47 = vld [vmem:[%s19888_s1 + $0x470] sm:$0xff]   ;;  %v5240_v62 = vld [vmem:[#allocation2 + $0x308] sm:$0xff] }
 0x232   :  { %20122 = vst [vmem:[#allocation33_spill] sm:$0xff] %v16418_v42  ;;  %12629 = vmatprep.subr.bf16.mxu0 %v13511_v8  ;;  %v16433_v24 = vadd.f32 %v16186_v6, %v4078_v54  ;;  %v16435_v55 = vadd.f32 %v11449_v10, %v11448_v25  ;;  %v1687_v6 = vld [vmem:[%s19889_s0 + $0x170] sm:$0xf]  ;;  %v5236_v54 = vld [vmem:[#allocation2 + $0x2e8] sm:$0xff]  ;;  %v5810_v10 = vld [vmem:[#allocation2 + $0x3c0] sm:$0xff] }
 0x233   :  { %6140 = vmatmul.mubr.bf16.gmra.mrb[8].mxu0 %v5807_v52  ;;  %20123 = vst [vmem:[#allocation34_spill] sm:$0xff] %v16429_v50  ;;  %5557 = vmatmul.mubr.bf16.gmra.mrb[168].mxu1 %v5233_v61  ;;  %v2147_v52 = vshrl.u32 %v16292_v19, 16  ;;  %v1688_v19 = vld [vmem:[%s19889_s0 + $0x17c] sm:$0xf]  ;;  %v1398_v50 = vld [vmem:[%s19889_s0 + $0x1b4] sm:$0x1] }
 0x234   :  { %6147 = vmatprep.mubr.bf16.mxu0 %v5811_v35  ;;  %20124 = vst [vmem:[#allocation35_spill] sm:$0xff] %v16433_v24  ;;  %5564 = vmatprep.mubr.bf16.mxu1 %v5237_v13  ;;  %v5814_v35 = vld [vmem:[#allocation2 + $0x3e0] sm:$0xff]  ;;  %v1891_v13 = vld [vmem:[%s19889_s0 + $0x1ac] sm:$0xf]  ;;  %v1724_v42 = vmax.bf16 %v16266_v41, %v1688_v19  ;;  %v1435_v24 = vmax.bf16 %v16266_v41, %v1398_v50 }
 0x235   :  { %12630 = vmatpush3.bf16.msra.mxu0 %v13511_v8  ;;  %v10271_v8 = vcombine.low %v1925_v29, %v1926_v36  ;;  %v2149_v29 = vor.u32 %v2147_v52, %v16312_v56  ;;  %v1723_v36 = vmax.bf16 %v16266_v41, %v1687_v6  ;;  %v1927_v52 = vmax.bf16 %v16266_v41, %v1890_v32  ;;  %v2209_v32 = vld [vmem:[%s19889_s0 + $0x20] sm:$0xf] }
 0x236   :  { %v11451_v28 = vpop.f32.mrb[160].mxu0  ;;  %12631 = vmatprep.subr.bf16.mxu0 %v13512_v9  ;;  %v1928_v6 = vmax.bf16 %v16266_v41, %v1891_v13  ;;  %v2210_v13 = vld [vmem:[%s19889_s0 + $0x2c] sm:$0xf]  ;;  %v10236_v50 = vcombine.low %v1435_v24, %v1435_v24  ;;  %v2213_v24 = vld [vmem:[%s19889_s0 + $0x50] sm:$0xf] }
 0x237   :  { %v11452_v5 = vpop.f32.mrb[161].mxu0  ;;  %v10252_v19 = vcombine.low %v1723_v36, %v1724_v42 }
 0x238   :  { %v16445_v0 = vadd.f32 %v11452_v5, %v11451_v28  ;;  %v11454_v25 = vpop.f32.mrb[162].mxu0  ;;  %v2151_v28 = vshll.u32 %v10271_v8, 16 }
 0x239   :  { %v11455_v61 = vpop.f32.mrb[163].mxu0  ;;  %12632 = vmatpush3.bf16.msra.mxu0 %v13512_v9  ;;  %v1689_v9 = vld [vmem:[%s19889_s0 + $0x188] sm:$0xf]  ;;  %1853 = vst.msk [vmem:[#allocation2 + $0x4c8] sm:$0xff] %vm1837_vm2, %v10252_v19  ;;  %v1564_v19 = vrot.slane %v10236_v50, 1 }
 0x23a   :  { %v16456_v5 = vadd.f32 %v11455_v61, %v11454_v25  ;;  %12633 = vmatprep.subr.bf16.mxu0 %v13513_v47  ;;  %v13522_v25 = vld [vmem:[%s19888_s1 + $0x478] sm:$0xff]   ;;  %v2153_v56 = vrot.slane %v2151_v28, 1  ;;  %v2155_v61 = vshrl.u32 %v10271_v8, 16  ;;  %v5239_v8 = vld [vmem:[#allocation2 + $0x300] sm:$0xff]  ;;  %v1856_v50 = vld [vmem:[%s19889_s0 + $0x8] sm:$0xf] }
 0x23b   :  { %6148 = vmatmul.mubr.bf16.gmra.mrb[12].mxu0 %v5810_v10  ;;  %5565 = vmatmul.mubr.bf16.gmra.mrb[172].mxu1 %v5236_v54  ;;  %v1690_v10 = vld [vmem:[%s19889_s0 + $0x194] sm:$0xf]  ;;  %v16477_v54 = vcombine.low %v1927_v52, %v1928_v6 }
 0x23c   :  { %6155 = vmatprep.mubr.bf16.mxu0 %v5814_v35  ;;  %5572 = vmatprep.mubr.bf16.mxu1 %v5240_v62  ;;  %v2154_v21 = vsel %vm386_vm0, %v2149_v29, %v2153_v56  ;;  %v1725_v35 = vmax.bf16 %v16266_v41, %v1689_v9  ;;  %v16486_v62 = vld [vmem:[#allocation2 + $0x3d8] sm:$0xff]  ;;  %v2157_v9 = vor.u32 %v2155_v61, %v2153_v56 }
 0x23d   :  { %12634 = vmatpush3.bf16.msra.mxu0 %v13513_v47  ;;  %20125 = vst [vmem:[#allocation36_spill] sm:$0xff] %v16477_v54  ;;  %2204 = vst.msk [vmem:[#allocation2 + $0x4d0] sm:$0xff] %vm1837_vm2, %v2154_v21  ;;  %v1726_v47 = vmax.bf16 %v16266_v41, %v1690_v10  ;;  %v2211_v29 = vld [vmem:[%s19889_s0 + $0x38] sm:$0xf]  ;;  %v2159_v52 = vshll.u32 %v16477_v54, 16  ;;  %v2246_v56 = vmax.bf16 %v16266_v41, %v2209_v32  ;;  %v20127_v32 = vld [vmem:[#allocation5_spill] sm:$0xff] }
 0x23e   :  { %v11457_v16 = vpop.f32.mrb[164].mxu0  ;;  %12635 = vmatprep.subr.bf16.mxu0 %v13522_v25  ;;  %v2212_v21 = vld [vmem:[%s19889_s0 + $0x44] sm:$0xf]  ;;  %v16503_v10 = vld [vmem:[#allocation2 + $0x3f8] sm:$0xff]  ;;  %v2247_v61 = vmax.bf16 %v16266_v41, %v2210_v13  ;;  %v20128_v13 = vrot.slane %v20127_v32, 1  ;;  %v1893_v32 = vmax.bf16 %v16266_v41, %v1856_v50 }
 0x23f   :  { %v11458_v42 = vpop.f32.mrb[165].mxu0  ;;  %v10253_v49 = vcombine.low %v1725_v35, %v1726_v47  ;;  %v16517_v31 = vrot.slane %v2159_v52, 1  ;;  %v2248_v35 = vmax.bf16 %v16266_v41, %v2211_v29  ;;  %v1857_v29 = vld [vmem:[%s19889_s0 + $0x14] sm:$0xf]  ;;  %v1657_v52 = vld [vmem:[%s19889_s0 + $0x8] sm:$0xf] }
 0x240   :  { %v16494_v28 = vadd.f32 %v11458_v42, %v11457_v16  ;;  %v11460_v36 = vpop.f32.mrb[166].mxu0  ;;  %v2214_v16 = vld [vmem:[%s19889_s0 + $0x5c] sm:$0xf]  ;;  %v16513_v42 = vld [vmem:[%s19888_s1 + $0x200] sm:$0xff]   ;;  %v16527_v47 = vsel %vm738_vm1, %v20128_v13, %v1564_v19 }
 0x241   :  { %v11461_v6 = vpop.f32.mrb[167].mxu0  ;;  %12636 = vmatpush3.bf16.msra.mxu0 %v13522_v25  ;;  %20126 = vst [vmem:[#allocation37_spill] sm:$0xff] %v16517_v31  ;;  %1854 = vst.msk [vmem:[#allocation2 + $0x4e0] sm:$0xff] %vm1837_vm2, %v10253_v49  ;;  %v2250_v25 = vmax.bf16 %v16266_v41, %v2213_v24  ;;  %v2251_v49 = vmax.bf16 %v16266_v41, %v2214_v16  ;;  %v16546_v24 = vcombine.low %v2246_v56, %v2247_v61  ;;  %v16557_v56 = vld [vmem:[#allocation2 + $0x3f0] sm:$0xff]  ;;  %v16843_v54 = vld [vmem:[#allocation2 + $0x4b8] sm:$0xff] }
 0x242   :  { %v16515_v60 = vadd.f32 %v11461_v6, %v11460_v36  ;;  %v2249_v36 = vmax.bf16 %v16266_v41, %v2212_v21  ;;  %v2162_v6 = vsel %vm386_vm0, %v2157_v9, %v16517_v31  ;;  %v1658_v21 = vld [vmem:[%s19889_s0 + $0x14] sm:$0xf]  ;;  %12669 = vmatprep.subr.bf16.mxu0 %v16513_v42  ;;  %v1894_v9 = vmax.bf16 %v16266_v41, %v1857_v29 }
 0x243   :  { %6156 = vmatmul.mubr.bf16.gmra.mrb[16].mxu0 %v16486_v62  ;;  %5573 = vmatmul.mubr.bf16.gmra.mrb[176].mxu1 %v5239_v8  ;;  %2205 = vst.msk [vmem:[#allocation2 + $0x4e8] sm:$0xff] %vm1837_vm2, %v2162_v6  ;;  %v16550_v13 = vcombine.low %v2250_v25, %v2251_v49  ;;  %v1693_v16 = vmax.bf16 %v16266_v41, %v1657_v52  ;;  %v5242_v6 = vld [vmem:[#allocation2 + $0x318] sm:$0xff]  ;;  %v19925_v61 = vrot.slane %v16546_v24, 1  ;;  %v2216_v52 = vld [vmem:[%s19889_s0 + $0x74] sm:$0xf]  ;;  %20137 = vst [vmem:[#allocation44_spill] sm:$0xff] %v16843_v54 }
 0x244   :  { %6163 = vmatprep.mubr.bf16.mxu0 %v16503_v10  ;;  %5580 = vmatprep.mubr.bf16.mxu1 %v5243_v22  ;;  %v10276_v19 = vcombine.low %v2248_v35, %v2249_v36  ;;  %v2215_v22 = vld [vmem:[%s19889_s0 + $0x68] sm:$0xf]  ;;  %v1694_v50 = vmax.bf16 %v16266_v41, %v1658_v21  ;;  %v10255_v49 = vcombine.low %v1893_v32, %v1894_v9  ;;  %v5246_v9 = vld [vmem:[#allocation2 + $0x338] sm:$0xff] }
 0x245   :  { %v2379_v29 = vrot.slane %v16550_v13, 1  ;;  %v2252_v32 = vmax.bf16 %v16266_v41, %v2215_v22 }
 0x246   :  { %v11463_v8 = vpop.f32.mrb[168].mxu0  ;;  %v2377_v35 = vrot.slane %v10276_v19, 1  ;;  %v10237_v21 = vcombine.low %v1693_v16, %v1694_v50  ;;  %v2218_v19 = vld [vmem:[%s19889_s0 + $0x8c] sm:$0xf]  ;;  %v2220_v16 = vld [vmem:[%s19889_s0 + $0xa4] sm:$0xf] }
 0x247   :  { %v11464_v27 = vpop.f32.mrb[169].mxu0  ;;  %v2024_v22 = vshrl.u32 %v10255_v49, 16  ;;  %v2026_v50 = vshll.u32 %v10255_v49, 16 }
 0x248   :  { %v16561_v36 = vadd.f32 %v11464_v27, %v11463_v8  ;;  %v11466_v25 = vpop.f32.mrb[170].mxu0  ;;  %v2378_v27 = vsel %vm738_vm1, %v19925_v61, %v2377_v35  ;;  %v2219_v8 = vld [vmem:[%s19889_s0 + $0x98] sm:$0xf]  ;;  %v2380_v14 = vsel %vm738_vm1, %v2377_v35, %v2379_v29  ;;  %1838 = vst.msk [vmem:[#allocation2 + $0x360] sm:$0xff] %vm1837_vm2, %v10237_v21  ;;  %v2221_v35 = vld [vmem:[%s19889_s0 + $0xb0] sm:$0xf]  ;;  %v2257_v61 = vmax.bf16 %v16266_v41, %v2220_v16 }
 0x249   :  { %v11467_v30 = vpop.f32.mrb[171].mxu0  ;;  %2430 = vst.msk [vmem:[#allocation2 + $0x388] sm:$0xff] %vm1837_vm2, %v2378_v27  ;;  %2431 = vst.msk [vmem:[#allocation2 + $0x3a0] sm:$0xff] %vm1837_vm2, %v2380_v14  ;;  %v2222_v27 = vld [vmem:[%s19889_s0 + $0xbc] sm:$0xf]  ;;  %v2255_v14 = vmax.bf16 %v16266_v41, %v2218_v19  ;;  %v2256_v49 = vmax.bf16 %v16266_v41, %v2219_v8  ;;  %v2258_v39 = vmax.bf16 %v16266_v41, %v2221_v35 }
 0x24a   :  { %v16582_v13 = vadd.f32 %v11467_v30, %v11466_v25  ;;  %v2253_v30 = vmax.bf16 %v16266_v41, %v2216_v52  ;;  %v2254_v25 = vmax.bf16 %v16266_v41, %v2217_v58  ;;  %v2223_v52 = vld [vmem:[%s19889_s0 + $0xc8] sm:$0xf]  ;;  %v2028_v58 = vrot.slane %v2026_v50, 1 }
 0x24b   :  { %6164 = vmatmul.mubr.bf16.gmra.mrb[20].mxu0 %v16557_v56  ;;  %5581 = vmatmul.mubr.bf16.gmra.mrb[180].mxu1 %v5242_v6  ;;  %v2259_v19 = vmax.bf16 %v16266_v41, %v2222_v27  ;;  %v10280_v45 = vcombine.low %v2256_v49, %v2257_v61  ;;  %v2261_v61 = vmax.bf16 %v16266_v41, %v2224_v43 }
 0x24c   :  { %6171 = vmatprep.mubr.bf16.mxu0 %v16570_v26  ;;  %5588 = vmatprep.mubr.bf16.mxu1 %v5246_v9  ;;  %v10278_v21 = vcombine.low %v2252_v32, %v2253_v30  ;;  %v10279_v34 = vcombine.low %v2254_v25, %v2255_v14  ;;  %v2029_v57 = vor.u32 %v2028_v58, %v2024_v22  ;;  %v2225_v32 = vld [vmem:[%s19889_s0 + $0xe0] sm:$0xf]  ;;  %v16618_v30 = vld [vmem:[#allocation2 + $0x408] sm:$0xff] }
 0x24d   :  { %v2260_v9 = vmax.bf16 %v16266_v41, %v2223_v52  ;;  %v16620_v25 = vld [vmem:[#allocation2 + $0x428] sm:$0xff]  ;;  %v10281_v27 = vcombine.low %v2258_v39, %v2259_v19  ;;  %v2385_v58 = vrot.slane %v10280_v45, 1  ;;  %v2228_v39 = vld [vmem:[%s19889_s0 + $0x104] sm:$0xf]  ;;  %v2229_v45 = vld [vmem:[%s19889_s0 + $0x110] sm:$0xf] }
 0x24e   :  { %v11469_v6 = vpop.f32.mrb[172].mxu0  ;;  %v2381_v2 = vrot.slane %v10278_v21, 1  ;;  %v2383_v35 = vrot.slane %v10279_v34, 1  ;;  %v2226_v22 = vld [vmem:[%s19889_s0 + $0xec] sm:$0xf]  ;;  %v2034_v49 = vsel %vm386_vm0, %v2029_v57, %v15734_v7  ;;  %v2262_v57 = vmax.bf16 %v16266_v41, %v2225_v32 }
 0x24f   :  { %v11470_v8 = vpop.f32.mrb[173].mxu0  ;;  %v2227_v21 = vld [vmem:[%s19889_s0 + $0xf8] sm:$0xf]  ;;  %2189 = vst.msk [vmem:[#allocation2 + $0x368] sm:$0xff] %vm1837_vm2, %v2034_v49  ;;  %v2387_v7 = vrot.slane %v10281_v27, 1  ;;  %v10282_v19 = vcombine.low %v2260_v9, %v2261_v61  ;;  %v13754_v61 = vld [vmem:[#allocation2 + $0x350] sm:$0xff]  ;;  %v2266_v49 = vmax.bf16 %v16266_v41, %v2229_v45 }
 0x250   :  { %v16616_v16 = vadd.f32 %v11470_v8, %v11469_v6  ;;  %v11472_v50 = vpop.f32.mrb[174].mxu0  ;;  %v2382_v52 = vsel %vm738_vm1, %v2379_v29, %v2381_v2  ;;  %v2384_v43 = vsel %vm738_vm1, %v2381_v2, %v2383_v35  ;;  %v2386_v29 = vsel %vm738_vm1, %v2383_v35, %v2385_v58  ;;  %v2230_v2 = vld [vmem:[%s19889_s0 + $0x11c] sm:$0xf]  ;;  %v2231_v8 = vld [vmem:[%s19889_s0 + $0x128] sm:$0xf] }
 0x251   :  { %v11473_v14 = vpop.f32.mrb[175].mxu0  ;;  %2432 = vst.msk [vmem:[#allocation2 + $0x3b8] sm:$0xff] %vm1837_vm2, %v2382_v52  ;;  %2433 = vst.msk [vmem:[#allocation2 + $0x3d0] sm:$0xff] %vm1837_vm2, %v2384_v43  ;;  %v2263_v6 = vmax.bf16 %v16266_v41, %v2226_v22  ;;  %v2232_v32 = vld [vmem:[%s19889_s0 + $0x134] sm:$0xf]  ;;  %v2264_v9 = vmax.bf16 %v16266_v41, %v2227_v21  ;;  %v2265_v35 = vmax.bf16 %v16266_v41, %v2228_v39 }
 0x252   :  { %v16635_v34 = vadd.f32 %v11473_v14, %v11472_v50  ;;  %v2388_v50 = vsel %vm738_vm1, %v2385_v58, %v2387_v7  ;;  %2434 = vst.msk [vmem:[#allocation2 + $0x3e8] sm:$0xff] %vm1837_vm2, %v2386_v29  ;;  %v2233_v27 = vld [vmem:[%s19889_s0 + $0x140] sm:$0xf]  ;;  %v2234_v22 = vld [vmem:[%s19889_s0 + $0x14c] sm:$0xf]  ;;  %v2389_v14 = vrot.slane %v10282_v19, 1  ;;  %v2267_v58 = vmax.bf16 %v16266_v41, %v2230_v2 }
 0x253   :  { %6172 = vmatmul.mubr.bf16.gmra.mrb[24].mxu0 %v16618_v30  ;;  %5589 = vmatmul.mubr.bf16.gmra.mrb[184].mxu1 %v5245_v1  ;;  %2435 = vst.msk [vmem:[#allocation2 + $0x400] sm:$0xff] %vm1837_vm2, %v2388_v50  ;;  %v10283_v1 = vcombine.low %v2262_v57, %v2263_v6  ;;  %v10284_v21 = vcombine.low %v2264_v9, %v2265_v35  ;;  %v2235_v29 = vld [vmem:[%s19889_s0 + $0x158] sm:$0xf]  ;;  %v2236_v50 = vld [vmem:[%s19889_s0 + $0x164] sm:$0xf]  ;;  %v5205_v35 = vld [vmem:[#allocation2 + $0x1f0] sm:$0xff] }
 0x254   :  { %6179 = vmatprep.mubr.bf16.mxu0 %v16620_v25  ;;  %5596 = vmatprep.mubr.bf16.mxu1 %v13754_v61  ;;  %v2268_v39 = vmax.bf16 %v16266_v41, %v2231_v8  ;;  %v2269_v43 = vmax.bf16 %v16266_v41, %v2232_v32  ;;  %v16679_v6 = vld [vmem:[#allocation2 + $0x420] sm:$0xff]  ;;  %v2390_v45 = vsel %vm738_vm1, %v2387_v7, %v2389_v14  ;;  %v2238_v7 = vld [vmem:[%s19889_s0 + $0x17c] sm:$0xf] }
 0x255   :  { %v2391_v19 = vrot.slane %v10283_v1, 1  ;;  %v2270_v2 = vmax.bf16 %v16266_v41, %v2233_v27  ;;  %v2271_v8 = vmax.bf16 %v16266_v41, %v2234_v22  ;;  %2436 = vst.msk [vmem:[#allocation2 + $0x418] sm:$0xff] %vm1837_vm2, %v2390_v45  ;;  %v10285_v61 = vcombine.low %v2266_v49, %v2267_v58  ;;  %v16693_v1 = vld [vmem:[#allocation2 + $0x440] sm:$0xff]  ;;  %v2239_v58 = vld [vmem:[%s19889_s0 + $0x188] sm:$0xf] }
 0x256   :  { %v11475_v52 = vpop.f32.mrb[176].mxu0  ;;  %v2393_v23 = vrot.slane %v10284_v21, 1  ;;  %v10286_v17 = vcombine.low %v2268_v39, %v2269_v43  ;;  %v2273_v49 = vmax.bf16 %v16266_v41, %v2236_v50  ;;  %v2240_v21 = vld [vmem:[%s19889_s0 + $0x194] sm:$0xf]  ;;  %v2242_v50 = vld [vmem:[%s19889_s0 + $0x1ac] sm:$0xf] }
 0x257   :  { %v11476_v57 = vpop.f32.mrb[177].mxu0  ;;  %v2392_v22 = vsel %vm738_vm1, %v2389_v14, %v2391_v19  ;;  %v2395_v14 = vrot.slane %v10285_v61, 1  ;;  %v2208_v61 = vld [vmem:[%s19889_s0 + $0x14] sm:$0xf] }
 0x258   :  { %v16684_v9 = vadd.f32 %v11476_v57, %v11475_v52  ;;  %v11478_v32 = vpop.f32.mrb[178].mxu0  ;;  %v10287_v52 = vcombine.low %v2270_v2, %v2271_v8  ;;  %v2272_v57 = vmax.bf16 %v16266_v41, %v2235_v29  ;;  %2437 = vst.msk [vmem:[#allocation2 + $0x430] sm:$0xff] %vm1837_vm2, %v2392_v22  ;;  %v2394_v43 = vsel %vm738_vm1, %v2391_v19, %v2393_v23  ;;  %v2241_v29 = vld [vmem:[%s19889_s0 + $0x1a0] sm:$0xf] }
 0x259   :  { %v11479_v27 = vpop.f32.mrb[179].mxu0  ;;  %v2397_v45 = vrot.slane %v10286_v17, 1  ;;  %2438 = vst.msk [vmem:[#allocation2 + $0x448] sm:$0xff] %vm1837_vm2, %v2394_v43  ;;  %v2274_v8 = vmax.bf16 %v16266_v41, %v2237_v40  ;;  %v2207_v17 = vld [vmem:[%s19889_s0 + $0x8] sm:$0xe]  ;;  %v2396_v22 = vsel %vm738_vm1, %v2393_v23, %v2395_v14  ;;  %v2276_v40 = vmax.bf16 %v16266_v41, %v2239_v58 }
 0x25a   :  { %v16704_v39 = vadd.f32 %v11479_v27, %v11478_v32  ;;  %v2399_v2 = vrot.slane %v10287_v52, 1  ;;  %v2275_v32 = vmax.bf16 %v16266_v41, %v2238_v7  ;;  %v10288_v19 = vcombine.low %v2272_v57, %v2273_v49  ;;  %v13755_v27 = vld [vmem:[#allocation2 + $0x348] sm:$0xff]  ;;  %2439 = vst.msk [vmem:[#allocation2 + $0x460] sm:$0xff] %vm1837_vm2, %v2396_v22 }
 0x25b   :  { %6180 = vmatmul.mubr.bf16.gmra.mrb[28].mxu0 %v16679_v6  ;;  %5597 = vmatmul.mubr.bf16.gmra.mrb[188].mxu1 %v13755_v27  ;;  %v2398_v52 = vsel %vm738_vm1, %v2395_v14, %v2397_v45  ;;  %v2277_v43 = vmax.bf16 %v16266_v41, %v2240_v21  ;;  %v2278_v23 = vmax.bf16 %v16266_v41, %v2241_v29  ;;  %v16740_v21 = vld [vmem:[#allocation2 + $0x438] sm:$0xff] }
 0x25c   :  { %6187 = vmatprep.mubr.bf16.mxu0 %v16693_v1  ;;  %12589 = vmatprep.mubr.bf16.mxu1 %v5205_v35  ;;  %v2400_v7 = vsel %vm738_vm1, %v2397_v45, %v2399_v2  ;;  %2440 = vst.msk [vmem:[#allocation2 + $0x478] sm:$0xff] %vm1837_vm2, %v2398_v52  ;;  %v10289_v57 = vcombine.low %v2274_v8, %v2275_v32  ;;  %v2401_v49 = vrot.slane %v10288_v19, 1 }
 0x25d   :  { %2441 = vst.msk [vmem:[#allocation2 + $0x490] sm:$0xff] %vm1837_vm2, %v2400_v7  ;;  %v2279_v14 = vmax.bf16 %v16266_v41, %v2242_v50  ;;  %v2244_v58 = vmax.bf16 %v16266_v41, %v2207_v17  ;;  %v2245_v35 = vmax.bf16 %v16266_v41, %v2208_v61  ;;  %v10290_v52 = vcombine.low %v2276_v40, %v2277_v43  ;;  %v5208_v7 = vld [vmem:[#allocation2 + $0x208] sm:$0xff]  ;;  %v16745_v17 = vld [vmem:[#allocation2 + $0x458] sm:$0xff]  ;;  %v13515_v41 = vld [vmem:[%s19888_s1 + $0x180] sm:$0xff]  }
 0x25e   :  { %v11481_v27 = vpop.f32.mrb[180].mxu0  ;;  %v2402_v45 = vsel %vm738_vm1, %v2399_v2, %v2401_v49  ;;  %v2403_v59 = vrot.slane %v10289_v57, 1  ;;  %v5211_v57 = vld [vmem:[#allocation2 + $0x220] sm:$0xff]  ;;  %v13516_v43 = vld [vmem:[%s19888_s1 + $0x1c8] sm:$0xff]  }
 0x25f   :  { %v11482_v22 = vpop.f32.mrb[181].mxu0  ;;  %2442 = vst.msk [vmem:[#allocation2 + $0x4a8] sm:$0xff] %vm1837_vm2, %v2402_v45  ;;  %v16743_v19 = vcombine.low %v2278_v23, %v2279_v14  ;;  %v10274_v29 = vcombine.low %v2244_v58, %v2245_v35  ;;  %v2405_v61 = vrot.slane %v10290_v52, 1  ;;  %v20130_v58 = vrot.slane %v16546_v24, 1  ;;  %v13518_v45 = vld [vmem:[%s19888_s1 + $0x1d0] sm:$0xff]  }
 0x260   :  { %v16738_v8 = vadd.f32 %v11482_v22, %v11481_v27  ;;  %v11484_v32 = vpop.f32.mrb[182].mxu0  ;;  %v2404_v2 = vsel %vm738_vm1, %v2401_v49, %v2403_v59  ;;  %v13517_v22 = vld [vmem:[%s19888_s1 + $0x188] sm:$0xff]  }
 0x261   :  { %20129 = vst [vmem:[#allocation5_spill] sm:$0xff] %v16743_v19  ;;  %v11485_v50 = vpop.f32.mrb[183].mxu0  ;;  %2443 = vst.msk [vmem:[#allocation2 + $0x4c0] sm:$0xff] %vm1837_vm2, %v2404_v2  ;;  %v19937_v27 = vrot.slane %v16743_v19, 1  ;;  %v2374_v23 = vrot.slane %v10274_v29, 1  ;;  %v2406_v14 = vsel %vm738_vm1, %v2403_v59, %v2405_v61  ;;  %v16778_v29 = vld [vmem:[#allocation2 + $0x450] sm:$0xff] }
 0x262   :  { %v16751_v40 = vadd.f32 %v11485_v50, %v11484_v32  ;;  %2444 = vst.msk [vmem:[#allocation2 + $0x4d8] sm:$0xff] %vm1837_vm2, %v2406_v14  ;;  %v13519_v2 = vld [vmem:[%s19888_s1 + $0x190] sm:$0xff]   ;;  %v13529_v19 = vld [vmem:[%s19888_s1 + $0x1f8] sm:$0xff]  }
 0x263   :  { %6188 = vmatmul.mubr.bf16.gmra.mrb[32].mxu0 %v16740_v21  ;;  %12590 = vmatmul.mubr.bf16.vlgmr.msra.gmra.mrb[96].mxu1 %v5208_v7  ;;  %v2408_v49 = vsel %vm738_vm1, %v2405_v61, %v19937_v27  ;;  %v2376_v35 = vsel %vm738_vm1, %v2374_v23, %v20130_v58  ;;  %v5214_v7 = vld [vmem:[#allocation2 + $0x238] sm:$0xff] }
 0x264   :  { %6195 = vmatprep.mubr.bf16.mxu0 %v16745_v17  ;;  %12593 = vmatprep.mubr.bf16.mxu1 %v5211_v57  ;;  %2445 = vst.msk [vmem:[#allocation2 + $0x4f0] sm:$0xff] %vm1837_vm2, %v2408_v49  ;;  %2429 = vst.msk [vmem:[#allocation2 + $0x370] sm:$0xff] %vm1837_vm2, %v2376_v35  ;;  %v5217_v57 = vld [vmem:[#allocation2 + $0x250] sm:$0xff]  ;;  %v13521_v23 = vld [vmem:[%s19888_s1 + $0x198] sm:$0xff]  }
 0x265   :  { %11932 = vmatpush3.bf16.msra.mxu1 %v13515_v41  ;;  %v16780_v41 = vld [vmem:[#allocation2 + $0x470] sm:$0xff]  ;;  %v13523_v49 = vld [vmem:[%s19888_s1 + $0x1e0] sm:$0xff]   ;;  %v5226_v27 = vld [vmem:[#allocation2 + $0x298] sm:$0xff] }
 0x266   :  { %v11487_v59 = vpop.f32.mrb[184].mxu0  ;;  %11933 = vmatprep.subr.bf16.mxu1 %v13516_v43  ;;  %20131 = vst [vmem:[#allocation38_spill] sm:$0xff] %v16780_v41  ;;  %v13520_v43 = vld [vmem:[%s19888_s1 + $0x1d8] sm:$0xff]  }
 0x267   :  { %v11488_v52 = vpop.f32.mrb[185].mxu0 }
 0x268   :  { %v16776_v24 = vadd.f32 %v11488_v52, %v11487_v59  ;;  %v11490_v32 = vpop.f32.mrb[186].mxu0  ;;  %v16800_v59 = vld [vmem:[#allocation2 + $0x468] sm:$0xff] }
 0x269   :  { %v11491_v50 = vpop.f32.mrb[187].mxu0  ;;  %11934 = vmatpush3.bf16.msra.mxu1 %v13517_v22  ;;  %20132 = vst [vmem:[#allocation39_spill] sm:$0xff] %v16800_v59  ;;  %v5220_v52 = vld [vmem:[#allocation2 + $0x268] sm:$0xff] }
 0x26a   :  { %v16785_v61 = vadd.f32 %v11491_v50, %v11490_v32  ;;  %11935 = vmatprep.subr.bf16.mxu1 %v13518_v45  ;;  %v16802_v32 = vld [vmem:[#allocation2 + $0x488] sm:$0xff]  ;;  %v13524_v50 = vld [vmem:[%s19888_s1 + $0x1a0] sm:$0xff]  }
 0x26b   :  { %6196 = vmatmul.mubr.bf16.gmra.mrb[36].mxu0 %v16778_v29  ;;  %12594 = vmatmul.mubr.bf16.gmra.mrb[100].mxu1 %v5214_v7  ;;  %20133 = vst [vmem:[#allocation40_spill] sm:$0xff] %v16802_v32 }
 0x26c   :  { %6203 = vmatprep.mubr.bf16.mxu0 %v16780_v41  ;;  %12597 = vmatprep.mubr.bf16.mxu1 %v5217_v57  ;;  %v13525_v57 = vld [vmem:[%s19888_s1 + $0x1e8] sm:$0xff]  }
 0x26d   :  { %11936 = vmatpush3.bf16.msra.mxu1 %v13519_v2  ;;  %v5223_v2 = vld [vmem:[#allocation2 + $0x280] sm:$0xff] }
 0x26e   :  { %v11493_v14 = vpop.f32.mrb[188].mxu0  ;;  %11937 = vmatprep.subr.bf16.mxu1 %v13520_v43  ;;  %v13526_v43 = vld [vmem:[%s19888_s1 + $0x1a8] sm:$0xff]  }
 0x26f   :  { %v11494_v58 = vpop.f32.mrb[189].mxu0 }
 0x270   :  { %v16798_v35 = vadd.f32 %v11494_v58, %v11493_v14  ;;  %v11496_v22 = vpop.f32.mrb[190].mxu0  ;;  %v13527_v14 = vld [vmem:[%s19888_s1 + $0x1f0] sm:$0xff]  }
 0x271   :  { %v11497_v45 = vpop.f32.mrb[191].mxu0  ;;  %11938 = vmatpush3.bf16.msra.mxu1 %v13521_v23 }
 0x272   :  { %v16807_v7 = vadd.f32 %v11497_v45, %v11496_v22  ;;  %11939 = vmatprep.subr.bf16.mxu1 %v13523_v49  ;;  %v16820_v45 = vld [vmem:[#allocation2 + $0x480] sm:$0xff] }
 0x273   :  { %6204 = vmatmul.mubr.bf16.gmra.mrb[40].mxu0 %v16800_v59  ;;  %12598 = vmatmul.mubr.bf16.gmra.mrb[104].mxu1 %v5220_v52  ;;  %20134 = vst [vmem:[#allocation41_spill] sm:$0xff] %v16820_v45 }
 0x274   :  { %6211 = vmatprep.mubr.bf16.mxu0 %v16802_v32  ;;  %12601 = vmatprep.mubr.bf16.mxu1 %v5223_v2  ;;  %v16874_v32 = vld [vmem:[#allocation2 + $0x388] sm:$0xff] }
 0x275   :  { %11940 = vmatpush3.bf16.msra.mxu1 %v13524_v50  ;;  %v13528_v50 = vld [vmem:[%s19888_s1 + $0x1b0] sm:$0xff]  }
 0x276   :  { %v11539_v23 = vpop.f32.mrb[192].mxu0  ;;  %11941 = vmatprep.subr.bf16.mxu1 %v13525_v57  ;;  %v5229_v57 = vld [vmem:[#allocation2 + $0x2b0] sm:$0xff] }
 0x277   :  { %v11540_v49 = vpop.f32.mrb[193].mxu0 }
 0x278   :  { %v11541_v58 = vadd.f32 %v11540_v49, %v11539_v23  ;;  %v11542_v22 = vpop.f32.mrb[194].mxu0 }
 0x279   :  { %v11543_v52 = vpop.f32.mrb[195].mxu0  ;;  %11942 = vmatpush3.bf16.msra.mxu1 %v13526_v43 }
 0x27a   :  { %v11544_v2 = vadd.f32 %v11543_v52, %v11542_v22  ;;  %11943 = vmatprep.subr.bf16.mxu1 %v13527_v14  ;;  %v16831_v23 = vadd.f32 %v11541_v58, %v16244_v63  ;;  %v13530_v14 = vld [vmem:[%s19888_s1 + $0x1b8] sm:$0xff]  }
 0x27b   :  { %6212 = vmatmul.mubr.bf16.gmra.mrb[44].mxu0 %v16820_v45  ;;  %12602 = vmatmul.mubr.bf16.gmra.mrb[108].mxu1 %v5226_v27  ;;  %v16841_v58 = vld [vmem:[#allocation2 + $0x498] sm:$0xff]  ;;  %v5232_v27 = vld [vmem:[#allocation2 + $0x2c8] sm:$0xff]  ;;  %v16853_v45 = vld [vmem:[#allocation2 + $0x4b0] sm:$0xff] }
 0x27c   :  { %6219 = vmatprep.mubr.bf16.mxu0 %v16822_v46  ;;  %v16836_v43 = vadd.f32 %v11544_v2, %v16254_v20  ;;  %12605 = vmatprep.mubr.bf16.mxu1 %v5229_v57  ;;  %20136 = vst [vmem:[#allocation43_spill] sm:$0xff] %v16841_v58  ;;  %v5235_v2 = vld [vmem:[#allocation2 + $0x2e0] sm:$0xff]  ;;  %20138 = vst [vmem:[#allocation45_spill] sm:$0xff] %v16853_v45 }
 0x27d   :  { %11944 = vmatpush3.bf16.msra.mxu1 %v13528_v50 }
 0x27e   :  { %v11545_v49 = vpop.f32.mrb[196].mxu0  ;;  %11945 = vmatprep.subr.bf16.mxu1 %v13529_v19 }
 0x27f   :  { %v11546_v22 = vpop.f32.mrb[197].mxu0 }
 0x280   :  { %v11547_v52 = vadd.f32 %v11546_v22, %v11545_v49  ;;  %v11548_v63 = vpop.f32.mrb[198].mxu0 }
 0x281   :  { %v11549_v31 = vpop.f32.mrb[199].mxu0  ;;  %11946 = vmatpush3.bf16.msra.mxu1 %v13530_v14  ;;  %v5238_v14 = vld [vmem:[#allocation2 + $0x2f8] sm:$0xff] }
 0x282   :  { %v11550_v20 = vadd.f32 %v11549_v31, %v11548_v63  ;;  %v16846_v50 = vadd.f32 %v11547_v52, %v16286_v37  ;;  %v16855_v63 = vld [vmem:[#allocation2 + $0x4d0] sm:$0xff] }
 0x283   :  { %6220 = vmatmul.mubr.bf16.gmra.mrb[48].mxu0 %v16841_v58  ;;  %12606 = vmatmul.mubr.bf16.gmra.mrb[112].mxu1 %v5232_v27  ;;  %20139 = vst [vmem:[#allocation46_spill] sm:$0xff] %v16855_v63  ;;  %v5241_v52 = vld [vmem:[#allocation2 + $0x310] sm:$0xff]  ;;  %v5896_v58 = vld [vmem:[#allocation2 + $0x4e8] sm:$0xff] }
 0x284   :  { %6227 = vmatprep.mubr.bf16.mxu0 %v16843_v54  ;;  %v16851_v19 = vadd.f32 %v11550_v20, %v16297_v48  ;;  %12609 = vmatprep.mubr.bf16.mxu1 %v5235_v2  ;;  %v16865_v54 = vld [vmem:[#allocation2 + $0x4c8] sm:$0xff] }
 0x285   :  { %20140 = vst [vmem:[#allocation47_spill] sm:$0xff] %v16865_v54 }
 0x286   :  { %v11551_v57 = vpop.f32.mrb[200].mxu0 }
 0x287   :  { %v11552_v49 = vpop.f32.mrb[201].mxu0 }
 0x288   :  { %v11553_v22 = vadd.f32 %v11552_v49, %v11551_v57  ;;  %v11554_v46 = vpop.f32.mrb[202].mxu0 }
 0x289   :  { %v11555_v31 = vpop.f32.mrb[203].mxu0 }
 0x28a   :  { %v11556_v37 = vadd.f32 %v11555_v31, %v11554_v46  ;;  %v16858_v27 = vadd.f32 %v11553_v22, %v16310_v11  ;;  %v5244_v31 = vld [vmem:[#allocation2 + $0x328] sm:$0xff]  ;;  %v5247_v22 = vld [vmem:[#allocation2 + $0x340] sm:$0xff] }
 0x28b   :  { %6228 = vmatmul.mubr.bf16.gmra.mrb[52].mxu0 %v16853_v45  ;;  %12610 = vmatmul.mubr.bf16.gmra.mrb[116].mxu1 %v5238_v14 }
 0x28c   :  { %6235 = vmatprep.mubr.bf16.mxu0 %v16855_v63  ;;  %v16863_v48 = vadd.f32 %v11556_v37, %v16320_v12  ;;  %12613 = vmatprep.mubr.bf16.mxu1 %v5241_v52 }
 0x28e   :  { %v11557_v20 = vpop.f32.mrb[204].mxu0 }
 0x28f   :  { %v11558_v2 = vpop.f32.mrb[205].mxu0 }
 0x290   :  { %v11559_v57 = vadd.f32 %v11558_v2, %v11557_v20  ;;  %v11560_v49 = vpop.f32.mrb[206].mxu0  ;;  %v5895_v2 = vld [vmem:[#allocation2 + $0x4e0] sm:$0xff] }
 0x291   :  { %v11561_v46 = vpop.f32.mrb[207].mxu0 }
 0x292   :  { %v11562_v11 = vadd.f32 %v11561_v46, %v11560_v49  ;;  %v16868_v45 = vadd.f32 %v11559_v57, %v16334_v3  ;;  %v5799_v46 = vld [vmem:[#allocation2 + $0x368] sm:$0xff] }
 0x293   :  { %6236 = vmatmul.mubr.bf16.gmra.mrb[56].mxu0 %v16865_v54  ;;  %12614 = vmatmul.mubr.bf16.gmra.mrb[120].mxu1 %v5244_v31 }
 0x294   :  { %6243 = vmatprep.mubr.bf16.mxu0 %v5896_v58  ;;  %v16872_v12 = vadd.f32 %v11562_v11, %v16346_v33  ;;  %12617 = vmatprep.mubr.bf16.mxu1 %v5247_v22  ;;  %v16884_v22 = vld [vmem:[#allocation2 + $0x3a0] sm:$0xff] }
 0x296   :  { %v11563_v14 = vpop.f32.mrb[208].mxu0 }
 0x297   :  { %v11564_v37 = vpop.f32.mrb[209].mxu0 }
 0x298   :  { %v11565_v52 = vadd.f32 %v11564_v37, %v11563_v14  ;;  %v11566_v20 = vpop.f32.mrb[210].mxu0  ;;  %v5798_v14 = vld [vmem:[#allocation2 + $0x360] sm:$0xff] }
 0x299   :  { %v11567_v63 = vpop.f32.mrb[211].mxu0 }
 0x29a   :  { %v11568_v49 = vadd.f32 %v11567_v63, %v11566_v20  ;;  %v16877_v3 = vadd.f32 %v11565_v52, %v16356_v18  ;;  %v16886_v18 = vld [vmem:[#allocation2 + $0x3b8] sm:$0xff]  ;;  %v13756_v20 = vld [vmem:[#allocation2 + $0x380] sm:$0xff] }
 0x29b   :  { %6244 = vmatmul.mubr.bf16.gmra.mrb[60].mxu0 %v5895_v2  ;;  %12618 = vmatmul.mubr.bf16.gmra.mrb[124].mxu1 %v16527_v47  ;;  %v13532_v47 = vld [vmem:[%s19888_s1 + $0x208] sm:$0xff]   ;;  %v13533_v2 = vld [vmem:[%s19888_s1 + $0x210] sm:$0xff]  }
 0x29c   :  { %12637 = vmatprep.mubr.bf16.mxu0 %v16874_v32  ;;  %v16882_v33 = vadd.f32 %v11568_v49, %v16364_v38  ;;  %6589 = vmatprep.mubr.bf16.mxu1 %v5799_v46 }
 0x29e   :  { %v11569_v58 = vpop.f32.mrb[212].mxu0 }
 0x29f   :  { %v11570_v57 = vpop.f32.mrb[213].mxu0 }
 0x2a0   :  { %v11571_v31 = vadd.f32 %v11570_v57, %v11569_v58  ;;  %v11572_v11 = vpop.f32.mrb[214].mxu0  ;;  %v16903_v57 = vld [vmem:[#allocation2 + $0x3d0] sm:$0xff] }
 0x2a1   :  { %v11573_v63 = vpop.f32.mrb[215].mxu0 }
 0x2a2   :  { %v11574_v37 = vadd.f32 %v11573_v63, %v11572_v11  ;;  %v16892_v52 = vadd.f32 %v11571_v31, %v16375_v53  ;;  %v16905_v31 = vld [vmem:[#allocation2 + $0x3e8] sm:$0xff]  ;;  %v13534_v11 = vld [vmem:[%s19888_s1 + $0x218] sm:$0xff]  }
 0x2a3   :  { %12638 = vmatmul.mubr.bf16.vlgmr.msra.gmra.mrb[64].mxu0 %v16884_v22  ;;  %6590 = vmatmul.mubr.bf16.vlgmr.msra.gmra.mrb[192].mxu1 %v5798_v14  ;;  %v13757_v14 = vld [vmem:[#allocation2 + $0x378] sm:$0xff] }
 0x2a4   :  { %12670 = vmatpush3.bf16.msra.mxu0 %v16513_v42  ;;  %v16897_v38 = vadd.f32 %v11574_v37, %v16387_v51  ;;  %12641 = vmatprep.mubr.bf16.mxu0 %v16886_v18 }
 0x2a5   :  { %6597 = vmatprep.mubr.bf16.mxu1 %v13756_v20  ;;  %12671 = vmatprep.subr.bf16.mxu0 %v13532_v47 }
 0x2a6   :  { %v11575_v49 = vpop.f32.mrb[216].mxu0 }
 0x2a7   :  { %v11576_v53 = vpop.f32.mrb[217].mxu0 }
 0x2a8   :  { %v11577_v46 = vadd.f32 %v11576_v53, %v11575_v49  ;;  %v11578_v58 = vpop.f32.mrb[218].mxu0  ;;  %12672 = vmatpush3.bf16.msra.mxu0 %v13532_v47  ;;  %v13758_v47 = vld [vmem:[#allocation2 + $0x398] sm:$0xff]  ;;  %v13535_v49 = vld [vmem:[%s19888_s1 + $0x220] sm:$0xff]  }
 0x2a9   :  { %v11579_v42 = vpop.f32.mrb[219].mxu0  ;;  %12673 = vmatprep.subr.bf16.mxu0 %v13533_v2 }
 0x2aa   :  { %v11580_v51 = vadd.f32 %v11579_v42, %v11578_v58  ;;  %v16911_v63 = vadd.f32 %v11577_v46, %v16398_v4  ;;  %v16921_v58 = vld [vmem:[#allocation2 + $0x400] sm:$0xff] }
 0x2ab   :  { %12642 = vmatmul.mubr.bf16.gmra.mrb[68].mxu0 %v16903_v57  ;;  %6598 = vmatmul.mubr.bf16.gmra.mrb[196].mxu1 %v13757_v14  ;;  %20141 = vst [vmem:[#allocation48_spill] sm:$0xff] %v16921_v58  ;;  %v16923_v14 = vld [vmem:[#allocation2 + $0x418] sm:$0xff] }
 0x2ac   :  { %12645 = vmatprep.mubr.bf16.mxu0 %v16905_v31  ;;  %v16916_v37 = vadd.f32 %v11580_v51, %v16406_v44  ;;  %6605 = vmatprep.mubr.bf16.mxu1 %v13758_v47  ;;  %20142 = vst [vmem:[#allocation49_spill] sm:$0xff] %v16923_v14  ;;  %v13759_v47 = vld [vmem:[#allocation2 + $0x390] sm:$0xff] }
 0x2ad   :  { %12674 = vmatpush3.bf16.msra.mxu0 %v13533_v2  ;;  %v13536_v2 = vld [vmem:[%s19888_s1 + $0x228] sm:$0xff]  }
 0x2ae   :  { %v11581_v20 = vpop.f32.mrb[220].mxu0  ;;  %12675 = vmatprep.subr.bf16.mxu0 %v13534_v11 }
 0x2af   :  { %v11582_v4 = vpop.f32.mrb[221].mxu0 }
 0x2b0   :  { %v11583_v53 = vadd.f32 %v11582_v4, %v11581_v20  ;;  %v11584_v46 = vpop.f32.mrb[222].mxu0  ;;  %v13760_v4 = vld [vmem:[#allocation2 + $0x3b0] sm:$0xff] }
 0x2b1   :  { %v11585_v42 = vpop.f32.mrb[223].mxu0  ;;  %12676 = vmatpush3.bf16.msra.mxu0 %v13534_v11 }
 0x2b2   :  { %v11586_v44 = vadd.f32 %v11585_v42, %v11584_v46  ;;  %12677 = vmatprep.subr.bf16.mxu0 %v13535_v49  ;;  %v16929_v51 = vadd.f32 %v11583_v53, %v16420_v15  ;;  %v13537_v15 = vld [vmem:[%s19888_s1 + $0x230] sm:$0xff]  }
 0x2b3   :  { %12646 = vmatmul.mubr.bf16.gmra.mrb[72].mxu0 %v16921_v58  ;;  %6606 = vmatmul.mubr.bf16.gmra.mrb[200].mxu1 %v13759_v47 }
 0x2b4   :  { %12649 = vmatprep.mubr.bf16.mxu0 %v16923_v14  ;;  %v16934_v20 = vadd.f32 %v11586_v44, %v16435_v55  ;;  %6613 = vmatprep.mubr.bf16.mxu1 %v13760_v4  ;;  %v16939_v14 = vld [vmem:[#allocation2 + $0x430] sm:$0xff] }
 0x2b5   :  { %12678 = vmatpush3.bf16.msra.mxu0 %v13535_v49 }
 0x2b6   :  { %20143 = vst [vmem:[#allocation50_spill] sm:$0xff] %v16934_v20  ;;  %v11587_v11 = vpop.f32.mrb[224].mxu0  ;;  %v11675_v46 = vpop.f32.mrb[128].mxu1  ;;  %12679 = vmatprep.subr.bf16.mxu0 %v13536_v2  ;;  %v16941_v20 = vld [vmem:[#allocation2 + $0x448] sm:$0xff] }
 0x2b7   :  { %v11588_v53 = vpop.f32.mrb[225].mxu0  ;;  %v11676_v42 = vpop.f32.mrb[129].mxu1  ;;  %20144 = vst [vmem:[#allocation51_spill] sm:$0xff] %v16941_v20 }
 0x2b8   :  { %v11589_v54 = vadd.f32 %v11588_v53, %v11587_v11  ;;  %v11677_v59 = vadd.f32 %v11676_v42, %v11675_v46  ;;  %v11590_v47 = vpop.f32.mrb[226].mxu0  ;;  %v11678_v41 = vpop.f32.mrb[130].mxu1  ;;  %v13538_v11 = vld [vmem:[%s19888_s1 + $0x238] sm:$0xff]   ;;  %v13761_v42 = vld [vmem:[#allocation2 + $0x3a8] sm:$0xff] }
 0x2b9   :  { %v11591_v55 = vpop.f32.mrb[227].mxu0  ;;  %v11679_v44 = vpop.f32.mrb[131].mxu1  ;;  %12680 = vmatpush3.bf16.msra.mxu0 %v13536_v2 }
 0x2ba   :  { %v16944_v49 = vadd.f32 %v11589_v54, %v16445_v0  ;;  %v11592_v4 = vadd.f32 %v11591_v55, %v11590_v47  ;;  %v11680_v58 = vadd.f32 %v11679_v44, %v11678_v41  ;;  %12681 = vmatprep.subr.bf16.mxu0 %v13537_v15  ;;  %v16950_v46 = vadd.f32 %v16831_v23, %v11677_v59  ;;  %v13762_v54 = vld [vmem:[#allocation2 + $0x3c8] sm:$0xff]  ;;  %v13539_v59 = vld [vmem:[%s19888_s1 + $0x640] sm:$0xff]  }
 0x2bb   :  { %12650 = vmatmul.mubr.bf16.gmra.mrb[76].mxu0 %v16939_v14  ;;  %6614 = vmatmul.mubr.bf16.gmra.mrb[204].mxu1 %v13761_v42  ;;  %v16963_v42 = vld [vmem:[#allocation2 + $0x460] sm:$0xff] }
 0x2bc   :  { %20145 = vst [vmem:[#allocation52_spill] sm:$0xff] %v16950_v46  ;;  %v16954_v53 = vadd.f32 %v11592_v4, %v16456_v5  ;;  %12653 = vmatprep.mubr.bf16.mxu0 %v16941_v20  ;;  %v16958_v0 = vadd.f32 %v16836_v43, %v11680_v58  ;;  %6621 = vmatprep.mubr.bf16.mxu1 %v13762_v54 }
 0x2bd   :  { %12682 = vmatpush3.bf16.msra.mxu0 %v13537_v15 }
 0x2be   :  { %20146 = vst [vmem:[#allocation53_spill] sm:$0xff] %v16958_v0  ;;  %v11593_v41 = vpop.f32.mrb[228].mxu0  ;;  %v11681_v2 = vpop.f32.mrb[132].mxu1  ;;  %12683 = vmatprep.subr.bf16.mxu0 %v13538_v11  ;;  %v16965_v0 = vld [vmem:[#allocation2 + $0x478] sm:$0xff] }
 0x2bf   :  { %v11594_v23 = vpop.f32.mrb[229].mxu0  ;;  %v11682_v5 = vpop.f32.mrb[133].mxu1 }
 0x2c0   :  { %v11595_v47 = vadd.f32 %v11594_v23, %v11593_v41  ;;  %v11683_v55 = vadd.f32 %v11682_v5, %v11681_v2  ;;  %v11596_v44 = vpop.f32.mrb[230].mxu0  ;;  %v11684_v4 = vpop.f32.mrb[134].mxu1  ;;  %v13763_v2 = vld [vmem:[#allocation2 + $0x3c0] sm:$0xff] }
 0x2c1   :  { %v11597_v43 = vpop.f32.mrb[231].mxu0  ;;  %v11685_v58 = vpop.f32.mrb[135].mxu1  ;;  %12684 = vmatpush3.bf16.msra.mxu0 %v13538_v11 }
 0x2c2   :  { %v16968_v15 = vadd.f32 %v11595_v47, %v16494_v28  ;;  %v11598_v54 = vadd.f32 %v11597_v43, %v11596_v44  ;;  %v11686_v46 = vadd.f32 %v11685_v58, %v11684_v4  ;;  %12067 = vmatprep.subr.bf16.mxu0 %v13539_v59  ;;  %v16971_v20 = vadd.f32 %v16846_v50, %v11683_v55  ;;  %v13764_v28 = vld [vmem:[#allocation2 + $0x3e0] sm:$0xff]  ;;  %v16981_v43 = vld [vmem:[#allocation2 + $0x490] sm:$0xff] }
 0x2c3   :  { %12654 = vmatmul.mubr.bf16.gmra.mrb[80].mxu0 %v16963_v42  ;;  %6622 = vmatmul.mubr.bf16.gmra.mrb[208].mxu1 %v13763_v2 }
 0x2c4   :  { %v16975_v41 = vadd.f32 %v11598_v54, %v16515_v60  ;;  %12657 = vmatprep.mubr.bf16.mxu0 %v16965_v0  ;;  %v16979_v11 = vadd.f32 %v16851_v19, %v11686_v46  ;;  %6629 = vmatprep.mubr.bf16.mxu1 %v13764_v28  ;;  %v16983_v54 = vld [vmem:[#allocation2 + $0x4a8] sm:$0xff] }
 0x2c6   :  { %v11599_v23 = vpop.f32.mrb[232].mxu0  ;;  %v11687_v5 = vpop.f32.mrb[136].mxu1 }
 0x2c7   :  { %v11600_v59 = vpop.f32.mrb[233].mxu0  ;;  %v11688_v47 = vpop.f32.mrb[137].mxu1 }
 0x2c8   :  { %v11601_v50 = vadd.f32 %v11600_v59, %v11599_v23  ;;  %v11689_v55 = vadd.f32 %v11688_v47, %v11687_v5  ;;  %v11602_v44 = vpop.f32.mrb[234].mxu0  ;;  %v11690_v4 = vpop.f32.mrb[138].mxu1 }
 0x2c9   :  { %v11603_v60 = vpop.f32.mrb[235].mxu0  ;;  %v11691_v58 = vpop.f32.mrb[139].mxu1 }
 0x2ca   :  { %v16986_v2 = vadd.f32 %v11601_v50, %v16561_v36  ;;  %v11604_v19 = vadd.f32 %v11603_v60, %v11602_v44  ;;  %v11692_v46 = vadd.f32 %v11691_v58, %v11690_v4  ;;  %v16989_v28 = vadd.f32 %v16858_v27, %v11689_v55  ;;  %v17001_v60 = vld [vmem:[#allocation2 + $0x4c0] sm:$0xff] }
 0x2cb   :  { %12658 = vmatmul.mubr.bf16.gmra.mrb[84].mxu0 %v16981_v43  ;;  %6630 = vmatmul.mubr.bf16.gmra.mrb[212].mxu1 %v16486_v62  ;;  %v17003_v62 = vld [vmem:[#allocation2 + $0x4d8] sm:$0xff] }
 0x2cc   :  { %v16993_v23 = vadd.f32 %v11604_v19, %v16582_v13  ;;  %12661 = vmatprep.mubr.bf16.mxu0 %v16983_v54  ;;  %v16998_v5 = vadd.f32 %v16863_v48, %v11692_v46  ;;  %6637 = vmatprep.mubr.bf16.mxu1 %v16503_v10 }
 0x2ce   :  { %20147 = vst [vmem:[#allocation54_spill] sm:$0xff] %v16998_v5  ;;  %v11605_v36 = vpop.f32.mrb[236].mxu0  ;;  %v11693_v59 = vpop.f32.mrb[140].mxu1 }
 0x2cf   :  { %v11606_v47 = vpop.f32.mrb[237].mxu0  ;;  %v11694_v50 = vpop.f32.mrb[141].mxu1 }
 0x2d0   :  { %v11607_v27 = vadd.f32 %v11606_v47, %v11605_v36  ;;  %v11695_v55 = vadd.f32 %v11694_v50, %v11693_v59  ;;  %v11608_v44 = vpop.f32.mrb[238].mxu0  ;;  %v11696_v4 = vpop.f32.mrb[142].mxu1 }
 0x2d1   :  { %v11609_v13 = vpop.f32.mrb[239].mxu0  ;;  %v11697_v58 = vpop.f32.mrb[143].mxu1 }
 0x2d2   :  { %v17006_v19 = vadd.f32 %v11607_v27, %v16616_v16  ;;  %v11610_v48 = vadd.f32 %v11609_v13, %v11608_v44  ;;  %v11698_v46 = vadd.f32 %v11697_v58, %v11696_v4  ;;  %v17009_v10 = vadd.f32 %v16868_v45, %v11695_v55  ;;  %v5897_v13 = vld [vmem:[#allocation2 + $0x4f0] sm:$0xff] }
 0x2d3   :  { %12662 = vmatmul.mubr.bf16.gmra.mrb[88].mxu0 %v17001_v60  ;;  %6638 = vmatmul.mubr.bf16.gmra.mrb[216].mxu1 %v16557_v56 }
 0x2d4   :  { %v17013_v36 = vadd.f32 %v11610_v48, %v16635_v34  ;;  %12665 = vmatprep.mubr.bf16.mxu0 %v17003_v62  ;;  %v17018_v59 = vadd.f32 %v16872_v12, %v11698_v46  ;;  %6645 = vmatprep.mubr.bf16.mxu1 %v16570_v26  ;;  %v5800_v48 = vld [vmem:[#allocation2 + $0x370] sm:$0xff] }
 0x2d6   :  { %v11611_v16 = vpop.f32.mrb[240].mxu0  ;;  %v11699_v47 = vpop.f32.mrb[144].mxu1 }
 0x2d7   :  { %v11612_v50 = vpop.f32.mrb[241].mxu0  ;;  %v11700_v27 = vpop.f32.mrb[145].mxu1 }
 0x2d8   :  { %v11613_v45 = vadd.f32 %v11612_v50, %v11611_v16  ;;  %v11701_v55 = vadd.f32 %v11700_v27, %v11699_v47  ;;  %v11614_v44 = vpop.f32.mrb[242].mxu0  ;;  %v11702_v4 = vpop.f32.mrb[146].mxu1 }
 0x2d9   :  { %v11615_v34 = vpop.f32.mrb[243].mxu0  ;;  %v11703_v58 = vpop.f32.mrb[147].mxu1 }
 0x2da   :  { %v17022_v56 = vadd.f32 %v11613_v45, %v16684_v9  ;;  %v11616_v5 = vadd.f32 %v11615_v34, %v11614_v44  ;;  %v11704_v12 = vadd.f32 %v11703_v58, %v11702_v4  ;;  %v17025_v46 = vadd.f32 %v16877_v3, %v11701_v55 }
 0x2db   :  { %12666 = vmatmul.mubr.bf16.gmra.mrb[92].mxu0 %v5897_v13  ;;  %6646 = vmatmul.mubr.bf16.gmra.mrb[220].mxu1 %v16618_v30 }
 0x2dc   :  { %v17028_v26 = vadd.f32 %v11616_v5, %v16704_v39  ;;  %12685 = vmatprep.mubr.bf16.mxu0 %v5800_v48  ;;  %v17032_v16 = vadd.f32 %v16882_v33, %v11704_v12  ;;  %6653 = vmatprep.mubr.bf16.mxu1 %v16620_v25  ;;  %v13540_v39 = vld [vmem:[%s19888_s1 + $0x600] sm:$0xff]   ;;  %v13541_v25 = vld [vmem:[%s19888_s1 + $0x648] sm:$0xff]  }
 0x2de   :  { %v11617_v47 = vpop.f32.mrb[244].mxu0  ;;  %v11705_v9 = vpop.f32.mrb[148].mxu1 }
 0x2df   :  { %v11618_v50 = vpop.f32.mrb[245].mxu0  ;;  %v11706_v27 = vpop.f32.mrb[149].mxu1 }
 0x2e0   :  { %v11619_v45 = vadd.f32 %v11618_v50, %v11617_v47  ;;  %v11707_v44 = vadd.f32 %v11706_v27, %v11705_v9  ;;  %v11620_v3 = vpop.f32.mrb[246].mxu0  ;;  %v11708_v55 = vpop.f32.mrb[150].mxu1 }
 0x2e1   :  { %v11621_v5 = vpop.f32.mrb[247].mxu0  ;;  %v11709_v30 = vpop.f32.mrb[151].mxu1 }
 0x2e2   :  { %v17039_v4 = vadd.f32 %v11619_v45, %v16738_v8  ;;  %v11622_v33 = vadd.f32 %v11621_v5, %v11620_v3  ;;  %v11710_v13 = vadd.f32 %v11709_v30, %v11708_v55  ;;  %v17045_v34 = vadd.f32 %v16892_v52, %v11707_v44  ;;  %v13542_v8 = vld [vmem:[%s19888_s1 + $0x608] sm:$0xff]   ;;  %v13545_v3 = vld [vmem:[%s19888_s1 + $0x658] sm:$0xff]  }
 0x2e3   :  { %12686 = vmatmul.mubr.bf16.vlgmr.msra.gmra.mrb[64].mxu0 %v16874_v32  ;;  %6654 = vmatmul.mubr.bf16.gmra.mrb[224].mxu1 %v16679_v6  ;;  %v13543_v32 = vld [vmem:[%s19888_s1 + $0x650] sm:$0xff]  }
 0x2e4   :  { %v17049_v58 = vadd.f32 %v11622_v33, %v16751_v40  ;;  %12068 = vmatpush3.bf16.msra.mxu0 %v13540_v39  ;;  %v17056_v48 = vadd.f32 %v16897_v38, %v11710_v13  ;;  %6661 = vmatprep.mubr.bf16.mxu1 %v16693_v1  ;;  %v13544_v1 = vld [vmem:[%s19888_s1 + $0x610] sm:$0xff]  }
 0x2e5   :  { %12689 = vmatprep.mubr.bf16.mxu0 %v16884_v22  ;;  %12069 = vmatprep.subr.bf16.mxu0 %v13541_v25 }
 0x2e6   :  { %v11623_v40 = vpop.f32.mrb[248].mxu0  ;;  %v11711_v52 = vpop.f32.mrb[152].mxu1 }
 0x2e7   :  { %v11624_v6 = vpop.f32.mrb[249].mxu0  ;;  %v11712_v47 = vpop.f32.mrb[153].mxu1 }
 0x2e8   :  { %v11625_v12 = vadd.f32 %v11624_v6, %v11623_v40  ;;  %v11626_v9 = vpop.f32.mrb[250].mxu0  ;;  %12070 = vmatpush3.bf16.msra.mxu0 %v13542_v8  ;;  %v11713_v50 = vadd.f32 %v11712_v47, %v11711_v52  ;;  %v11714_v27 = vpop.f32.mrb[154].mxu1  ;;  %v13549_v6 = vld [vmem:[%s19888_s1 + $0x668] sm:$0xff]  }
 0x2e9   :  { %v11627_v38 = vpop.f32.mrb[251].mxu0  ;;  %12071 = vmatprep.subr.bf16.mxu0 %v13543_v32  ;;  %v11715_v44 = vpop.f32.mrb[155].mxu1 }
 0x2ea   :  { %v17067_v22 = vadd.f32 %v11625_v12, %v16776_v24  ;;  %v11628_v45 = vadd.f32 %v11627_v38, %v11626_v9  ;;  %v11716_v55 = vadd.f32 %v11715_v44, %v11714_v27  ;;  %v17074_v39 = vadd.f32 %v16911_v63, %v11713_v50  ;;  %v13546_v24 = vld [vmem:[%s19888_s1 + $0x618] sm:$0xff]   ;;  %v20149_v50 = vld [vmem:[#allocation38_spill] sm:$0xff] }
 0x2eb   :  { %12690 = vmatmul.mubr.bf16.gmra.mrb[68].mxu0 %v16886_v18  ;;  %6662 = vmatmul.mubr.bf16.gmra.mrb[228].mxu1 %v16740_v21  ;;  %v13550_v27 = vld [vmem:[%s19888_s1 + $0x628] sm:$0xff]  }
 0x2ec   :  { %v17077_v5 = vadd.f32 %v11628_v45, %v16785_v61  ;;  %12693 = vmatprep.mubr.bf16.mxu0 %v16903_v57  ;;  %6669 = vmatprep.mubr.bf16.mxu1 %v16745_v17  ;;  %v17086_v30 = vadd.f32 %v16916_v37, %v11716_v55  ;;  %v13547_v61 = vld [vmem:[%s19888_s1 + $0x660] sm:$0xff]   ;;  %v20150_v38 = vld [vmem:[#allocation50_spill] sm:$0xff] }
 0x2ed   :  { %12072 = vmatpush3.bf16.msra.mxu0 %v13544_v1  ;;  %v13548_v37 = vld [vmem:[%s19888_s1 + $0x620] sm:$0xff]  }
 0x2ee   :  { %v11629_v18 = vpop.f32.mrb[252].mxu0  ;;  %12073 = vmatprep.subr.bf16.mxu0 %v13545_v3  ;;  %v11717_v63 = vpop.f32.mrb[156].mxu1 }
 0x2ef   :  { %v11630_v21 = vpop.f32.mrb[253].mxu0  ;;  %v11718_v57 = vpop.f32.mrb[157].mxu1 }
 0x2f0   :  { %v11631_v33 = vadd.f32 %v11630_v21, %v11629_v18  ;;  %v11632_v13 = vpop.f32.mrb[254].mxu0  ;;  %v11719_v17 = vadd.f32 %v11718_v57, %v11717_v63  ;;  %v11720_v25 = vpop.f32.mrb[158].mxu1 }
 0x2f1   :  { %v11633_v8 = vpop.f32.mrb[255].mxu0  ;;  %12074 = vmatpush3.bf16.msra.mxu0 %v13546_v24  ;;  %v11721_v52 = vpop.f32.mrb[159].mxu1 }
 0x2f2   :  { %v17095_v32 = vadd.f32 %v11631_v33, %v16798_v35  ;;  %v11634_v40 = vadd.f32 %v11633_v8, %v11632_v13  ;;  %12075 = vmatprep.subr.bf16.mxu0 %v13547_v61  ;;  %v11722_v12 = vadd.f32 %v11721_v52, %v11720_v25  ;;  %v17102_v47 = vadd.f32 %v16929_v51, %v11719_v17  ;;  %v20148_v35 = vld [vmem:[#allocation48_spill] sm:$0xff]  ;;  %v13552_v61 = vld [vmem:[%s19888_s1 + $0x630] sm:$0xff]   ;;  %v20151_v13 = vld [vmem:[#allocation49_spill] sm:$0xff] }
 0x2f3   :  { %12694 = vmatmul.mubr.bf16.gmra.mrb[72].mxu0 %v16905_v31  ;;  %6670 = vmatmul.mubr.bf16.gmra.mrb[232].mxu1 %v16778_v29  ;;  %v13553_v33 = vld [vmem:[%s19888_s1 + $0x678] sm:$0xff]   ;;  %v20152_v25 = vld [vmem:[#allocation39_spill] sm:$0xff] }
 0x2f4   :  { %v17105_v9 = vadd.f32 %v11634_v40, %v16807_v7  ;;  %12697 = vmatprep.mubr.bf16.mxu0 %v20148_v35  ;;  %6677 = vmatprep.mubr.bf16.mxu1 %v20149_v50  ;;  %v17114_v1 = vadd.f32 %v20150_v38, %v11722_v12  ;;  %v13551_v7 = vld [vmem:[%s19888_s1 + $0x670] sm:$0xff]   ;;  %v20153_v8 = vld [vmem:[#allocation40_spill] sm:$0xff] }
 0x2f5   :  { %12076 = vmatpush3.bf16.msra.mxu0 %v13548_v37  ;;  %v13554_v37 = vld [vmem:[%s19888_s1 + $0x638] sm:$0xff]  }
 0x2f6   :  { %v11811_v31 = vpop.f32.mrb[0].mxu0  ;;  %12077 = vmatprep.subr.bf16.mxu0 %v13549_v6  ;;  %v11723_v51 = vpop.f32.mrb[160].mxu1 }
 0x2f7   :  { %v11812_v29 = vpop.f32.mrb[1].mxu0  ;;  %v11724_v45 = vpop.f32.mrb[161].mxu1 }
 0x2f8   :  { %v17119_v44 = vadd.f32 %v11812_v29, %v11811_v31  ;;  %v11814_v3 = vpop.f32.mrb[2].mxu0  ;;  %v11725_v55 = vadd.f32 %v11724_v45, %v11723_v51  ;;  %v11726_v24 = vpop.f32.mrb[162].mxu1  ;;  %v20154_v29 = vld [vmem:[#allocation51_spill] sm:$0xff] }
 0x2f9   :  { %v11815_v18 = vpop.f32.mrb[3].mxu0  ;;  %12078 = vmatpush3.bf16.msra.mxu0 %v13550_v27  ;;  %v11727_v63 = vpop.f32.mrb[163].mxu1 }
 0x2fa   :  { %v17124_v21 = vadd.f32 %v11815_v18, %v11814_v3  ;;  %12079 = vmatprep.subr.bf16.mxu0 %v13551_v7  ;;  %v11728_v57 = vadd.f32 %v11727_v63, %v11726_v24  ;;  %v17131_v17 = vadd.f32 %v16944_v49, %v11725_v55  ;;  %v17145_v49 = vld [vmem:[%s19888_s1 + $0x680] sm:$0xff]   ;;  %v20156_v55 = vld [vmem:[#allocation42_spill] sm:$0xff] }
 0x2fb   :  { %12698 = vmatmul.mubr.bf16.gmra.mrb[76].mxu0 %v20151_v13  ;;  %6678 = vmatmul.mubr.bf16.gmra.mrb[236].mxu1 %v20152_v25  ;;  %v20155_v3 = vld [vmem:[#allocation41_spill] sm:$0xff] }
 0x2fc   :  { %12701 = vmatprep.mubr.bf16.mxu0 %v16939_v14  ;;  %6685 = vmatprep.mubr.bf16.mxu1 %v20153_v8  ;;  %v17140_v40 = vadd.f32 %v16954_v53, %v11728_v57 }
 0x2fd   :  { %12080 = vmatpush3.bf16.msra.mxu0 %v13552_v61 }
 0x2fe   :  { %v11817_v52 = vpop.f32.mrb[4].mxu0  ;;  %12081 = vmatprep.subr.bf16.mxu0 %v13553_v33  ;;  %v11729_v6 = vpop.f32.mrb[164].mxu1 }
 0x2ff   :  { %v11818_v12 = vpop.f32.mrb[5].mxu0  ;;  %v11730_v14 = vpop.f32.mrb[165].mxu1 }
 0x300   :  { %v17147_v35 = vadd.f32 %v11818_v12, %v11817_v52  ;;  %v11820_v50 = vpop.f32.mrb[6].mxu0  ;;  %v11731_v27 = vadd.f32 %v11730_v14, %v11729_v6  ;;  %v11732_v38 = vpop.f32.mrb[166].mxu1  ;;  %v20158_v12 = vld [vmem:[#allocation44_spill] sm:$0xff] }
 0x301   :  { %v11821_v31 = vpop.f32.mrb[7].mxu0  ;;  %12082 = vmatpush3.bf16.msra.mxu0 %v13554_v37  ;;  %v11733_v7 = vpop.f32.mrb[167].mxu1 }
 0x302   :  { %v17149_v53 = vadd.f32 %v11821_v31, %v11820_v50  ;;  %12717 = vmatprep.subr.bf16.mxu0 %v17145_v49  ;;  %v11734_v51 = vadd.f32 %v11733_v7, %v11732_v38  ;;  %v17154_v45 = vadd.f32 %v16968_v15, %v11731_v27  ;;  %v1892_v50 = vld [vmem:[%s19889_s0 + $0x1b8] sm:$0x1] }
 0x303   :  { %12702 = vmatmul.mubr.bf16.gmra.mrb[80].mxu0 %v20154_v29  ;;  %6686 = vmatmul.mubr.bf16.gmra.mrb[240].mxu1 %v20155_v3  ;;  %v17179_v38 = vld [vmem:[#allocation2 + $0x4f8] sm:$0xff] }
 0x304   :  { %12705 = vmatprep.mubr.bf16.mxu0 %v16963_v42  ;;  %6693 = vmatprep.mubr.bf16.mxu1 %v20156_v55  ;;  %v17160_v24 = vadd.f32 %v16975_v41, %v11734_v51  ;;  %v20157_v41 = vld [vmem:[#allocation43_spill] sm:$0xff]  ;;  %20159 = vst [vmem:[#allocation48_spill] sm:$0xff] %v17179_v38 }
 0x306   :  { %v11823_v18 = vpop.f32.mrb[8].mxu0  ;;  %v11735_v61 = vpop.f32.mrb[168].mxu1 }
 0x307   :  { %v11824_v63 = vpop.f32.mrb[9].mxu0  ;;  %v11736_v33 = vpop.f32.mrb[169].mxu1 }
 0x308   :  { %v17162_v57 = vadd.f32 %v11824_v63, %v11823_v18  ;;  %v11826_v13 = vpop.f32.mrb[10].mxu0  ;;  %v11737_v25 = vadd.f32 %v11736_v33, %v11735_v61  ;;  %v11738_v8 = vpop.f32.mrb[170].mxu1  ;;  %v20160_v63 = vld [vmem:[#allocation36_spill] sm:$0xff] }
 0x309   :  { %v11827_v15 = vpop.f32.mrb[11].mxu0  ;;  %v11739_v37 = vpop.f32.mrb[171].mxu1  ;;  %v2163_v33 = vshrl.u32 %v20160_v63, 16 }
 0x30a   :  { %v17164_v52 = vadd.f32 %v11827_v15, %v11826_v13  ;;  %v11740_v6 = vadd.f32 %v11739_v37, %v11738_v8  ;;  %v17168_v42 = vadd.f32 %v16986_v2, %v11737_v25  ;;  %v1691_v15 = vld [vmem:[%s19889_s0 + $0x1a0] sm:$0xf]  ;;  %v1692_v37 = vld [vmem:[%s19889_s0 + $0x1ac] sm:$0xf] }
 0x30b   :  { %12706 = vmatmul.mubr.bf16.gmra.mrb[84].mxu0 %v16965_v0  ;;  %6694 = vmatmul.mubr.bf16.gmra.mrb[244].mxu1 %v20157_v41  ;;  %v1929_v0 = vmax.bf16 %v17179_v38, %v1892_v50  ;;  %v20162_v41 = vld [vmem:[#allocation37_spill] sm:$0xff] }
 0x30c   :  { %12709 = vmatprep.mubr.bf16.mxu0 %v16981_v43  ;;  %6701 = vmatprep.mubr.bf16.mxu1 %v20158_v12  ;;  %v17174_v14 = vadd.f32 %v16993_v23, %v11740_v6  ;;  %v20161_v6 = vld [vmem:[#allocation45_spill] sm:$0xff]  ;;  %v2165_v12 = vor.u32 %v2163_v33, %v20162_v41  ;;  %v6880_v33 = vld [vmem:[#allocation2 + $0x398] sm:$0xff] }
 0x30d   :  { %v10273_v29 = vcombine.low %v1929_v0, %v1929_v0 }
 0x30e   :  { %v11829_v27 = vpop.f32.mrb[12].mxu0  ;;  %v11741_v2 = vpop.f32.mrb[172].mxu1 }
 0x30f   :  { %v11830_v31 = vpop.f32.mrb[13].mxu0  ;;  %v11742_v7 = vpop.f32.mrb[173].mxu1  ;;  %v2167_v13 = vshll.u32 %v10273_v29, 16 }
 0x310   :  { %v17182_v51 = vadd.f32 %v11830_v31, %v11829_v27  ;;  %v11832_v43 = vpop.f32.mrb[14].mxu0  ;;  %v11743_v3 = vadd.f32 %v11742_v7, %v11741_v2  ;;  %v11744_v55 = vpop.f32.mrb[174].mxu1  ;;  %v20163_v27 = vld [vmem:[#allocation46_spill] sm:$0xff] }
 0x311   :  { %v11833_v23 = vpop.f32.mrb[15].mxu0  ;;  %v11745_v18 = vpop.f32.mrb[175].mxu1  ;;  %v2169_v50 = vrot.slane %v2167_v13, 1 }
 0x312   :  { %v17184_v61 = vadd.f32 %v11833_v23, %v11832_v43  ;;  %v11746_v25 = vadd.f32 %v11745_v18, %v11744_v55  ;;  %v17189_v8 = vadd.f32 %v17006_v19, %v11743_v3  ;;  %v1728_v19 = vmax.bf16 %v17179_v38, %v1692_v37  ;;  %v20164_v37 = vld [vmem:[#allocation47_spill] sm:$0xff] }
 0x313   :  { %12710 = vmatmul.mubr.bf16.gmra.mrb[88].mxu0 %v16983_v54  ;;  %6702 = vmatmul.mubr.bf16.gmra.mrb[248].mxu1 %v20161_v6  ;;  %v1727_v54 = vmax.bf16 %v17179_v38, %v1691_v15  ;;  %v2170_v31 = vsel %vm386_vm0, %v2165_v12, %v2169_v50 }
 0x314   :  { %12713 = vmatprep.mubr.bf16.mxu0 %v17001_v60  ;;  %6709 = vmatprep.mubr.bf16.mxu1 %v20163_v27  ;;  %v17204_v0 = vadd.f32 %v17013_v36, %v11746_v25  ;;  %2206 = vst.msk [vmem:[#allocation2 + $0x500] sm:$0xff] %vm1837_vm2, %v2170_v31 }
 0x315   :  { %v10254_v7 = vcombine.low %v1727_v54, %v1728_v19 }
 0x316   :  { %v11835_v2 = vpop.f32.mrb[16].mxu0  ;;  %v11747_v43 = vpop.f32.mrb[176].mxu1 }
 0x317   :  { %v11836_v29 = vpop.f32.mrb[17].mxu0  ;;  %v11748_v60 = vpop.f32.mrb[177].mxu1  ;;  %1855 = vst.msk [vmem:[#allocation2 + $0x4f8] sm:$0xff] %vm1837_vm2, %v10254_v7 }
 0x318   :  { %v17208_v3 = vadd.f32 %v11836_v29, %v11835_v2  ;;  %v11838_v55 = vpop.f32.mrb[18].mxu0  ;;  %v11749_v23 = vadd.f32 %v11748_v60, %v11747_v43  ;;  %v11750_v18 = vpop.f32.mrb[178].mxu1  ;;  %v6879_v2 = vld [vmem:[#allocation2 + $0x390] sm:$0xff] }
 0x319   :  { %v11839_v63 = vpop.f32.mrb[19].mxu0  ;;  %v11751_v36 = vpop.f32.mrb[179].mxu1  ;;  %v6883_v43 = vld [vmem:[#allocation2 + $0x3b0] sm:$0xff] }
 0x31a   :  { %v17211_v13 = vadd.f32 %v11839_v63, %v11838_v55  ;;  %v11752_v25 = vadd.f32 %v11751_v36, %v11750_v18  ;;  %v17215_v15 = vadd.f32 %v17022_v56, %v11749_v23  ;;  %v13556_v56 = vld [vmem:[%s19888_s1 + $0x688] sm:$0xff]   ;;  %v13557_v23 = vld [vmem:[%s19888_s1 + $0x690] sm:$0xff]  }
 0x31b   :  { %12714 = vmatmul.mubr.bf16.gmra.mrb[92].mxu0 %v17003_v62  ;;  %6710 = vmatmul.mubr.bf16.gmra.mrb[252].mxu1 %v20164_v37 }
 0x31c   :  { %7152 = vmatprep.mubr.bf16.mxu0 %v6880_v33  ;;  %v17219_v6 = vadd.f32 %v17028_v26, %v11752_v25 }
 0x31e   :  { %v11841_v41 = vpop.f32.mrb[20].mxu0  ;;  %v11753_v12 = vpop.f32.mrb[180].mxu1 }
 0x31f   :  { %v11842_v50 = vpop.f32.mrb[21].mxu0  ;;  %v11754_v54 = vpop.f32.mrb[181].mxu1 }
 0x320   :  { %v17221_v19 = vadd.f32 %v11842_v50, %v11841_v41  ;;  %v11844_v27 = vpop.f32.mrb[22].mxu0  ;;  %v11755_v31 = vadd.f32 %v11754_v54, %v11753_v12  ;;  %v11756_v7 = vpop.f32.mrb[182].mxu1  ;;  %v6886_v54 = vld [vmem:[#allocation2 + $0x3c8] sm:$0xff] }
 0x321   :  { %v11845_v62 = vpop.f32.mrb[23].mxu0  ;;  %v11757_v29 = vpop.f32.mrb[183].mxu1 }
 0x322   :  { %v17226_v60 = vadd.f32 %v11845_v62, %v11844_v27  ;;  %v11758_v26 = vadd.f32 %v11757_v29, %v11756_v7  ;;  %v17229_v55 = vadd.f32 %v17039_v4, %v11755_v31  ;;  %v6882_v4 = vld [vmem:[#allocation2 + $0x3a8] sm:$0xff]  ;;  %v13558_v27 = vld [vmem:[%s19888_s1 + $0x698] sm:$0xff]   ;;  %v13559_v62 = vld [vmem:[%s19888_s1 + $0x6a0] sm:$0xff]  }
 0x323   :  { %7153 = vmatmul.mubr.bf16.vlgmr.msra.gmra.mrb[96].mxu0 %v6879_v2 }
 0x324   :  { %12718 = vmatpush3.bf16.msra.mxu0 %v17145_v49  ;;  %7160 = vmatprep.mubr.bf16.mxu0 %v6883_v43  ;;  %v17236_v18 = vadd.f32 %v17049_v58, %v11758_v26 }
 0x325   :  { %12719 = vmatprep.subr.bf16.mxu0 %v13556_v56 }
 0x326   :  { %v11847_v63 = vpop.f32.mrb[24].mxu0  ;;  %v11759_v33 = vpop.f32.mrb[184].mxu1 }
 0x327   :  { %v11848_v36 = vpop.f32.mrb[25].mxu0  ;;  %v11760_v25 = vpop.f32.mrb[185].mxu1 }
 0x328   :  { %v17238_v37 = vadd.f32 %v11848_v36, %v11847_v63  ;;  %v11850_v41 = vpop.f32.mrb[26].mxu0  ;;  %12720 = vmatpush3.bf16.msra.mxu0 %v13556_v56  ;;  %v11761_v12 = vadd.f32 %v11760_v25, %v11759_v33  ;;  %v11762_v49 = vpop.f32.mrb[186].mxu1  ;;  %v6885_v25 = vld [vmem:[#allocation2 + $0x3c0] sm:$0xff] }
 0x329   :  { %v11851_v50 = vpop.f32.mrb[27].mxu0  ;;  %12721 = vmatprep.subr.bf16.mxu0 %v13557_v23  ;;  %v11763_v58 = vpop.f32.mrb[187].mxu1 }
 0x32a   :  { %v17243_v2 = vadd.f32 %v11851_v50, %v11850_v41  ;;  %v11764_v31 = vadd.f32 %v11763_v58, %v11762_v49  ;;  %v17246_v7 = vadd.f32 %v17067_v22, %v11761_v12  ;;  %v13560_v12 = vld [vmem:[%s19888_s1 + $0x6a8] sm:$0xff]   ;;  %v13561_v58 = vld [vmem:[%s19888_s1 + $0x6b0] sm:$0xff]  }
 0x32b   :  { %7161 = vmatmul.mubr.bf16.gmra.mrb[100].mxu0 %v6882_v4  ;;  %v6889_v4 = vld [vmem:[#allocation2 + $0x3e0] sm:$0xff] }
 0x32c   :  { %7168 = vmatprep.mubr.bf16.mxu0 %v6886_v54  ;;  %12722 = vmatpush3.bf16.msra.mxu0 %v13557_v23  ;;  %v17252_v43 = vadd.f32 %v17077_v5, %v11764_v31 }
 0x32d   :  { %12723 = vmatprep.subr.bf16.mxu0 %v13558_v27 }
 0x32e   :  { %v11853_v56 = vpop.f32.mrb[28].mxu0  ;;  %v11765_v29 = vpop.f32.mrb[188].mxu1 }
 0x32f   :  { %v11854_v26 = vpop.f32.mrb[29].mxu0  ;;  %v11766_v63 = vpop.f32.mrb[189].mxu1 }
 0x330   :  { %v17254_v33 = vadd.f32 %v11854_v26, %v11853_v56  ;;  %v11856_v36 = vpop.f32.mrb[30].mxu0  ;;  %12724 = vmatpush3.bf16.msra.mxu0 %v13558_v27  ;;  %v11767_v22 = vadd.f32 %v11766_v63, %v11765_v29  ;;  %v11768_v41 = vpop.f32.mrb[190].mxu1 }
 0x331   :  { %v11857_v23 = vpop.f32.mrb[31].mxu0  ;;  %12725 = vmatprep.subr.bf16.mxu0 %v13559_v62  ;;  %v11769_v5 = vpop.f32.mrb[191].mxu1 }
 0x332   :  { %v17259_v49 = vadd.f32 %v11857_v23, %v11856_v36  ;;  %v11770_v50 = vadd.f32 %v11769_v5, %v11768_v41  ;;  %v17262_v54 = vadd.f32 %v17095_v32, %v11767_v22  ;;  %v6892_v23 = vld [vmem:[#allocation2 + $0x3f8] sm:$0xff] }
 0x333   :  { %7169 = vmatmul.mubr.bf16.gmra.mrb[104].mxu0 %v6885_v25  ;;  %v6888_v25 = vld [vmem:[#allocation2 + $0x3d8] sm:$0xff] }
 0x334   :  { %7176 = vmatprep.mubr.bf16.mxu0 %v6889_v4  ;;  %12726 = vmatpush3.bf16.msra.mxu0 %v13559_v62  ;;  %v17265_v27 = vadd.f32 %v17105_v9, %v11770_v50  ;;  %v20166_v62 = vld [vmem:[#allocation52_spill] sm:$0xff] }
 0x335   :  { %12727 = vmatprep.subr.bf16.mxu0 %v13560_v12  ;;  %v13562_v4 = vld [vmem:[%s19888_s1 + $0x6b8] sm:$0xff]  }
 0x336   :  { %v11859_v31 = vpop.f32.mrb[32].mxu0  ;;  %v12591_v56 = vpop.f32.mrb[96].mxu1 }
 0x337   :  { %v11860_v29 = vpop.f32.mrb[33].mxu0  ;;  %v17271_v26 = vadd.f32 %v16971_v20, %v12591_v56  ;;  %v5639_v63 = vpop.f32.mrb[97].mxu1 }
 0x338   :  { %v17273_v36 = vadd.f32 %v11860_v29, %v11859_v31  ;;  %v11862_v32 = vpop.f32.mrb[34].mxu0  ;;  %12728 = vmatpush3.bf16.msra.mxu0 %v13560_v12  ;;  %v17276_v9 = vadd.f32 %v20166_v62, %v5639_v63  ;;  %v12592_v22 = vpop.f32.mrb[98].mxu1  ;;  %v20169_v31 = vld [vmem:[#allocation53_spill] sm:$0xff] }
 0x339   :  { %20165 = vst [vmem:[#allocation38_spill] sm:$0xff] %v17271_v26  ;;  %v11863_v41 = vpop.f32.mrb[35].mxu0  ;;  %12729 = vmatprep.subr.bf16.mxu0 %v13561_v58  ;;  %v17282_v20 = vadd.f32 %v16979_v11, %v12592_v22  ;;  %v5642_v5 = vpop.f32.mrb[99].mxu1  ;;  %v6891_v22 = vld [vmem:[#allocation2 + $0x3f0] sm:$0xff] }
 0x33a   :  { %20167 = vst [vmem:[#allocation50_spill] sm:$0xff] %v17276_v9  ;;  %v17284_v50 = vadd.f32 %v11863_v41, %v11862_v32  ;;  %v17287_v56 = vadd.f32 %v20169_v31, %v5642_v5 }
 0x33b   :  { %20168 = vst [vmem:[#allocation49_spill] sm:$0xff] %v17282_v20  ;;  %7177 = vmatmul.mubr.bf16.gmra.mrb[108].mxu0 %v6888_v25 }
 0x33c   :  { %20170 = vst [vmem:[#allocation39_spill] sm:$0xff] %v17287_v56  ;;  %7184 = vmatprep.mubr.bf16.mxu0 %v6892_v23  ;;  %12730 = vmatpush3.bf16.msra.mxu0 %v13561_v58  ;;  %v6895_v23 = vld [vmem:[#allocation2 + $0x410] sm:$0xff] }
 0x33d   :  { %12731 = vmatprep.subr.bf16.mxu0 %v13562_v4 }
 0x33e   :  { %v11865_v12 = vpop.f32.mrb[36].mxu0  ;;  %v12595_v29 = vpop.f32.mrb[100].mxu1 }
 0x33f   :  { %v11866_v63 = vpop.f32.mrb[37].mxu0  ;;  %v17290_v62 = vadd.f32 %v17009_v10, %v12595_v29  ;;  %v5655_v9 = vpop.f32.mrb[101].mxu1  ;;  %v20174_v10 = vld [vmem:[#allocation54_spill] sm:$0xff] }
 0x340   :  { %v17292_v26 = vadd.f32 %v11866_v63, %v11865_v12  ;;  %v11868_v11 = vpop.f32.mrb[38].mxu0  ;;  %12732 = vmatpush3.bf16.msra.mxu0 %v13562_v4  ;;  %v17295_v32 = vadd.f32 %v16989_v28, %v5655_v9  ;;  %v12596_v41 = vpop.f32.mrb[102].mxu1 }
 0x341   :  { %20171 = vst [vmem:[#allocation40_spill] sm:$0xff] %v17290_v62  ;;  %v11869_v25 = vpop.f32.mrb[39].mxu0  ;;  %v17298_v58 = vadd.f32 %v17018_v59, %v12596_v41  ;;  %v5658_v5 = vpop.f32.mrb[103].mxu1 }
 0x342   :  { %20172 = vst [vmem:[#allocation51_spill] sm:$0xff] %v17295_v32  ;;  %v17300_v31 = vadd.f32 %v11869_v25, %v11868_v11  ;;  %v17303_v29 = vadd.f32 %v20174_v10, %v5658_v5  ;;  %v6894_v32 = vld [vmem:[#allocation2 + $0x408] sm:$0xff] }
 0x343   :  { %20173 = vst [vmem:[#allocation41_spill] sm:$0xff] %v17298_v58  ;;  %7185 = vmatmul.mubr.bf16.gmra.mrb[112].mxu0 %v6891_v22  ;;  %v6898_v5 = vld [vmem:[#allocation2 + $0x428] sm:$0xff] }
 0x344   :  { %7192 = vmatprep.mubr.bf16.mxu0 %v6895_v23 }
 0x346   :  { %v11871_v12 = vpop.f32.mrb[40].mxu0  ;;  %v12599_v63 = vpop.f32.mrb[104].mxu1 }
 0x347   :  { %v11872_v4 = vpop.f32.mrb[41].mxu0  ;;  %v17306_v28 = vadd.f32 %v17045_v34, %v12599_v63  ;;  %v5671_v9 = vpop.f32.mrb[105].mxu1 }
 0x348   :  { %v11874_v56 = vpop.f32.mrb[42].mxu0  ;;  %v17309_v59 = vadd.f32 %v17025_v46, %v5671_v9  ;;  %v17311_v41 = vadd.f32 %v11872_v4, %v11871_v12  ;;  %v12600_v11 = vpop.f32.mrb[106].mxu1  ;;  %v6897_v4 = vld [vmem:[#allocation2 + $0x420] sm:$0xff] }
 0x349   :  { %20175 = vst [vmem:[#allocation42_spill] sm:$0xff] %v17306_v28  ;;  %v11875_v25 = vpop.f32.mrb[43].mxu0  ;;  %v5674_v10 = vpop.f32.mrb[107].mxu1  ;;  %v17314_v22 = vadd.f32 %v17056_v48, %v12600_v11 }
 0x34a   :  { %20176 = vst [vmem:[#allocation43_spill] sm:$0xff] %v17309_v59  ;;  %v17317_v23 = vadd.f32 %v17032_v16, %v5674_v10  ;;  %v17319_v34 = vadd.f32 %v11875_v25, %v11874_v56  ;;  %v6901_v16 = vld [vmem:[#allocation2 + $0x440] sm:$0xff] }
 0x34b   :  { %20177 = vst [vmem:[#allocation44_spill] sm:$0xff] %v17314_v22  ;;  %7193 = vmatmul.mubr.bf16.gmra.mrb[116].mxu0 %v6894_v32 }
 0x34c   :  { %20178 = vst [vmem:[#allocation36_spill] sm:$0xff] %v17317_v23  ;;  %7200 = vmatprep.mubr.bf16.mxu0 %v6898_v5 }
 0x34e   :  { %v11877_v63 = vpop.f32.mrb[44].mxu0  ;;  %v12603_v28 = vpop.f32.mrb[108].mxu1 }
 0x34f   :  { %v11878_v46 = vpop.f32.mrb[45].mxu0  ;;  %v5687_v9 = vpop.f32.mrb[109].mxu1  ;;  %v17322_v59 = vadd.f32 %v17102_v47, %v12603_v28 }
 0x350   :  { %v11880_v12 = vpop.f32.mrb[46].mxu0  ;;  %v17325_v58 = vadd.f32 %v17074_v39, %v5687_v9  ;;  %v12604_v48 = vpop.f32.mrb[110].mxu1  ;;  %v17327_v10 = vadd.f32 %v11878_v46, %v11877_v63  ;;  %v6904_v46 = vld [vmem:[#allocation2 + $0x458] sm:$0xff] }
 0x351   :  { %20179 = vst [vmem:[#allocation45_spill] sm:$0xff] %v17322_v59  ;;  %v11881_v11 = vpop.f32.mrb[47].mxu0  ;;  %v5690_v56 = vpop.f32.mrb[111].mxu1  ;;  %v17330_v32 = vadd.f32 %v17114_v1, %v12604_v48 }
 0x352   :  { %20180 = vst [vmem:[#allocation37_spill] sm:$0xff] %v17325_v58  ;;  %v17333_v25 = vadd.f32 %v17086_v30, %v5690_v56  ;;  %v17335_v5 = vadd.f32 %v11881_v11, %v11880_v12  ;;  %v6900_v58 = vld [vmem:[#allocation2 + $0x438] sm:$0xff] }
 0x353   :  { %7201 = vmatmul.mubr.bf16.gmra.mrb[120].mxu0 %v6897_v4  ;;  %20181 = vst [vmem:[#allocation46_spill] sm:$0xff] %v17330_v32 }
 0x354   :  { %20182 = vst [vmem:[#allocation47_spill] sm:$0xff] %v17333_v25  ;;  %7208 = vmatprep.mubr.bf16.mxu0 %v6901_v16 }
 0x356   :  { %v11883_v47 = vpop.f32.mrb[48].mxu0  ;;  %v12607_v28 = vpop.f32.mrb[112].mxu1 }
 0x357   :  { %v11884_v39 = vpop.f32.mrb[49].mxu0  ;;  %v5703_v9 = vpop.f32.mrb[113].mxu1  ;;  %v17338_v4 = vadd.f32 %v17154_v45, %v12607_v28 }
 0x358   :  { %v11886_v59 = vpop.f32.mrb[50].mxu0  ;;  %v12608_v22 = vpop.f32.mrb[114].mxu1  ;;  %v17341_v1 = vadd.f32 %v17131_v17, %v5703_v9  ;;  %v17343_v48 = vadd.f32 %v11884_v39, %v11883_v47  ;;  %v6903_v47 = vld [vmem:[#allocation2 + $0x450] sm:$0xff] }
 0x359   :  { %v11887_v63 = vpop.f32.mrb[51].mxu0  ;;  %20183 = vst [vmem:[#allocation52_spill] sm:$0xff] %v17338_v4  ;;  %v5706_v30 = vpop.f32.mrb[115].mxu1  ;;  %v17346_v12 = vadd.f32 %v17160_v24, %v12608_v22 }
 0x35a   :  { %20184 = vst [vmem:[#allocation53_spill] sm:$0xff] %v17341_v1  ;;  %v17349_v11 = vadd.f32 %v17140_v40, %v5706_v30  ;;  %v17351_v16 = vadd.f32 %v11887_v63, %v11886_v59 }
 0x35b   :  { %7209 = vmatmul.mubr.bf16.gmra.mrb[124].mxu0 %v6900_v58  ;;  %20185 = vst [vmem:[#allocation54_spill] sm:$0xff] %v17346_v12 }
 0x35c   :  { %7216 = vmatprep.mubr.bf16.mxu0 %v6904_v46  ;;  %20186 = vst [vmem:[#allocation55_spill] sm:$0xff] %v17349_v11  ;;  %v6907_v46 = vld [vmem:[#allocation2 + $0x470] sm:$0xff] }
 0x35e   :  { %v11889_v56 = vpop.f32.mrb[52].mxu0  ;;  %v12611_v32 = vpop.f32.mrb[116].mxu1 }
 0x35f   :  { %v11890_v45 = vpop.f32.mrb[53].mxu0  ;;  %v17354_v28 = vadd.f32 %v17189_v8, %v12611_v32  ;;  %v5719_v17 = vpop.f32.mrb[117].mxu1 }
 0x360   :  { %v11892_v9 = vpop.f32.mrb[54].mxu0  ;;  %v12612_v39 = vpop.f32.mrb[118].mxu1  ;;  %v17357_v24 = vadd.f32 %v17168_v42, %v5719_v17  ;;  %v17359_v40 = vadd.f32 %v11890_v45, %v11889_v56  ;;  %v2243_v42 = vld [vmem:[%s19889_s0 + $0x1b8] sm:$0x1]  ;;  %v6910_v17 = vld [vmem:[#allocation2 + $0x488] sm:$0xff] }
 0x361   :  { %20187 = vst [vmem:[#allocation56_spill] sm:$0xff] %v17354_v28  ;;  %v11893_v58 = vpop.f32.mrb[55].mxu0  ;;  %v5722_v4 = vpop.f32.mrb[119].mxu1  ;;  %v17362_v59 = vadd.f32 %v17204_v0, %v12612_v39 }
 0x362   :  { %20188 = vst [vmem:[#allocation57_spill] sm:$0xff] %v17357_v24  ;;  %v17365_v8 = vadd.f32 %v17174_v14, %v5722_v4  ;;  %v17367_v32 = vadd.f32 %v11893_v58, %v11892_v9  ;;  %v2280_v4 = vmax.bf16 %v17179_v38, %v2243_v42 }
 0x363   :  { %7217 = vmatmul.mubr.bf16.gmra.mrb[128].mxu0 %v6903_v47  ;;  %20189 = vst [vmem:[#allocation58_spill] sm:$0xff] %v17362_v59  ;;  %v6906_v47 = vld [vmem:[#allocation2 + $0x468] sm:$0xff] }
 0x364   :  { %7224 = vmatprep.mubr.bf16.mxu0 %v6907_v46  ;;  %20190 = vst [vmem:[#allocation59_spill] sm:$0xff] %v17365_v8  ;;  %v7580_v8 = vrot.slane %v17290_v62, 1 }
 0x366   :  { %v11895_v22 = vpop.f32.mrb[56].mxu0  ;;  %v12615_v63 = vpop.f32.mrb[120].mxu1 }
 0x367   :  { %v11896_v30 = vpop.f32.mrb[57].mxu0  ;;  %v5735_v28 = vpop.f32.mrb[121].mxu1  ;;  %v17373_v0 = vadd.f32 %v17229_v55, %v12615_v63 }
 0x368   :  { %v11898_v12 = vpop.f32.mrb[58].mxu0  ;;  %v12616_v56 = vpop.f32.mrb[122].mxu1  ;;  %v17377_v9 = vadd.f32 %v17215_v15, %v5735_v28  ;;  %v17379_v39 = vadd.f32 %v11896_v30, %v11895_v22  ;;  %v6913_v30 = vld [vmem:[#allocation2 + $0x4a0] sm:$0xff] }
 0x369   :  { %v11899_v45 = vpop.f32.mrb[59].mxu0  ;;  %20191 = vst [vmem:[#allocation60_spill] sm:$0xff] %v17373_v0  ;;  %v5738_v14 = vpop.f32.mrb[123].mxu1  ;;  %v17382_v58 = vadd.f32 %v17236_v18, %v12616_v56 }
 0x36a   :  { %20192 = vst [vmem:[#allocation61_spill] sm:$0xff] %v17377_v9  ;;  %v17385_v46 = vadd.f32 %v17219_v6, %v5738_v14  ;;  %v17387_v59 = vadd.f32 %v11899_v45, %v11898_v12 }
 0x36b   :  { %7225 = vmatmul.mubr.bf16.gmra.mrb[132].mxu0 %v6906_v47  ;;  %20193 = vst [vmem:[#allocation62_spill] sm:$0xff] %v17382_v58  ;;  %v10292_v47 = vcombine.low %v2280_v4, %v2280_v4  ;;  %v20232_v58 = vld [vmem:[#allocation38_spill] sm:$0xff] }
 0x36c   :  { %7232 = vmatprep.mubr.bf16.mxu0 %v6910_v17  ;;  %20194 = vst [vmem:[#allocation63_spill] sm:$0xff] %v17385_v46  ;;  %v6909_v17 = vld [vmem:[#allocation2 + $0x480] sm:$0xff] }
 0x36d   :  { %v2409_v56 = vrot.slane %v10292_v47, 1 }
 0x36e   :  { %v11901_v55 = vpop.f32.mrb[60].mxu0  ;;  %v12619_v63 = vpop.f32.mrb[124].mxu1 }
 0x36f   :  { %v11902_v0 = vpop.f32.mrb[61].mxu0  ;;  %v5751_v24 = vpop.f32.mrb[125].mxu1  ;;  %v17390_v15 = vadd.f32 %v17262_v54, %v12619_v63  ;;  %v20199_v63 = vld [vmem:[#allocation5_spill] sm:$0xff] }
 0x370   :  { %v11904_v42 = vpop.f32.mrb[62].mxu0  ;;  %v12620_v28 = vpop.f32.mrb[126].mxu1  ;;  %v17393_v6 = vadd.f32 %v17246_v7, %v5751_v24  ;;  %v17395_v12 = vadd.f32 %v11902_v0, %v11901_v55  ;;  %v20200_v38 = vrot.slane %v20199_v63, 1  ;;  %v6916_v0 = vld [vmem:[#allocation2 + $0x4b8] sm:$0xff] }
 0x371   :  { %20195 = vst [vmem:[#allocation64_spill] sm:$0xff] %v17390_v15  ;;  %v11905_v22 = vpop.f32.mrb[63].mxu0  ;;  %v5754_v18 = vpop.f32.mrb[127].mxu1  ;;  %v17398_v45 = vadd.f32 %v17265_v27, %v12620_v28  ;;  %v6912_v15 = vld [vmem:[#allocation2 + $0x498] sm:$0xff] }
 0x372   :  { %20196 = vst [vmem:[#allocation65_spill] sm:$0xff] %v17393_v6  ;;  %v17401_v14 = vadd.f32 %v17252_v43, %v5754_v18  ;;  %v17403_v54 = vadd.f32 %v11905_v22, %v11904_v42 }
 0x373   :  { %7233 = vmatmul.mubr.bf16.gmra.mrb[136].mxu0 %v6909_v17  ;;  %20197 = vst [vmem:[#allocation66_spill] sm:$0xff] %v17398_v45  ;;  %v2410_v17 = vsel %vm738_vm1, %v20200_v38, %v2409_v56  ;;  %v6915_v38 = vld [vmem:[#allocation2 + $0x4b0] sm:$0xff] }
 0x374   :  { %7240 = vmatprep.mubr.bf16.mxu0 %v6913_v30  ;;  %20198 = vst [vmem:[#allocation67_spill] sm:$0xff] %v17401_v14  ;;  %2446 = vst.msk [vmem:[#allocation2 + $0x508] sm:$0xff] %vm1837_vm2, %v2410_v17  ;;  %v6919_v56 = vld [vmem:[#allocation2 + $0x4d0] sm:$0xff]  ;;  %v20225_v14 = vld [vmem:[#allocation9_spill] sm:$0xff] }
 0x376   :  { %v11947_v4 = vpop.f32.mrb[192].mxu1 }
 0x377   :  { %v11948_v47 = vpop.f32.mrb[193].mxu1 }
 0x378   :  { %v11949_v7 = vadd.f32 %v11948_v47, %v11947_v4  ;;  %v11950_v24 = vpop.f32.mrb[194].mxu1 }
 0x379   :  { %v11951_v55 = vpop.f32.mrb[195].mxu1 }
 0x37a   :  { %v17410_v27 = vadd.f32 %v11949_v7, %v17119_v44  ;;  %v11952_v43 = vadd.f32 %v11951_v55, %v11950_v24 }
 0x37b   :  { %7241 = vmatmul.mubr.bf16.gmra.mrb[140].mxu0 %v6912_v15 }
 0x37c   :  { %7248 = vmatprep.mubr.bf16.mxu0 %v6916_v0  ;;  %v17413_v42 = vadd.f32 %v11952_v43, %v17124_v21  ;;  %v6918_v21 = vld [vmem:[#allocation2 + $0x4c8] sm:$0xff] }
 0x37d   :  { %v6922_v0 = vld [vmem:[#allocation2 + $0x4e8] sm:$0xff] }
 0x37e   :  { %v11953_v28 = vpop.f32.mrb[196].mxu1 }
 0x37f   :  { %v11954_v22 = vpop.f32.mrb[197].mxu1 }
 0x380   :  { %v11955_v30 = vadd.f32 %v11954_v22, %v11953_v28  ;;  %v11956_v18 = vpop.f32.mrb[198].mxu1 }
 0x381   :  { %v11957_v63 = vpop.f32.mrb[199].mxu1 }
 0x382   :  { %v17416_v4 = vadd.f32 %v11955_v30, %v17147_v35  ;;  %v11958_v17 = vadd.f32 %v11957_v63, %v11956_v18 }
 0x383   :  { %7249 = vmatmul.mubr.bf16.gmra.mrb[144].mxu0 %v6915_v38 }
 0x384   :  { %7256 = vmatprep.mubr.bf16.mxu0 %v6919_v56  ;;  %v17419_v44 = vadd.f32 %v11958_v17, %v17149_v53  ;;  %v6921_v53 = vld [vmem:[#allocation2 + $0x4e0] sm:$0xff] }
 0x385   :  { %v6925_v56 = vld [vmem:[#allocation2 + $0x500] sm:$0xff] }
 0x386   :  { %v11959_v15 = vpop.f32.mrb[200].mxu1 }
 0x387   :  { %v11960_v47 = vpop.f32.mrb[201].mxu1 }
 0x388   :  { %v11961_v7 = vadd.f32 %v11960_v47, %v11959_v15  ;;  %v11962_v24 = vpop.f32.mrb[202].mxu1 }
 0x389   :  { %v11963_v55 = vpop.f32.mrb[203].mxu1 }
 0x38a   :  { %v17422_v43 = vadd.f32 %v11961_v7, %v17162_v57  ;;  %v11964_v28 = vadd.f32 %v11963_v55, %v11962_v24 }
 0x38b   :  { %7257 = vmatmul.mubr.bf16.gmra.mrb[148].mxu0 %v6918_v21 }
 0x38c   :  { %7264 = vmatprep.mubr.bf16.mxu0 %v6922_v0  ;;  %v17425_v35 = vadd.f32 %v11964_v28, %v17164_v52  ;;  %v6924_v52 = vld [vmem:[#allocation2 + $0x4f8] sm:$0xff]  ;;  %v6881_v0 = vld [vmem:[#allocation2 + $0x3a0] sm:$0xff] }
 0x38e   :  { %v11965_v22 = vpop.f32.mrb[204].mxu1 }
 0x38f   :  { %v11966_v38 = vpop.f32.mrb[205].mxu1 }
 0x390   :  { %v11967_v30 = vadd.f32 %v11966_v38, %v11965_v22  ;;  %v11968_v18 = vpop.f32.mrb[206].mxu1 }
 0x391   :  { %v11969_v63 = vpop.f32.mrb[207].mxu1 }
 0x392   :  { %v17428_v17 = vadd.f32 %v11967_v30, %v17182_v51  ;;  %v11970_v15 = vadd.f32 %v11969_v63, %v11968_v18 }
 0x393   :  { %7265 = vmatmul.mubr.bf16.gmra.mrb[152].mxu0 %v6921_v53 }
 0x394   :  { %7272 = vmatprep.mubr.bf16.mxu0 %v6925_v56  ;;  %v17431_v57 = vadd.f32 %v11970_v15, %v17184_v61  ;;  %v6884_v61 = vld [vmem:[#allocation2 + $0x3b8] sm:$0xff]  ;;  %v6887_v56 = vld [vmem:[#allocation2 + $0x3d0] sm:$0xff] }
 0x396   :  { %v11971_v47 = vpop.f32.mrb[208].mxu1 }
 0x397   :  { %v11972_v21 = vpop.f32.mrb[209].mxu1 }
 0x398   :  { %v11973_v7 = vadd.f32 %v11972_v21, %v11971_v47  ;;  %v11974_v24 = vpop.f32.mrb[210].mxu1 }
 0x399   :  { %v11975_v55 = vpop.f32.mrb[211].mxu1 }
 0x39a   :  { %v17434_v28 = vadd.f32 %v11973_v7, %v17208_v3  ;;  %v11976_v22 = vadd.f32 %v11975_v55, %v11974_v24 }
 0x39b   :  { %7273 = vmatmul.mubr.bf16.gmra.mrb[156].mxu0 %v6924_v52 }
 0x39c   :  { %12733 = vmatprep.mubr.bf16.mxu0 %v6881_v0  ;;  %v17437_v51 = vadd.f32 %v11976_v22, %v17211_v13  ;;  %v6890_v13 = vld [vmem:[#allocation2 + $0x3e8] sm:$0xff]  ;;  %v6893_v0 = vld [vmem:[#allocation2 + $0x400] sm:$0xff] }
 0x39e   :  { %v11977_v38 = vpop.f32.mrb[212].mxu1 }
 0x39f   :  { %v11978_v53 = vpop.f32.mrb[213].mxu1 }
 0x3a0   :  { %v11979_v30 = vadd.f32 %v11978_v53, %v11977_v38  ;;  %v11980_v18 = vpop.f32.mrb[214].mxu1 }
 0x3a1   :  { %v11981_v63 = vpop.f32.mrb[215].mxu1 }
 0x3a2   :  { %v17440_v15 = vadd.f32 %v11979_v30, %v17221_v19  ;;  %v11982_v47 = vadd.f32 %v11981_v63, %v11980_v18 }
 0x3a3   :  { %12734 = vmatmul.mubr.bf16.vlgmr.msra.gmra.mrb[64].mxu0 %v6884_v61 }
 0x3a4   :  { %12737 = vmatprep.mubr.bf16.mxu0 %v6887_v56  ;;  %v17443_v3 = vadd.f32 %v11982_v47, %v17226_v60  ;;  %v6896_v60 = vld [vmem:[#allocation2 + $0x418] sm:$0xff]  ;;  %v6899_v56 = vld [vmem:[#allocation2 + $0x430] sm:$0xff] }
 0x3a6   :  { %v11983_v21 = vpop.f32.mrb[216].mxu1 }
 0x3a7   :  { %v11984_v52 = vpop.f32.mrb[217].mxu1 }
 0x3a8   :  { %v11985_v7 = vadd.f32 %v11984_v52, %v11983_v21  ;;  %v11986_v24 = vpop.f32.mrb[218].mxu1 }
 0x3a9   :  { %v11987_v55 = vpop.f32.mrb[219].mxu1 }
 0x3aa   :  { %v17446_v22 = vadd.f32 %v11985_v7, %v17238_v37  ;;  %v11988_v38 = vadd.f32 %v11987_v55, %v11986_v24 }
 0x3ab   :  { %12738 = vmatmul.mubr.bf16.gmra.mrb[68].mxu0 %v6890_v13 }
 0x3ac   :  { %12741 = vmatprep.mubr.bf16.mxu0 %v6893_v0  ;;  %v17449_v19 = vadd.f32 %v11988_v38, %v17243_v2  ;;  %v6902_v2 = vld [vmem:[#allocation2 + $0x448] sm:$0xff]  ;;  %v6905_v0 = vld [vmem:[#allocation2 + $0x460] sm:$0xff] }
 0x3ae   :  { %v11989_v53 = vpop.f32.mrb[220].mxu1 }
 0x3af   :  { %v11990_v61 = vpop.f32.mrb[221].mxu1 }
 0x3b0   :  { %v11991_v30 = vadd.f32 %v11990_v61, %v11989_v53  ;;  %v11992_v18 = vpop.f32.mrb[222].mxu1 }
 0x3b1   :  { %v11993_v63 = vpop.f32.mrb[223].mxu1 }
 0x3b2   :  { %v17452_v47 = vadd.f32 %v11991_v30, %v17254_v33  ;;  %v11994_v21 = vadd.f32 %v11993_v63, %v11992_v18 }
 0x3b3   :  { %12742 = vmatmul.mubr.bf16.gmra.mrb[72].mxu0 %v6896_v60 }
 0x3b4   :  { %12745 = vmatprep.mubr.bf16.mxu0 %v6899_v56  ;;  %v17455_v37 = vadd.f32 %v11994_v21, %v17259_v49  ;;  %v6908_v49 = vld [vmem:[#allocation2 + $0x478] sm:$0xff]  ;;  %v6911_v56 = vld [vmem:[#allocation2 + $0x490] sm:$0xff] }
 0x3b6   :  { %20201 = vst [vmem:[#allocation5_spill] sm:$0xff] %v17455_v37  ;;  %v11995_v52 = vpop.f32.mrb[224].mxu1 }
 0x3b7   :  { %v11996_v13 = vpop.f32.mrb[225].mxu1 }
 0x3b8   :  { %v11997_v7 = vadd.f32 %v11996_v13, %v11995_v52  ;;  %v11998_v24 = vpop.f32.mrb[226].mxu1 }
 0x3b9   :  { %v11999_v55 = vpop.f32.mrb[227].mxu1 }
 0x3ba   :  { %v17458_v38 = vadd.f32 %v11997_v7, %v17273_v36  ;;  %v12000_v53 = vadd.f32 %v11999_v55, %v11998_v24 }
 0x3bb   :  { %12746 = vmatmul.mubr.bf16.gmra.mrb[76].mxu0 %v6902_v2 }
 0x3bc   :  { %20202 = vst [vmem:[#allocation68_spill] sm:$0xff] %v17458_v38  ;;  %12749 = vmatprep.mubr.bf16.mxu0 %v6905_v0  ;;  %v17461_v33 = vadd.f32 %v12000_v53, %v17284_v50  ;;  %v6914_v50 = vld [vmem:[#allocation2 + $0x4a8] sm:$0xff]  ;;  %v6917_v0 = vld [vmem:[#allocation2 + $0x4c0] sm:$0xff] }
 0x3be   :  { %20203 = vst [vmem:[#allocation69_spill] sm:$0xff] %v17461_v33  ;;  %v12001_v61 = vpop.f32.mrb[228].mxu1 }
 0x3bf   :  { %v12002_v60 = vpop.f32.mrb[229].mxu1 }
 0x3c0   :  { %v12003_v30 = vadd.f32 %v12002_v60, %v12001_v61  ;;  %v12004_v18 = vpop.f32.mrb[230].mxu1 }
 0x3c1   :  { %v12005_v63 = vpop.f32.mrb[231].mxu1 }
 0x3c2   :  { %v17464_v21 = vadd.f32 %v12003_v30, %v17292_v26  ;;  %v12006_v52 = vadd.f32 %v12005_v63, %v12004_v18 }
 0x3c3   :  { %12750 = vmatmul.mubr.bf16.gmra.mrb[80].mxu0 %v6908_v49 }
 0x3c4   :  { %20204 = vst [vmem:[#allocation70_spill] sm:$0xff] %v17464_v21  ;;  %12753 = vmatprep.mubr.bf16.mxu0 %v6911_v56  ;;  %v17467_v36 = vadd.f32 %v12006_v52, %v17300_v31  ;;  %v6920_v31 = vld [vmem:[#allocation2 + $0x4d8] sm:$0xff]  ;;  %v6923_v56 = vld [vmem:[#allocation2 + $0x4f0] sm:$0xff] }
 0x3c6   :  { %20205 = vst [vmem:[#allocation71_spill] sm:$0xff] %v17467_v36  ;;  %v12007_v13 = vpop.f32.mrb[232].mxu1  ;;  %v7572_v36 = vrot.slane %v17303_v29, 1 }
 0x3c7   :  { %v12008_v2 = vpop.f32.mrb[233].mxu1 }
 0x3c8   :  { %v12009_v7 = vadd.f32 %v12008_v2, %v12007_v13  ;;  %v12010_v24 = vpop.f32.mrb[234].mxu1 }
 0x3c9   :  { %v12011_v55 = vpop.f32.mrb[235].mxu1 }
 0x3ca   :  { %v17470_v53 = vadd.f32 %v12009_v7, %v17311_v41  ;;  %v12012_v61 = vadd.f32 %v12011_v55, %v12010_v24 }
 0x3cb   :  { %12754 = vmatmul.mubr.bf16.gmra.mrb[84].mxu0 %v6914_v50 }
 0x3cc   :  { %20206 = vst [vmem:[#allocation72_spill] sm:$0xff] %v17470_v53  ;;  %12757 = vmatprep.mubr.bf16.mxu0 %v6917_v0  ;;  %v17473_v26 = vadd.f32 %v12012_v61, %v17319_v34  ;;  %v6926_v34 = vld [vmem:[#allocation2 + $0x508] sm:$0xff]  ;;  %v7936_v53 = vmul.f32 %v17303_v29, %v17303_v29 }
 0x3ce   :  { %20207 = vst [vmem:[#allocation73_spill] sm:$0xff] %v17473_v26  ;;  %v12013_v60 = vpop.f32.mrb[236].mxu1  ;;  %v8107_v33 = vrot.slane %v7936_v53, 1 }
 0x3cf   :  { %v12014_v49 = vpop.f32.mrb[237].mxu1 }
 0x3d0   :  { %v12015_v30 = vadd.f32 %v12014_v49, %v12013_v60  ;;  %v12016_v18 = vpop.f32.mrb[238].mxu1 }
 0x3d1   :  { %v12017_v63 = vpop.f32.mrb[239].mxu1 }
 0x3d2   :  { %v17476_v52 = vadd.f32 %v12015_v30, %v17327_v10  ;;  %v12018_v13 = vadd.f32 %v12017_v63, %v12016_v18 }
 0x3d3   :  { %12758 = vmatmul.mubr.bf16.gmra.mrb[88].mxu0 %v6920_v31 }
 0x3d4   :  { %20208 = vst [vmem:[#allocation74_spill] sm:$0xff] %v17476_v52  ;;  %12761 = vmatprep.mubr.bf16.mxu0 %v6923_v56  ;;  %v17479_v41 = vadd.f32 %v12018_v13, %v17335_v5 }
 0x3d6   :  { %20209 = vst [vmem:[#allocation75_spill] sm:$0xff] %v17479_v41  ;;  %v12019_v2 = vpop.f32.mrb[240].mxu1 }
 0x3d7   :  { %v12020_v50 = vpop.f32.mrb[241].mxu1 }
 0x3d8   :  { %v12021_v7 = vadd.f32 %v12020_v50, %v12019_v2  ;;  %v12022_v24 = vpop.f32.mrb[242].mxu1 }
 0x3d9   :  { %v12023_v0 = vpop.f32.mrb[243].mxu1 }
 0x3da   :  { %v17482_v55 = vadd.f32 %v12021_v7, %v17343_v48  ;;  %v12024_v61 = vadd.f32 %v12023_v0, %v12022_v24 }
 0x3db   :  { %12762 = vmatmul.mubr.bf16.gmra.mrb[92].mxu0 %v6926_v34 }
 0x3dc   :  { %20210 = vst [vmem:[#allocation76_spill] sm:$0xff] %v17482_v55  ;;  %v17485_v10 = vadd.f32 %v12024_v61, %v17351_v16 }
 0x3de   :  { %20211 = vst [vmem:[#allocation77_spill] sm:$0xff] %v17485_v10  ;;  %v12025_v60 = vpop.f32.mrb[244].mxu1  ;;  %v17577_v10 = vmul.f32 %v20232_v58, %v20232_v58 }
 0x3df   :  { %v12026_v49 = vpop.f32.mrb[245].mxu1 }
 0x3e0   :  { %v12027_v31 = vadd.f32 %v12026_v49, %v12025_v60  ;;  %v12028_v30 = vpop.f32.mrb[246].mxu1  ;;  %v20216_v49 = vld [vmem:[#allocation14_spill] sm:$0xff] }
 0x3e1   :  { %v12029_v5 = vpop.f32.mrb[247].mxu1 }
 0x3e2   :  { %v17488_v18 = vadd.f32 %v12027_v31, %v17359_v40  ;;  %v12030_v56 = vadd.f32 %v12029_v5, %v12028_v30  ;;  %v7560_v31 = vrot.slane %v20216_v49, 1  ;;  %v7929_v30 = vmul.f32 %v20216_v49, %v20216_v49 }
 0x3e4   :  { %20212 = vst [vmem:[#allocation78_spill] sm:$0xff] %v17488_v18  ;;  %v17491_v63 = vadd.f32 %v12030_v56, %v17367_v32  ;;  %v20218_v56 = vld [vmem:[#allocation13_spill] sm:$0xff] }
 0x3e6   :  { %20213 = vst [vmem:[#allocation79_spill] sm:$0xff] %v17491_v63  ;;  %v12031_v13 = vpop.f32.mrb[248].mxu1 }
 0x3e7   :  { %v12032_v48 = vpop.f32.mrb[249].mxu1 }
 0x3e8   :  { %v12033_v2 = vadd.f32 %v12032_v48, %v12031_v13  ;;  %v12034_v50 = vpop.f32.mrb[250].mxu1  ;;  %v7559_v13 = vrot.slane %v20218_v56, 1 }
 0x3e9   :  { %v12035_v34 = vpop.f32.mrb[251].mxu1 }
 0x3ea   :  { %v17494_v16 = vadd.f32 %v12033_v2, %v17379_v39  ;;  %v12036_v7 = vadd.f32 %v12035_v34, %v12034_v50  ;;  %v7561_v2 = vsel %vm738_vm1, %v7559_v13, %v7560_v31  ;;  %v7770_v50 = vsel %vm7769_vm3, %v7560_v31, 0.0  ;;  %v20223_v31 = vld [vmem:[#allocation15_spill] sm:$0xff] }
 0x3eb   :  { %v7568_v6 = vrot.slane %v20223_v31, 1 }
 0x3ec   :  { %20214 = vst [vmem:[#allocation80_spill] sm:$0xff] %v17494_v16  ;;  %v17497_v24 = vadd.f32 %v12036_v7, %v17387_v59  ;;  %v7926_v59 = vmul.f32 %v20218_v56, %v20218_v56  ;;  %v8095_v7 = vrot.slane %v7929_v30, 1  ;;  %v7932_v30 = vmul.f32 %v20223_v31, %v20223_v31 }
 0x3ee   :  { %20215 = vst [vmem:[#allocation81_spill] sm:$0xff] %v17497_v24  ;;  %v12037_v0 = vpop.f32.mrb[252].mxu1  ;;  %v8094_v49 = vrot.slane %v7926_v59, 1  ;;  %v8304_v59 = vsel %vm7769_vm3, %v8095_v7, 0.0 }
 0x3ef   :  { %v12038_v61 = vpop.f32.mrb[253].mxu1 }
 0x3f0   :  { %v12039_v40 = vadd.f32 %v12038_v61, %v12037_v0  ;;  %v12040_v60 = vpop.f32.mrb[254].mxu1  ;;  %v20220_v0 = vld [vmem:[#allocation16_spill] sm:$0xff] }
 0x3f1   :  { %v12041_v32 = vpop.f32.mrb[255].mxu1  ;;  %v17515_v61 = vmul.f32 %v20220_v0, %v20220_v0 }
 0x3f2   :  { %v17503_v5 = vadd.f32 %v12039_v40, %v17395_v12  ;;  %v12042_v39 = vadd.f32 %v12041_v32, %v12040_v60  ;;  %v20221_v12 = vld [vmem:[#allocation8_spill] sm:$0xff] }
 0x3f3   :  { %v17519_v40 = vmul.f32 %v20221_v12, %v20221_v12 }
 0x3f4   :  { %20217 = vst [vmem:[#allocation82_spill] sm:$0xff] %v17503_v5  ;;  %v17509_v48 = vadd.f32 %v12042_v39, %v17403_v54  ;;  %v7771_v54 = vadd.f32 %v7770_v50, %v7561_v2  ;;  %v20222_v39 = vld [vmem:[#allocation18_spill] sm:$0xff]  ;;  %v7569_v5 = vrot.slane %v20221_v12, 1  ;;  %v20230_v12 = vrot.slane %v17515_v61, 1 }
 0x3f5   :  { %v17523_v13 = vmul.f32 %v20222_v39, %v20222_v39  ;;  %v8104_v50 = vrot.slane %v17519_v40, 1  ;;  %v17552_v40 = vmul.f32 %v17282_v20, %v17282_v20 }
 0x3f6   :  { %20219 = vst [vmem:[#allocation83_spill] sm:$0xff] %v17509_v48  ;;  %v12083_v34 = vpop.f32.mrb[96].mxu0  ;;  %v17540_v48 = vmul.f32 %v20225_v14, %v20225_v14  ;;  %v7570_v2 = vsel %vm738_vm1, %v7568_v6, %v7569_v5  ;;  %v17568_v31 = vsel %vm7769_vm3, %v20230_v12, 0.0  ;;  %v20235_v12 = vld [vmem:[#allocation11_spill] sm:$0xff] }
 0x3f7   :  { %v12084_v60 = vpop.f32.mrb[97].mxu0  ;;  %v8098_v41 = vrot.slane %v17552_v40, 1  ;;  %v7772_v46 = vadd.f32 %v7771_v54, %v7570_v2  ;;  %v7562_v40 = vrot.slane %v20232_v58, 1 }
 0x3f8   :  { %v12085_v32 = vadd.f32 %v12084_v60, %v12083_v34  ;;  %v12086_v45 = vpop.f32.mrb[98].mxu0  ;;  %v8096_v34 = vsel %vm738_vm1, %v8094_v49, %v8095_v7  ;;  %v8103_v49 = vrot.slane %v7932_v30, 1 }
 0x3f9   :  { %v12087_v56 = vpop.f32.mrb[99].mxu0 }
 0x3fa   :  { %v12088_v24 = vadd.f32 %v12087_v56, %v12086_v45  ;;  %v17530_v16 = vadd.f32 %v17410_v27, %v12085_v32  ;;  %v20227_v56 = vld [vmem:[#allocation20_spill] sm:$0xff]  ;;  %v20228_v32 = vrot.slane %v20220_v0, 1 }
 0x3fb   :  { %v17548_v7 = vmul.f32 %v20227_v56, %v20227_v56 }
 0x3fc   :  { %20224 = vst [vmem:[#allocation18_spill] sm:$0xff] %v17530_v16  ;;  %v17543_v45 = vadd.f32 %v17413_v42, %v12088_v24  ;;  %v17557_v60 = vsel %vm7769_vm3, %v20228_v32, 0.0  ;;  %v20229_v42 = vld [vmem:[#allocation22_spill] sm:$0xff]  ;;  %v8307_v16 = vsel %vm7769_vm3, %v8104_v50, 0.0  ;;  %v20231_v32 = vld [vmem:[#allocation17_spill] sm:$0xff] }
 0x3fd   :  { %v17563_v30 = vmul.f32 %v20229_v42, %v20229_v42  ;;  %v20233_v52 = vrot.slane %v20229_v42, 1  ;;  %v20238_v24 = vld [vmem:[#allocation41_spill] sm:$0xff] }
 0x3fe   :  { %20226 = vst [vmem:[#allocation84_spill] sm:$0xff] %v17543_v45  ;;  %v12089_v27 = vpop.f32.mrb[100].mxu0  ;;  %v7773_v45 = vsel %vm7769_vm3, %v7569_v5, 0.0  ;;  %v7563_v5 = vrot.slane %v17282_v20, 1  ;;  %v8351_v20 = vsel %vm7769_vm3, %v8098_v41, 0.0  ;;  %v7581_v58 = vrot.slane %v20238_v24, 1 }
 0x3ff   :  { %v12090_v18 = vpop.f32.mrb[101].mxu0  ;;  %v17586_v6 = vsel %vm7769_vm3, %v20233_v52, 0.0  ;;  %v13565_v52 = vld [vmem:[%s19890_s4 + $0x4] ss:$12 sps:$4 sm:$0xff]  }
 0x400   :  { %v12091_v55 = vadd.f32 %v12090_v18, %v12089_v27  ;;  %v12092_v9 = vpop.f32.mrb[102].mxu0  ;;  %v13563_v27 = vld [vmem:[%s19890_s4] ss:$12 sps:$4 sm:$0xff]   ;;  %v7817_v2 = vsel %vm7769_vm3, %v7563_v5, 0.0  ;;  %9317 = vmatprep.subr.bf16.mxu1 %v13565_v52  ;;  %v7564_v1 = vsel %vm738_vm1, %v7562_v40, %v7563_v5 }
 0x401   :  { %v12093_v63 = vpop.f32.mrb[103].mxu0  ;;  %9318 = vmatpush1.bf16.msra.mxu1 %v13563_v27  ;;  %v7818_v40 = vadd.f32 %v7817_v2, %v7564_v1  ;;  %v20243_v2 = vrot.slane %v20229_v42, 1 }
 0x402   :  { %v12094_v26 = vadd.f32 %v12093_v63, %v12092_v9  ;;  %v17590_v18 = vadd.f32 %v17416_v4, %v12091_v55  ;;  %v8097_v9 = vrot.slane %v17577_v10, 1  ;;  %v17605_v4 = vmul.f32 %v17290_v62, %v17290_v62  ;;  %v20236_v55 = vld [vmem:[#allocation51_spill] sm:$0xff] }
 0x403   :  { %v7933_v63 = vmul.f32 %v20236_v55, %v20236_v55  ;;  %v8105_v10 = vsel %vm738_vm1, %v8103_v49, %v8104_v50  ;;  %v20239_v50 = vrot.slane %v20220_v0, 1  ;;  %v20240_v49 = vrot.slane %v20222_v39, 1 }
 0x404   :  { %20234 = vst [vmem:[#allocation85_spill] sm:$0xff] %v17590_v18  ;;  %v17610_v54 = vadd.f32 %v17419_v44, %v12094_v26  ;;  %v17617_v18 = vmul.f32 %v20238_v24, %v20238_v24  ;;  %v8305_v44 = vadd.f32 %v8304_v59, %v8096_v34  ;;  %v7774_v26 = vadd.f32 %v7773_v45, %v7772_v46 }
 0x405   :  { %v8115_v24 = vrot.slane %v17605_v4, 1  ;;  %v8106_v11 = vrot.slane %v7933_v63, 1  ;;  %v7579_v62 = vsel %vm738_vm1, %v20240_v49, %v20239_v50  ;;  %v7823_v46 = vsel %vm7769_vm3, %v7581_v58, 0.0 }
 0x406   :  { %20237 = vst [vmem:[#allocation51_spill] sm:$0xff] %v17610_v54  ;;  %v12095_v21 = vpop.f32.mrb[104].mxu0  ;;  %v7571_v54 = vrot.slane %v20236_v55, 1  ;;  %v8306_v27 = vadd.f32 %v8305_v44, %v8105_v10  ;;  %v8116_v34 = vrot.slane %v17617_v18, 1  ;;  %v7820_v45 = vsel %vm7769_vm3, %v7572_v36, 0.0 }
 0x407   :  { %v12096_v38 = vpop.f32.mrb[105].mxu0  ;;  %v8354_v63 = vsel %vm7769_vm3, %v8107_v33, 0.0 }
 0x408   :  { %v12097_v52 = vadd.f32 %v12096_v38, %v12095_v21  ;;  %v12098_v37 = vpop.f32.mrb[106].mxu0  ;;  %v7573_v59 = vsel %vm738_vm1, %v7571_v54, %v7572_v36  ;;  %v7775_v21 = vadd.f32 %v7774_v26, %v7579_v62  ;;  %v8308_v10 = vadd.f32 %v8307_v16, %v8306_v27  ;;  %v13566_v54 = vld [vmem:[%s19890_s4 + $0x18] ss:$12 sps:$4 sm:$0xff]  }
 0x409   :  { %v12099_v53 = vpop.f32.mrb[107].mxu0  ;;  %v7819_v44 = vadd.f32 %v7818_v40, %v7573_v59  ;;  %v8099_v62 = vsel %vm738_vm1, %v8097_v9, %v8098_v41  ;;  %v20241_v36 = vrot.slane %v17515_v61, 1  ;;  %v20244_v26 = vrot.slane %v20225_v14, 1 }
 0x40a   :  { %v12100_v5 = vadd.f32 %v12099_v53, %v12098_v37  ;;  %v17635_v38 = vadd.f32 %v17422_v43, %v12097_v52  ;;  %v13568_v37 = vld [vmem:[%s19890_s4 + $0x1c] ss:$12 sps:$4 sm:$0xff]   ;;  %v7777_v43 = vadd.f32 %v17557_v60, %v7775_v21  ;;  %v8108_v41 = vsel %vm738_vm1, %v8106_v11, %v8107_v33 }
 0x40b   :  { %v7588_v52 = vsel %vm738_vm1, %v20244_v26, %v20243_v2  ;;  %9319 = vmatprep.subr.bf16.mxu1 %v13568_v37  ;;  %v7821_v60 = vadd.f32 %v7820_v45, %v7819_v44  ;;  %v8352_v61 = vadd.f32 %v8351_v20, %v8099_v62  ;;  %v7582_v40 = vsel %vm738_vm1, %v7580_v8, %v7581_v58  ;;  %v20245_v45 = vld [vmem:[#allocation43_spill] sm:$0xff] }
 0x40c   :  { %v17639_v50 = vadd.f32 %v17425_v35, %v12100_v5  ;;  %v20242_v35 = vrot.slane %v17523_v13, 1  ;;  %9320 = vmatpush1.bf16.msra.mxu1 %v13566_v54  ;;  %v7778_v21 = vadd.f32 %v7777_v43, %v7588_v52  ;;  %v7589_v44 = vrot.slane %v20245_v45, 1  ;;  %v13569_v62 = vld [vmem:[%s19890_s4 + $0x30] ss:$12 sps:$4 sm:$0xff]  }
 0x40d   :  { %v7590_v11 = vrot.slane %v17317_v23, 1  ;;  %v20246_v20 = vrot.slane %v17563_v30, 1  ;;  %v20247_v33 = vrot.slane %v17540_v48, 1  ;;  %v13571_v48 = vld [vmem:[%s19890_s4 + $0x34] ss:$12 sps:$4 sm:$0xff]   ;;  %v20248_v26 = vrot.slane %v20227_v56, 1 }
 0x40e   :  { %v12101_v49 = vpop.f32.mrb[108].mxu0  ;;  %v8114_v16 = vsel %vm738_vm1, %v20242_v35, %v20241_v36  ;;  %v8353_v36 = vadd.f32 %v8352_v61, %v8108_v41  ;;  %v7780_v8 = vadd.f32 %v17586_v6, %v7778_v21  ;;  %v17686_v6 = vmul.f32 %v17317_v23, %v17317_v23  ;;  %9321 = vmatprep.subr.bf16.mxu1 %v13571_v48 }
 0x40f   :  { %v12102_v1 = vpop.f32.mrb[109].mxu0  ;;  %v8309_v59 = vadd.f32 %v8308_v10, %v8114_v16  ;;  %v7822_v10 = vadd.f32 %v7821_v60, %v7582_v40  ;;  %v7945_v41 = vmul.f32 %v20245_v45, %v20245_v45  ;;  %v20250_v61 = vmov %v20246_v20 }
 0x410   :  { %v12103_v27 = vadd.f32 %v12102_v1, %v12101_v49  ;;  %v12104_v53 = vpop.f32.mrb[110].mxu0  ;;  %v8355_v37 = vadd.f32 %v8354_v63, %v8353_v36  ;;  %v20249_v63 = vrot.slane %v20231_v32, 1  ;;  %9322 = vmatpush1.bf16.msra.mxu1 %v13569_v62  ;;  %v20251_v36 = vld [vmem:[#allocation10_spill] sm:$0xff]  ;;  %v8125_v4 = vrot.slane %v17686_v6, 1 }
 0x411   :  { %v12105_v9 = vpop.f32.mrb[111].mxu0  ;;  %v8311_v49 = vadd.f32 %v17568_v31, %v8309_v59  ;;  %v7824_v16 = vadd.f32 %v7823_v46, %v7822_v10  ;;  %v8117_v46 = vsel %vm738_vm1, %v8115_v24, %v8116_v34  ;;  %v20252_v24 = vmov %v20248_v26 }
 0x412   :  { %v12106_v5 = vadd.f32 %v12105_v9, %v12104_v53  ;;  %v17661_v13 = vadd.f32 %v17428_v17, %v12103_v27  ;;  %v8123_v17 = vsel %vm738_vm1, %v20247_v33, %v20246_v20  ;;  %v7597_v52 = vsel %vm738_vm1, %v20249_v63, %v20248_v26 }
 0x413   :  { %v8312_v1 = vadd.f32 %v8311_v49, %v8123_v17  ;;  %v7591_v27 = vsel %vm738_vm1, %v7589_v44, %v7590_v11  ;;  %v7781_v60 = vadd.f32 %v7780_v8, %v7597_v52  ;;  %v8356_v21 = vadd.f32 %v8355_v37, %v8117_v46  ;;  %v13574_v46 = vld [vmem:[%s19890_s4 + $0x4c] ss:$12 sps:$4 sm:$0xff]  }
 0x414   :  { %v17665_v35 = vadd.f32 %v17431_v57, %v12106_v5  ;;  %v7950_v57 = vmul.f32 %v20231_v32, %v20231_v32  ;;  %v8313_v5 = vsel %vm7769_vm3, %v20250_v61, 0.0  ;;  %v7604_v49 = vrot.slane %v20251_v36, 1  ;;  %v20258_v61 = vld [vmem:[#allocation19_spill] sm:$0xff]  ;;  %9323 = vmatprep.subr.bf16.mxu1 %v13574_v46 }
 0x415   :  { %v8314_v40 = vadd.f32 %v8313_v5, %v8312_v1  ;;  %v7825_v10 = vadd.f32 %v7824_v16, %v7591_v27  ;;  %v7782_v44 = vsel %vm7769_vm3, %v20252_v24, 0.0  ;;  %v20253_v20 = vrot.slane %v17548_v7, 1 }
 0x416   :  { %v12107_v54 = vpop.f32.mrb[112].mxu0  ;;  %v8130_v9 = vrot.slane %v7950_v57, 1  ;;  %v7956_v33 = vmul.f32 %v20251_v36, %v20251_v36  ;;  %v8357_v57 = vsel %vm7769_vm3, %v8116_v34, 0.0  ;;  %v8124_v37 = vrot.slane %v7945_v41, 1 }
 0x417   :  { %v12108_v58 = vpop.f32.mrb[113].mxu0  ;;  %v7826_v48 = vsel %vm7769_vm3, %v7590_v11, 0.0  ;;  %v8358_v1 = vadd.f32 %v8357_v57, %v8356_v21  ;;  %v13572_v11 = vld [vmem:[%s19890_s4 + $0x48] ss:$12 sps:$4 sm:$0xff]   ;;  %v20257_v41 = vmov %v20253_v20  ;;  %v7613_v5 = vrot.slane %v20258_v61, 1 }
 0x418   :  { %v12109_v31 = vadd.f32 %v12108_v58, %v12107_v54  ;;  %v12110_v43 = vpop.f32.mrb[114].mxu0  ;;  %v8132_v30 = vsel %vm738_vm1, %v8130_v9, %v20253_v20  ;;  %v20254_v54 = vrot.slane %v20235_v12, 1  ;;  %v7783_v58 = vadd.f32 %v7782_v44, %v7781_v60  ;;  %9324 = vmatpush1.bf16.msra.mxu1 %v13572_v11 }
 0x419   :  { %v12111_v2 = vpop.f32.mrb[115].mxu0  ;;  %v7827_v26 = vadd.f32 %v7826_v48, %v7825_v10  ;;  %v8126_v63 = vsel %vm738_vm1, %v8124_v37, %v8125_v4  ;;  %v8316_v9 = vsel %vm7769_vm3, %v20257_v41, 0.0  ;;  %v7962_v44 = vmul.f32 %v20258_v61, %v20258_v61 }
 0x41a   :  { %v12112_v53 = vadd.f32 %v12111_v2, %v12110_v43  ;;  %v17695_v59 = vadd.f32 %v17434_v28, %v12109_v31  ;;  %v7606_v8 = vsel %vm738_vm1, %v7604_v49, %v20254_v54  ;;  %v20255_v43 = vld [vmem:[#allocation44_spill] sm:$0xff]  ;;  %v8315_v2 = vadd.f32 %v8314_v40, %v8132_v30 }
 0x41b   :  { %v7599_v62 = vrot.slane %v20255_v43, 1  ;;  %v7784_v21 = vadd.f32 %v7783_v58, %v7606_v8  ;;  %v7954_v40 = vmul.f32 %v20255_v43, %v20255_v43  ;;  %v8359_v10 = vadd.f32 %v8358_v1, %v8126_v63 }
 0x41c   :  { %v17708_v28 = vadd.f32 %v17437_v51, %v12112_v53  ;;  %v17722_v51 = vmul.f32 %v20235_v12, %v20235_v12  ;;  %v20256_v53 = vld [vmem:[#allocation42_spill] sm:$0xff]  ;;  %v8317_v7 = vadd.f32 %v8316_v9, %v8315_v2  ;;  %v7608_v8 = vrot.slane %v17333_v25, 1  ;;  %v20261_v2 = vld [vmem:[#allocation37_spill] sm:$0xff] }
 0x41d   :  { %v7598_v18 = vrot.slane %v20256_v53, 1  ;;  %v7951_v20 = vmul.f32 %v20256_v53, %v20256_v53  ;;  %v8360_v48 = vsel %vm7769_vm3, %v8125_v4, 0.0  ;;  %v17773_v46 = vmul.f32 %v17333_v25, %v17333_v25 }
 0x41e   :  { %v12113_v17 = vpop.f32.mrb[116].mxu0  ;;  %v8140_v27 = vrot.slane %v17722_v51, 1  ;;  %v20259_v51 = vld [vmem:[#allocation21_spill] sm:$0xff] }
 0x41f   :  { %v12114_v31 = vpop.f32.mrb[117].mxu0  ;;  %v7600_v49 = vsel %vm738_vm1, %v7598_v18, %v7599_v62  ;;  %v7614_v57 = vrot.slane %v20259_v51, 1 }
 0x420   :  { %v12115_v16 = vadd.f32 %v12114_v31, %v12113_v17  ;;  %v12116_v6 = vpop.f32.mrb[118].mxu0  ;;  %v7828_v30 = vadd.f32 %v7827_v26, %v7600_v49  ;;  %v17760_v17 = vmul.f32 %v20259_v51, %v20259_v51  ;;  %v8134_v31 = vrot.slane %v7954_v40, 1 }
 0x421   :  { %v12117_v52 = vpop.f32.mrb[119].mxu0  ;;  %v7607_v26 = vrot.slane %v20261_v2, 1  ;;  %v8148_v40 = vrot.slane %v7962_v44, 1 }
 0x422   :  { %v12118_v60 = vadd.f32 %v12117_v52, %v12116_v6  ;;  %v17736_v34 = vadd.f32 %v17440_v15, %v12115_v16  ;;  %v8139_v15 = vrot.slane %v7956_v33, 1  ;;  %v20260_v33 = vmov %v20254_v54 }
 0x423   :  { %v7785_v54 = vsel %vm7769_vm3, %v20260_v33, 0.0  ;;  %v7829_v16 = vsel %vm7769_vm3, %v7599_v62, 0.0  ;;  %v8361_v6 = vadd.f32 %v8360_v48, %v8359_v10  ;;  %v8149_v9 = vrot.slane %v17760_v17, 1  ;;  %v20262_v48 = vld [vmem:[#allocation12_spill] sm:$0xff] }
 0x424   :  { %v17752_v24 = vadd.f32 %v17443_v3, %v12118_v60  ;;  %v8141_v3 = vsel %vm738_vm1, %v8139_v15, %v8140_v27  ;;  %v7786_v37 = vadd.f32 %v7785_v54, %v7784_v21  ;;  %v8133_v60 = vrot.slane %v7951_v20, 1  ;;  %v13577_v20 = vld [vmem:[%s19890_s4 + $0x64] ss:$12 sps:$4 sm:$0xff]  }
 0x425   :  { %v8318_v18 = vadd.f32 %v8317_v7, %v8141_v3  ;;  %v7830_v11 = vadd.f32 %v7829_v16, %v7828_v30  ;;  %v7609_v4 = vsel %vm738_vm1, %v7607_v26, %v7608_v8  ;;  %v7615_v15 = vsel %vm738_vm1, %v7613_v5, %v7614_v57  ;;  %v13575_v7 = vld [vmem:[%s19890_s4 + $0x60] ss:$12 sps:$4 sm:$0xff]   ;;  %9325 = vmatprep.subr.bf16.mxu1 %v13577_v20 }
 0x426   :  { %v12119_v58 = vpop.f32.mrb[120].mxu0  ;;  %v8135_v49 = vsel %vm738_vm1, %v8133_v60, %v8134_v31  ;;  %v7957_v10 = vmul.f32 %v20261_v2, %v20261_v2  ;;  %v7788_v30 = vsel %vm7769_vm3, %v7614_v57, 0.0  ;;  %v7787_v17 = vadd.f32 %v7786_v37, %v7615_v15  ;;  %v20263_v57 = vld [vmem:[#allocation4_spill] sm:$0xff]  ;;  %9326 = vmatpush1.bf16.msra.mxu1 %v13575_v7  ;;  %v20265_v60 = vld [vmem:[#allocation46_spill] sm:$0xff] }
 0x427   :  { %v12120_v1 = vpop.f32.mrb[121].mxu0  ;;  %v8362_v44 = vadd.f32 %v8361_v6, %v8135_v49  ;;  %v7831_v54 = vadd.f32 %v7830_v11, %v7609_v4  ;;  %v8143_v3 = vrot.slane %v17773_v46, 1  ;;  %v7968_v16 = vmul.f32 %v20262_v48, %v20262_v48  ;;  %v20264_v6 = vld [vmem:[#allocation3_spill] sm:$0xff] }
 0x428   :  { %v12121_v63 = vadd.f32 %v12120_v1, %v12119_v58  ;;  %v12122_v52 = vpop.f32.mrb[122].mxu0  ;;  %v8150_v58 = vsel %vm738_vm1, %v8148_v40, %v8149_v9  ;;  %v7622_v1 = vrot.slane %v20262_v48, 1  ;;  %v7623_v26 = vrot.slane %v20263_v57, 1 }
 0x429   :  { %v12123_v41 = vpop.f32.mrb[123].mxu0  ;;  %v17807_v37 = vmul.f32 %v20263_v57, %v20263_v57  ;;  %v7617_v11 = vrot.slane %v20265_v60, 1  ;;  %v7832_v46 = vsel %vm7769_vm3, %v7608_v8, 0.0  ;;  %v7789_v15 = vadd.f32 %v7788_v30, %v7787_v17  ;;  %v20266_v57 = vld [vmem:[#allocation45_spill] sm:$0xff]  ;;  %v20267_v30 = vld [vmem:[#allocation23_spill] sm:$0xff] }
 0x42a   :  { %v12124_v21 = vadd.f32 %v12123_v41, %v12122_v52  ;;  %v17778_v62 = vadd.f32 %v17446_v22, %v12121_v63  ;;  %v8319_v22 = vsel %vm7769_vm3, %v8140_v27, 0.0  ;;  %v8363_v63 = vsel %vm7769_vm3, %v8134_v31, 0.0 }
 0x42b   :  { %v8320_v33 = vadd.f32 %v8319_v22, %v8318_v18  ;;  %v8142_v52 = vrot.slane %v7957_v10, 1  ;;  %v8364_v41 = vadd.f32 %v8363_v63, %v8362_v44  ;;  %v7833_v49 = vadd.f32 %v7832_v46, %v7831_v54 }
 0x42c   :  { %v17793_v5 = vadd.f32 %v17449_v19, %v12124_v21  ;;  %v17803_v19 = vmul.f32 %v20264_v6, %v20264_v6  ;;  %v7624_v22 = vsel %vm738_vm1, %v7622_v1, %v7623_v26  ;;  %v7616_v48 = vrot.slane %v20266_v57, 1 }
 0x42d   :  { %v8321_v40 = vadd.f32 %v8320_v33, %v8150_v58  ;;  %v8144_v7 = vsel %vm738_vm1, %v8142_v52, %v8143_v3  ;;  %v8322_v51 = vsel %vm7769_vm3, %v8149_v9, 0.0  ;;  %v8158_v8 = vrot.slane %v17807_v37, 1  ;;  %v20268_v58 = vld [vmem:[#allocation5_spill] sm:$0xff]  ;;  %v13580_v9 = vld [vmem:[%s19890_s4 + $0x7c] ss:$12 sps:$4 sm:$0xff]  }
 0x42e   :  { %v12125_v27 = vpop.f32.mrb[124].mxu0  ;;  %v7966_v44 = vmul.f32 %v20265_v60, %v20265_v60  ;;  %v7974_v17 = vmul.f32 %v20267_v30, %v20267_v30  ;;  %v7618_v33 = vsel %vm738_vm1, %v7616_v48, %v7617_v11  ;;  %v8365_v54 = vadd.f32 %v8364_v41, %v8144_v7  ;;  %v20269_v41 = vld [vmem:[#allocation55_spill] sm:$0xff]  ;;  %9327 = vmatprep.subr.bf16.mxu1 %v13580_v9 }
 0x42f   :  { %v12126_v18 = vpop.f32.mrb[125].mxu0  ;;  %v7790_v37 = vadd.f32 %v7789_v15, %v7624_v22  ;;  %v7963_v63 = vmul.f32 %v20266_v57, %v20266_v57  ;;  %v7834_v52 = vadd.f32 %v7833_v49, %v7618_v33  ;;  %v7632_v48 = vrot.slane %v20264_v6, 1  ;;  %v20270_v33 = vld [vmem:[#allocation53_spill] sm:$0xff] }
 0x430   :  { %v12127_v4 = vadd.f32 %v12126_v18, %v12125_v27  ;;  %v12128_v21 = vpop.f32.mrb[126].mxu0  ;;  %v8157_v27 = vrot.slane %v7968_v16, 1  ;;  %v8323_v46 = vadd.f32 %v8322_v51, %v8321_v40  ;;  %v7791_v7 = vsel %vm7769_vm3, %v7623_v26, 0.0 }
 0x431   :  { %v12129_v20 = vpop.f32.mrb[127].mxu0  ;;  %v8366_v16 = vsel %vm7769_vm3, %v8143_v3, 0.0  ;;  %v7835_v49 = vsel %vm7769_vm3, %v7617_v11, 0.0  ;;  %v7792_v40 = vadd.f32 %v7791_v7, %v7790_v37  ;;  %v8151_v6 = vrot.slane %v7963_v63, 1  ;;  %v20272_v7 = vld [vmem:[#allocation69_spill] sm:$0xff] }
 0x432   :  { %v12130_v31 = vadd.f32 %v12129_v20, %v12128_v21  ;;  %v17816_v10 = vadd.f32 %v17452_v47, %v12127_v4  ;;  %v13578_v47 = vld [vmem:[%s19890_s4 + $0x78] ss:$12 sps:$4 sm:$0xff]   ;;  %v7626_v4 = vrot.slane %v20269_v41, 1  ;;  %v8159_v20 = vsel %vm738_vm1, %v8157_v27, %v8158_v8 }
 0x433   :  { %9328 = vmatpush1.bf16.msra.mxu1 %v13578_v47  ;;  %v8367_v22 = vadd.f32 %v8366_v16, %v8365_v54  ;;  %v7836_v60 = vadd.f32 %v7835_v49, %v7834_v52  ;;  %v17846_v26 = vmul.f32 %v20269_v41, %v20269_v41  ;;  %v20271_v47 = vld [vmem:[#allocation68_spill] sm:$0xff]  ;;  %v7631_v11 = vrot.slane %v20267_v30, 1 }
 0x434   :  { %v17826_v1 = vadd.f32 %v20268_v58, %v12130_v31  ;;  %v8152_v31 = vrot.slane %v7966_v44, 1  ;;  %v7625_v58 = vrot.slane %v20270_v33, 1  ;;  %v8324_v44 = vadd.f32 %v8323_v46, %v8159_v20  ;;  %v20278_v41 = vld [vmem:[#allocation52_spill] sm:$0xff] }
 0x435   :  { %v7969_v37 = vmul.f32 %v20270_v33, %v20270_v33  ;;  %v8166_v63 = vrot.slane %v7974_v17, 1  ;;  %v7794_v52 = vsel %vm7769_vm3, %v7632_v48, 0.0  ;;  %v7633_v46 = vsel %vm738_vm1, %v7631_v11, %v7632_v48  ;;  %v13583_v17 = vld [vmem:[%s19890_s4 + $0x94] ss:$12 sps:$4 sm:$0xff]  }
 0x436   :  { %v12131_v21 = vpop.f32.mrb[128].mxu0  ;;  %v7627_v3 = vsel %vm738_vm1, %v7625_v58, %v7626_v4  ;;  %v8153_v54 = vsel %vm738_vm1, %v8151_v6, %v8152_v31  ;;  %v8325_v20 = vsel %vm7769_vm3, %v8158_v8, 0.0  ;;  %v13581_v6 = vld [vmem:[%s19890_s4 + $0x90] ss:$12 sps:$4 sm:$0xff]   ;;  %v20273_v49 = vrot.slane %v17803_v19, 1  ;;  %v20274_v48 = vld [vmem:[#allocation25_spill] sm:$0xff]  ;;  %9329 = vmatprep.subr.bf16.mxu1 %v13583_v17 }
 0x437   :  { %v12132_v15 = vpop.f32.mrb[129].mxu0  ;;  %v7793_v58 = vadd.f32 %v7792_v40, %v7633_v46  ;;  %9330 = vmatpush1.bf16.msra.mxu1 %v13581_v6  ;;  %v7634_v33 = vrot.slane %v20278_v41, 1 }
 0x438   :  { %v12133_v18 = vadd.f32 %v12132_v15, %v12131_v21  ;;  %v12134_v51 = vpop.f32.mrb[130].mxu0  ;;  %v8368_v21 = vadd.f32 %v8367_v22, %v8153_v54  ;;  %v8161_v15 = vrot.slane %v17846_v26, 1  ;;  %v8168_v22 = vsel %vm738_vm1, %v8166_v63, %v20273_v49  ;;  %v20276_v54 = vld [vmem:[#allocation54_spill] sm:$0xff] }
 0x439   :  { %v12135_v9 = vpop.f32.mrb[131].mxu0  ;;  %v7838_v63 = vsel %vm7769_vm3, %v7626_v4, 0.0  ;;  %v20277_v49 = vld [vmem:[#allocation26_spill] sm:$0xff]  ;;  %v7795_v17 = vadd.f32 %v7794_v52, %v7793_v58 }
 0x43a   :  { %v12136_v27 = vadd.f32 %v12135_v9, %v12134_v51  ;;  %v17850_v57 = vadd.f32 %v20271_v47, %v12133_v18  ;;  %v7837_v18 = vadd.f32 %v7836_v60, %v7627_v3  ;;  %v8326_v51 = vadd.f32 %v8325_v20, %v8324_v44  ;;  %v20275_v60 = vld [vmem:[#allocation27_spill] sm:$0xff]  ;;  %v20279_v4 = vld [vmem:[#allocation70_spill] sm:$0xff] }
 0x43b   :  { %v7640_v9 = vrot.slane %v20274_v48, 1  ;;  %v7641_v3 = vrot.slane %v20275_v60, 1  ;;  %v17876_v26 = vmul.f32 %v20275_v60, %v20275_v60  ;;  %v8160_v47 = vrot.slane %v7969_v37, 1 }
 0x43c   :  { %v17858_v16 = vadd.f32 %v20272_v7, %v12136_v27  ;;  %v8369_v27 = vsel %vm7769_vm3, %v8152_v31, 0.0  ;;  %v7635_v7 = vrot.slane %v20276_v54, 1  ;;  %v7980_v20 = vmul.f32 %v20274_v48, %v20274_v48 }
 0x43d   :  { %v8370_v40 = vadd.f32 %v8369_v27, %v8368_v21  ;;  %v17885_v60 = vmul.f32 %v20277_v49, %v20277_v49  ;;  %v7839_v30 = vadd.f32 %v7838_v63, %v7837_v18  ;;  %v8162_v31 = vsel %vm738_vm1, %v8160_v47, %v8161_v15  ;;  %v20281_v63 = vld [vmem:[#allocation71_spill] sm:$0xff] }
 0x43e   :  { %v12137_v8 = vpop.f32.mrb[132].mxu0  ;;  %v7642_v6 = vsel %vm738_vm1, %v7640_v9, %v7641_v3  ;;  %v8176_v27 = vrot.slane %v17876_v26, 1  ;;  %v20280_v18 = vrot.slane %v17803_v19, 1  ;;  %v7636_v52 = vsel %vm738_vm1, %v7634_v33, %v7635_v7 }
 0x43f   :  { %v12138_v11 = vpop.f32.mrb[133].mxu0  ;;  %v8371_v58 = vadd.f32 %v8370_v40, %v8162_v31  ;;  %v7975_v9 = vmul.f32 %v20278_v41, %v20278_v41  ;;  %v7840_v26 = vadd.f32 %v7839_v30, %v7636_v52  ;;  %v8185_v19 = vrot.slane %v17885_v60, 1  ;;  %v20284_v41 = vld [vmem:[#allocation57_spill] sm:$0xff] }
 0x440   :  { %v12139_v44 = vadd.f32 %v12138_v11, %v12137_v8  ;;  %v12140_v46 = vpop.f32.mrb[134].mxu0  ;;  %v8327_v8 = vadd.f32 %v8326_v51, %v8168_v22  ;;  %v7978_v11 = vmul.f32 %v20276_v54, %v20276_v54  ;;  %v8328_v47 = vsel %vm7769_vm3, %v20280_v18, 0.0  ;;  %v20283_v18 = vld [vmem:[#allocation59_spill] sm:$0xff] }
 0x441   :  { %v12141_v37 = vpop.f32.mrb[135].mxu0  ;;  %v8175_v51 = vrot.slane %v7980_v20, 1  ;;  %v7644_v48 = vrot.slane %v20283_v18, 1  ;;  %v7841_v20 = vsel %vm7769_vm3, %v7635_v7, 0.0  ;;  %v7643_v30 = vrot.slane %v20284_v41, 1 }
 0x442   :  { %v12142_v61 = vadd.f32 %v12141_v37, %v12140_v46  ;;  %v17890_v21 = vadd.f32 %v20279_v4, %v12139_v44  ;;  %v20282_v44 = vld [vmem:[#allocation24_spill] sm:$0xff]  ;;  %v7650_v37 = vrot.slane %v20277_v49, 1  ;;  %v7796_v4 = vadd.f32 %v7795_v17, %v7642_v6 }
 0x443   :  { %v7986_v22 = vmul.f32 %v20282_v44, %v20282_v44  ;;  %v8177_v40 = vsel %vm738_vm1, %v8175_v51, %v8176_v27  ;;  %v8170_v31 = vrot.slane %v7978_v11, 1  ;;  %v7797_v60 = vsel %vm7769_vm3, %v7641_v3, 0.0 }
 0x444   :  { %v17901_v46 = vadd.f32 %v20281_v63, %v12142_v61  ;;  %v8329_v61 = vadd.f32 %v8328_v47, %v8327_v8  ;;  %v8372_v63 = vsel %vm7769_vm3, %v8161_v15, 0.0  ;;  %v8169_v17 = vrot.slane %v7975_v9, 1  ;;  %v20285_v47 = vld [vmem:[#allocation72_spill] sm:$0xff] }
 0x445   :  { %v8373_v25 = vadd.f32 %v8372_v63, %v8371_v58  ;;  %v7842_v6 = vadd.f32 %v7841_v20, %v7840_v26  ;;  %v7984_v12 = vmul.f32 %v20283_v18, %v20283_v18  ;;  %v7798_v8 = vadd.f32 %v7797_v60, %v7796_v4  ;;  %v20291_v18 = vld [vmem:[#allocation74_spill] sm:$0xff] }
 0x446   :  { %v12143_v33 = vpop.f32.mrb[136].mxu0  ;;  %v7645_v11 = vsel %vm738_vm1, %v7643_v30, %v7644_v48  ;;  %v7649_v7 = vrot.slane %v20282_v44, 1  ;;  %v8330_v58 = vadd.f32 %v8329_v61, %v8177_v40  ;;  %v7981_v3 = vmul.f32 %v20284_v41, %v20284_v41 }
 0x447   :  { %v12144_v54 = vpop.f32.mrb[137].mxu0  ;;  %v8184_v9 = vrot.slane %v7986_v22, 1  ;;  %v7843_v20 = vadd.f32 %v7842_v6, %v7645_v11  ;;  %v7800_v30 = vsel %vm7769_vm3, %v7650_v37, 0.0  ;;  %v8331_v40 = vsel %vm7769_vm3, %v8176_v27, 0.0 }
 0x448   :  { %v12145_v52 = vadd.f32 %v12144_v54, %v12143_v33  ;;  %v12146_v49 = vpop.f32.mrb[138].mxu0  ;;  %v8171_v54 = vsel %vm738_vm1, %v8169_v17, %v8170_v31  ;;  %v20286_v33 = vld [vmem:[#allocation73_spill] sm:$0xff]  ;;  %v7651_v4 = vsel %vm738_vm1, %v7649_v7, %v7650_v37  ;;  %v8332_v17 = vadd.f32 %v8331_v40, %v8330_v58 }
 0x449   :  { %v12147_v51 = vpop.f32.mrb[139].mxu0  ;;  %v8374_v26 = vadd.f32 %v8373_v25, %v8171_v54  ;;  %v7799_v60 = vadd.f32 %v7798_v8, %v7651_v4  ;;  %v8375_v25 = vsel %vm7769_vm3, %v8170_v31, 0.0  ;;  %v8178_v22 = vrot.slane %v7981_v3, 1  ;;  %v20288_v54 = vld [vmem:[#allocation58_spill] sm:$0xff]  ;;  %v20289_v7 = vld [vmem:[#allocation29_spill] sm:$0xff]  ;;  %v20290_v3 = vld [vmem:[#allocation56_spill] sm:$0xff] }
 0x44a   :  { %v12148_v15 = vadd.f32 %v12147_v51, %v12146_v49  ;;  %v17919_v2 = vadd.f32 %v20285_v47, %v12145_v52  ;;  %v8179_v49 = vrot.slane %v7984_v12, 1  ;;  %v8186_v52 = vsel %vm738_vm1, %v8184_v9, %v8185_v19  ;;  %v20287_v51 = vld [vmem:[#allocation31_spill] sm:$0xff] }
 0x44b   :  { %v7659_v47 = vrot.slane %v20287_v51, 1  ;;  %v7844_v6 = vsel %vm7769_vm3, %v7644_v48, 0.0  ;;  %v8376_v12 = vadd.f32 %v8375_v25, %v8374_v26  ;;  %v7658_v9 = vrot.slane %v20289_v7, 1 }
 0x44c   :  { %v17926_v63 = vadd.f32 %v20286_v33, %v12148_v15  ;;  %v7653_v33 = vrot.slane %v20288_v54, 1  ;;  %v7992_v27 = vmul.f32 %v20289_v7, %v20289_v7  ;;  %v7845_v8 = vadd.f32 %v7844_v6, %v7843_v20  ;;  %v20293_v7 = vld [vmem:[#allocation75_spill] sm:$0xff] }
 0x44d   :  { %v8180_v58 = vsel %vm738_vm1, %v8178_v22, %v8179_v49  ;;  %v7995_v31 = vmul.f32 %v20287_v51, %v20287_v51  ;;  %v7652_v40 = vrot.slane %v20290_v3, 1  ;;  %v8334_v26 = vsel %vm7769_vm3, %v8185_v19, 0.0 }
 0x44e   :  { %v12149_v61 = vpop.f32.mrb[140].mxu0  ;;  %v7990_v20 = vmul.f32 %v20288_v54, %v20288_v54  ;;  %v7660_v22 = vsel %vm738_vm1, %v7658_v9, %v7659_v47  ;;  %v8377_v51 = vadd.f32 %v8376_v12, %v8180_v58  ;;  %v7987_v19 = vmul.f32 %v20290_v3, %v20290_v3  ;;  %v20295_v9 = vld [vmem:[#allocation63_spill] sm:$0xff] }
 0x44f   :  { %v12150_v15 = vpop.f32.mrb[141].mxu0  ;;  %v7654_v6 = vsel %vm738_vm1, %v7652_v40, %v7653_v33  ;;  %v8193_v36 = vrot.slane %v7992_v27, 1  ;;  %v7662_v54 = vrot.slane %v20295_v9, 1  ;;  %v7847_v58 = vsel %vm7769_vm3, %v7653_v33, 0.0 }
 0x450   :  { %v12151_v11 = vadd.f32 %v12150_v15, %v12149_v61  ;;  %v12152_v37 = vpop.f32.mrb[142].mxu0  ;;  %v20292_v61 = vld [vmem:[#allocation28_spill] sm:$0xff]  ;;  %v7801_v15 = vadd.f32 %v7800_v30, %v7799_v60  ;;  %v7846_v41 = vadd.f32 %v7845_v8, %v7654_v6  ;;  %v8194_v60 = vrot.slane %v7995_v31, 1  ;;  %v20296_v8 = vld [vmem:[#allocation61_spill] sm:$0xff] }
 0x451   :  { %v12153_v4 = vpop.f32.mrb[143].mxu0  ;;  %v17949_v25 = vmul.f32 %v20292_v61, %v20292_v61  ;;  %v7661_v27 = vrot.slane %v20296_v8, 1  ;;  %v8187_v56 = vrot.slane %v7987_v19, 1  ;;  %v7996_v53 = vmul.f32 %v20295_v9, %v20295_v9  ;;  %v20298_v19 = vld [vmem:[#allocation77_spill] sm:$0xff]  ;;  %v20303_v9 = vld [vmem:[#allocation78_spill] sm:$0xff] }
 0x452   :  { %v12154_v44 = vadd.f32 %v12153_v4, %v12152_v37  ;;  %v17944_v48 = vadd.f32 %v20291_v18, %v12151_v11  ;;  %v8333_v18 = vadd.f32 %v8332_v17, %v8186_v52  ;;  %v20294_v11 = vld [vmem:[#allocation30_spill] sm:$0xff]  ;;  %v7802_v12 = vadd.f32 %v7801_v15, %v7660_v22  ;;  %v20297_v22 = vld [vmem:[#allocation76_spill] sm:$0xff] }
 0x453   :  { %v7668_v4 = vrot.slane %v20294_v11, 1  ;;  %v17963_v30 = vmul.f32 %v20294_v11, %v20294_v11  ;;  %v8378_v52 = vsel %vm7769_vm3, %v8179_v49, 0.0  ;;  %v7848_v31 = vadd.f32 %v7847_v58, %v7846_v41 }
 0x454   :  { %v17956_v37 = vadd.f32 %v20293_v7, %v12154_v44  ;;  %v7803_v44 = vsel %vm7769_vm3, %v7659_v47, 0.0  ;;  %v8188_v7 = vrot.slane %v7990_v20, 1  ;;  %v8379_v3 = vadd.f32 %v8378_v52, %v8377_v51 }
 0x455   :  { %v8335_v11 = vadd.f32 %v8334_v26, %v8333_v18  ;;  %v8195_v47 = vsel %vm738_vm1, %v8193_v36, %v8194_v60  ;;  %v7663_v20 = vsel %vm738_vm1, %v7661_v27, %v7662_v54  ;;  %v7804_v51 = vadd.f32 %v7803_v44, %v7802_v12 }
 0x456   :  { %v12155_v40 = vpop.f32.mrb[144].mxu0  ;;  %v8189_v33 = vsel %vm738_vm1, %v8187_v56, %v8188_v7  ;;  %v7993_v26 = vmul.f32 %v20296_v8, %v20296_v8  ;;  %v7667_v41 = vrot.slane %v20292_v61, 1  ;;  %v8202_v36 = vrot.slane %v17949_v25, 1  ;;  %v20300_v25 = vld [vmem:[#allocation62_spill] sm:$0xff] }
 0x457   :  { %v12156_v17 = vpop.f32.mrb[145].mxu0  ;;  %v8380_v18 = vadd.f32 %v8379_v3, %v8189_v33  ;;  %v8336_v52 = vadd.f32 %v8335_v11, %v8195_v47  ;;  %v7806_v12 = vsel %vm7769_vm3, %v7668_v4, 0.0  ;;  %v8203_v56 = vrot.slane %v17963_v30, 1 }
 0x458   :  { %v12157_v6 = vadd.f32 %v12156_v17, %v12155_v40  ;;  %v12158_v43 = vpop.f32.mrb[146].mxu0  ;;  %v7849_v17 = vadd.f32 %v7848_v31, %v7663_v20  ;;  %v7669_v58 = vsel %vm738_vm1, %v7667_v41, %v7668_v4  ;;  %v8337_v44 = vsel %vm7769_vm3, %v8194_v60, 0.0  ;;  %v20301_v41 = vld [vmem:[#allocation33_spill] sm:$0xff] }
 0x459   :  { %v12159_v15 = vpop.f32.mrb[147].mxu0  ;;  %v7671_v11 = vrot.slane %v20300_v25, 1  ;;  %v8338_v4 = vadd.f32 %v8337_v44, %v8336_v52  ;;  %v7676_v30 = vrot.slane %v20301_v41, 1 }
 0x45a   :  { %v12160_v49 = vadd.f32 %v12159_v15, %v12158_v43  ;;  %v17975_v32 = vadd.f32 %v20297_v22, %v12157_v6  ;;  %v8197_v43 = vrot.slane %v7996_v53, 1  ;;  %v7805_v6 = vadd.f32 %v7804_v51, %v7669_v58  ;;  %v20299_v15 = vld [vmem:[#allocation35_spill] sm:$0xff] }
 0x45b   :  { %v7677_v3 = vrot.slane %v20299_v15, 1  ;;  %v8196_v22 = vrot.slane %v7993_v26, 1  ;;  %v7850_v53 = vsel %vm7769_vm3, %v7662_v54, 0.0  ;;  %v8007_v58 = vmul.f32 %v20299_v15, %v20299_v15 }
 0x45c   :  { %v17982_v40 = vadd.f32 %v20298_v19, %v12160_v49  ;;  %v8381_v49 = vsel %vm7769_vm3, %v8188_v7, 0.0  ;;  %v7851_v19 = vadd.f32 %v7850_v53, %v7849_v17  ;;  %v20302_v7 = vld [vmem:[#allocation60_spill] sm:$0xff]  ;;  %v8204_v54 = vsel %vm738_vm1, %v8202_v36, %v8203_v56 }
 0x45d   :  { %v8382_v31 = vadd.f32 %v8381_v49, %v8380_v18  ;;  %v8198_v60 = vsel %vm738_vm1, %v8196_v22, %v8197_v43  ;;  %v7670_v26 = vrot.slane %v20302_v7, 1  ;;  %v8004_v18 = vmul.f32 %v20301_v41, %v20301_v41  ;;  %v20304_v22 = vld [vmem:[#allocation79_spill] sm:$0xff] }
 0x45e   :  { %v12161_v27 = vpop.f32.mrb[148].mxu0  ;;  %v7807_v52 = vadd.f32 %v7806_v12, %v7805_v6  ;;  %v8002_v17 = vmul.f32 %v20300_v25, %v20300_v25  ;;  %v7678_v44 = vsel %vm738_vm1, %v7676_v30, %v7677_v3  ;;  %v8339_v53 = vadd.f32 %v8338_v4, %v8204_v54  ;;  %v20305_v12 = vld [vmem:[#allocation67_spill] sm:$0xff]  ;;  %v20306_v4 = vld [vmem:[#allocation65_spill] sm:$0xff] }
 0x45f   :  { %v12162_v33 = vpop.f32.mrb[149].mxu0  ;;  %v8383_v49 = vadd.f32 %v8382_v31, %v8198_v60  ;;  %v7680_v6 = vrot.slane %v20305_v12, 1  ;;  %v8211_v15 = vrot.slane %v8004_v18, 1  ;;  %v7679_v54 = vrot.slane %v20306_v4, 1 }
 0x460   :  { %v12163_v47 = vadd.f32 %v12162_v33, %v12161_v27  ;;  %v12164_v20 = vpop.f32.mrb[150].mxu0  ;;  %v7672_v27 = vsel %vm738_vm1, %v7670_v26, %v7671_v11  ;;  %v7808_v41 = vadd.f32 %v7807_v52, %v7678_v44  ;;  %v8206_v30 = vrot.slane %v8002_v17, 1  ;;  %v20307_v17 = vld [vmem:[#allocation80_spill] sm:$0xff] }
 0x461   :  { %v12165_v51 = vpop.f32.mrb[151].mxu0  ;;  %v7852_v36 = vadd.f32 %v7851_v19, %v7672_v27  ;;  %v8384_v26 = vsel %vm7769_vm3, %v8197_v43, 0.0  ;;  %v7681_v52 = vsel %vm738_vm1, %v7679_v54, %v7680_v6 }
 0x462   :  { %v12166_v61 = vadd.f32 %v12165_v51, %v12164_v20  ;;  %v17999_v8 = vadd.f32 %v20303_v9, %v12163_v47  ;;  %v7999_v9 = vmul.f32 %v20302_v7, %v20302_v7  ;;  %v8340_v47 = vsel %vm7769_vm3, %v8203_v56, 0.0 }
 0x463   :  { %v8212_v20 = vrot.slane %v8007_v58, 1  ;;  %v8385_v60 = vadd.f32 %v8384_v26, %v8383_v49  ;;  %v8341_v19 = vadd.f32 %v8340_v47, %v8339_v53  ;;  %v8008_v58 = vmul.f32 %v20305_v12, %v20305_v12  ;;  %v20308_v47 = vld [vmem:[#allocation81_spill] sm:$0xff] }
 0x464   :  { %v18009_v33 = vadd.f32 %v20304_v22, %v12166_v61  ;;  %v7853_v61 = vsel %vm7769_vm3, %v7671_v11, 0.0  ;;  %v8205_v27 = vrot.slane %v7999_v9, 1  ;;  %v7809_v11 = vsel %vm7769_vm3, %v7677_v3, 0.0 }
 0x465   :  { %v7854_v56 = vadd.f32 %v7853_v61, %v7852_v36  ;;  %v8213_v18 = vsel %vm738_vm1, %v8211_v15, %v8212_v20  ;;  %v8005_v53 = vmul.f32 %v20306_v4, %v20306_v4  ;;  %v7810_v9 = vadd.f32 %v7809_v11, %v7808_v41 }
 0x466   :  { %v12167_v51 = vpop.f32.mrb[152].mxu0  ;;  %v8207_v49 = vsel %vm738_vm1, %v8205_v27, %v8206_v30  ;;  %v8342_v26 = vadd.f32 %v8341_v19, %v8213_v18  ;;  %v7856_v27 = vsel %vm7769_vm3, %v7680_v6, 0.0 }
 0x467   :  { %v12168_v31 = vpop.f32.mrb[153].mxu0  ;;  %v8386_v36 = vadd.f32 %v8385_v60, %v8207_v49  ;;  %v7855_v15 = vadd.f32 %v7854_v56, %v7681_v52  ;;  %v8214_v54 = vrot.slane %v8005_v53, 1 }
 0x468   :  { %v12169_v22 = vadd.f32 %v12168_v31, %v12167_v51  ;;  %v12170_v25 = vpop.f32.mrb[154].mxu0  ;;  %v8215_v31 = vrot.slane %v8008_v58, 1  ;;  %v20309_v58 = vld [vmem:[#allocation82_spill] sm:$0xff] }
 0x469   :  { %v12171_v7 = vpop.f32.mrb[155].mxu0  ;;  %v7857_v11 = vadd.f32 %v7856_v27, %v7855_v15  ;;  %v20313_v27 = vld [vmem:[#allocation51_spill] sm:$0xff] }
 0x46a   :  { %v12172_v43 = vadd.f32 %v12171_v7, %v12170_v25  ;;  %v18023_v44 = vadd.f32 %v20307_v17, %v12169_v22  ;;  %v8343_v25 = vsel %vm7769_vm3, %v8212_v20, 0.0  ;;  %v8387_v7 = vsel %vm7769_vm3, %v8206_v30, 0.0  ;;  %v20310_v30 = vld [vmem:[#allocation83_spill] sm:$0xff] }
 0x46b   :  { %v7811_v22 = vrot.slane %v7810_v9, 4  ;;  %v8388_v17 = vadd.f32 %v8387_v7, %v8386_v36  ;;  %v8344_v60 = vadd.f32 %v8343_v25, %v8342_v26  ;;  %v8390_v36 = vsel %vm7769_vm3, %v8215_v31, 0.0 }
 0x46c   :  { %v18030_v51 = vadd.f32 %v20308_v47, %v12172_v43  ;;  %v8216_v43 = vsel %vm738_vm1, %v8214_v54, %v8215_v31  ;;  %v7858_v47 = vrot.slane %v7857_v11, 4  ;;  %v20312_v54 = vld [vmem:[#allocation18_spill] sm:$0xff] }
 0x46d   :  { %v7812_v20 = vadd.f32 %v7811_v22, %v7810_v9  ;;  %v8389_v52 = vadd.f32 %v8388_v17, %v8216_v43  ;;  %v8345_v53 = vrot.slane %v8344_v60, 4  ;;  %v20314_v43 = vld [vmem:[#allocation84_spill] sm:$0xff] }
 0x46e   :  { %v12173_v61 = vpop.f32.mrb[156].mxu0  ;;  %v7859_v22 = vadd.f32 %v7858_v47, %v7857_v11 }
 0x46f   :  { %v12174_v3 = vpop.f32.mrb[157].mxu0  ;;  %v7813_v25 = vrot.slane %v7812_v20, 2  ;;  %v8391_v7 = vadd.f32 %v8390_v36, %v8389_v52  ;;  %v8346_v9 = vadd.f32 %v8345_v53, %v8344_v60 }
 0x470   :  { %v12175_v12 = vadd.f32 %v12174_v3, %v12173_v61  ;;  %v12176_v41 = vpop.f32.mrb[158].mxu0  ;;  %v20311_v61 = vld [vmem:[#allocation85_spill] sm:$0xff]  ;;  %v7860_v11 = vrot.slane %v7859_v22, 2 }
 0x471   :  { %v12177_v19 = vpop.f32.mrb[159].mxu0  ;;  %v8392_v52 = vrot.slane %v8391_v7, 4  ;;  %v8347_v60 = vrot.slane %v8346_v9, 2 }
 0x472   :  { %v12178_v56 = vadd.f32 %v12177_v19, %v12176_v41  ;;  %v18037_v18 = vadd.f32 %v20309_v58, %v12175_v12  ;;  %v18058_v58 = vadd.f32 %v7813_v25, %v7812_v20 }
 0x473   :  { %v18068_v25 = vadd.f32 %v8392_v52, %v8391_v7 }
 0x474   :  { %v18040_v49 = vadd.f32 %v20310_v30, %v12178_v56 }
 0x476   :  { %v12735_v6 = vpop.f32.mrb[64].mxu0 }
 0x477   :  { %v18044_v26 = vadd.f32 %v20311_v61, %v12735_v6  ;;  %v7315_v15 = vpop.f32.mrb[65].mxu0 }
 0x478   :  { %v18047_v3 = vadd.f32 %v20312_v54, %v7315_v15  ;;  %v12736_v12 = vpop.f32.mrb[66].mxu0 }
 0x479   :  { %v18050_v17 = vadd.f32 %v20313_v27, %v12736_v12  ;;  %v7318_v41 = vpop.f32.mrb[67].mxu0  ;;  %v7928_v30 = vmul.f32 %v18044_v26, %v18044_v26  ;;  %v7565_v53 = vrot.slane %v18044_v26, 1 }
 0x47a   :  { %v18053_v19 = vadd.f32 %v20314_v43, %v7318_v41  ;;  %v18073_v41 = vadd.f32 %v8347_v60, %v8346_v9  ;;  %v18075_v43 = vadd.f32 %v7860_v11, %v7859_v22 }
 0x47b   :  { %v7566_v31 = vrot.slane %v18050_v17, 1  ;;  %v7931_v56 = vmul.f32 %v18050_v17, %v18050_v17  ;;  %v8100_v54 = vrot.slane %v7928_v30, 1  ;;  %v8394_v30 = vrot.slane %v18068_v25, 2 }
 0x47d   :  { %v8101_v47 = vrot.slane %v7931_v56, 1  ;;  %v7567_v36 = vsel %vm738_vm1, %v7565_v53, %v7566_v31  ;;  %v7866_v56 = vsel %vm7865_vm4, %v7566_v31, 0.0 }
 0x47e   :  { %v12739_v6 = vpop.f32.mrb[68].mxu0 }
 0x47f   :  { %v18065_v61 = vadd.f32 %v17661_v13, %v12739_v6  ;;  %v7331_v15 = vpop.f32.mrb[69].mxu0  ;;  %v7864_v6 = vsel %vm1837_vm2, %v7567_v36, 0.0  ;;  %v8102_v7 = vsel %vm738_vm1, %v8100_v54, %v8101_v47 }
 0x480   :  { %v18071_v12 = vadd.f32 %v17635_v38, %v7331_v15  ;;  %v12740_v27 = vpop.f32.mrb[70].mxu0  ;;  %v8398_v36 = vsel %vm1837_vm2, %v8102_v7, 0.0  ;;  %v8399_v15 = vsel %vm7865_vm4, %v8101_v47, 0.0 }
 0x481   :  { %20315 = vst [vmem:[#allocation5_spill] sm:$0xff] %v18065_v61  ;;  %v18079_v53 = vadd.f32 %v17665_v35, %v12740_v27  ;;  %v7334_v13 = vpop.f32.mrb[71].mxu0  ;;  %v7583_v9 = vrot.slane %v18065_v61, 1  ;;  %v7940_v22 = vmul.f32 %v18065_v61, %v18065_v61  ;;  %v8400_v61 = vadd.f32 %v8399_v15, %v8398_v36 }
 0x482   :  { %v7934_v52 = vmul.f32 %v18071_v12, %v18071_v12  ;;  %v18086_v38 = vadd.f32 %v17639_v50, %v7334_v13  ;;  %v7574_v60 = vrot.slane %v18071_v12, 1  ;;  %v7867_v13 = vadd.f32 %v7866_v56, %v7864_v6 }
 0x483   :  { %20316 = vst [vmem:[#allocation68_spill] sm:$0xff] %v18079_v53  ;;  %v7584_v31 = vrot.slane %v18079_v53, 1  ;;  %v7943_v35 = vmul.f32 %v18079_v53, %v18079_v53  ;;  %v8118_v14 = vrot.slane %v7940_v22, 1 }
 0x484   :  { %v7575_v11 = vrot.slane %v18086_v38, 1  ;;  %v7937_v50 = vmul.f32 %v18086_v38, %v18086_v38  ;;  %v8109_v20 = vrot.slane %v7934_v52, 1 }
 0x485   :  { %v7585_v54 = vsel %vm738_vm1, %v7583_v9, %v7584_v31  ;;  %v8119_v27 = vrot.slane %v7943_v35, 1 }
 0x486   :  { %v7576_v4 = vsel %vm738_vm1, %v7574_v60, %v7575_v11  ;;  %v8110_v23 = vrot.slane %v7937_v50, 1  ;;  %v12743_v42 = vpop.f32.mrb[72].mxu0  ;;  %v7872_v47 = vsel %vm1837_vm2, %v7585_v54, 0.0  ;;  %v7870_v35 = vsel %vm7865_vm4, %v7575_v11, 0.0 }
 0x487   :  { %v7868_v53 = vsel %vm1837_vm2, %v7576_v4, 0.0  ;;  %v18106_v0 = vadd.f32 %v17736_v34, %v12743_v42  ;;  %v7347_v7 = vpop.f32.mrb[73].mxu0  ;;  %v8120_v52 = vsel %vm738_vm1, %v8118_v14, %v8119_v27 }
 0x488   :  { %v7869_v9 = vadd.f32 %v7868_v53, %v7867_v13  ;;  %v8111_v56 = vsel %vm738_vm1, %v8109_v20, %v8110_v23  ;;  %v12744_v6 = vpop.f32.mrb[74].mxu0  ;;  %v18114_v22 = vadd.f32 %v17695_v59, %v7347_v7  ;;  %v8403_v20 = vsel %vm7865_vm4, %v8110_v23, 0.0 }
 0x489   :  { %v8401_v60 = vsel %vm1837_vm2, %v8111_v56, 0.0  ;;  %v7350_v4 = vpop.f32.mrb[75].mxu0  ;;  %v18117_v50 = vadd.f32 %v17752_v24, %v12744_v6  ;;  %v7601_v14 = vrot.slane %v18106_v0, 1  ;;  %v7952_v11 = vmul.f32 %v18106_v0, %v18106_v0 }
 0x48a   :  { %v7871_v42 = vadd.f32 %v7870_v35, %v7869_v9  ;;  %v8402_v34 = vadd.f32 %v8401_v60, %v8400_v61  ;;  %v18120_v53 = vadd.f32 %v17708_v28, %v7350_v4  ;;  %v7946_v59 = vmul.f32 %v18114_v22, %v18114_v22 }
 0x48b   :  { %v7602_v61 = vrot.slane %v18117_v50, 1  ;;  %v18131_v24 = vmul.f32 %v18117_v50, %v18117_v50  ;;  %v8405_v28 = vsel %vm1837_vm2, %v8120_v52, 0.0  ;;  %v7592_v23 = vrot.slane %v18114_v22, 1 }
 0x48c   :  { %v7873_v36 = vadd.f32 %v7872_v47, %v7871_v42  ;;  %v8404_v15 = vadd.f32 %v8403_v20, %v8402_v34  ;;  %v7593_v54 = vrot.slane %v18120_v53, 1  ;;  %v7949_v13 = vmul.f32 %v18120_v53, %v18120_v53  ;;  %v13586_v34 = vld [vmem:[%s19890_s4 + $0xac] ss:$12 sps:$4 sm:$0xff]  }
 0x48d   :  { %v7874_v7 = vsel %vm7865_vm4, %v7584_v31, 0.0  ;;  %v8407_v47 = vsel %vm7865_vm4, %v8119_v27, 0.0  ;;  %v7603_v56 = vsel %vm738_vm1, %v7601_v14, %v7602_v61  ;;  %v8136_v35 = vrot.slane %v7952_v11, 1  ;;  %v13584_v11 = vld [vmem:[%s19890_s4 + $0xa8] ss:$12 sps:$4 sm:$0xff]   ;;  %9331 = vmatprep.subr.bf16.mxu1 %v13586_v34 }
 0x48e   :  { %v8406_v9 = vadd.f32 %v8405_v28, %v8404_v15  ;;  %v12747_v6 = vpop.f32.mrb[76].mxu0  ;;  %v8137_v60 = vrot.slane %v18131_v24, 1  ;;  %v7594_v52 = vsel %vm738_vm1, %v7592_v23, %v7593_v54  ;;  %v7875_v4 = vadd.f32 %v7874_v7, %v7873_v36  ;;  %9332 = vmatpush1.bf16.msra.mxu1 %v13584_v11 }
 0x48f   :  { %v7363_v42 = vpop.f32.mrb[77].mxu0  ;;  %v18147_v20 = vadd.f32 %v8394_v30, %v18068_v25  ;;  %v8127_v31 = vrot.slane %v7946_v59, 1  ;;  %v7876_v27 = vsel %vm1837_vm2, %v7594_v52, 0.0  ;;  %v8128_v15 = vrot.slane %v7949_v13, 1 }
 0x490   :  { %v12748_v14 = vpop.f32.mrb[78].mxu0  ;;  %v7880_v24 = vsel %vm1837_vm2, %v7603_v56, 0.0  ;;  %v7877_v36 = vadd.f32 %v7876_v27, %v7875_v4  ;;  %v8408_v28 = vadd.f32 %v8407_v47, %v8406_v9  ;;  %v18155_v23 = vadd.f32 %v17816_v10, %v12747_v6  ;;  %v13587_v4 = vld [vmem:[%s19890_s4 + $0xc0] ss:$12 sps:$4 sm:$0xff]  }
 0x491   :  { %v7366_v7 = vpop.f32.mrb[79].mxu0  ;;  %v7878_v25 = vsel %vm7865_vm4, %v7593_v54, 0.0  ;;  %v8129_v30 = vsel %vm738_vm1, %v8127_v31, %v8128_v15  ;;  %v18160_v59 = vadd.f32 %v17778_v62, %v7363_v42  ;;  %v18163_v13 = vadd.f32 %v17826_v1, %v12748_v14  ;;  %v13589_v54 = vld [vmem:[%s19890_s4 + $0xc4] ss:$12 sps:$4 sm:$0xff]   ;;  %v13602_v62 = vld [vmem:[%s19890_s4 + $0xc8] ss:$12 sps:$4 sm:$0xff]  }
 0x492   :  { %v8138_v56 = vsel %vm738_vm1, %v8136_v35, %v8137_v60  ;;  %v7879_v52 = vadd.f32 %v7878_v25, %v7877_v36  ;;  %v8409_v47 = vsel %vm1837_vm2, %v8129_v30, 0.0  ;;  %v8411_v10 = vsel %vm7865_vm4, %v8128_v15, 0.0  ;;  %v13603_v42 = vld [vmem:[%s19890_s4 + $0x8] ss:$12 sps:$4 sm:$0xff]   ;;  %9333 = vmatprep.subr.bf16.mxu1 %v13589_v54  ;;  %12203 = vmatprep.subr.bf16.mxu0 %v13602_v62 }
 0x493   :  { %v8410_v9 = vadd.f32 %v8409_v47, %v8408_v28  ;;  %v7964_v1 = vmul.f32 %v18155_v23, %v18155_v23  ;;  %v7958_v6 = vmul.f32 %v18160_v59, %v18160_v59  ;;  %v7620_v35 = vrot.slane %v18163_v13, 1  ;;  %9334 = vmatpush1.bf16.msra.mxu1 %v13587_v4  ;;  %12204 = vmatpush3.bf16.msra.mxu0 %v13603_v42  ;;  %v13604_v4 = vld [vmem:[%s19890_s4 + $0xe0] ss:$12 sps:$4 sm:$0xff]  }
 0x494   :  { %v7881_v34 = vadd.f32 %v7880_v24, %v7879_v52  ;;  %v7619_v31 = vrot.slane %v18155_v23, 1  ;;  %v18188_v27 = vmul.f32 %v18163_v13, %v18163_v13  ;;  %v18191_v15 = vadd.f32 %v17793_v5, %v7366_v7  ;;  %12205 = vmatprep.subr.bf16.mxu0 %v13604_v4 }
 0x495   :  { %v7882_v14 = vsel %vm7865_vm4, %v7602_v61, 0.0  ;;  %v8413_v11 = vsel %vm1837_vm2, %v8138_v56, 0.0  ;;  %v8412_v36 = vadd.f32 %v8411_v10, %v8410_v9  ;;  %v7610_v28 = vrot.slane %v18160_v59, 1  ;;  %v13592_v61 = vld [vmem:[%s19890_s4 + $0xdc] ss:$12 sps:$4 sm:$0xff]  }
 0x496   :  { %v12751_v25 = vpop.f32.mrb[80].mxu0  ;;  %v7621_v24 = vsel %vm738_vm1, %v7619_v31, %v7620_v35  ;;  %v8155_v30 = vrot.slane %v18188_v27, 1  ;;  %v7611_v5 = vrot.slane %v18191_v15, 1  ;;  %v7883_v7 = vadd.f32 %v7882_v14, %v7881_v34  ;;  %v13590_v9 = vld [vmem:[%s19890_s4 + $0xd8] ss:$12 sps:$4 sm:$0xff]   ;;  %9335 = vmatprep.subr.bf16.mxu1 %v13592_v61 }
 0x497   :  { %v7379_v52 = vpop.f32.mrb[81].mxu0  ;;  %v8414_v56 = vadd.f32 %v8413_v11, %v8412_v36  ;;  %v7961_v47 = vmul.f32 %v18191_v15, %v18191_v15  ;;  %v18207_v10 = vadd.f32 %v17890_v21, %v12751_v25  ;;  %v8415_v42 = vsel %vm7865_vm4, %v8137_v60, 0.0  ;;  %9336 = vmatpush1.bf16.msra.mxu1 %v13590_v9  ;;  %v13610_v9 = vld [vmem:[%s19890_s4 + $0x38] ss:$12 sps:$4 sm:$0xff]  }
 0x498   :  { %v18210_v54 = vadd.f32 %v17850_v57, %v7379_v52  ;;  %v12752_v62 = vpop.f32.mrb[82].mxu0  ;;  %v8154_v34 = vrot.slane %v7964_v1, 1  ;;  %v8145_v31 = vrot.slane %v7958_v6, 1  ;;  %v7612_v27 = vsel %vm738_vm1, %v7610_v28, %v7611_v5  ;;  %v13605_v57 = vld [vmem:[%s19890_s4 + $0x20] ss:$12 sps:$4 sm:$0xff]  }
 0x499   :  { %20317 = vst [vmem:[#allocation69_spill] sm:$0xff] %v18207_v10  ;;  %v7382_v21 = vpop.f32.mrb[83].mxu0  ;;  %v7888_v14 = vsel %vm1837_vm2, %v7621_v24, 0.0  ;;  %v7884_v11 = vsel %vm1837_vm2, %v7612_v27, 0.0  ;;  %v8146_v36 = vrot.slane %v7961_v47, 1  ;;  %v8416_v25 = vadd.f32 %v8415_v42, %v8414_v56  ;;  %12206 = vmatpush3.bf16.msra.mxu0 %v13605_v57 }
 0x49a   :  { %v8156_v60 = vsel %vm738_vm1, %v8154_v34, %v8155_v30  ;;  %v7885_v1 = vadd.f32 %v7884_v11, %v7883_v7  ;;  %v7886_v6 = vsel %vm7865_vm4, %v7611_v5, 0.0  ;;  %v7637_v28 = vrot.slane %v18207_v10, 1  ;;  %v13595_v52 = vld [vmem:[%s19890_s4 + $0xf4] ss:$12 sps:$4 sm:$0xff]   ;;  %v13609_v24 = vld [vmem:[%s19890_s4 + $0xf8] ss:$12 sps:$4 sm:$0xff]  }
 0x49b   :  { %v8147_v61 = vsel %vm738_vm1, %v8145_v31, %v8146_v36  ;;  %v7976_v56 = vmul.f32 %v18207_v10, %v18207_v10  ;;  %v7628_v7 = vrot.slane %v18210_v54, 1  ;;  %v18239_v5 = vadd.f32 %v17901_v46, %v12752_v62  ;;  %v13593_v47 = vld [vmem:[%s19890_s4 + $0xf0] ss:$12 sps:$4 sm:$0xff]   ;;  %9337 = vmatprep.subr.bf16.mxu1 %v13595_v52  ;;  %12207 = vmatprep.subr.bf16.mxu0 %v13609_v24 }
 0x49c   :  { %v7887_v4 = vadd.f32 %v7886_v6, %v7885_v1  ;;  %v8417_v42 = vsel %vm1837_vm2, %v8147_v61, 0.0  ;;  %v8419_v34 = vsel %vm7865_vm4, %v8146_v36, 0.0  ;;  %v18250_v31 = vadd.f32 %v17858_v16, %v7382_v21  ;;  %9338 = vmatpush1.bf16.msra.mxu1 %v13593_v47  ;;  %v13598_v6 = vld [vmem:[%s19890_s4 + $0x10c] ss:$12 sps:$4 sm:$0xff]   ;;  %v13611_v52 = vld [vmem:[%s19890_s4 + $0x110] ss:$12 sps:$4 sm:$0xff]  }
 0x49d   :  { %v8418_v46 = vadd.f32 %v8417_v42, %v8416_v25  ;;  %v7970_v62 = vmul.f32 %v18210_v54, %v18210_v54  ;;  %v20035_v27 = vrot.slane %v18239_v5, 1  ;;  %v18257_v57 = vmul.f32 %v18239_v5, %v18239_v5  ;;  %12208 = vmatpush3.bf16.msra.mxu0 %v13610_v9  ;;  %v13596_v9 = vld [vmem:[%s19890_s4 + $0x108] ss:$12 sps:$4 sm:$0xff]   ;;  %9339 = vmatprep.subr.bf16.mxu1 %v13598_v6 }
 0x49e   :  { %v12755_v11 = vpop.f32.mrb[84].mxu0  ;;  %v7889_v1 = vadd.f32 %v7888_v14, %v7887_v4  ;;  %v7629_v36 = vrot.slane %v18250_v31, 1  ;;  %v7973_v16 = vmul.f32 %v18250_v31, %v18250_v31  ;;  %v7890_v14 = vsel %vm7865_vm4, %v7620_v35, 0.0  ;;  %12209 = vmatprep.subr.bf16.mxu0 %v13611_v52 }
 0x49f   :  { %v18263_v21 = vadd.f32 %v17944_v48, %v12755_v11  ;;  %v7395_v25 = vpop.f32.mrb[85].mxu0  ;;  %v8423_v24 = vsel %vm7865_vm4, %v8155_v30, 0.0  ;;  %v8420_v61 = vadd.f32 %v8419_v34, %v8418_v46  ;;  %v7639_v48 = vsel %vm738_vm1, %v7637_v28, %v20035_v27  ;;  %v13612_v30 = vld [vmem:[%s19890_s4 + $0x50] ss:$12 sps:$4 sm:$0xff]  }
 0x4a0   :  { %v12756_v47 = vpop.f32.mrb[86].mxu0  ;;  %v8421_v4 = vsel %vm1837_vm2, %v8156_v60, 0.0  ;;  %v8173_v42 = vrot.slane %v18257_v57, 1  ;;  %v7630_v11 = vsel %vm738_vm1, %v7628_v7, %v7629_v36  ;;  %v7891_v45 = vadd.f32 %v7890_v14, %v7889_v1  ;;  %9340 = vmatpush1.bf16.msra.mxu1 %v13596_v9  ;;  %v13601_v1 = vld [vmem:[%s19890_s4 + $0x124] ss:$12 sps:$4 sm:$0xff]  }
 0x4a1   :  { %v7398_v35 = vpop.f32.mrb[87].mxu0  ;;  %v8422_v28 = vadd.f32 %v8421_v4, %v8420_v61  ;;  %v8172_v34 = vrot.slane %v7976_v56, 1  ;;  %v8163_v46 = vrot.slane %v7970_v62, 1  ;;  %v7892_v27 = vsel %vm1837_vm2, %v7630_v11, 0.0  ;;  %12210 = vmatpush3.bf16.msra.mxu0 %v13612_v30  ;;  %9341 = vmatprep.subr.bf16.mxu1 %v13601_v1  ;;  %v13618_v30 = vld [vmem:[%s19890_s4 + $0x140] ss:$12 sps:$4 sm:$0xff]  }
 0x4a2   :  { %v7896_v60 = vsel %vm1837_vm2, %v7639_v48, 0.0  ;;  %v7893_v10 = vadd.f32 %v7892_v27, %v7891_v45  ;;  %v7894_v57 = vsel %vm7865_vm4, %v7629_v36, 0.0  ;;  %v8164_v7 = vrot.slane %v7973_v16, 1  ;;  %v13599_v45 = vld [vmem:[%s19890_s4 + $0x120] ss:$12 sps:$4 sm:$0xff]  }
 0x4a3   :  { %v20318_v6 = vrot.slane %v18075_v43, 1  ;;  %v8424_v56 = vadd.f32 %v8423_v24, %v8422_v28  ;;  %v18299_v62 = vadd.f32 %v17919_v2, %v7395_v25  ;;  %v18302_v14 = vadd.f32 %v17956_v37, %v12756_v47  ;;  %v13616_v27 = vld [vmem:[%s19890_s4 + $0x128] ss:$12 sps:$4 sm:$0xff]  }
 0x4a4   :  { %v8174_v36 = vsel %vm738_vm1, %v8172_v34, %v8173_v42  ;;  %v7895_v16 = vadd.f32 %v7894_v57, %v7893_v10  ;;  %v8165_v2 = vsel %vm738_vm1, %v8163_v46, %v8164_v7  ;;  %v18316_v37 = vadd.f32 %v17926_v63, %v7398_v35  ;;  %9342 = vmatpush1.bf16.msra.mxu1 %v13599_v45  ;;  %v13608_v35 = vld [vmem:[%s19890_s4 + $0x13c] ss:$12 sps:$4 sm:$0xff]  }
 0x4a5   :  { %v18296_v52 = vadd.f32 %v20318_v6, %v18075_v43  ;;  %v13617_v43 = vld [vmem:[%s19890_s4 + $0x68] ss:$12 sps:$4 sm:$0xff]   ;;  %v8425_v25 = vsel %vm1837_vm2, %v8165_v2, 0.0  ;;  %v8427_v24 = vsel %vm7865_vm4, %v8164_v7, 0.0  ;;  %v7988_v61 = vmul.f32 %v18263_v21, %v18263_v21  ;;  %12211 = vmatprep.subr.bf16.mxu0 %v13616_v27  ;;  %v13606_v7 = vld [vmem:[%s19890_s4 + $0x138] ss:$12 sps:$4 sm:$0xff]   ;;  %9343 = vmatprep.subr.bf16.mxu1 %v13608_v35 }
 0x4a6   :  { %v7646_v48 = vrot.slane %v18299_v62, 1  ;;  %v12759_v47 = vpop.f32.mrb[88].mxu0  ;;  %v7897_v9 = vadd.f32 %v7896_v60, %v7895_v16  ;;  %v8426_v10 = vadd.f32 %v8425_v25, %v8424_v56  ;;  %v7656_v4 = vrot.slane %v18302_v14, 1  ;;  %12212 = vmatpush3.bf16.msra.mxu0 %v13617_v43 }
 0x4a7   :  { %v18326_v63 = vmul.f32 %v18302_v14, %v18302_v14  ;;  %v7411_v11 = vpop.f32.mrb[89].mxu0  ;;  %v7982_v28 = vmul.f32 %v18299_v62, %v18299_v62  ;;  %v7647_v34 = vrot.slane %v18316_v37, 1  ;;  %v7985_v46 = vmul.f32 %v18316_v37, %v18316_v37  ;;  %12213 = vmatprep.subr.bf16.mxu0 %v13618_v30  ;;  %v13615_v30 = vld [vmem:[%s19890_s4 + $0x154] ss:$12 sps:$4 sm:$0xff]  }
 0x4a8   :  { %v18340_v60 = vadd.f32 %v17999_v8, %v12759_v47  ;;  %v12760_v57 = vpop.f32.mrb[90].mxu0  ;;  %v20319_v1 = vrot.slane %v18239_v5, 1  ;;  %v8428_v56 = vadd.f32 %v8427_v24, %v8426_v10  ;;  %v7655_v45 = vrot.slane %v18263_v21, 1  ;;  %v13619_v8 = vld [vmem:[%s19890_s4 + $0x80] ss:$12 sps:$4 sm:$0xff]   ;;  %9344 = vmatpush1.bf16.msra.mxu1 %v13606_v7 }
 0x4a9   :  { %v8191_v27 = vrot.slane %v18326_v63, 1  ;;  %v7414_v43 = vpop.f32.mrb[91].mxu0  ;;  %v8429_v16 = vsel %vm1837_vm2, %v8174_v36, 0.0  ;;  %v8431_v2 = vsel %vm7865_vm4, %v8173_v42, 0.0  ;;  %v7648_v25 = vsel %vm738_vm1, %v7646_v48, %v7647_v34  ;;  %v13623_v42 = vld [vmem:[%s19890_s4 + $0x158] ss:$12 sps:$4 sm:$0xff]   ;;  %9345 = vmatprep.subr.bf16.mxu1 %v13615_v30 }
 0x4aa   :  { %v7898_v6 = vsel %vm7865_vm4, %v20319_v1, 0.0  ;;  %v8430_v24 = vadd.f32 %v8429_v16, %v8428_v56  ;;  %v8190_v10 = vrot.slane %v7988_v61, 1  ;;  %v7657_v63 = vsel %vm738_vm1, %v7655_v45, %v7656_v4  ;;  %12214 = vmatpush3.bf16.msra.mxu0 %v13619_v8  ;;  %v13613_v7 = vld [vmem:[%s19890_s4 + $0x150] ss:$12 sps:$4 sm:$0xff]  }
 0x4ab   :  { %v7899_v47 = vadd.f32 %v7898_v6, %v7897_v9  ;;  %v7900_v35 = vsel %vm1837_vm2, %v7648_v25, 0.0  ;;  %v8181_v36 = vrot.slane %v7982_v28, 1  ;;  %v7902_v9 = vsel %vm7865_vm4, %v7647_v34, 0.0  ;;  %v13624_v28 = vld [vmem:[%s19890_s4 + $0x98] ss:$12 sps:$4 sm:$0xff]   ;;  %12215 = vmatprep.subr.bf16.mxu0 %v13623_v42 }
 0x4ac   :  { %v8182_v61 = vrot.slane %v7985_v46, 1  ;;  %v8192_v1 = vsel %vm738_vm1, %v8190_v10, %v8191_v27  ;;  %v8432_v6 = vadd.f32 %v8431_v2, %v8430_v24  ;;  %v18372_v56 = vadd.f32 %v17975_v32, %v7411_v11  ;;  %9346 = vmatpush1.bf16.msra.mxu1 %v13613_v7  ;;  %v13625_v30 = vld [vmem:[%s19890_s4 + $0x170] ss:$12 sps:$4 sm:$0xff]  }
 0x4ad   :  { %v7901_v48 = vadd.f32 %v7900_v35, %v7899_v47  ;;  %v18375_v45 = vadd.f32 %v18009_v33, %v12760_v57  ;;  %v7904_v34 = vsel %vm1837_vm2, %v7657_v63, 0.0  ;;  %v18383_v16 = vadd.f32 %v17982_v40, %v7414_v43  ;;  %v13622_v47 = vld [vmem:[%s19890_s4 + $0x16c] ss:$12 sps:$4 sm:$0xff]   ;;  %v13620_v35 = vld [vmem:[%s19890_s4 + $0x168] ss:$12 sps:$4 sm:$0xff]  }
 0x4ae   :  { %v8183_v8 = vsel %vm738_vm1, %v8181_v36, %v8182_v61  ;;  %v12763_v2 = vpop.f32.mrb[92].mxu0  ;;  %v8435_v33 = vsel %vm7865_vm4, %v8182_v61, 0.0  ;;  %v8000_v11 = vmul.f32 %v18340_v60, %v18340_v60  ;;  %v7664_v57 = vrot.slane %v18372_v56, 1  ;;  %12216 = vmatpush3.bf16.msra.mxu0 %v13624_v28  ;;  %9347 = vmatprep.subr.bf16.mxu1 %v13622_v47  ;;  %v13626_v7 = vld [vmem:[%s19890_s4 + $0xb0] ss:$12 sps:$4 sm:$0xff]  }
 0x4af   :  { %20320 = vst [vmem:[#allocation70_spill] sm:$0xff] %v18375_v45  ;;  %v7903_v46 = vadd.f32 %v7902_v9, %v7901_v48  ;;  %20321 = vst [vmem:[#allocation71_spill] sm:$0xff] %v18383_v16  ;;  %v8433_v32 = vsel %vm1837_vm2, %v8183_v8, 0.0  ;;  %v7427_v25 = vpop.f32.mrb[93].mxu0  ;;  %v7994_v24 = vmul.f32 %v18372_v56, %v18372_v56  ;;  %v7674_v10 = vrot.slane %v18375_v45, 1  ;;  %12217 = vmatprep.subr.bf16.mxu0 %v13625_v30 }
 0x4b0   :  { %v8434_v43 = vadd.f32 %v8433_v32, %v8432_v6  ;;  %v12764_v63 = vpop.f32.mrb[94].mxu0  ;;  %v8003_v42 = vmul.f32 %v18375_v45, %v18375_v45  ;;  %v7665_v36 = vrot.slane %v18383_v16, 1  ;;  %v7997_v48 = vmul.f32 %v18383_v16, %v18383_v16  ;;  %9348 = vmatpush1.bf16.msra.mxu1 %v13620_v35 }
 0x4b1   :  { %v7905_v40 = vadd.f32 %v7904_v34, %v7903_v46  ;;  %v18408_v9 = vadd.f32 %v18037_v18, %v12763_v2  ;;  %v7430_v61 = vpop.f32.mrb[95].mxu0  ;;  %v7906_v6 = vsel %vm7865_vm4, %v7656_v4, 0.0  ;;  %v8439_v28 = vsel %vm7865_vm4, %v8191_v27, 0.0 }
 0x4b2   :  { %v8436_v34 = vadd.f32 %v8435_v33, %v8434_v43  ;;  %v7673_v46 = vrot.slane %v18340_v60, 1  ;;  %v8437_v18 = vsel %vm1837_vm2, %v8192_v1, 0.0  ;;  %v8208_v8 = vrot.slane %v8000_v11, 1  ;;  %12218 = vmatpush3.bf16.msra.mxu0 %v13626_v7 }
 0x4b3   :  { %20322 = vst [vmem:[#allocation72_spill] sm:$0xff] %v18408_v9  ;;  %v7666_v2 = vsel %vm738_vm1, %v7664_v57, %v7665_v36  ;;  %v7907_v32 = vadd.f32 %v7906_v6, %v7905_v40  ;;  %v8199_v9 = vrot.slane %v7994_v24, 1  ;;  %v8209_v16 = vrot.slane %v8003_v42, 1  ;;  %v13629_v40 = vld [vmem:[%s19890_s4 + $0x184] ss:$12 sps:$4 sm:$0xff]  }
 0x4b4   :  { %v8438_v47 = vadd.f32 %v8437_v18, %v8436_v34  ;;  %v7675_v45 = vsel %vm738_vm1, %v7673_v46, %v7674_v10  ;;  %v7908_v4 = vsel %vm1837_vm2, %v7666_v2, 0.0  ;;  %v8200_v33 = vrot.slane %v7997_v48, 1  ;;  %9510 = vmatprep.subr.bf16.mxu1 %v13629_v40 }
 0x4b5   :  { %v7909_v27 = vadd.f32 %v7908_v4, %v7907_v32  ;;  %v18423_v43 = vadd.f32 %v18023_v44, %v7427_v25  ;;  %v7910_v35 = vsel %vm7865_vm4, %v7665_v36, 0.0  ;;  %v18427_v11 = vadd.f32 %v18040_v49, %v12764_v63 }
 0x4b6   :  { %v8440_v1 = vadd.f32 %v8439_v28, %v8438_v47  ;;  %v18430_v57 = vadd.f32 %v18030_v51, %v7430_v61  ;;  %v7912_v24 = vsel %vm1837_vm2, %v7675_v45, 0.0  ;;  %v8201_v42 = vsel %vm738_vm1, %v8199_v9, %v8200_v33 }
 0x4b7   :  { %v7911_v30 = vadd.f32 %v7910_v35, %v7909_v27  ;;  %v7682_v44 = vrot.slane %v18423_v43, 1  ;;  %v8441_v25 = vsel %vm1837_vm2, %v8201_v42, 0.0  ;;  %v8006_v49 = vmul.f32 %v18423_v43, %v18423_v43 }
 0x4b8   :  { %v7683_v63 = vrot.slane %v18430_v57, 1  ;;  %v8009_v51 = vmul.f32 %v18430_v57, %v18430_v57  ;;  %v7914_v36 = vsel %vm7865_vm4, %v7674_v10, 0.0  ;;  %v8210_v45 = vsel %vm738_vm1, %v8208_v8, %v8209_v16 }
 0x4b9   :  { %v7913_v48 = vadd.f32 %v7912_v24, %v7911_v30  ;;  %v8442_v61 = vadd.f32 %v8441_v25, %v8440_v1  ;;  %v8443_v9 = vsel %vm7865_vm4, %v8200_v33, 0.0  ;;  %v8217_v7 = vrot.slane %v8006_v49, 1 }
 0x4ba   :  { %v7684_v6 = vsel %vm738_vm1, %v7682_v44, %v7683_v63  ;;  %v8218_v28 = vrot.slane %v8009_v51, 1  ;;  %v8396_v34 = vrot.slane %v18147_v20, 1  ;;  %v8445_v32 = vsel %vm1837_vm2, %v8210_v45, 0.0 }
 0x4bb   :  { %v8444_v46 = vadd.f32 %v8443_v9, %v8442_v61  ;;  %v7915_v18 = vadd.f32 %v7914_v36, %v7913_v48  ;;  %v7916_v2 = vsel %vm1837_vm2, %v7684_v6, 0.0  ;;  %v20323_v8 = vrot.slane %v18058_v58, 1 }
 0x4bc   :  { %v8219_v10 = vsel %vm738_vm1, %v8217_v7, %v8218_v28  ;;  %v8349_v4 = vrot.slane %v18073_v41, 1  ;;  %v8447_v35 = vsel %vm7865_vm4, %v8209_v16, 0.0  ;;  %v7918_v1 = vsel %vm7865_vm4, %v7683_v63, 0.0 }
 0x4bd   :  { %v7816_v47 = vadd.f32 %v20323_v8, %v18058_v58  ;;  %v8446_v27 = vadd.f32 %v8445_v32, %v8444_v46  ;;  %v7917_v33 = vadd.f32 %v7916_v2, %v7915_v18  ;;  %v8449_v40 = vsel %vm1837_vm2, %v8219_v10, 0.0 }
 0x4be   :  { %v8397_v24 = vadd.f32 %v8396_v34, %v18147_v20  ;;  %v18461_v30 = vmul.f32 0.0051020407, %v18296_v52  ;;  %v8350_v25 = vadd.f32 %v8349_v4, %v18073_v41  ;;  %v8451_v36 = vsel %vm7865_vm4, %v8218_v28, 0.0 }
 0x4bf   :  { %v7919_v42 = vadd.f32 %v7918_v1, %v7917_v33  ;;  %v8448_v44 = vadd.f32 %v8447_v35, %v8446_v27  ;;  %v8459_v58 = vmul.f32 0.0051020407, %v7816_v47 }
 0x4c0   :  { %v8463_v45 = vmul.f32 0.0051020407, %v8397_v24  ;;  %v8466_v16 = vmul.f32 %v18461_v30, %v18461_v30  ;;  %v8462_v61 = vmul.f32 0.0051020407, %v8350_v25 }
 0x4c1   :  { %v7920_v49 = vrot.slane %v7919_v42, 4  ;;  %v8450_v51 = vadd.f32 %v8449_v40, %v8448_v44  ;;  %v8465_v20 = vmul.f32 %v8459_v58, %v8459_v58  ;;  %v13767_v44 = vmov 1966171168  }
 0x4c2   :  { %v8469_v7 = vsub.f32 %v8463_v45, %v8466_v16  ;;  %v8486_v25 = vunpack.c.l.s4 %v13767_v44 }
 0x4c3   :  { %v7921_v63 = vadd.f32 %v7920_v49, %v7919_v42  ;;  %v8452_v48 = vadd.f32 %v8451_v36, %v8450_v51  ;;  %v8468_v46 = vsub.f32 %v8462_v61, %v8465_v20  ;;  %v8488_v49 = vlaneseq }
 0x4c4   :  { %v8472_v2 = vmax.f32 %v8469_v7, 0.0  ;;  %v8487_v51 = vunpack.c.0.s8 %v8486_v25  ;;  %v8474_v7 = vld [vmem:[%s19891_s2] sm:$0x7] }
 0x4c5   :  { %v7922_v9 = vrot.slane %v7921_v63, 2  ;;  %v8453_v52 = vrot.slane %v8452_v48, 4  ;;  %v8471_v28 = vmax.f32 %v8468_v46, 0.0  ;;  %v18467_v36 = vshrl.u32 %v8488_v49, 7  ;;  %v20328_v49 = vld [vmem:[#allocation13_spill] sm:$0xff] }
 0x4c6   :  { %v8476_v4 = vadd.f32 1e-05, %v8472_v2 }
 0x4c7   :  { %v7923_v6 = vadd.f32 %v7922_v9, %v7921_v63  ;;  %v8454_v34 = vadd.f32 %v8453_v52, %v8452_v48  ;;  %v8475_v35 = vadd.f32 1e-05, %v8471_v28  ;;  %v8490_v48 = vsub.s32 %v8487_v51, %v18467_v36 }
 0x4c8   :  { %13635 = vrsqrt.f32 %v8476_v4  ;;  %v8521_v46 = vsub.s32 2, %v18467_v36 }
 0x4c9   :  { %v7924_v41 = vrot.slane %v7923_v6, 1  ;;  %v8455_v18 = vrot.slane %v8454_v34, 2  ;;  %13637 = vrsqrt.f32 %v8475_v35  ;;  %v20324_v35 = vld [vmem:[#allocation7_spill] sm:$0xff] }
 0x4cb   :  { %v7925_v32 = vadd.f32 %v7924_v41, %v7923_v6  ;;  %v8456_v10 = vadd.f32 %v8455_v18, %v8454_v34  ;;  %v8513_v6 = vsub.s32 0, %v18467_v36  ;;  %v8517_v34 = vsub.s32 1, %v18467_v36 }
 0x4cd   :  { %v8457_v8 = vrot.slane %v8456_v10, 1  ;;  %v8461_v47 = vmul.f32 0.0051020407, %v7925_v32 }
 0x4cf   :  { %v8458_v27 = vadd.f32 %v8457_v8, %v8456_v10  ;;  %v8467_v33 = vmul.f32 %v8461_v47, %v8461_v47 }
 0x4d1   :  { %v8464_v1 = vmul.f32 0.0051020407, %v8458_v27 }
 0x4d2   :  { %v13636_v45 = vpop.eup %13635 }
 0x4d3   :  { %v8470_v40 = vsub.f32 %v8464_v1, %v8467_v33  ;;  %v13638_v16 = vpop.eup %13637 }
 0x4d4   :  { %v8484_v63 = vcombine.low %v13638_v16, %v13636_v45 }
 0x4d5   :  { %v8473_v24 = vmax.f32 %v8470_v40, 0.0  ;;  %v20325_v40 = vld [vmem:[#allocation50_spill] sm:$0xff] }
 0x4d6   :  { %v8491_v20 = vrot.slane %v8484_v63, %v8490_v48  ;;  %v20331_v63 = vld [vmem:[#allocation14_spill] sm:$0xff] }
 0x4d7   :  { %v8477_v42 = vadd.f32 1e-05, %v8473_v24 }
 0x4d9   :  { %13639 = vrsqrt.f32 %v8477_v42  ;;  %v20326_v42 = vld [vmem:[#allocation6_spill] sm:$0xff] }
 0x4e3   :  { %v13640_v61 = vpop.eup %13639 }
 0x4e4   :  { %v8498_v9 = vrot.slane %v13640_v61, %v8490_v48 }
 0x4e6   :  { %v8499_v52 = vcombine.low %v8491_v20, %v8498_v9 }
 0x4e8   :  { %v8506_v41 = vrot.slane %v8499_v52, %v8490_v48  ;;  %v20334_v52 = vld [vmem:[#allocation15_spill] sm:$0xff] }
 0x4ea   :  { %v8508_v18 = vmul.f32 %v8506_v41, %v8474_v7 }
 0x4ec   :  { %v18476_v2 = vrot.slane %v8508_v18, %v8513_v6  ;;  %v18478_v32 = vrot.slane %v8508_v18, %v8517_v34  ;;  %v18480_v10 = vrot.slane %v8508_v18, %v8521_v46  ;;  %v20336_v18 = vld [vmem:[#allocation8_spill] sm:$0xff] }
 0x4ee   :  { %v8526_v28 = vmul.f32 %v18476_v2, %v8459_v58  ;;  %v8527_v8 = vmul.f32 %v18478_v32, %v18461_v30  ;;  %v8528_v4 = vmul.f32 %v18480_v10, %v8461_v47  ;;  %v8643_v27 = vmul.f32 %v18423_v43, %v18480_v10 }
 0x4ef   :  { %v8646_v33 = vmul.f32 %v18430_v57, %v18480_v10  ;;  %v18492_v1 = vmul.f32 %v20324_v35, %v18476_v2  ;;  %v18496_v24 = vmul.f32 %v20325_v40, %v18478_v32  ;;  %v18500_v58 = vmul.f32 %v18047_v3, %v18480_v10  ;;  %v20327_v57 = vld [vmem:[#allocation39_spill] sm:$0xff]  ;;  %v20329_v3 = vld [vmem:[#allocation38_spill] sm:$0xff]  ;;  %v20338_v35 = vld [vmem:[#allocation40_spill] sm:$0xff] }
 0x4f0   :  { %v8532_v30 = vcombine.low %v8526_v28, %v8527_v8  ;;  %v8546_v47 = vrot.slane %v8528_v4, %v8490_v48  ;;  %v18504_v43 = vmul.f32 %v20326_v42, %v18476_v2  ;;  %v18508_v44 = vmul.f32 %v20327_v57, %v18478_v32  ;;  %v20342_v42 = vld [vmem:[#allocation41_spill] sm:$0xff] }
 0x4f1   :  { %v18512_v25 = vmul.f32 %v18053_v19, %v18480_v10  ;;  %v18516_v51 = vmul.f32 %v20328_v49, %v18476_v2  ;;  %v18520_v36 = vmul.f32 %v20329_v3, %v18478_v32  ;;  %v18524_v45 = vmul.f32 %v18044_v26, %v18480_v10  ;;  %v20332_v19 = vld [vmem:[#allocation49_spill] sm:$0xff]  ;;  %v20344_v49 = vld [vmem:[#allocation68_spill] sm:$0xff] }
 0x4f2   :  { %v8539_v16 = vrot.slane %v8532_v30, %v8490_v48  ;;  %v18528_v61 = vmul.f32 %v20331_v63, %v18476_v2  ;;  %v18532_v20 = vmul.f32 %v20332_v19, %v18478_v32  ;;  %v18536_v9 = vmul.f32 %v18050_v17, %v18480_v10  ;;  %v20340_v30 = vld [vmem:[#allocation5_spill] sm:$0xff]  ;;  %v20346_v19 = vld [vmem:[#allocation43_spill] sm:$0xff] }
 0x4f3   :  { %20330 = vst [vmem:[#allocation73_spill] sm:$0xff] %v18520_v36  ;;  %v18540_v7 = vmul.f32 %v20334_v52, %v18476_v2  ;;  %v18544_v26 = vmul.f32 %v20236_v55, %v18478_v32  ;;  %v18548_v41 = vmul.f32 %v18071_v12, %v18480_v10  ;;  %v18552_v28 = vmul.f32 %v20336_v18, %v18476_v2  ;;  %v8509_v12 = vld [vmem:[%s19892_s3] sm:$0x7] }
 0x4f4   :  { %20333 = vst [vmem:[#allocation74_spill] sm:$0xff] %v18532_v20  ;;  %v8547_v8 = vcombine.low %v8539_v16, %v8546_v47  ;;  %v18556_v17 = vmul.f32 %v17303_v29, %v18478_v32  ;;  %v18560_v4 = vmul.f32 %v18086_v38, %v18480_v10  ;;  %v18564_v55 = vmul.f32 %v20222_v39, %v18476_v2  ;;  %v20341_v47 = vld [vmem:[#allocation16_spill] sm:$0xff]  ;;  %v20345_v16 = vld [vmem:[#allocation9_spill] sm:$0xff] }
 0x4f5   :  { %20335 = vst [vmem:[#allocation75_spill] sm:$0xff] %v18544_v26  ;;  %v18571_v40 = vmul.f32 %v20338_v35, %v18478_v32  ;;  %v18575_v29 = vmul.f32 %v20340_v30, %v18480_v10  ;;  %v18579_v38 = vmul.f32 %v20341_v47, %v18476_v2  ;;  %v18583_v39 = vmul.f32 %v20342_v42, %v18478_v32  ;;  %v20348_v35 = vld [vmem:[#allocation22_spill] sm:$0xff] }
 0x4f6   :  { %20337 = vst [vmem:[#allocation76_spill] sm:$0xff] %v18556_v17  ;;  %v8554_v57 = vrot.slane %v8547_v8, %v8490_v48  ;;  %v18587_v3 = vmul.f32 %v20344_v49, %v18480_v10  ;;  %v18591_v63 = vmul.f32 %v20345_v16, %v18476_v2  ;;  %v18595_v52 = vmul.f32 %v20346_v19, %v18478_v32  ;;  %v20349_v48 = vld [vmem:[#allocation36_spill] sm:$0xff]  ;;  %v20351_v49 = vld [vmem:[#allocation17_spill] sm:$0xff] }
 0x4f7   :  { %20339 = vst [vmem:[#allocation77_spill] sm:$0xff] %v18571_v40  ;;  %20343 = vst [vmem:[#allocation78_spill] sm:$0xff] %v18583_v39  ;;  %v18599_v18 = vmul.f32 %v18114_v22, %v18480_v10  ;;  %v18603_v30 = vmul.f32 %v20348_v35, %v18476_v2  ;;  %v18607_v8 = vmul.f32 %v20349_v48, %v18478_v32  ;;  %v20352_v22 = vld [vmem:[#allocation42_spill] sm:$0xff]  ;;  %v20354_v48 = vld [vmem:[#allocation20_spill] sm:$0xff] }
 0x4f8   :  { %20347 = vst [vmem:[#allocation79_spill] sm:$0xff] %v18595_v52  ;;  %v18611_v47 = vmul.f32 %v18120_v53, %v18480_v10  ;;  %v8556_v42 = vsub.f32 %v8509_v12, %v8554_v57  ;;  %v18615_v16 = vmul.f32 %v20351_v49, %v18476_v2  ;;  %v18619_v19 = vmul.f32 %v20352_v22, %v18478_v32  ;;  %v20355_v53 = vld [vmem:[#allocation44_spill] sm:$0xff]  ;;  %v20357_v57 = vld [vmem:[#allocation10_spill] sm:$0xff] }
 0x4f9   :  { %20350 = vst [vmem:[#allocation80_spill] sm:$0xff] %v18607_v8  ;;  %v18623_v35 = vmul.f32 %v18106_v0, %v18480_v10  ;;  %v18627_v8 = vmul.f32 %v20354_v48, %v18476_v2  ;;  %v18631_v52 = vmul.f32 %v20355_v53, %v18478_v32  ;;  %v18635_v12 = vmul.f32 %v18117_v50, %v18480_v10  ;;  %v20359_v48 = vld [vmem:[#allocation37_spill] sm:$0xff]  ;;  %v20361_v50 = vld [vmem:[#allocation11_spill] sm:$0xff] }
 0x4fa   :  { %20353 = vst [vmem:[#allocation81_spill] sm:$0xff] %v18619_v19  ;;  %v18639_v49 = vmul.f32 %v20357_v57, %v18476_v2  ;;  %v18641_v22 = vrot.slane %v8556_v42, %v8513_v6  ;;  %v18643_v0 = vrot.slane %v8556_v42, %v8517_v34  ;;  %v18645_v19 = vrot.slane %v8556_v42, %v8521_v46  ;;  %v20362_v57 = vld [vmem:[#allocation47_spill] sm:$0xff] }
 0x4fb   :  { %20356 = vst [vmem:[#allocation82_spill] sm:$0xff] %v18631_v52  ;;  %v18649_v39 = vmul.f32 %v20359_v48, %v18478_v32  ;;  %v18653_v53 = vmul.f32 %v18160_v59, %v18480_v10  ;;  %v18657_v52 = vmul.f32 %v20361_v50, %v18476_v2  ;;  %v18661_v6 = vmul.f32 %v20362_v57, %v18478_v32  ;;  %v20364_v48 = vld [vmem:[#allocation19_spill] sm:$0xff] }
 0x4fc   :  { %20358 = vst [vmem:[#allocation83_spill] sm:$0xff] %v18643_v0  ;;  %v18665_v34 = vmul.f32 %v18191_v15, %v18480_v10  ;;  %v8755_v46 = vadd.f32 %v18645_v19, %v8643_v27  ;;  %v8758_v42 = vadd.f32 %v18645_v19, %v8646_v33  ;;  %v18671_v59 = vmul.f32 %v20364_v48, %v18476_v2  ;;  %v20368_v27 = vld [vmem:[#allocation46_spill] sm:$0xff] }
 0x4fd   :  { %20360 = vst [vmem:[#allocation85_spill] sm:$0xff] %v18649_v39  ;;  %20363 = vst [vmem:[#allocation18_spill] sm:$0xff] %v18661_v6  ;;  %v20365_v39 = vld [vmem:[#allocation45_spill] sm:$0xff]  ;;  %v18679_v57 = vmul.f32 %v18155_v23, %v18480_v10  ;;  %v18687_v40 = vmul.f32 %v20368_v27, %v18478_v32  ;;  %v18691_v33 = vmul.f32 %v18163_v13, %v18480_v10  ;;  %v20373_v27 = vld [vmem:[#allocation4_spill] sm:$0xff] }
 0x4fe   :  { %v18675_v50 = vmul.f32 %v20365_v39, %v18478_v32  ;;  %v20367_v6 = vld [vmem:[#allocation21_spill] sm:$0xff]  ;;  %v8851_v48 = vmax.f32 %v8755_v46, 0.0  ;;  %v8854_v17 = vmax.f32 %v8758_v42, 0.0  ;;  %v20370_v39 = vld [vmem:[#allocation12_spill] sm:$0xff]  ;;  %v20374_v13 = vld [vmem:[#allocation55_spill] sm:$0xff]  ;;  %v18715_v42 = vmul.f32 %v18250_v31, %v18480_v10 }
 0x4ff   :  { %v18683_v15 = vmul.f32 %v20367_v6, %v18476_v2  ;;  %20369 = vst [vmem:[#allocation84_spill] sm:$0xff] %v18687_v40  ;;  %v20371_v23 = vld [vmem:[#allocation53_spill] sm:$0xff]  ;;  %v18703_v6 = vmul.f32 %v18210_v54, %v18480_v10  ;;  %v18707_v40 = vmul.f32 %v20373_v27, %v18476_v2  ;;  %v18711_v46 = vmul.f32 %v20374_v13, %v18478_v32  ;;  %v20378_v54 = vld [vmem:[#allocation52_spill] sm:$0xff]  ;;  %v20381_v13 = vld [vmem:[#allocation3_spill] sm:$0xff] }
 0x500   :  { %20366 = vst [vmem:[#allocation51_spill] sm:$0xff] %v18675_v50  ;;  %v18695_v50 = vmul.f32 %v20370_v39, %v18476_v2  ;;  %v18699_v26 = vmul.f32 %v20371_v23, %v18478_v32  ;;  %v18717_v39 = vpack.c.bf16 %v8854_v17, %v8851_v48  ;;  %v20377_v23 = vld [vmem:[#allocation23_spill] sm:$0xff]  ;;  %v18725_v20 = vmul.f32 %v20378_v54, %v18478_v32  ;;  %v20380_v27 = vld [vmem:[#allocation69_spill] sm:$0xff]  ;;  %v20382_v31 = vld [vmem:[#allocation54_spill] sm:$0xff] }
 0x501   :  { %20375 = vst [vmem:[#allocation50_spill] sm:$0xff] %v18711_v46  ;;  %v18729_v36 = vmul.f32 %v20380_v27, %v18480_v10  ;;  %v18733_v46 = vmul.f32 %v20381_v13, %v18476_v2  ;;  %v18737_v17 = vmul.f32 %v20382_v31, %v18478_v32  ;;  %v18741_v48 = vmul.f32 %v18239_v5, %v18480_v10 }
 0x502   :  { %20372 = vst [vmem:[#allocation7_spill] sm:$0xff] %v18699_v26  ;;  %20376 = vst [vmem:[#allocation6_spill] sm:$0xff] %v18717_v39  ;;  %v18721_v26 = vmul.f32 %v20377_v23, %v18476_v2  ;;  %v20384_v23 = vld [vmem:[#allocation25_spill] sm:$0xff]  ;;  %v18753_v13 = vmul.f32 %v18299_v62, %v18480_v10 }
 0x503   :  { %20379 = vst [vmem:[#allocation39_spill] sm:$0xff] %v18725_v20  ;;  %20383 = vst [vmem:[#allocation13_spill] sm:$0xff] %v18737_v17  ;;  %v18745_v54 = vmul.f32 %v20384_v23, %v18476_v2  ;;  %v20386_v39 = vld [vmem:[#allocation57_spill] sm:$0xff]  ;;  %v20388_v20 = vld [vmem:[#allocation27_spill] sm:$0xff]  ;;  %v18765_v23 = vmul.f32 %v18316_v37, %v18480_v10 }
 0x504   :  { %v18749_v27 = vmul.f32 %v20386_v39, %v18478_v32  ;;  %v18757_v31 = vmul.f32 %v20388_v20, %v18476_v2  ;;  %v20390_v17 = vld [vmem:[#allocation59_spill] sm:$0xff]  ;;  %v18777_v20 = vmul.f32 %v18263_v21, %v18480_v10 }
 0x505   :  { %20385 = vst [vmem:[#allocation38_spill] sm:$0xff] %v18745_v54  ;;  %v18761_v5 = vmul.f32 %v20390_v17, %v18478_v32  ;;  %v20392_v54 = vld [vmem:[#allocation24_spill] sm:$0xff] }
 0x506   :  { %20387 = vst [vmem:[#allocation14_spill] sm:$0xff] %v18749_v27  ;;  %20389 = vst [vmem:[#allocation49_spill] sm:$0xff] %v18757_v31  ;;  %v18769_v39 = vmul.f32 %v20392_v54, %v18476_v2  ;;  %v20394_v27 = vld [vmem:[#allocation56_spill] sm:$0xff]  ;;  %v20396_v31 = vld [vmem:[#allocation26_spill] sm:$0xff]  ;;  %v18789_v54 = vmul.f32 %v18302_v14, %v18480_v10 }
 0x507   :  { %20391 = vst [vmem:[#allocation15_spill] sm:$0xff] %v18761_v5  ;;  %v18773_v62 = vmul.f32 %v20394_v27, %v18478_v32  ;;  %v18781_v17 = vmul.f32 %v20396_v31, %v18476_v2  ;;  %v20398_v5 = vld [vmem:[#allocation58_spill] sm:$0xff]  ;;  %v18801_v31 = vmul.f32 %v18372_v56, %v18480_v10 }
 0x508   :  { %20393 = vst [vmem:[#allocation8_spill] sm:$0xff] %v18769_v39  ;;  %v18785_v37 = vmul.f32 %v20398_v5, %v18478_v32  ;;  %20400 = vst [vmem:[#allocation41_spill] sm:$0xff] %v18789_v54  ;;  %v20401_v39 = vld [vmem:[#allocation29_spill] sm:$0xff]  ;;  %v20409_v54 = vld [vmem:[#allocation71_spill] sm:$0xff] }
 0x509   :  { %20395 = vst [vmem:[#allocation40_spill] sm:$0xff] %v18773_v62  ;;  %20397 = vst [vmem:[#allocation5_spill] sm:$0xff] %v18781_v17  ;;  %v18793_v27 = vmul.f32 %v20401_v39, %v18476_v2  ;;  %v20403_v62 = vld [vmem:[#allocation61_spill] sm:$0xff]  ;;  %v20405_v17 = vld [vmem:[#allocation31_spill] sm:$0xff]  ;;  %v18813_v39 = vmul.f32 %v20409_v54, %v18480_v10 }
 0x50a   :  { %20399 = vst [vmem:[#allocation16_spill] sm:$0xff] %v18785_v37  ;;  %v18797_v21 = vmul.f32 %v20403_v62, %v18478_v32  ;;  %v18805_v5 = vmul.f32 %v20405_v17, %v18476_v2  ;;  %v20407_v37 = vld [vmem:[#allocation63_spill] sm:$0xff]  ;;  %v18825_v17 = vmul.f32 %v18340_v60, %v18480_v10 }
 0x50b   :  { %20402 = vst [vmem:[#allocation68_spill] sm:$0xff] %v18793_v27  ;;  %v18809_v14 = vmul.f32 %v20407_v37, %v18478_v32  ;;  %20410 = vst [vmem:[#allocation36_spill] sm:$0xff] %v18813_v39  ;;  %v20411_v27 = vld [vmem:[#allocation28_spill] sm:$0xff]  ;;  %v20420_v39 = vld [vmem:[#allocation70_spill] sm:$0xff] }
 0x50c   :  { %20404 = vst [vmem:[#allocation9_spill] sm:$0xff] %v18797_v21  ;;  %20406 = vst [vmem:[#allocation43_spill] sm:$0xff] %v18805_v5  ;;  %v18817_v62 = vmul.f32 %v20411_v27, %v18476_v2  ;;  %v20413_v21 = vld [vmem:[#allocation60_spill] sm:$0xff]  ;;  %v20416_v5 = vld [vmem:[#allocation30_spill] sm:$0xff]  ;;  %v18837_v27 = vmul.f32 %v20420_v39, %v18480_v10 }
 0x50d   :  { %20408 = vst [vmem:[#allocation22_spill] sm:$0xff] %v18809_v14  ;;  %v18821_v56 = vmul.f32 %v20413_v21, %v18478_v32  ;;  %20415 = vst [vmem:[#allocation20_spill] sm:$0xff] %v18825_v17  ;;  %v18829_v37 = vmul.f32 %v20416_v5, %v18476_v2  ;;  %v20418_v14 = vld [vmem:[#allocation62_spill] sm:$0xff]  ;;  %v20426_v17 = vld [vmem:[#allocation35_spill] sm:$0xff] }
 0x50e   :  { %20412 = vst [vmem:[#allocation17_spill] sm:$0xff] %v18817_v62  ;;  %v18833_v54 = vmul.f32 %v20418_v14, %v18478_v32  ;;  %20421 = vst [vmem:[#allocation37_spill] sm:$0xff] %v18837_v27  ;;  %v20422_v62 = vld [vmem:[#allocation33_spill] sm:$0xff]  ;;  %v18849_v5 = vmul.f32 %v20426_v17, %v18476_v2  ;;  %v20431_v27 = vld [vmem:[#allocation64_spill] sm:$0xff] }
 0x50f   :  { %20414 = vst [vmem:[#allocation42_spill] sm:$0xff] %v18821_v56  ;;  %20417 = vst [vmem:[#allocation44_spill] sm:$0xff] %v18829_v37  ;;  %v18841_v21 = vmul.f32 %v20422_v62, %v18476_v2  ;;  %v20424_v56 = vld [vmem:[#allocation65_spill] sm:$0xff]  ;;  %v20428_v37 = vld [vmem:[#allocation67_spill] sm:$0xff]  ;;  %v18861_v62 = vmul.f32 %v20431_v27, %v18478_v32  ;;  %v18881_v27 = vadd.f32 %v18641_v22, %v18492_v1 }
 0x510   :  { %20419 = vst [vmem:[#allocation10_spill] sm:$0xff] %v18833_v54  ;;  %v18845_v60 = vmul.f32 %v20424_v56, %v18478_v32  ;;  %20427 = vst [vmem:[#allocation19_spill] sm:$0xff] %v18849_v5  ;;  %v18853_v14 = vmul.f32 %v20428_v37, %v18478_v32  ;;  %v20430_v54 = vld [vmem:[#allocation32_spill] sm:$0xff]  ;;  %v20434_v5 = vld [vmem:[#allocation66_spill] sm:$0xff]  ;;  %v18905_v1 = vadd.f32 %v18641_v22, %v18516_v51 }
 0x511   :  { %20423 = vst [vmem:[#allocation11_spill] sm:$0xff] %v18841_v21  ;;  %v18857_v39 = vmul.f32 %v20430_v54, %v18476_v2  ;;  %v20432_v21 = vld [vmem:[#allocation72_spill] sm:$0xff]  ;;  %v18873_v37 = vmul.f32 %v20434_v5, %v18478_v32  ;;  %v18877_v54 = vmul.f32 %v18427_v11, %v18480_v10  ;;  %20435 = vst [vmem:[#allocation21_spill] sm:$0xff] %v18881_v27 }
 0x512   :  { %20425 = vst [vmem:[#allocation47_spill] sm:$0xff] %v18845_v60  ;;  %20429 = vst [vmem:[#allocation45_spill] sm:$0xff] %v18853_v14  ;;  %v18865_v56 = vmul.f32 %v20432_v21, %v18480_v10  ;;  %v20433_v60 = vld [vmem:[#allocation34_spill] sm:$0xff]  ;;  %v18885_v21 = vadd.f32 %v18643_v0, %v18496_v24  ;;  %v18893_v32 = vadd.f32 %v18641_v22, %v18504_v43  ;;  %v20444_v5 = vld [vmem:[#allocation8_spill] sm:$0xff] }
 0x513   :  { %v18869_v17 = vmul.f32 %v20433_v60, %v18476_v2  ;;  %v18889_v2 = vadd.f32 %v18645_v19, %v18500_v58  ;;  %v18897_v11 = vadd.f32 %v18643_v0, %v18508_v44  ;;  %v18901_v10 = vadd.f32 %v18645_v19, %v18512_v25  ;;  %v20442_v60 = vld [vmem:[#allocation49_spill] sm:$0xff] }
 0x514   :  { %20436 = vst [vmem:[#allocation46_spill] sm:$0xff] %v18885_v21  ;;  %20438 = vst [vmem:[#allocation53_spill] sm:$0xff] %v18893_v32  ;;  %v18909_v24 = vadd.f32 %v18645_v19, %v18524_v45  ;;  %v18913_v58 = vadd.f32 %v18641_v22, %v18528_v61  ;;  %v18917_v43 = vadd.f32 %v18645_v19, %v18536_v9  ;;  %v20447_v14 = vld [vmem:[#allocation5_spill] sm:$0xff] }
 0x515   :  { %20437 = vst [vmem:[#allocation12_spill] sm:$0xff] %v18889_v2  ;;  %20439 = vst [vmem:[#allocation4_spill] sm:$0xff] %v18897_v11  ;;  %v18921_v44 = vadd.f32 %v18641_v22, %v18540_v7  ;;  %v18925_v25 = vadd.f32 %v18645_v19, %v18548_v41  ;;  %v18929_v51 = vadd.f32 %v18641_v22, %v18552_v28 }
 0x516   :  { %v18933_v45 = vadd.f32 %v18645_v19, %v18560_v4  ;;  %v18937_v61 = vadd.f32 %v18641_v22, %v18564_v55  ;;  %v18941_v9 = vadd.f32 %v18645_v19, %v18575_v29  ;;  %v18945_v7 = vadd.f32 %v18641_v22, %v18579_v38 }
 0x517   :  { %v18949_v41 = vadd.f32 %v18645_v19, %v18587_v3  ;;  %v18953_v28 = vadd.f32 %v18641_v22, %v18591_v63  ;;  %v18957_v4 = vadd.f32 %v18645_v19, %v18599_v18  ;;  %v18961_v55 = vadd.f32 %v18641_v22, %v18603_v30 }
 0x518   :  { %v18965_v29 = vadd.f32 %v18645_v19, %v18611_v47  ;;  %v18969_v38 = vadd.f32 %v18641_v22, %v18615_v16  ;;  %v18973_v3 = vadd.f32 %v18645_v19, %v18623_v35  ;;  %v18977_v63 = vadd.f32 %v18641_v22, %v18627_v8 }
 0x519   :  { %v18981_v18 = vadd.f32 %v18645_v19, %v18635_v12  ;;  %v18985_v30 = vadd.f32 %v18641_v22, %v18639_v49  ;;  %v18989_v47 = vadd.f32 %v18645_v19, %v18653_v53  ;;  %v18993_v16 = vadd.f32 %v18641_v22, %v18657_v52 }
 0x51a   :  { %v18997_v8 = vadd.f32 %v18645_v19, %v18665_v34  ;;  %v19001_v35 = vadd.f32 %v18641_v22, %v18671_v59  ;;  %v19005_v12 = vadd.f32 %v18645_v19, %v18679_v57  ;;  %v19009_v49 = vadd.f32 %v18641_v22, %v18683_v15 }
 0x51b   :  { %v19013_v52 = vadd.f32 %v18645_v19, %v18691_v33  ;;  %v19017_v53 = vadd.f32 %v18641_v22, %v18695_v50  ;;  %v19021_v34 = vadd.f32 %v18645_v19, %v18703_v6  ;;  %v19025_v59 = vadd.f32 %v18641_v22, %v18707_v40  ;;  %v20440_v6 = vld [vmem:[#allocation38_spill] sm:$0xff] }
 0x51c   :  { %v19029_v57 = vadd.f32 %v18645_v19, %v18715_v42  ;;  %v19033_v15 = vadd.f32 %v18641_v22, %v18721_v26  ;;  %v19037_v50 = vadd.f32 %v18645_v19, %v18729_v36  ;;  %v19041_v33 = vadd.f32 %v18641_v22, %v18733_v46 }
 0x51d   :  { %v19045_v40 = vadd.f32 %v18645_v19, %v18741_v48  ;;  %v19049_v42 = vadd.f32 %v18641_v22, %v20440_v6  ;;  %v19053_v26 = vadd.f32 %v18645_v19, %v18753_v13  ;;  %v19057_v36 = vadd.f32 %v18641_v22, %v20442_v60 }
 0x51e   :  { %v19061_v46 = vadd.f32 %v18645_v19, %v18765_v23  ;;  %v19065_v48 = vadd.f32 %v18641_v22, %v20444_v5  ;;  %v19069_v6 = vadd.f32 %v18645_v19, %v18777_v20  ;;  %v19073_v13 = vadd.f32 %v18641_v22, %v20447_v14 }
 0x51f   :  { %20441 = vst [vmem:[#allocation55_spill] sm:$0xff] %v19053_v26  ;;  %20443 = vst [vmem:[#allocation23_spill] sm:$0xff] %v19057_v36  ;;  %v20449_v26 = vld [vmem:[#allocation41_spill] sm:$0xff]  ;;  %v20451_v36 = vld [vmem:[#allocation68_spill] sm:$0xff]  ;;  %v19085_v5 = vadd.f32 %v18645_v19, %v18801_v31 }
 0x520   :  { %20445 = vst [vmem:[#allocation52_spill] sm:$0xff] %v19065_v48  ;;  %20446 = vst [vmem:[#allocation69_spill] sm:$0xff] %v19069_v6  ;;  %v19077_v60 = vadd.f32 %v18645_v19, %v20449_v26  ;;  %v19081_v23 = vadd.f32 %v18641_v22, %v20451_v36  ;;  %v20454_v48 = vld [vmem:[#allocation43_spill] sm:$0xff]  ;;  %v20456_v6 = vld [vmem:[#allocation36_spill] sm:$0xff] }
 0x521   :  { %20448 = vst [vmem:[#allocation3_spill] sm:$0xff] %v19073_v13  ;;  %20453 = vst [vmem:[#allocation57_spill] sm:$0xff] %v19085_v5  ;;  %v19089_v20 = vadd.f32 %v18641_v22, %v20454_v48  ;;  %v19093_v14 = vadd.f32 %v18645_v19, %v20456_v6  ;;  %v20458_v13 = vld [vmem:[#allocation17_spill] sm:$0xff] }
 0x522   :  { %20450 = vst [vmem:[#allocation54_spill] sm:$0xff] %v19077_v60  ;;  %20452 = vst [vmem:[#allocation25_spill] sm:$0xff] %v19081_v23  ;;  %v19097_v26 = vadd.f32 %v18641_v22, %v20458_v13  ;;  %v20459_v60 = vld [vmem:[#allocation20_spill] sm:$0xff]  ;;  %v20461_v5 = vld [vmem:[#allocation37_spill] sm:$0xff] }
 0x523   :  { %20455 = vst [vmem:[#allocation27_spill] sm:$0xff] %v19089_v20  ;;  %20457 = vst [vmem:[#allocation59_spill] sm:$0xff] %v19093_v14  ;;  %v19101_v36 = vadd.f32 %v18645_v19, %v20459_v60  ;;  %v20460_v23 = vld [vmem:[#allocation44_spill] sm:$0xff]  ;;  %v19109_v48 = vadd.f32 %v18645_v19, %v20461_v5  ;;  %v20462_v20 = vld [vmem:[#allocation11_spill] sm:$0xff]  ;;  %v19121_v60 = vadd.f32 %v18641_v22, %v18857_v39 }
 0x524   :  { %v19105_v31 = vadd.f32 %v18641_v22, %v20460_v23  ;;  %v19113_v6 = vadd.f32 %v18641_v22, %v20462_v20  ;;  %v20463_v14 = vld [vmem:[#allocation19_spill] sm:$0xff]  ;;  %v19125_v23 = vadd.f32 %v18643_v0, %v18861_v62  ;;  %v19129_v5 = vadd.f32 %v18645_v19, %v18865_v56 }
 0x525   :  { %v19117_v13 = vadd.f32 %v18641_v22, %v20463_v14  ;;  %20465 = vst [vmem:[#allocation56_spill] sm:$0xff] %v19121_v60  ;;  %v19133_v20 = vadd.f32 %v18641_v22, %v18869_v17  ;;  %v19137_v14 = vadd.f32 %v18643_v0, %v18873_v37  ;;  %v19141_v39 = vadd.f32 %v18645_v19, %v18877_v54 }
 0x526   :  { %20466 = vst [vmem:[#allocation26_spill] sm:$0xff] %v19125_v23  ;;  %20467 = vst [vmem:[#allocation58_spill] sm:$0xff] %v19129_v5  ;;  %v8770_v22 = vmax.f32 %v18901_v10, 0.0  ;;  %v8771_v17 = vmax.f32 %v18905_v1, 0.0  ;;  %v8773_v37 = vmax.f32 %v18909_v24, 0.0  ;;  %v8774_v0 = vmax.f32 %v18913_v58, 0.0 }
 0x527   :  { %20464 = vst [vmem:[#allocation24_spill] sm:$0xff] %v19117_v13  ;;  %20468 = vst [vmem:[#allocation29_spill] sm:$0xff] %v19133_v20  ;;  %v8776_v19 = vmax.f32 %v18917_v43, 0.0  ;;  %v8777_v54 = vmax.f32 %v18921_v44, 0.0  ;;  %v8779_v62 = vmax.f32 %v18925_v25, 0.0  ;;  %v8780_v23 = vmax.f32 %v18929_v51, 0.0 }
 0x528   :  { %20469 = vst [vmem:[#allocation61_spill] sm:$0xff] %v19137_v14  ;;  %20470 = vst [vmem:[#allocation31_spill] sm:$0xff] %v19141_v39  ;;  %v8782_v56 = vmax.f32 %v18933_v45, 0.0  ;;  %v8783_v5 = vmax.f32 %v18937_v61, 0.0  ;;  %v8785_v10 = vmax.f32 %v18941_v9, 0.0  ;;  %v8786_v1 = vmax.f32 %v18945_v7, 0.0 }
 0x529   :  { %v8788_v24 = vmax.f32 %v18949_v41, 0.0  ;;  %v8789_v58 = vmax.f32 %v18953_v28, 0.0  ;;  %v8791_v43 = vmax.f32 %v18957_v4, 0.0  ;;  %v8792_v44 = vmax.f32 %v18961_v55, 0.0  ;;  %v20471_v60 = vld [vmem:[#allocation55_spill] sm:$0xff]  ;;  %v20473_v21 = vld [vmem:[#allocation52_spill] sm:$0xff] }
 0x52a   :  { %v8794_v25 = vmax.f32 %v18965_v29, 0.0  ;;  %v8795_v51 = vmax.f32 %v18969_v38, 0.0  ;;  %v8797_v45 = vmax.f32 %v18973_v3, 0.0  ;;  %v8798_v61 = vmax.f32 %v18977_v63, 0.0  ;;  %v20472_v11 = vld [vmem:[#allocation23_spill] sm:$0xff]  ;;  %v20474_v2 = vld [vmem:[#allocation69_spill] sm:$0xff] }
 0x52b   :  { %v8800_v9 = vmax.f32 %v18981_v18, 0.0  ;;  %v8801_v7 = vmax.f32 %v18985_v30, 0.0  ;;  %v8803_v41 = vmax.f32 %v18989_v47, 0.0  ;;  %v8804_v28 = vmax.f32 %v18993_v16, 0.0  ;;  %v20475_v32 = vld [vmem:[#allocation3_spill] sm:$0xff]  ;;  %v20476_v27 = vld [vmem:[#allocation54_spill] sm:$0xff] }
 0x52c   :  { %v8806_v4 = vmax.f32 %v18997_v8, 0.0  ;;  %v8807_v55 = vmax.f32 %v19001_v35, 0.0  ;;  %v8809_v29 = vmax.f32 %v19005_v12, 0.0  ;;  %v8810_v38 = vmax.f32 %v19009_v49, 0.0  ;;  %v20477_v39 = vld [vmem:[#allocation25_spill] sm:$0xff]  ;;  %v20479_v20 = vld [vmem:[#allocation27_spill] sm:$0xff] }
 0x52d   :  { %v8812_v3 = vmax.f32 %v19013_v52, 0.0  ;;  %v8813_v63 = vmax.f32 %v19017_v53, 0.0  ;;  %v8815_v18 = vmax.f32 %v19021_v34, 0.0  ;;  %v8816_v30 = vmax.f32 %v19025_v59, 0.0  ;;  %v20478_v14 = vld [vmem:[#allocation57_spill] sm:$0xff]  ;;  %v20480_v13 = vld [vmem:[#allocation59_spill] sm:$0xff] }
 0x52e   :  { %v8818_v47 = vmax.f32 %v19029_v57, 0.0  ;;  %v8819_v16 = vmax.f32 %v19033_v15, 0.0  ;;  %v8821_v8 = vmax.f32 %v19037_v50, 0.0  ;;  %v8822_v35 = vmax.f32 %v19041_v33, 0.0 }
 0x52f   :  { %v8824_v12 = vmax.f32 %v19045_v40, 0.0  ;;  %v8825_v49 = vmax.f32 %v19049_v42, 0.0  ;;  %v8827_v52 = vmax.f32 %v20471_v60, 0.0  ;;  %v8828_v53 = vmax.f32 %v20472_v11, 0.0 }
 0x530   :  { %v8830_v34 = vmax.f32 %v19061_v46, 0.0  ;;  %v8831_v59 = vmax.f32 %v20473_v21, 0.0  ;;  %v8833_v57 = vmax.f32 %v20474_v2, 0.0  ;;  %v8834_v15 = vmax.f32 %v20475_v32, 0.0 }
 0x531   :  { %v8836_v50 = vmax.f32 %v20476_v27, 0.0  ;;  %v8837_v33 = vmax.f32 %v20477_v39, 0.0  ;;  %v8839_v40 = vmax.f32 %v20478_v14, 0.0  ;;  %v8840_v42 = vmax.f32 %v20479_v20, 0.0  ;;  %v20481_v27 = vld [vmem:[#allocation24_spill] sm:$0xff] }
 0x532   :  { %v8842_v60 = vmax.f32 %v20480_v13, 0.0  ;;  %v8843_v11 = vmax.f32 %v19097_v26, 0.0  ;;  %v8845_v46 = vmax.f32 %v19101_v36, 0.0  ;;  %v8846_v21 = vmax.f32 %v19105_v31, 0.0  ;;  %v20482_v14 = vld [vmem:[#allocation56_spill] sm:$0xff]  ;;  %v20484_v36 = vld [vmem:[#allocation58_spill] sm:$0xff] }
 0x533   :  { %v8848_v2 = vmax.f32 %v19109_v48, 0.0  ;;  %v8849_v32 = vmax.f32 %v19113_v6, 0.0  ;;  %v8852_v39 = vmax.f32 %v20481_v27, 0.0  ;;  %v8855_v20 = vmax.f32 %v20482_v14, 0.0  ;;  %v20485_v48 = vld [vmem:[#allocation29_spill] sm:$0xff]  ;;  %v20487_v13 = vld [vmem:[#allocation31_spill] sm:$0xff] }
 0x534   :  { %v8857_v31 = vmax.f32 %v20484_v36, 0.0  ;;  %v8858_v6 = vmax.f32 %v20485_v48, 0.0  ;;  %v8860_v26 = vmax.f32 %v20487_v13, 0.0  ;;  %v20488_v36 = vld [vmem:[#allocation21_spill] sm:$0xff] }
 0x535   :  { %v20489_v48 = vmax.f32 %v20488_v36, 0.0  ;;  %v20490_v14 = vld [vmem:[#allocation53_spill] sm:$0xff]  ;;  %v20492_v36 = vld [vmem:[#allocation12_spill] sm:$0xff] }
 0x536   :  { %v20491_v27 = vmax.f32 %v20490_v14, 0.0  ;;  %v20493_v14 = vmax.f32 %v20492_v36, 0.0  ;;  %v19219_v36 = vpack.c.bf16 %v8776_v19, %v8773_v37  ;;  %v19233_v19 = vpack.c.bf16 %v8798_v61, %v8795_v51 }
 0x537   :  { %v19235_v37 = vpack.c.bf16 %v8800_v9, %v8797_v45  ;;  %v19263_v51 = vpack.c.bf16 %v8842_v60, %v8839_v40  ;;  %v19265_v45 = vpack.c.bf16 %v8846_v21, %v8843_v11  ;;  %v19267_v61 = vpack.c.bf16 %v8848_v2, %v8845_v46  ;;  %v20509_v60 = vld [vmem:[#allocation80_spill] sm:$0xff] }
 0x538   :  { %v8861_v13 = vpack.c.bf16 %v20491_v27, %v20489_v48  ;;  %v19215_v27 = vpack.c.bf16 %v8770_v22, %v20493_v14  ;;  %v19217_v48 = vpack.c.bf16 %v8774_v0, %v8771_v17  ;;  %20496 = vst [vmem:[#allocation28_spill] sm:$0xff] %v19219_v36  ;;  %v19221_v14 = vpack.c.bf16 %v8780_v23, %v8777_v54 }
 0x539   :  { %v19223_v22 = vpack.c.bf16 %v8782_v56, %v8779_v62  ;;  %v19227_v0 = vpack.c.bf16 %v8788_v24, %v8785_v10  ;;  %v19229_v17 = vpack.c.bf16 %v8792_v44, %v8789_v58  ;;  %v19237_v36 = vpack.c.bf16 %v8804_v28, %v8801_v7  ;;  %v20497_v28 = vld [vmem:[#allocation46_spill] sm:$0xff] }
 0x53a   :  { %20494 = vst [vmem:[#allocation63_spill] sm:$0xff] %v19215_v27  ;;  %20495 = vst [vmem:[#allocation71_spill] sm:$0xff] %v19217_v48  ;;  %v19225_v27 = vpack.c.bf16 %v8786_v1, %v8783_v5  ;;  %v19231_v48 = vpack.c.bf16 %v8794_v25, %v8791_v43  ;;  %v19239_v23 = vpack.c.bf16 %v8806_v4, %v8803_v41  ;;  %v20498_v4 = vmax.f32 %v20497_v28, 0.0 }
 0x53b   :  { %v19241_v54 = vpack.c.bf16 %v8810_v38, %v8807_v55  ;;  %v19243_v62 = vpack.c.bf16 %v8812_v3, %v8809_v29  ;;  %v19245_v5 = vpack.c.bf16 %v8816_v30, %v8813_v63  ;;  %v19247_v56 = vpack.c.bf16 %v8818_v47, %v8815_v18  ;;  %v20499_v55 = vld [vmem:[#allocation4_spill] sm:$0xff]  ;;  %v13627_v3 = vld [vmem:[%s19890_s4 + $0x180] ss:$12 sps:$4 sm:$0xff]   ;;  %v20502_v18 = vld [vmem:[#allocation83_spill] sm:$0xff] }
 0x53c   :  { %v19249_v10 = vpack.c.bf16 %v8822_v35, %v8819_v16  ;;  %v19251_v1 = vpack.c.bf16 %v8824_v12, %v8821_v8  ;;  %v19253_v24 = vpack.c.bf16 %v8828_v53, %v8825_v49  ;;  %v19255_v58 = vpack.c.bf16 %v8830_v34, %v8827_v52  ;;  %v20501_v63 = vld [vmem:[#allocation73_spill] sm:$0xff]  ;;  %v20503_v47 = vld [vmem:[#allocation74_spill] sm:$0xff]  ;;  %v20504_v8 = vld [vmem:[#allocation75_spill] sm:$0xff] }
 0x53d   :  { %v19257_v43 = vpack.c.bf16 %v8834_v15, %v8831_v59  ;;  %v19259_v44 = vpack.c.bf16 %v8836_v50, %v8833_v57  ;;  %v19261_v25 = vpack.c.bf16 %v8840_v42, %v8837_v33  ;;  %v19269_v9 = vpack.c.bf16 %v8852_v39, %v8849_v32  ;;  %v20505_v12 = vld [vmem:[#allocation76_spill] sm:$0xff]  ;;  %v20506_v52 = vld [vmem:[#allocation77_spill] sm:$0xff]  ;;  %v20507_v34 = vld [vmem:[#allocation78_spill] sm:$0xff] }
 0x53e   :  { %v19271_v7 = vpack.c.bf16 %v8858_v6, %v8855_v20  ;;  %v19273_v41 = vpack.c.bf16 %v8860_v26, %v8857_v31  ;;  %v20500_v29 = vmax.f32 %v20499_v55, 0.0  ;;  %v8676_v30 = vadd.f32 %v20502_v18, %v20501_v63  ;;  %v20508_v57 = vld [vmem:[#allocation79_spill] sm:$0xff]  ;;  %v13632_v50 = vld [vmem:[%s19890_s4 + $0x19c] ss:$12 sps:$4 sm:$0xff]   ;;  %v20510_v26 = vld [vmem:[#allocation81_spill] sm:$0xff] }
 0x53f   :  { %v8679_v16 = vadd.f32 %v20502_v18, %v20503_v47  ;;  %v8682_v35 = vadd.f32 %v20502_v18, %v20504_v8  ;;  %v8685_v49 = vadd.f32 %v20502_v18, %v20505_v12  ;;  %v8688_v53 = vadd.f32 %v20502_v18, %v20506_v52  ;;  %v20511_v6 = vld [vmem:[#allocation82_spill] sm:$0xff] }
 0x540   :  { %v8862_v38 = vpack.c.bf16 %v20500_v29, %v20498_v4  ;;  %v8691_v59 = vadd.f32 %v20502_v18, %v20507_v34  ;;  %v8694_v15 = vadd.f32 %v20502_v18, %v20508_v57  ;;  %v8772_v33 = vmax.f32 %v8676_v30, 0.0  ;;  %v13630_v4 = vld [vmem:[%s19890_s4 + $0x198] ss:$12 sps:$4 sm:$0xff]   ;;  %v20513_v63 = vld [vmem:[#allocation18_spill] sm:$0xff] }
 0x541   :  { %v8775_v40 = vmax.f32 %v8679_v16, 0.0  ;;  %v8778_v42 = vmax.f32 %v8682_v35, 0.0  ;;  %v8697_v11 = vadd.f32 %v20502_v18, %v20509_v60  ;;  %v8781_v46 = vmax.f32 %v8685_v49, 0.0  ;;  %v19317_v30 = vld [vmem:[%s19890_s4 + $0x188] ss:$12 sps:$4 sm:$0xff]  }
 0x542   :  { %9349 = vmatprep.mubr.bf16.mxu1 %v8862_v38  ;;  %9735 = vmatprep.mubr.bf16.mxu0 %v8862_v38  ;;  %v8784_v21 = vmax.f32 %v8688_v53, 0.0  ;;  %v8787_v2 = vmax.f32 %v8691_v59, 0.0  ;;  %v8790_v32 = vmax.f32 %v8694_v15, 0.0  ;;  %v8700_v31 = vadd.f32 %v20502_v18, %v20510_v26  ;;  %v20514_v35 = vld [vmem:[#allocation51_spill] sm:$0xff]  ;;  %v20515_v53 = vld [vmem:[#allocation84_spill] sm:$0xff]  ;;  %v20520_v26 = vld [vmem:[#allocation14_spill] sm:$0xff] }
 0x543   :  { %9350 = vmatmul.mubr.bf16.vlgmr.msra.gmra.mrb[32].mxu1 %v8861_v13  ;;  %9736 = vmatmul.mubr.bf16.vlgmr.msra.gmra.mrb[160].mxu0 %v8861_v13  ;;  %v8865_v39 = vpack.c.bf16 %v8775_v40, %v8772_v33  ;;  %v8793_v20 = vmax.f32 %v8697_v11, 0.0  ;;  %v8703_v28 = vadd.f32 %v20502_v18, %v20511_v6  ;;  %v8868_v55 = vpack.c.bf16 %v8781_v46, %v8778_v42  ;;  %v20512_v13 = vld [vmem:[#allocation85_spill] sm:$0xff]  ;;  %v20516_v59 = vld [vmem:[#allocation7_spill] sm:$0xff]  ;;  %v20517_v33 = vld [vmem:[#allocation50_spill] sm:$0xff] }
 0x544   :  { %9511 = vmatpush1.bf16.msra.mxu1 %v13627_v3  ;;  %v19308_v29 = vpack.c.bf16 %v8787_v2, %v8784_v21  ;;  %v8706_v38 = vadd.f32 %v20502_v18, %v20512_v13  ;;  %v8709_v3 = vadd.f32 %v20502_v18, %v20513_v63  ;;  %v8796_v16 = vmax.f32 %v8700_v31, 0.0  ;;  %v20518_v42 = vld [vmem:[#allocation39_spill] sm:$0xff]  ;;  %v20519_v2 = vld [vmem:[#allocation13_spill] sm:$0xff]  ;;  %v20523_v63 = vld [vmem:[#allocation40_spill] sm:$0xff] }
 0x545   :  { %9512 = vmatprep.subr.bf16.mxu1 %v13632_v50  ;;  %9359 = vmatprep.mubr.bf16.mxu1 %v8865_v39  ;;  %v8874_v47 = vpack.c.bf16 %v8793_v20, %v8790_v32  ;;  %v8799_v8 = vmax.f32 %v8703_v28, 0.0  ;;  %v8712_v12 = vadd.f32 %v20502_v18, %v20514_v35  ;;  %v8715_v34 = vadd.f32 %v20502_v18, %v20515_v53  ;;  %v20521_v6 = vld [vmem:[#allocation15_spill] sm:$0xff] }
 0x546   :  { %9743 = vmatprep.mubr.bf16.mxu0 %v8865_v39  ;;  %v8802_v49 = vmax.f32 %v8706_v38, 0.0  ;;  %v8805_v52 = vmax.f32 %v8709_v3, 0.0  ;;  %v8718_v57 = vadd.f32 %v20502_v18, %v20516_v59  ;;  %v8721_v40 = vadd.f32 %v20502_v18, %v20517_v33  ;;  %v20522_v13 = vld [vmem:[#allocation71_spill] sm:$0xff]  ;;  %v20526_v33 = vld [vmem:[#allocation22_spill] sm:$0xff] }
 0x547   :  { %v8877_v15 = vpack.c.bf16 %v8799_v8, %v8796_v16  ;;  %v8808_v50 = vmax.f32 %v8712_v12, 0.0  ;;  %v8724_v60 = vadd.f32 %v20502_v18, %v20518_v42  ;;  %v8811_v46 = vmax.f32 %v8715_v34, 0.0  ;;  %v20524_v16 = vld [vmem:[#allocation16_spill] sm:$0xff] }
 0x548   :  { %9513 = vmatpush1.bf16.msra.mxu1 %v13630_v4  ;;  %v8880_v11 = vpack.c.bf16 %v8805_v52, %v8802_v49  ;;  %v8814_v21 = vmax.f32 %v8718_v57, 0.0  ;;  %v8727_v32 = vadd.f32 %v20502_v18, %v20519_v2  ;;  %v8817_v39 = vmax.f32 %v8721_v40, 0.0  ;;  %v20525_v52 = vld [vmem:[#allocation9_spill] sm:$0xff]  ;;  %v20528_v2 = vld [vmem:[#allocation10_spill] sm:$0xff] }
 0x549   :  { %12765 = vmatprep.subr.bf16.mxu1 %v19317_v30  ;;  %v8820_v20 = vmax.f32 %v8724_v60, 0.0  ;;  %v8730_v31 = vadd.f32 %v20502_v18, %v20520_v26  ;;  %v8733_v28 = vadd.f32 %v20502_v18, %v20521_v6  ;;  %v8883_v4 = vpack.c.bf16 %v8811_v46, %v8808_v50  ;;  %v20527_v60 = vld [vmem:[#allocation42_spill] sm:$0xff] }
 0x54a   :  { %v8823_v38 = vmax.f32 %v8727_v32, 0.0  ;;  %v8736_v3 = vadd.f32 %v20502_v18, %v20523_v63  ;;  %v8739_v8 = vadd.f32 %v20502_v18, %v20524_v16  ;;  %v8886_v35 = vpack.c.bf16 %v8817_v39, %v8814_v21  ;;  %v20529_v39 = vld [vmem:[#allocation47_spill] sm:$0xff]  ;;  %v20533_v63 = vld [vmem:[#allocation61_spill] sm:$0xff] }
 0x54b   :  { %9360 = vmatmul.mubr.bf16.gmra.mrb[36].mxu1 %v20522_v13  ;;  %9744 = vmatmul.mubr.bf16.gmra.mrb[164].mxu0 %v20522_v13  ;;  %v8826_v12 = vmax.f32 %v8730_v31, 0.0  ;;  %v8829_v49 = vmax.f32 %v8733_v28, 0.0  ;;  %v8742_v53 = vadd.f32 %v20502_v18, %v20525_v52  ;;  %v8745_v50 = vadd.f32 %v20502_v18, %v20526_v33  ;;  %v20530_v31 = vld [vmem:[#allocation45_spill] sm:$0xff]  ;;  %v20531_v13 = vld [vmem:[#allocation26_spill] sm:$0xff] }
 0x54c   :  { %9369 = vmatprep.mubr.bf16.mxu1 %v8868_v55  ;;  %9751 = vmatprep.mubr.bf16.mxu0 %v8868_v55  ;;  %v8889_v34 = vpack.c.bf16 %v8823_v38, %v8820_v20  ;;  %v8832_v59 = vmax.f32 %v8736_v3, 0.0  ;;  %v8835_v57 = vmax.f32 %v8739_v8, 0.0  ;;  %v8748_v46 = vadd.f32 %v20502_v18, %v20527_v60 }
 0x54d   :  { %v8892_v40 = vpack.c.bf16 %v8829_v49, %v8826_v12  ;;  %v8838_v42 = vmax.f32 %v8742_v53, 0.0  ;;  %v8751_v55 = vadd.f32 %v20502_v18, %v20528_v2  ;;  %v8841_v32 = vmax.f32 %v8745_v50, 0.0 }
 0x54e   :  { %v8895_v21 = vpack.c.bf16 %v8835_v57, %v8832_v59  ;;  %v8754_v26 = vadd.f32 %v20502_v18, %v20529_v39  ;;  %v8757_v20 = vadd.f32 %v20502_v18, %v20530_v31  ;;  %v8844_v6 = vmax.f32 %v8748_v46, 0.0 }
 0x54f   :  { %v8847_v28 = vmax.f32 %v8751_v55, 0.0  ;;  %v20532_v38 = vmax.f32 %v20531_v13, 0.0  ;;  %v20534_v3 = vmax.f32 %v20533_v63, 0.0  ;;  %v8898_v8 = vpack.c.bf16 %v8841_v32, %v8838_v42  ;;  %v20538_v42 = vld [vmem:[#allocation6_spill] sm:$0xff] }
 0x550   :  { %v8850_v12 = vmax.f32 %v8754_v26, 0.0  ;;  %v8853_v49 = vmax.f32 %v8757_v20, 0.0 }
 0x551   :  { %v8907_v16 = vpack.c.bf16 %v20534_v3, %v20532_v38  ;;  %v8901_v52 = vpack.c.bf16 %v8847_v28, %v8844_v6 }
 0x552   :  { %v8904_v53 = vpack.c.bf16 %v8853_v49, %v8850_v12 }
 0x553   :  { %9370 = vmatmul.mubr.bf16.gmra.mrb[40].mxu1 %v19221_v14  ;;  %9752 = vmatmul.mubr.bf16.gmra.mrb[168].mxu0 %v19221_v14  ;;  %v20536_v14 = vld [vmem:[#allocation63_spill] sm:$0xff] }
 0x554   :  { %9379 = vmatprep.mubr.bf16.mxu1 %v19308_v29  ;;  %9759 = vmatprep.mubr.bf16.mxu0 %v19308_v29 }
 0x55b   :  { %9380 = vmatmul.mubr.bf16.gmra.mrb[44].mxu1 %v19225_v27  ;;  %9760 = vmatmul.mubr.bf16.gmra.mrb[172].mxu0 %v19225_v27  ;;  %v20535_v27 = vld [vmem:[#allocation48_spill] sm:$0xff] }
 0x55c   :  { %9389 = vmatprep.mubr.bf16.mxu1 %v8874_v47  ;;  %9767 = vmatprep.mubr.bf16.mxu0 %v8874_v47 }
 0x563   :  { %9390 = vmatmul.mubr.bf16.gmra.mrb[48].mxu1 %v19229_v17  ;;  %9768 = vmatmul.mubr.bf16.gmra.mrb[176].mxu0 %v19229_v17  ;;  %v20537_v17 = vld [vmem:[#allocation28_spill] sm:$0xff] }
 0x564   :  { %9399 = vmatprep.mubr.bf16.mxu1 %v8877_v15  ;;  %9775 = vmatprep.mubr.bf16.mxu0 %v8877_v15 }
 0x56b   :  { %9400 = vmatmul.mubr.bf16.gmra.mrb[52].mxu1 %v19233_v19  ;;  %9776 = vmatmul.mubr.bf16.gmra.mrb[180].mxu0 %v19233_v19 }
 0x56c   :  { %9409 = vmatprep.mubr.bf16.mxu1 %v8880_v11  ;;  %9783 = vmatprep.mubr.bf16.mxu0 %v8880_v11 }
 0x573   :  { %9410 = vmatmul.mubr.bf16.gmra.mrb[56].mxu1 %v19237_v36  ;;  %9784 = vmatmul.mubr.bf16.gmra.mrb[184].mxu0 %v19237_v36  ;;  %v13634_v36 = vld [vmem:[%s19890_s4 + $0x1a0] ss:$12 sps:$4 sm:$0xff]  }
 0x574   :  { %9419 = vmatprep.mubr.bf16.mxu1 %v8883_v4  ;;  %9791 = vmatprep.mubr.bf16.mxu0 %v8883_v4 }
 0x57b   :  { %9420 = vmatmul.mubr.bf16.gmra.mrb[60].mxu1 %v19241_v54  ;;  %9792 = vmatmul.mubr.bf16.gmra.mrb[188].mxu0 %v19241_v54 }
 0x57c   :  { %9429 = vmatprep.mubr.bf16.mxu1 %v8886_v35  ;;  %9799 = vmatprep.mubr.bf16.mxu0 %v8886_v35 }
 0x583   :  { %9430 = vmatmul.mubr.bf16.gmra.mrb[64].mxu1 %v19245_v5  ;;  %9800 = vmatmul.mubr.bf16.gmra.mrb[192].mxu0 %v19245_v5 }
 0x584   :  { %9439 = vmatprep.mubr.bf16.mxu1 %v8889_v34  ;;  %9807 = vmatprep.mubr.bf16.mxu0 %v8889_v34 }
 0x58b   :  { %9440 = vmatmul.mubr.bf16.gmra.mrb[68].mxu1 %v19249_v10  ;;  %9808 = vmatmul.mubr.bf16.gmra.mrb[196].mxu0 %v19249_v10 }
 0x58c   :  { %9449 = vmatprep.mubr.bf16.mxu1 %v8892_v40  ;;  %9815 = vmatprep.mubr.bf16.mxu0 %v8892_v40 }
 0x593   :  { %9450 = vmatmul.mubr.bf16.gmra.mrb[72].mxu1 %v19253_v24  ;;  %9816 = vmatmul.mubr.bf16.gmra.mrb[200].mxu0 %v19253_v24 }
 0x594   :  { %9459 = vmatprep.mubr.bf16.mxu1 %v8895_v21  ;;  %9823 = vmatprep.mubr.bf16.mxu0 %v8895_v21 }
 0x59b   :  { %9460 = vmatmul.mubr.bf16.gmra.mrb[76].mxu1 %v19257_v43  ;;  %9824 = vmatmul.mubr.bf16.gmra.mrb[204].mxu0 %v19257_v43 }
 0x59c   :  { %9469 = vmatprep.mubr.bf16.mxu1 %v8898_v8  ;;  %9831 = vmatprep.mubr.bf16.mxu0 %v8898_v8 }
 0x5a3   :  { %9470 = vmatmul.mubr.bf16.gmra.mrb[80].mxu1 %v19261_v25  ;;  %9832 = vmatmul.mubr.bf16.gmra.mrb[208].mxu0 %v19261_v25 }
 0x5a4   :  { %9479 = vmatprep.mubr.bf16.mxu1 %v8901_v52  ;;  %9839 = vmatprep.mubr.bf16.mxu0 %v8901_v52 }
 0x5ab   :  { %9480 = vmatmul.mubr.bf16.gmra.mrb[84].mxu1 %v19265_v45  ;;  %9840 = vmatmul.mubr.bf16.gmra.mrb[212].mxu0 %v19265_v45 }
 0x5ac   :  { %9489 = vmatprep.mubr.bf16.mxu1 %v8904_v53  ;;  %9847 = vmatprep.mubr.bf16.mxu0 %v8904_v53 }
 0x5b3   :  { %9490 = vmatmul.mubr.bf16.gmra.mrb[88].mxu1 %v19269_v9  ;;  %9848 = vmatmul.mubr.bf16.gmra.mrb[216].mxu0 %v19269_v9 }
 0x5b4   :  { %9499 = vmatprep.mubr.bf16.mxu1 %v8907_v16  ;;  %9855 = vmatprep.mubr.bf16.mxu0 %v8907_v16 }
 0x5bb   :  { %9500 = vmatmul.mubr.bf16.gmra.mrb[92].mxu1 %v19271_v7  ;;  %9856 = vmatmul.mubr.bf16.gmra.mrb[220].mxu0 %v19271_v7 }
 0x5bc   :  { %9542 = vmatprep.mubr.bf16.mxu1 %v20535_v27 }
 0x5c3   :  { %10947 = vmatmul.mubr.msk.bf16.vlgmr.msra.gmra.mrb[32].mxu1 %vm1837_vm2, %v20536_v14 }
 0x5c4   :  { %12766 = vmatpush3.bf16.msra.mxu1 %v19317_v30  ;;  %9552 = vmatprep.mubr.bf16.mxu1 %v20535_v27 }
 0x5c5   :  { %12767 = vmatprep.subr.bf16.mxu1 %v13634_v36 }
 0x5c8   :  { %12768 = vmatpush3.bf16.msra.mxu1 %v13634_v36 }
 0x5cb   :  { %10948 = vmatmul.mubr.msk.bf16.gmra.mrb[36].mxu1 %vm1837_vm2, %v20537_v17 }
 0x5cc   :  { %9562 = vmatprep.mubr.bf16.mxu1 %v20535_v27 }
 0x5d3   :  { %10949 = vmatmul.mubr.msk.bf16.gmra.mrb[40].mxu1 %vm1837_vm2, %v19223_v22 }
 0x5d4   :  { %9572 = vmatprep.mubr.bf16.mxu1 %v20535_v27 }
 0x5db   :  { %10950 = vmatmul.mubr.msk.bf16.gmra.mrb[44].mxu1 %vm1837_vm2, %v19227_v0 }
 0x5dc   :  { %9582 = vmatprep.mubr.bf16.mxu1 %v20535_v27 }
 0x5e3   :  { %10951 = vmatmul.mubr.msk.bf16.gmra.mrb[48].mxu1 %vm1837_vm2, %v19231_v48 }
 0x5e4   :  { %9592 = vmatprep.mubr.bf16.mxu1 %v20535_v27 }
 0x5eb   :  { %10952 = vmatmul.mubr.msk.bf16.gmra.mrb[52].mxu1 %vm1837_vm2, %v19235_v37 }
 0x5ec   :  { %9602 = vmatprep.mubr.bf16.mxu1 %v20535_v27 }
 0x5f3   :  { %10953 = vmatmul.mubr.msk.bf16.gmra.mrb[56].mxu1 %vm1837_vm2, %v19239_v23 }
 0x5f4   :  { %9612 = vmatprep.mubr.bf16.mxu1 %v20535_v27 }
 0x5fb   :  { %10954 = vmatmul.mubr.msk.bf16.gmra.mrb[60].mxu1 %vm1837_vm2, %v19243_v62 }
 0x5fc   :  { %9622 = vmatprep.mubr.bf16.mxu1 %v20535_v27 }
 0x603   :  { %10955 = vmatmul.mubr.msk.bf16.gmra.mrb[64].mxu1 %vm1837_vm2, %v19247_v56 }
 0x604   :  { %9632 = vmatprep.mubr.bf16.mxu1 %v20535_v27 }
 0x60b   :  { %10956 = vmatmul.mubr.msk.bf16.gmra.mrb[68].mxu1 %vm1837_vm2, %v19251_v1 }
 0x60c   :  { %9642 = vmatprep.mubr.bf16.mxu1 %v20535_v27 }
 0x613   :  { %10957 = vmatmul.mubr.msk.bf16.gmra.mrb[72].mxu1 %vm1837_vm2, %v19255_v58 }
 0x614   :  { %9652 = vmatprep.mubr.bf16.mxu1 %v20535_v27 }
 0x616   :  { %v12219_v19 = vpop.f32.mrb[160].mxu0 }
 0x617   :  { %v12220_v54 = vpop.f32.mrb[161].mxu0 }
 0x618   :  { %v19426_v5 = vadd.f32 %v12220_v54, %v12219_v19  ;;  %v12222_v10 = vpop.f32.mrb[162].mxu0 }
 0x619   :  { %v12223_v24 = vpop.f32.mrb[163].mxu0 }
 0x61a   :  { %v19428_v43 = vadd.f32 %v12223_v24, %v12222_v10 }
 0x61b   :  { %10958 = vmatmul.mubr.msk.bf16.gmra.mrb[76].mxu1 %vm1837_vm2, %v19259_v44 }
 0x61c   :  { %9662 = vmatprep.mubr.bf16.mxu1 %v20535_v27 }
 0x61e   :  { %v12225_v25 = vpop.f32.mrb[164].mxu0 }
 0x61f   :  { %v12226_v45 = vpop.f32.mrb[165].mxu0 }
 0x620   :  { %v19433_v9 = vadd.f32 %v12226_v45, %v12225_v25  ;;  %v12228_v7 = vpop.f32.mrb[166].mxu0 }
 0x621   :  { %v12229_v18 = vpop.f32.mrb[167].mxu0 }
 0x622   :  { %v19435_v29 = vadd.f32 %v12229_v18, %v12228_v7 }
 0x623   :  { %10959 = vmatmul.mubr.msk.bf16.gmra.mrb[80].mxu1 %vm1837_vm2, %v19263_v51 }
 0x624   :  { %9672 = vmatprep.mubr.bf16.mxu1 %v20535_v27 }
 0x626   :  { %v12231_v30 = vpop.f32.mrb[168].mxu0 }
 0x627   :  { %v12232_v47 = vpop.f32.mrb[169].mxu0 }
 0x628   :  { %v19440_v15 = vadd.f32 %v12232_v47, %v12231_v30  ;;  %v12234_v11 = vpop.f32.mrb[170].mxu0 }
 0x629   :  { %v12235_v4 = vpop.f32.mrb[171].mxu0 }
 0x62a   :  { %v19442_v35 = vadd.f32 %v12235_v4, %v12234_v11 }
 0x62b   :  { %10960 = vmatmul.mubr.msk.bf16.gmra.mrb[84].mxu1 %vm1837_vm2, %v19267_v61 }
 0x62c   :  { %9682 = vmatprep.mubr.bf16.mxu1 %v20535_v27 }
 0x62e   :  { %v12237_v34 = vpop.f32.mrb[172].mxu0 }
 0x62f   :  { %v12238_v59 = vpop.f32.mrb[173].mxu0 }
 0x630   :  { %v19447_v57 = vadd.f32 %v12238_v59, %v12237_v34  ;;  %v12240_v33 = vpop.f32.mrb[174].mxu0 }
 0x631   :  { %v12241_v50 = vpop.f32.mrb[175].mxu0 }
 0x632   :  { %v19449_v40 = vadd.f32 %v12241_v50, %v12240_v33 }
 0x633   :  { %10961 = vmatmul.mubr.msk.bf16.gmra.mrb[88].mxu1 %vm1837_vm2, %v20538_v42 }
 0x634   :  { %9692 = vmatprep.mubr.bf16.mxu1 %v20535_v27 }
 0x636   :  { %v12243_v60 = vpop.f32.mrb[176].mxu0 }
 0x637   :  { %v12244_v46 = vpop.f32.mrb[177].mxu0 }
 0x638   :  { %v19454_v2 = vadd.f32 %v12244_v46, %v12243_v60  ;;  %v12246_v55 = vpop.f32.mrb[178].mxu0 }
 0x639   :  { %v12247_v21 = vpop.f32.mrb[179].mxu0 }
 0x63a   :  { %v19456_v32 = vadd.f32 %v12247_v21, %v12246_v55 }
 0x63b   :  { %10962 = vmatmul.mubr.msk.bf16.gmra.mrb[92].mxu1 %vm1837_vm2, %v19273_v41 }
 0x63c   :  { %12769 = vmatprep.mubr.msk.bf16.mxu1 %vm1837_vm2, %v20536_v14 }
 0x63e   :  { %v12249_v39 = vpop.f32.mrb[180].mxu0 }
 0x63f   :  { %v12250_v26 = vpop.f32.mrb[181].mxu0 }
 0x640   :  { %v19462_v31 = vadd.f32 %v12250_v26, %v12249_v39  ;;  %v12252_v20 = vpop.f32.mrb[182].mxu0 }
 0x641   :  { %v12253_v6 = vpop.f32.mrb[183].mxu0 }
 0x642   :  { %v19464_v28 = vadd.f32 %v12253_v6, %v12252_v20 }
 0x643   :  { %12770 = vmatmul.mubr.msk.bf16.vlgmr.msra.gmra.mrb[0].mxu1 %vm1837_vm2, %v20537_v17 }
 0x644   :  { %12773 = vmatprep.mubr.msk.bf16.mxu1 %vm1837_vm2, %v19223_v22 }
 0x646   :  { %v12255_v13 = vpop.f32.mrb[184].mxu0 }
 0x647   :  { %v12256_v38 = vpop.f32.mrb[185].mxu0 }
 0x648   :  { %v19470_v63 = vadd.f32 %v12256_v38, %v12255_v13  ;;  %v12258_v3 = vpop.f32.mrb[186].mxu0 }
 0x649   :  { %v12259_v16 = vpop.f32.mrb[187].mxu0 }
 0x64a   :  { %v19472_v8 = vadd.f32 %v12259_v16, %v12258_v3 }
 0x64b   :  { %12774 = vmatmul.mubr.msk.bf16.gmra.mrb[4].mxu1 %vm1837_vm2, %v19227_v0 }
 0x64c   :  { %12777 = vmatprep.mubr.msk.bf16.mxu1 %vm1837_vm2, %v19231_v48 }
 0x64e   :  { %v12261_v12 = vpop.f32.mrb[188].mxu0 }
 0x64f   :  { %v12262_v49 = vpop.f32.mrb[189].mxu0 }
 0x650   :  { %v19478_v52 = vadd.f32 %v12262_v49, %v12261_v12  ;;  %v12264_v53 = vpop.f32.mrb[190].mxu0 }
 0x651   :  { %v12265_v22 = vpop.f32.mrb[191].mxu0 }
 0x652   :  { %v19480_v27 = vadd.f32 %v12265_v22, %v12264_v53 }
 0x653   :  { %12778 = vmatmul.mubr.msk.bf16.gmra.mrb[8].mxu1 %vm1837_vm2, %v19235_v37 }
 0x654   :  { %12781 = vmatprep.mubr.msk.bf16.mxu1 %vm1837_vm2, %v19239_v23 }
 0x656   :  { %v12267_v36 = vpop.f32.mrb[192].mxu0 }
 0x657   :  { %v12268_v14 = vpop.f32.mrb[193].mxu0 }
 0x658   :  { %v19486_v0 = vadd.f32 %v12268_v14, %v12267_v36  ;;  %v12270_v17 = vpop.f32.mrb[194].mxu0 }
 0x659   :  { %v12271_v48 = vpop.f32.mrb[195].mxu0 }
 0x65a   :  { %v19488_v19 = vadd.f32 %v12271_v48, %v12270_v17 }
 0x65b   :  { %12782 = vmatmul.mubr.msk.bf16.gmra.mrb[12].mxu1 %vm1837_vm2, %v19243_v62 }
 0x65c   :  { %12785 = vmatprep.mubr.msk.bf16.mxu1 %vm1837_vm2, %v19247_v56 }
 0x65e   :  { %v12273_v54 = vpop.f32.mrb[196].mxu0 }
 0x65f   :  { %v12274_v10 = vpop.f32.mrb[197].mxu0 }
 0x660   :  { %v19494_v37 = vadd.f32 %v12274_v10, %v12273_v54  ;;  %v12276_v24 = vpop.f32.mrb[198].mxu0 }
 0x661   :  { %v12277_v23 = vpop.f32.mrb[199].mxu0 }
 0x662   :  { %v19496_v25 = vadd.f32 %v12277_v23, %v12276_v24 }
 0x663   :  { %12786 = vmatmul.mubr.msk.bf16.gmra.mrb[16].mxu1 %vm1837_vm2, %v19251_v1 }
 0x664   :  { %12789 = vmatprep.mubr.msk.bf16.mxu1 %vm1837_vm2, %v19255_v58 }
 0x666   :  { %v12279_v45 = vpop.f32.mrb[200].mxu0 }
 0x667   :  { %v12280_v7 = vpop.f32.mrb[201].mxu0 }
 0x668   :  { %v19502_v62 = vadd.f32 %v12280_v7, %v12279_v45  ;;  %v12282_v18 = vpop.f32.mrb[202].mxu0 }
 0x669   :  { %v12283_v56 = vpop.f32.mrb[203].mxu0 }
 0x66a   :  { %v19504_v30 = vadd.f32 %v12283_v56, %v12282_v18 }
 0x66b   :  { %12790 = vmatmul.mubr.msk.bf16.gmra.mrb[20].mxu1 %vm1837_vm2, %v19259_v44 }
 0x66c   :  { %12793 = vmatprep.mubr.msk.bf16.mxu1 %vm1837_vm2, %v19263_v51 }
 0x66e   :  { %v12285_v47 = vpop.f32.mrb[204].mxu0 }
 0x66f   :  { %v12286_v11 = vpop.f32.mrb[205].mxu0 }
 0x670   :  { %v19510_v1 = vadd.f32 %v12286_v11, %v12285_v47  ;;  %v12288_v4 = vpop.f32.mrb[206].mxu0 }
 0x671   :  { %v12289_v58 = vpop.f32.mrb[207].mxu0 }
 0x672   :  { %v19512_v34 = vadd.f32 %v12289_v58, %v12288_v4 }
 0x673   :  { %12794 = vmatmul.mubr.msk.bf16.gmra.mrb[24].mxu1 %vm1837_vm2, %v19267_v61 }
 0x674   :  { %12797 = vmatprep.mubr.msk.bf16.mxu1 %vm1837_vm2, %v20538_v42 }
 0x676   :  { %v12291_v59 = vpop.f32.mrb[208].mxu0 }
 0x677   :  { %v12292_v33 = vpop.f32.mrb[209].mxu0 }
 0x678   :  { %v19518_v44 = vadd.f32 %v12292_v33, %v12291_v59  ;;  %v12294_v50 = vpop.f32.mrb[210].mxu0 }
 0x679   :  { %v12295_v51 = vpop.f32.mrb[211].mxu0 }
 0x67a   :  { %v19520_v60 = vadd.f32 %v12295_v51, %v12294_v50 }
 0x67b   :  { %12798 = vmatmul.mubr.msk.bf16.gmra.mrb[28].mxu1 %vm1837_vm2, %v19273_v41 }
 0x67e   :  { %v12297_v46 = vpop.f32.mrb[212].mxu0 }
 0x67f   :  { %v12298_v55 = vpop.f32.mrb[213].mxu0 }
 0x680   :  { %v19524_v21 = vadd.f32 %v12298_v55, %v12297_v46  ;;  %v12300_v39 = vpop.f32.mrb[214].mxu0 }
 0x681   :  { %v12301_v61 = vpop.f32.mrb[215].mxu0 }
 0x682   :  { %v19526_v26 = vadd.f32 %v12301_v61, %v12300_v39 }
 0x686   :  { %v12303_v42 = vpop.f32.mrb[216].mxu0 }
 0x687   :  { %v12304_v20 = vpop.f32.mrb[217].mxu0 }
 0x688   :  { %v19528_v6 = vadd.f32 %v12304_v20, %v12303_v42  ;;  %v12306_v13 = vpop.f32.mrb[218].mxu0 }
 0x689   :  { %v12307_v38 = vpop.f32.mrb[219].mxu0 }
 0x68a   :  { %v19530_v3 = vadd.f32 %v12307_v38, %v12306_v13 }
 0x68e   :  { %v12309_v16 = vpop.f32.mrb[220].mxu0 }
 0x68f   :  { %v12310_v12 = vpop.f32.mrb[221].mxu0 }
 0x690   :  { %v19532_v49 = vadd.f32 %v12310_v12, %v12309_v16  ;;  %v12312_v41 = vpop.f32.mrb[222].mxu0 }
 0x691   :  { %v12313_v53 = vpop.f32.mrb[223].mxu0 }
 0x692   :  { %v19534_v22 = vadd.f32 %v12313_v53, %v12312_v41 }
 0x696   :  { %v9544_v36 = vpop.f32.mrb[32].mxu1 }
 0x697   :  { %10025 = vst [vmem:[%s19893_s5] sm:$0xff] %v9544_v36  ;;  %v9546_v14 = vpop.f32.mrb[33].mxu1 }
 0x698   :  { %10026 = vst [vmem:[%s19893_s5 + $0x8] sm:$0xff] %v9546_v14  ;;  %v9548_v17 = vpop.f32.mrb[34].mxu1 }
 0x699   :  { %10028 = vst [vmem:[%s19893_s5 + $0x18] sm:$0xff] %v9548_v17  ;;  %v9550_v48 = vpop.f32.mrb[35].mxu1 }
 0x69a   :  { %10029 = vst [vmem:[%s19893_s5 + $0x20] sm:$0xff] %v9550_v48 }
 0x69e   :  { %v9554_v54 = vpop.f32.mrb[36].mxu1 }
 0x69f   :  { %10031 = vst [vmem:[%s19893_s5 + $0x30] sm:$0xff] %v9554_v54  ;;  %v9556_v10 = vpop.f32.mrb[37].mxu1 }
 0x6a0   :  { %10032 = vst [vmem:[%s19893_s5 + $0x38] sm:$0xff] %v9556_v10  ;;  %v9558_v24 = vpop.f32.mrb[38].mxu1 }
 0x6a1   :  { %10034 = vst [vmem:[%s19893_s5 + $0x48] sm:$0xff] %v9558_v24  ;;  %v9560_v23 = vpop.f32.mrb[39].mxu1 }
 0x6a2   :  { %10035 = vst [vmem:[%s19893_s5 + $0x50] sm:$0xff] %v9560_v23 }
 0x6a6   :  { %v9564_v45 = vpop.f32.mrb[40].mxu1 }
 0x6a7   :  { %10037 = vst [vmem:[%s19893_s5 + $0x60] sm:$0xff] %v9564_v45  ;;  %v9566_v7 = vpop.f32.mrb[41].mxu1 }
 0x6a8   :  { %10038 = vst [vmem:[%s19893_s5 + $0x68] sm:$0xff] %v9566_v7  ;;  %v9568_v18 = vpop.f32.mrb[42].mxu1 }
 0x6a9   :  { %10040 = vst [vmem:[%s19893_s5 + $0x78] sm:$0xff] %v9568_v18  ;;  %v9570_v56 = vpop.f32.mrb[43].mxu1 }
 0x6aa   :  { %10041 = vst [vmem:[%s19893_s5 + $0x80] sm:$0xff] %v9570_v56 }
 0x6ae   :  { %v9574_v47 = vpop.f32.mrb[44].mxu1 }
 0x6af   :  { %10043 = vst [vmem:[%s19893_s5 + $0x90] sm:$0xff] %v9574_v47  ;;  %v9576_v11 = vpop.f32.mrb[45].mxu1 }
 0x6b0   :  { %10044 = vst [vmem:[%s19893_s5 + $0x98] sm:$0xff] %v9576_v11  ;;  %v9578_v4 = vpop.f32.mrb[46].mxu1 }
 0x6b1   :  { %10046 = vst [vmem:[%s19893_s5 + $0xa8] sm:$0xff] %v9578_v4  ;;  %v9580_v58 = vpop.f32.mrb[47].mxu1 }
 0x6b2   :  { %10047 = vst [vmem:[%s19893_s5 + $0xb0] sm:$0xff] %v9580_v58 }
 0x6b6   :  { %v9584_v59 = vpop.f32.mrb[48].mxu1 }
 0x6b7   :  { %10049 = vst [vmem:[%s19893_s5 + $0xc0] sm:$0xff] %v9584_v59  ;;  %v9586_v33 = vpop.f32.mrb[49].mxu1 }
 0x6b8   :  { %10050 = vst [vmem:[%s19893_s5 + $0xc8] sm:$0xff] %v9586_v33  ;;  %v9588_v50 = vpop.f32.mrb[50].mxu1 }
 0x6b9   :  { %10052 = vst [vmem:[%s19893_s5 + $0xd8] sm:$0xff] %v9588_v50  ;;  %v9590_v51 = vpop.f32.mrb[51].mxu1 }
 0x6ba   :  { %10053 = vst [vmem:[%s19893_s5 + $0xe0] sm:$0xff] %v9590_v51 }
 0x6be   :  { %v9594_v46 = vpop.f32.mrb[52].mxu1 }
 0x6bf   :  { %10055 = vst [vmem:[%s19893_s5 + $0xf0] sm:$0xff] %v9594_v46  ;;  %v9596_v55 = vpop.f32.mrb[53].mxu1 }
 0x6c0   :  { %10056 = vst [vmem:[%s19893_s5 + $0xf8] sm:$0xff] %v9596_v55  ;;  %v9598_v39 = vpop.f32.mrb[54].mxu1 }
 0x6c1   :  { %10058 = vst [vmem:[%s19893_s5 + $0x108] sm:$0xff] %v9598_v39  ;;  %v9600_v61 = vpop.f32.mrb[55].mxu1 }
 0x6c2   :  { %10059 = vst [vmem:[%s19893_s5 + $0x110] sm:$0xff] %v9600_v61 }
 0x6c6   :  { %v9604_v42 = vpop.f32.mrb[56].mxu1 }
 0x6c7   :  { %10061 = vst [vmem:[%s19893_s5 + $0x120] sm:$0xff] %v9604_v42  ;;  %v9606_v20 = vpop.f32.mrb[57].mxu1 }
 0x6c8   :  { %10062 = vst [vmem:[%s19893_s5 + $0x128] sm:$0xff] %v9606_v20  ;;  %v9608_v13 = vpop.f32.mrb[58].mxu1 }
 0x6c9   :  { %10064 = vst [vmem:[%s19893_s5 + $0x138] sm:$0xff] %v9608_v13  ;;  %v9610_v38 = vpop.f32.mrb[59].mxu1 }
 0x6ca   :  { %10065 = vst [vmem:[%s19893_s5 + $0x140] sm:$0xff] %v9610_v38 }
 0x6ce   :  { %v9614_v16 = vpop.f32.mrb[60].mxu1 }
 0x6cf   :  { %10067 = vst [vmem:[%s19893_s5 + $0x150] sm:$0xff] %v9614_v16  ;;  %v9616_v12 = vpop.f32.mrb[61].mxu1 }
 0x6d0   :  { %10068 = vst [vmem:[%s19893_s5 + $0x158] sm:$0xff] %v9616_v12  ;;  %v9618_v41 = vpop.f32.mrb[62].mxu1 }
 0x6d1   :  { %10070 = vst [vmem:[%s19893_s5 + $0x168] sm:$0xff] %v9618_v41  ;;  %v9620_v53 = vpop.f32.mrb[63].mxu1 }
 0x6d2   :  { %10071 = vst [vmem:[%s19893_s5 + $0x170] sm:$0xff] %v9620_v53 }
 0x6d6   :  { %v9624_v36 = vpop.f32.mrb[64].mxu1 }
 0x6d7   :  { %10073 = vst [vmem:[%s19893_s5 + $0x180] sm:$0xff] %v9624_v36  ;;  %v9626_v14 = vpop.f32.mrb[65].mxu1 }
 0x6d8   :  { %10074 = vst [vmem:[%s19893_s5 + $0x188] sm:$0xff] %v9626_v14  ;;  %v9628_v17 = vpop.f32.mrb[66].mxu1 }
 0x6d9   :  { %10076 = vst [vmem:[%s19893_s5 + $0x198] sm:$0xff] %v9628_v17  ;;  %v9630_v48 = vpop.f32.mrb[67].mxu1 }
 0x6da   :  { %10077 = vst [vmem:[%s19893_s5 + $0x1a0] sm:$0xff] %v9630_v48 }
 0x6de   :  { %v9634_v54 = vpop.f32.mrb[68].mxu1 }
 0x6df   :  { %10079 = vst [vmem:[%s19893_s5 + $0x1b0] sm:$0xff] %v9634_v54  ;;  %v9636_v10 = vpop.f32.mrb[69].mxu1 }
 0x6e0   :  { %10080 = vst [vmem:[%s19893_s5 + $0x1b8] sm:$0xff] %v9636_v10  ;;  %v9638_v24 = vpop.f32.mrb[70].mxu1 }
 0x6e1   :  { %10082 = vst [vmem:[%s19893_s5 + $0x1c8] sm:$0xff] %v9638_v24  ;;  %v9640_v23 = vpop.f32.mrb[71].mxu1 }
 0x6e2   :  { %10083 = vst [vmem:[%s19893_s5 + $0x1d0] sm:$0xff] %v9640_v23 }
 0x6e6   :  { %v9644_v45 = vpop.f32.mrb[72].mxu1 }
 0x6e7   :  { %10085 = vst [vmem:[%s19893_s5 + $0x1e0] sm:$0xff] %v9644_v45  ;;  %v9646_v7 = vpop.f32.mrb[73].mxu1 }
 0x6e8   :  { %10086 = vst [vmem:[%s19893_s5 + $0x1e8] sm:$0xff] %v9646_v7  ;;  %v9648_v18 = vpop.f32.mrb[74].mxu1 }
 0x6e9   :  { %10088 = vst [vmem:[%s19893_s5 + $0x1f8] sm:$0xff] %v9648_v18  ;;  %v9650_v56 = vpop.f32.mrb[75].mxu1 }
 0x6ea   :  { %10089 = vst [vmem:[%s19893_s5 + $0x200] sm:$0xff] %v9650_v56 }
 0x6ee   :  { %v9654_v47 = vpop.f32.mrb[76].mxu1 }
 0x6ef   :  { %10091 = vst [vmem:[%s19893_s5 + $0x210] sm:$0xff] %v9654_v47  ;;  %v9656_v11 = vpop.f32.mrb[77].mxu1 }
 0x6f0   :  { %10092 = vst [vmem:[%s19893_s5 + $0x218] sm:$0xff] %v9656_v11  ;;  %v9658_v4 = vpop.f32.mrb[78].mxu1 }
 0x6f1   :  { %10094 = vst [vmem:[%s19893_s5 + $0x228] sm:$0xff] %v9658_v4  ;;  %v9660_v58 = vpop.f32.mrb[79].mxu1 }
 0x6f2   :  { %10095 = vst [vmem:[%s19893_s5 + $0x230] sm:$0xff] %v9660_v58 }
 0x6f6   :  { %v9664_v59 = vpop.f32.mrb[80].mxu1 }
 0x6f7   :  { %10097 = vst [vmem:[%s19893_s5 + $0x240] sm:$0xff] %v9664_v59  ;;  %v9666_v33 = vpop.f32.mrb[81].mxu1 }
 0x6f8   :  { %10098 = vst [vmem:[%s19893_s5 + $0x248] sm:$0xff] %v9666_v33  ;;  %v9668_v50 = vpop.f32.mrb[82].mxu1 }
 0x6f9   :  { %10100 = vst [vmem:[%s19893_s5 + $0x258] sm:$0xff] %v9668_v50  ;;  %v9670_v51 = vpop.f32.mrb[83].mxu1 }
 0x6fa   :  { %10101 = vst [vmem:[%s19893_s5 + $0x260] sm:$0xff] %v9670_v51 }
 0x6fe   :  { %v9674_v46 = vpop.f32.mrb[84].mxu1 }
 0x6ff   :  { %10103 = vst [vmem:[%s19893_s5 + $0x270] sm:$0xff] %v9674_v46  ;;  %v9676_v55 = vpop.f32.mrb[85].mxu1 }
 0x700   :  { %10104 = vst [vmem:[%s19893_s5 + $0x278] sm:$0xff] %v9676_v55  ;;  %v9678_v39 = vpop.f32.mrb[86].mxu1 }
 0x701   :  { %10106 = vst [vmem:[%s19893_s5 + $0x288] sm:$0xff] %v9678_v39  ;;  %v9680_v61 = vpop.f32.mrb[87].mxu1 }
 0x702   :  { %10107 = vst [vmem:[%s19893_s5 + $0x290] sm:$0xff] %v9680_v61 }
 0x706   :  { %v9684_v42 = vpop.f32.mrb[88].mxu1 }
 0x707   :  { %10109 = vst [vmem:[%s19893_s5 + $0x2a0] sm:$0xff] %v9684_v42  ;;  %v9686_v20 = vpop.f32.mrb[89].mxu1 }
 0x708   :  { %10110 = vst [vmem:[%s19893_s5 + $0x2a8] sm:$0xff] %v9686_v20  ;;  %v9688_v13 = vpop.f32.mrb[90].mxu1 }
 0x709   :  { %10112 = vst [vmem:[%s19893_s5 + $0x2b8] sm:$0xff] %v9688_v13  ;;  %v9690_v38 = vpop.f32.mrb[91].mxu1 }
 0x70a   :  { %10113 = vst [vmem:[%s19893_s5 + $0x2c0] sm:$0xff] %v9690_v38 }
 0x70e   :  { %v9694_v16 = vpop.f32.mrb[92].mxu1 }
 0x70f   :  { %10115 = vst [vmem:[%s19893_s5 + $0x2d0] sm:$0xff] %v9694_v16  ;;  %v9696_v12 = vpop.f32.mrb[93].mxu1 }
 0x710   :  { %10116 = vst [vmem:[%s19893_s5 + $0x2d8] sm:$0xff] %v9696_v12  ;;  %v9698_v41 = vpop.f32.mrb[94].mxu1 }
 0x711   :  { %10118 = vst [vmem:[%s19893_s5 + $0x2e8] sm:$0xff] %v9698_v41  ;;  %v9700_v53 = vpop.f32.mrb[95].mxu1 }
 0x712   :  { %10119 = vst [vmem:[%s19893_s5 + $0x2f0] sm:$0xff] %v9700_v53 }
 0x716   :  { %v12771_v36 = vpop.f32.mrb[0].mxu1 }
 0x717   :  { %v9907_v14 = vadd.f32 %v12771_v36, %v19433_v9  ;;  %v9898_v17 = vpop.f32.mrb[1].mxu1 }
 0x718   :  { %v9899_v48 = vadd.f32 %v19426_v5, %v9898_v17  ;;  %v12772_v54 = vpop.f32.mrb[2].mxu1 }
 0x719   :  { %10033 = vst.msk [vmem:[%s19893_s5 + $0x40] sm:$0xff] %vm1837_vm2, %v9907_v14  ;;  %v9910_v10 = vadd.f32 %v12772_v54, %v19435_v29  ;;  %v9901_v24 = vpop.f32.mrb[3].mxu1 }
 0x71a   :  { %10027 = vst.msk [vmem:[%s19893_s5 + $0x10] sm:$0xff] %vm1837_vm2, %v9899_v48  ;;  %v9902_v23 = vadd.f32 %v19428_v43, %v9901_v24 }
 0x71b   :  { %10036 = vst.msk [vmem:[%s19893_s5 + $0x58] sm:$0xff] %vm1837_vm2, %v9910_v10 }
 0x71c   :  { %10030 = vst.msk [vmem:[%s19893_s5 + $0x28] sm:$0xff] %vm1837_vm2, %v9902_v23 }
 0x71e   :  { %v12775_v5 = vpop.f32.mrb[4].mxu1 }
 0x71f   :  { %v9923_v9 = vadd.f32 %v12775_v5, %v19447_v57  ;;  %v9914_v29 = vpop.f32.mrb[5].mxu1 }
 0x720   :  { %v9915_v45 = vadd.f32 %v19440_v15, %v9914_v29  ;;  %v12776_v7 = vpop.f32.mrb[6].mxu1 }
 0x721   :  { %10045 = vst.msk [vmem:[%s19893_s5 + $0xa0] sm:$0xff] %vm1837_vm2, %v9923_v9  ;;  %v9926_v43 = vadd.f32 %v12776_v7, %v19449_v40  ;;  %v9917_v18 = vpop.f32.mrb[7].mxu1 }
 0x722   :  { %10039 = vst.msk [vmem:[%s19893_s5 + $0x70] sm:$0xff] %vm1837_vm2, %v9915_v45  ;;  %v9918_v56 = vadd.f32 %v19442_v35, %v9917_v18 }
 0x723   :  { %10048 = vst.msk [vmem:[%s19893_s5 + $0xb8] sm:$0xff] %vm1837_vm2, %v9926_v43 }
 0x724   :  { %10042 = vst.msk [vmem:[%s19893_s5 + $0x88] sm:$0xff] %vm1837_vm2, %v9918_v56 }
 0x726   :  { %v12779_v15 = vpop.f32.mrb[8].mxu1 }
 0x727   :  { %v9939_v57 = vadd.f32 %v12779_v15, %v19462_v31  ;;  %v9930_v40 = vpop.f32.mrb[9].mxu1 }
 0x728   :  { %v9931_v47 = vadd.f32 %v19454_v2, %v9930_v40  ;;  %v12780_v11 = vpop.f32.mrb[10].mxu1 }
 0x729   :  { %10057 = vst.msk [vmem:[%s19893_s5 + $0x100] sm:$0xff] %vm1837_vm2, %v9939_v57  ;;  %v9942_v35 = vadd.f32 %v12780_v11, %v19464_v28  ;;  %v9933_v4 = vpop.f32.mrb[11].mxu1 }
 0x72a   :  { %10051 = vst.msk [vmem:[%s19893_s5 + $0xd0] sm:$0xff] %vm1837_vm2, %v9931_v47  ;;  %v9934_v58 = vadd.f32 %v19456_v32, %v9933_v4 }
 0x72b   :  { %10060 = vst.msk [vmem:[%s19893_s5 + $0x118] sm:$0xff] %vm1837_vm2, %v9942_v35 }
 0x72c   :  { %10054 = vst.msk [vmem:[%s19893_s5 + $0xe8] sm:$0xff] %vm1837_vm2, %v9934_v58 }
 0x72e   :  { %v12783_v2 = vpop.f32.mrb[12].mxu1 }
 0x72f   :  { %v9955_v31 = vadd.f32 %v12783_v2, %v19478_v52  ;;  %v9946_v28 = vpop.f32.mrb[13].mxu1 }
 0x730   :  { %v9947_v59 = vadd.f32 %v19470_v63, %v9946_v28  ;;  %v12784_v33 = vpop.f32.mrb[14].mxu1 }
 0x731   :  { %10069 = vst.msk [vmem:[%s19893_s5 + $0x160] sm:$0xff] %vm1837_vm2, %v9955_v31  ;;  %v9958_v32 = vadd.f32 %v12784_v33, %v19480_v27  ;;  %v9949_v50 = vpop.f32.mrb[15].mxu1 }
 0x732   :  { %10063 = vst.msk [vmem:[%s19893_s5 + $0x130] sm:$0xff] %vm1837_vm2, %v9947_v59  ;;  %v9950_v51 = vadd.f32 %v19472_v8, %v9949_v50 }
 0x733   :  { %10072 = vst.msk [vmem:[%s19893_s5 + $0x178] sm:$0xff] %vm1837_vm2, %v9958_v32 }
 0x734   :  { %10066 = vst.msk [vmem:[%s19893_s5 + $0x148] sm:$0xff] %vm1837_vm2, %v9950_v51 }
 0x736   :  { %v12787_v63 = vpop.f32.mrb[16].mxu1 }
 0x737   :  { %v9971_v52 = vadd.f32 %v12787_v63, %v19494_v37  ;;  %v9962_v27 = vpop.f32.mrb[17].mxu1 }
 0x738   :  { %v9963_v46 = vadd.f32 %v19486_v0, %v9962_v27  ;;  %v12788_v55 = vpop.f32.mrb[18].mxu1 }
 0x739   :  { %10081 = vst.msk [vmem:[%s19893_s5 + $0x1c0] sm:$0xff] %vm1837_vm2, %v9971_v52  ;;  %v9974_v8 = vadd.f32 %v12788_v55, %v19496_v25  ;;  %v9965_v39 = vpop.f32.mrb[19].mxu1 }
 0x73a   :  { %10075 = vst.msk [vmem:[%s19893_s5 + $0x190] sm:$0xff] %vm1837_vm2, %v9963_v46  ;;  %v9966_v61 = vadd.f32 %v19488_v19, %v9965_v39 }
 0x73b   :  { %10084 = vst.msk [vmem:[%s19893_s5 + $0x1d8] sm:$0xff] %vm1837_vm2, %v9974_v8 }
 0x73c   :  { %10078 = vst.msk [vmem:[%s19893_s5 + $0x1a8] sm:$0xff] %vm1837_vm2, %v9966_v61 }
 0x73e   :  { %v12791_v0 = vpop.f32.mrb[20].mxu1 }
 0x73f   :  { %v9987_v37 = vadd.f32 %v12791_v0, %v19510_v1  ;;  %v9978_v25 = vpop.f32.mrb[21].mxu1 }
 0x740   :  { %v9979_v42 = vadd.f32 %v19502_v62, %v9978_v25  ;;  %v12792_v20 = vpop.f32.mrb[22].mxu1 }
 0x741   :  { %10093 = vst.msk [vmem:[%s19893_s5 + $0x220] sm:$0xff] %vm1837_vm2, %v9987_v37  ;;  %v9990_v19 = vadd.f32 %v12792_v20, %v19512_v34  ;;  %v9981_v13 = vpop.f32.mrb[23].mxu1 }
 0x742   :  { %10087 = vst.msk [vmem:[%s19893_s5 + $0x1f0] sm:$0xff] %vm1837_vm2, %v9979_v42  ;;  %v9982_v38 = vadd.f32 %v19504_v30, %v9981_v13 }
 0x743   :  { %10096 = vst.msk [vmem:[%s19893_s5 + $0x238] sm:$0xff] %vm1837_vm2, %v9990_v19 }
 0x744   :  { %10090 = vst.msk [vmem:[%s19893_s5 + $0x208] sm:$0xff] %vm1837_vm2, %v9982_v38 }
 0x746   :  { %v12795_v62 = vpop.f32.mrb[24].mxu1 }
 0x747   :  { %v10003_v1 = vadd.f32 %v12795_v62, %v19524_v21  ;;  %v9994_v34 = vpop.f32.mrb[25].mxu1 }
 0x748   :  { %v9995_v16 = vadd.f32 %v19518_v44, %v9994_v34  ;;  %v12796_v12 = vpop.f32.mrb[26].mxu1 }
 0x749   :  { %10105 = vst.msk [vmem:[%s19893_s5 + $0x280] sm:$0xff] %vm1837_vm2, %v10003_v1  ;;  %v10006_v30 = vadd.f32 %v12796_v12, %v19526_v26  ;;  %v9997_v41 = vpop.f32.mrb[27].mxu1 }
 0x74a   :  { %10099 = vst.msk [vmem:[%s19893_s5 + $0x250] sm:$0xff] %vm1837_vm2, %v9995_v16  ;;  %v9998_v53 = vadd.f32 %v19520_v60, %v9997_v41 }
 0x74b   :  { %10108 = vst.msk [vmem:[%s19893_s5 + $0x298] sm:$0xff] %vm1837_vm2, %v10006_v30 }
 0x74c   :  { %10102 = vst.msk [vmem:[%s19893_s5 + $0x268] sm:$0xff] %vm1837_vm2, %v9998_v53 }
 0x74e   :  { %v12799_v44 = vpop.f32.mrb[28].mxu1 }
 0x74f   :  { %v10019_v21 = vadd.f32 %v12799_v44, %v19532_v49  ;;  %v10010_v26 = vpop.f32.mrb[29].mxu1 }
 0x750   :  { %v10011_v36 = vadd.f32 %v19528_v6, %v10010_v26  ;;  %v12800_v14 = vpop.f32.mrb[30].mxu1 }
 0x751   :  { %10117 = vst.msk [vmem:[%s19893_s5 + $0x2e0] sm:$0xff] %vm1837_vm2, %v10019_v21  ;;  %v10022_v60 = vadd.f32 %v12800_v14, %v19534_v22  ;;  %v10013_v17 = vpop.f32.mrb[31].mxu1 }
 0x752   :  { %10111 = vst.msk [vmem:[%s19893_s5 + $0x2b0] sm:$0xff] %vm1837_vm2, %v10011_v36  ;;  %v10014_v48 = vadd.f32 %v19530_v3, %v10013_v17 }
 0x753   :  { %10120 = vst.msk [vmem:[%s19893_s5 + $0x2f8] sm:$0xff] %vm1837_vm2, %v10022_v60 }
 0x754   :  { %10114 = vst.msk [vmem:[%s19893_s5 + $0x2c8] sm:$0xff] %vm1837_vm2, %v10014_v48 }

</bundles_post_ra>
